<compile_context>
chip_gen: v7x
topology: tpu7x:2x2x1
jax: 0.10.0
libtpu: 0.0.40
codegen_flags: <defaults>
</compile_context>

<pallas_src>
import numpy as np

import jax
import jax.numpy as jnp
from jax.experimental import pallas as pl
from jax.experimental.pallas import tpu as pltpu

KSIZE = 3                 # kernel size of every layer
NTAPS = KSIZE * KSIZE     # 9 taps


# ----------------------------- fused Pallas kernel ----------------------------- #
def _fused_autoencoder_kernel(x_ref,
                              gcat1_ref, w1_ref, b1_ref,
                              gcat2_ref, w2_ref, b2_ref,
                              gcat3_ref, w3_ref, b3_ref,
                              g4t_ref, w4_ref, b4_ref,
                              o_ref,
                              s1_ref, s2_ref, s3_ref):
    """One batch sample per grid step; all constants stay VMEM-resident."""
    f32 = jnp.float32
    M0 = x_ref.shape[1]        # H*W
    M1 = gcat1_ref.shape[0]    # (H/2)*(W/2)
    M2 = gcat2_ref.shape[0]    # (H/4)*(W/4)

    def gather_gemm(gcat_ref, s_ref, b_ref):
        # one K-concatenated gather GEMM: (M_out, 9*M_in) @ (9*M_in, C_out) + bias
        return jnp.dot(gcat_ref[...], s_ref[...],
                       preferred_element_type=f32) + b_ref[...]

    # ---- encoder 1: Conv2d(1 -> 64, s2, p1) + ReLU --------------------------------
    # C_in == 1: each tap's "H @ W_t" product is a VPU broadcast-multiply (no K=1 GEMM).
    x_col = x_ref[0]                                                   # (M0, 1)
    for t in range(NTAPS):
        s1_ref[pl.ds(t * M0, M0), :] = x_col * w1_ref[t]               # (M0, 64)
    h1 = jnp.maximum(gather_gemm(gcat1_ref, s1_ref, b1_ref), 0.0)      # (M1, 64)

    # ---- encoder 2: Conv2d(64 -> 128, s2, p1) + ReLU ------------------------------
    for t in range(NTAPS):
        s2_ref[pl.ds(t * M1, M1), :] = jnp.dot(h1, w2_ref[t],
                                               preferred_element_type=f32)
    h2 = jnp.maximum(gather_gemm(gcat2_ref, s2_ref, b2_ref), 0.0)      # (M2, 128)

    # ---- decoder 1: ConvT(128 -> 64, s2, p1, op1) + ReLU --------------------------
    for t in range(NTAPS):
        s3_ref[pl.ds(t * M2, M2), :] = jnp.dot(h2, w3_ref[t],
                                               preferred_element_type=f32)
    h3 = jnp.maximum(gather_gemm(gcat3_ref, s3_ref, b3_ref), 0.0)      # (M1, 64)

    # ---- decoder 2: ConvT(64 -> 1, s2, p1, op1) + Sigmoid, lane-dense -------------
    # C_out == 1: evaluate transposed so the result is a (1, M0) lane-dense row
    # (full 128-lane epilogue + stores) instead of a (M0, 1) column.
    #   u[t, m] = (h3 @ w4_t)[m]        out[m0] = sum_t (u[t] @ g4_t^T)[m0] + b4
    u = jnp.einsum("tc,mc->tm", w4_ref[...], h3,
                   preferred_element_type=f32)                          # (9, M1)
    acc = None
    for t in range(NTAPS):
        term = jnp.dot(u[t:t + 1, :], g4t_ref[t],
                       preferred_element_type=f32)                      # (1, M0)
        acc = term if acc is None else acc + term
    pre = acc + b4_ref[...]                                             # (1, M0)

    # numerically-stable sigmoid; reciprocal on the EUP (approx) is essentially free.
    z = jnp.exp(-jnp.abs(pre))
    r = pl.reciprocal(1.0 + z, approx=True)
    o_ref[0] = jnp.where(pre >= 0.0, r, z * r)


# ----------------------- per-sample gather / scatter matrices ------------------ #
def _conv_gather_taps(H, W, stride, pad):
    """g[t] (OH*OW, H*W): 0/1 row-gather for tap t of a stride/pad 3x3 conv (one sample)."""
    OH = (H + 2 * pad - KSIZE) // stride + 1
    OW = (W + 2 * pad - KSIZE) // stride + 1
    g = np.zeros((NTAPS, OH * OW, H * W), np.float32)
    for kh in range(KSIZE):
        for kw in range(KSIZE):
            t = kh * KSIZE + kw
            for oh in range(OH):
                ih = oh * stride + kh - pad
                if ih < 0 or ih >= H:
                    continue
                for ow in range(OW):
                    iw = ow * stride + kw - pad
                    if iw < 0 or iw >= W:
                        continue
                    g[t, oh * OW + ow, ih * W + iw] = 1.0
    return g


def _convT_scatter_taps(H, W, stride, pad, out_pad):
    """g[t] (OH*OW, H*W): 0/1 scatter for ConvTranspose2d tap t (oh = ih*stride - pad + kh)."""
    OH = (H - 1) * stride - 2 * pad + KSIZE + out_pad
    OW = (W - 1) * stride - 2 * pad + KSIZE + out_pad
    g = np.zeros((NTAPS, OH * OW, H * W), np.float32)
    for kh in range(KSIZE):
        for kw in range(KSIZE):
            t = kh * KSIZE + kw
            for ih in range(H):
                oh = ih * stride - pad + kh
                if oh < 0 or oh >= OH:
                    continue
                for iw in range(W):
                    ow = iw * stride - pad + kw
                    if ow < 0 or ow >= OW:
                        continue
                    g[t, oh * OW + ow, ih * W + iw] = 1.0
    return g


def _build_constants(params, H, W):
    H2, W2 = H // 2, W // 2
    H4, W4 = H2 // 2, W2 // 2
    M0, M1, M2 = H * W, H2 * W2, H4 * W4

    g1 = _conv_gather_taps(H, W, 2, 1)            # (9, M1, M0)
    g2 = _conv_gather_taps(H2, W2, 2, 1)          # (9, M2, M1)
    g3 = _convT_scatter_taps(H4, W4, 2, 1, 1)     # (9, M1, M2)
    g4 = _convT_scatter_taps(H2, W2, 2, 1, 1)     # (9, M0, M1)

    # K-concatenated gather matrices: Gcat[:, t*M_in:(t+1)*M_in] = g_t
    gcat1 = jnp.asarray(np.transpose(g1, (1, 0, 2)).reshape(M1, NTAPS * M0))
    gcat2 = jnp.asarray(np.transpose(g2, (1, 0, 2)).reshape(M2, NTAPS * M1))
    gcat3 = jnp.asarray(np.transpose(g3, (1, 0, 2)).reshape(M1, NTAPS * M2))
    g4t = jnp.asarray(np.transpose(g4, (0, 2, 1)))               # (9, M1, M0) = g4_t^T

    # Conv2d weight (C_out, C_in, kh, kw) -> taps (9, C_in, C_out)
    w1 = jnp.transpose(params["enc1_w"], (2, 3, 1, 0)).reshape(NTAPS, 1, 64)
    w2 = jnp.transpose(params["enc2_w"], (2, 3, 1, 0)).reshape(NTAPS, 64, 128)
    # ConvTranspose2d weight (C_in, C_out, kh, kw) -> taps (9, C_in, C_out)
    w3 = jnp.transpose(params["dec1_w"], (2, 3, 0, 1)).reshape(NTAPS, 128, 64)
    w4 = jnp.transpose(params["dec2_w"], (2, 3, 0, 1)).reshape(NTAPS, 64, 1)[..., 0]  # (9, 64)

    b1 = params["enc1_b"].reshape(1, 64)
    b2 = params["enc2_b"].reshape(1, 128)
    b3 = params["dec1_b"].reshape(1, 64)
    b4 = params["dec2_b"].reshape(1, 1)

    return (gcat1, w1, b1, gcat2, w2, b2, gcat3, w3, b3, g4t, w4, b4)


def _resident_spec(a):
    """Whole-array block that stays VMEM-resident across the batch grid."""
    nd = a.ndim
    return pl.BlockSpec(a.shape, lambda n, _nd=nd: (0,) * _nd)


# ------------------------------- full forward pass ----------------------------- #
def conv_autoencoder_forward(x, params):
    """x: (N, 1, H, W) float32 NCHW (PyTorch layout) -> (N, 1, H, W)."""
    N, C, H, W = x.shape
    assert C == 1 and H % 4 == 0 and W % 4 == 0
    M0, M1, M2 = H * W, (H // 2) * (W // 2), (H // 4) * (W // 4)

    consts = _build_constants(params, H, W)
    x_col = x.astype(jnp.float32).reshape(N, M0, 1)    # no 128-lane pad: 4*M0 B/sample DMA

    out = pl.pallas_call(
        _fused_autoencoder_kernel,
        out_shape=jax.ShapeDtypeStruct((N, 1, M0), jnp.float32),   # lane-dense output rows
        grid=(N,),
        in_specs=[pl.BlockSpec((1, M0, 1), lambda n: (n, 0, 0))]
                 + [_resident_spec(a) for a in consts],
        out_specs=pl.BlockSpec((1, 1, M0), lambda n: (n, 0, 0)),
        scratch_shapes=[
            pltpu.VMEM((NTAPS * M0, 64), jnp.float32),     # layer-1 tap stack (9*M0, 64)
            pltpu.VMEM((NTAPS * M1, 128), jnp.float32),    # layer-2 tap stack (9*M1, 128)
            pltpu.VMEM((NTAPS * M2, 64), jnp.float32),     # layer-3 tap stack (9*M2, 64)
        ],
        compiler_params=pltpu.CompilerParams(
            dimension_semantics=("parallel",),       # batch samples independent -> megacore
            vmem_limit_bytes=32 * 1024 * 1024,       # ~4 MiB live; headroom on v7x's 64 MiB
        ),
    )(x_col, *consts)

    return out.reshape(N, 1, H, W)


def init_params(key):
    ks = jax.random.split(key, 8)
    s = 0.1
    return {
        "enc1_w": s * jax.random.normal(ks[0], (64, 1, 3, 3), jnp.float32),
        "enc1_b": s * jax.random.normal(ks[1], (64,), jnp.float32),
        "enc2_w": s * jax.random.normal(ks[2], (128, 64, 3, 3), jnp.float32),
        "enc2_b": s * jax.random.normal(ks[3], (128,), jnp.float32),
        "dec1_w": s * jax.random.normal(ks[4], (128, 64, 3, 3), jnp.float32),
        "dec1_b": s * jax.random.normal(ks[5], (64,), jnp.float32),
        "dec2_w": s * jax.random.normal(ks[6], (64, 1, 3, 3), jnp.float32),
        "dec2_b": s * jax.random.normal(ks[7], (1,), jnp.float32),
    }


# ---------------------------- pure-JAX reference check ------------------------- #
def reference_forward(x, p):
    dn = ("NCHW", "OIHW", "NCHW")

    def conv(x, w, b, stride, pad):
        y = jax.lax.conv_general_dilated(
            x, w, window_strides=(stride, stride),
            padding=((pad, pad), (pad, pad)), dimension_numbers=dn)
        return y + b[None, :, None, None]

    def convT(x, w, b):  # stride=2, pad=1, out_pad=1, k=3
        w_eff = jnp.flip(w, axis=(2, 3)).transpose(1, 0, 2, 3)
        y = jax.lax.conv_general_dilated(
            x, w_eff, window_strides=(1, 1),
            padding=((1, 2), (1, 2)), lhs_dilation=(2, 2),
            dimension_numbers=dn)
        return y + b[None, :, None, None]

    h = jax.nn.relu(conv(x, p["enc1_w"], p["enc1_b"], 2, 1))
    h = jax.nn.relu(conv(h, p["enc2_w"], p["enc2_b"], 2, 1))
    h = jax.nn.relu(convT(h, p["dec1_w"], p["dec1_b"]))
    h = jax.nn.sigmoid(convT(h, p["dec2_w"], p["dec2_b"]))
    return h


if __name__ == "__main__":
    key = jax.random.PRNGKey(0)
    pkey, xkey = jax.random.split(key)
    params = init_params(pkey)
    x = jax.random.uniform(xkey, (2, 1, 16, 16), jnp.float32)   # NCHW, 1 input channel

    fwd = jax.jit(lambda inp: conv_autoencoder_forward(inp, params))
    out = jax.block_until_ready(fwd(x))

    assert out.shape == (2, 1, 16, 16), out.shape
    ref = jax.block_until_ready(reference_forward(x, params))
    assert bool(jnp.all(jnp.isfinite(out)))
    err = float(jnp.max(jnp.abs(out - ref)))
    # everything is f32 except the EUP approx reciprocal in the sigmoid -> relaxed parity bound
    assert err < 5e-3, err
    print("KERNEL_OK")
</pallas_src>

<mosaic_0001>
module attributes {stable_mosaic.version = 11 : i64} {
  func.func @_fused_autoencoder_kernel(%arg0: i32, %arg1: memref<1x256x1xf32, #tpu.memory_space<vmem>>, %arg2: memref<64x2304xf32, #tpu.memory_space<vmem>>, %arg3: memref<9x1x64xf32, #tpu.memory_space<vmem>>, %arg4: memref<1x64xf32, #tpu.memory_space<vmem>>, %arg5: memref<16x576xf32, #tpu.memory_space<vmem>>, %arg6: memref<9x64x128xf32, #tpu.memory_space<vmem>>, %arg7: memref<1x128xf32, #tpu.memory_space<vmem>>, %arg8: memref<64x144xf32, #tpu.memory_space<vmem>>, %arg9: memref<9x128x64xf32, #tpu.memory_space<vmem>>, %arg10: memref<1x64xf32, #tpu.memory_space<vmem>>, %arg11: memref<9x64x256xf32, #tpu.memory_space<vmem>>, %arg12: memref<9x64xf32, #tpu.memory_space<vmem>>, %arg13: memref<1x1xf32, #tpu.memory_space<vmem>>, %arg14: memref<1x1x256xf32, #tpu.memory_space<vmem>>, %arg15: memref<2304x64xf32, #tpu.memory_space<vmem>>, %arg16: memref<576x128xf32, #tpu.memory_space<vmem>>, %arg17: memref<144x64xf32, #tpu.memory_space<vmem>>) attributes {dimension_semantics = [#tpu.dimension_semantics<parallel>], iteration_bounds = array<i64: 2>, scalar_prefetch = 0 : i64, scratch_operands = 3 : i64, tpu.core_type = #tpu.core_type<tc>, window_params = [{transform_indices = @transform_0, window_bounds = array<i64: 1, 256, 1>}, {pipeline_mode = #tpu.pipeline_mode<synchronous>, transform_indices = @transform_1, window_bounds = array<i64: 64, 2304>}, {pipeline_mode = #tpu.pipeline_mode<synchronous>, transform_indices = @transform_2, window_bounds = array<i64: 9, 1, 64>}, {pipeline_mode = #tpu.pipeline_mode<synchronous>, transform_indices = @transform_3, window_bounds = array<i64: 1, 64>}, {pipeline_mode = #tpu.pipeline_mode<synchronous>, transform_indices = @transform_4, window_bounds = array<i64: 16, 576>}, {pipeline_mode = #tpu.pipeline_mode<synchronous>, transform_indices = @transform_5, window_bounds = array<i64: 9, 64, 128>}, {pipeline_mode = #tpu.pipeline_mode<synchronous>, transform_indices = @transform_6, window_bounds = array<i64: 1, 128>}, {pipeline_mode = #tpu.pipeline_mode<synchronous>, transform_indices = @transform_7, window_bounds = array<i64: 64, 144>}, {pipeline_mode = #tpu.pipeline_mode<synchronous>, transform_indices = @transform_8, window_bounds = array<i64: 9, 128, 64>}, {pipeline_mode = #tpu.pipeline_mode<synchronous>, transform_indices = @transform_9, window_bounds = array<i64: 1, 64>}, {pipeline_mode = #tpu.pipeline_mode<synchronous>, transform_indices = @transform_10, window_bounds = array<i64: 9, 64, 256>}, {pipeline_mode = #tpu.pipeline_mode<synchronous>, transform_indices = @transform_11, window_bounds = array<i64: 9, 64>}, {pipeline_mode = #tpu.pipeline_mode<synchronous>, transform_indices = @transform_12, window_bounds = array<i64: 1, 1>}, {transform_indices = @transform_13, window_bounds = array<i64: 1, 1, 256>}]} {
    %c0 = arith.constant 0 : index
    %c0_0 = arith.constant 0 : index
    %c0_1 = arith.constant 0 : index
    %0 = vector.load %arg1[%c0, %c0_0, %c0_1] : memref<1x256x1xf32, #tpu.memory_space<vmem>>, vector<1x256x1xf32>
    %1 = vector.shape_cast %0 : vector<1x256x1xf32> to vector<256x1xf32>
    %c0_2 = arith.constant 0 : index
    %c0_3 = arith.constant 0 : index
    %c0_4 = arith.constant 0 : index
    %2 = vector.load %arg3[%c0_2, %c0_3, %c0_4] : memref<9x1x64xf32, #tpu.memory_space<vmem>>, vector<1x1x64xf32>
    %3 = vector.shape_cast %2 : vector<1x1x64xf32> to vector<1x64xf32>
    %4 = vector.broadcast %1 : vector<256x1xf32> to vector<256x64xf32>
    %5 = vector.broadcast %3 : vector<1x64xf32> to vector<256x64xf32>
    %6 = arith.mulf %4, %5 : vector<256x64xf32>
    %c0_5 = arith.constant 0 : index
    %c0_6 = arith.constant 0 : index
    %7 = vector.load %arg15[%c0_5, %c0_6] : memref<2304x64xf32, #tpu.memory_space<vmem>>, vector<256x64xf32>
    tpu.vector_store %arg15[%c0_5, %c0_6], %6 {strides = array<i32>} : memref<2304x64xf32, #tpu.memory_space<vmem>>, vector<256x64xf32>,
    %c1 = arith.constant 1 : index
    %c0_7 = arith.constant 0 : index
    %c0_8 = arith.constant 0 : index
    %8 = vector.load %arg3[%c1, %c0_7, %c0_8] : memref<9x1x64xf32, #tpu.memory_space<vmem>>, vector<1x1x64xf32>
    %9 = vector.shape_cast %8 : vector<1x1x64xf32> to vector<1x64xf32>
    %10 = vector.broadcast %1 : vector<256x1xf32> to vector<256x64xf32>
    %11 = vector.broadcast %9 : vector<1x64xf32> to vector<256x64xf32>
    %12 = arith.mulf %10, %11 : vector<256x64xf32>
    %c256 = arith.constant 256 : index
    %c0_9 = arith.constant 0 : index
    %13 = vector.load %arg15[%c256, %c0_9] : memref<2304x64xf32, #tpu.memory_space<vmem>>, vector<256x64xf32>
    tpu.vector_store %arg15[%c256, %c0_9], %12 {strides = array<i32>} : memref<2304x64xf32, #tpu.memory_space<vmem>>, vector<256x64xf32>,
    %c2 = arith.constant 2 : index
    %c0_10 = arith.constant 0 : index
    %c0_11 = arith.constant 0 : index
    %14 = vector.load %arg3[%c2, %c0_10, %c0_11] : memref<9x1x64xf32, #tpu.memory_space<vmem>>, vector<1x1x64xf32>
    %15 = vector.shape_cast %14 : vector<1x1x64xf32> to vector<1x64xf32>
    %16 = vector.broadcast %1 : vector<256x1xf32> to vector<256x64xf32>
    %17 = vector.broadcast %15 : vector<1x64xf32> to vector<256x64xf32>
    %18 = arith.mulf %16, %17 : vector<256x64xf32>
    %c512 = arith.constant 512 : index
    %c0_12 = arith.constant 0 : index
    %19 = vector.load %arg15[%c512, %c0_12] : memref<2304x64xf32, #tpu.memory_space<vmem>>, vector<256x64xf32>
    tpu.vector_store %arg15[%c512, %c0_12], %18 {strides = array<i32>} : memref<2304x64xf32, #tpu.memory_space<vmem>>, vector<256x64xf32>,
    %c3 = arith.constant 3 : index
    %c0_13 = arith.constant 0 : index
    %c0_14 = arith.constant 0 : index
    %20 = vector.load %arg3[%c3, %c0_13, %c0_14] : memref<9x1x64xf32, #tpu.memory_space<vmem>>, vector<1x1x64xf32>
    %21 = vector.shape_cast %20 : vector<1x1x64xf32> to vector<1x64xf32>
    %22 = vector.broadcast %1 : vector<256x1xf32> to vector<256x64xf32>
    %23 = vector.broadcast %21 : vector<1x64xf32> to vector<256x64xf32>
    %24 = arith.mulf %22, %23 : vector<256x64xf32>
    %c768 = arith.constant 768 : index
    %c0_15 = arith.constant 0 : index
    %25 = vector.load %arg15[%c768, %c0_15] : memref<2304x64xf32, #tpu.memory_space<vmem>>, vector<256x64xf32>
    tpu.vector_store %arg15[%c768, %c0_15], %24 {strides = array<i32>} : memref<2304x64xf32, #tpu.memory_space<vmem>>, vector<256x64xf32>,
    %c4 = arith.constant 4 : index
    %c0_16 = arith.constant 0 : index
    %c0_17 = arith.constant 0 : index
    %26 = vector.load %arg3[%c4, %c0_16, %c0_17] : memref<9x1x64xf32, #tpu.memory_space<vmem>>, vector<1x1x64xf32>
    %27 = vector.shape_cast %26 : vector<1x1x64xf32> to vector<1x64xf32>
    %28 = vector.broadcast %1 : vector<256x1xf32> to vector<256x64xf32>
    %29 = vector.broadcast %27 : vector<1x64xf32> to vector<256x64xf32>
    %30 = arith.mulf %28, %29 : vector<256x64xf32>
    %c1024 = arith.constant 1024 : index
    %c0_18 = arith.constant 0 : index
    %31 = vector.load %arg15[%c1024, %c0_18] : memref<2304x64xf32, #tpu.memory_space<vmem>>, vector<256x64xf32>
    tpu.vector_store %arg15[%c1024, %c0_18], %30 {strides = array<i32>} : memref<2304x64xf32, #tpu.memory_space<vmem>>, vector<256x64xf32>,
    %c5 = arith.constant 5 : index
    %c0_19 = arith.constant 0 : index
    %c0_20 = arith.constant 0 : index
    %32 = vector.load %arg3[%c5, %c0_19, %c0_20] : memref<9x1x64xf32, #tpu.memory_space<vmem>>, vector<1x1x64xf32>
    %33 = vector.shape_cast %32 : vector<1x1x64xf32> to vector<1x64xf32>
    %34 = vector.broadcast %1 : vector<256x1xf32> to vector<256x64xf32>
    %35 = vector.broadcast %33 : vector<1x64xf32> to vector<256x64xf32>
    %36 = arith.mulf %34, %35 : vector<256x64xf32>
    %c1280 = arith.constant 1280 : index
    %c0_21 = arith.constant 0 : index
    %37 = vector.load %arg15[%c1280, %c0_21] : memref<2304x64xf32, #tpu.memory_space<vmem>>, vector<256x64xf32>
    tpu.vector_store %arg15[%c1280, %c0_21], %36 {strides = array<i32>} : memref<2304x64xf32, #tpu.memory_space<vmem>>, vector<256x64xf32>,
    %c6 = arith.constant 6 : index
    %c0_22 = arith.constant 0 : index
    %c0_23 = arith.constant 0 : index
    %38 = vector.load %arg3[%c6, %c0_22, %c0_23] : memref<9x1x64xf32, #tpu.memory_space<vmem>>, vector<1x1x64xf32>
    %39 = vector.shape_cast %38 : vector<1x1x64xf32> to vector<1x64xf32>
    %40 = vector.broadcast %1 : vector<256x1xf32> to vector<256x64xf32>
    %41 = vector.broadcast %39 : vector<1x64xf32> to vector<256x64xf32>
    %42 = arith.mulf %40, %41 : vector<256x64xf32>
    %c1536 = arith.constant 1536 : index
    %c0_24 = arith.constant 0 : index
    %43 = vector.load %arg15[%c1536, %c0_24] : memref<2304x64xf32, #tpu.memory_space<vmem>>, vector<256x64xf32>
    tpu.vector_store %arg15[%c1536, %c0_24], %42 {strides = array<i32>} : memref<2304x64xf32, #tpu.memory_space<vmem>>, vector<256x64xf32>,
    %c7 = arith.constant 7 : index
    %c0_25 = arith.constant 0 : index
    %c0_26 = arith.constant 0 : index
    %44 = vector.load %arg3[%c7, %c0_25, %c0_26] : memref<9x1x64xf32, #tpu.memory_space<vmem>>, vector<1x1x64xf32>
    %45 = vector.shape_cast %44 : vector<1x1x64xf32> to vector<1x64xf32>
    %46 = vector.broadcast %1 : vector<256x1xf32> to vector<256x64xf32>
    %47 = vector.broadcast %45 : vector<1x64xf32> to vector<256x64xf32>
    %48 = arith.mulf %46, %47 : vector<256x64xf32>
    %c1792 = arith.constant 1792 : index
    %c0_27 = arith.constant 0 : index
    %49 = vector.load %arg15[%c1792, %c0_27] : memref<2304x64xf32, #tpu.memory_space<vmem>>, vector<256x64xf32>
    tpu.vector_store %arg15[%c1792, %c0_27], %48 {strides = array<i32>} : memref<2304x64xf32, #tpu.memory_space<vmem>>, vector<256x64xf32>,
    %c8 = arith.constant 8 : index
    %c0_28 = arith.constant 0 : index
    %c0_29 = arith.constant 0 : index
    %50 = vector.load %arg3[%c8, %c0_28, %c0_29] : memref<9x1x64xf32, #tpu.memory_space<vmem>>, vector<1x1x64xf32>
    %51 = vector.shape_cast %50 : vector<1x1x64xf32> to vector<1x64xf32>
    %52 = vector.broadcast %1 : vector<256x1xf32> to vector<256x64xf32>
    %53 = vector.broadcast %51 : vector<1x64xf32> to vector<256x64xf32>
    %54 = arith.mulf %52, %53 : vector<256x64xf32>
    %c2048 = arith.constant 2048 : index
    %c0_30 = arith.constant 0 : index
    %55 = vector.load %arg15[%c2048, %c0_30] : memref<2304x64xf32, #tpu.memory_space<vmem>>, vector<256x64xf32>
    tpu.vector_store %arg15[%c2048, %c0_30], %54 {strides = array<i32>} : memref<2304x64xf32, #tpu.memory_space<vmem>>, vector<256x64xf32>,
    %c0_31 = arith.constant 0 : index
    %c0_32 = arith.constant 0 : index
    %56 = vector.load %arg2[%c0_31, %c0_32] : memref<64x2304xf32, #tpu.memory_space<vmem>>, vector<64x2304xf32>
    %c0_33 = arith.constant 0 : index
    %c0_34 = arith.constant 0 : index
    %57 = vector.load %arg15[%c0_33, %c0_34] : memref<2304x64xf32, #tpu.memory_space<vmem>>, vector<2304x64xf32>
    %cst = arith.constant dense<0.000000e+00> : vector<64x64xf32>
    %58 = tpu.matmul %56, %57, %cst {dimension_numbers = #tpu.dot_dimension_numbers<[1], [0], [0], [1], [0, 0, 1, 1], [], []>} : vector<64x2304xf32>, vector<2304x64xf32>, vector<64x64xf32> -> vector<64x64xf32>
    %c0_35 = arith.constant 0 : index
    %c0_36 = arith.constant 0 : index
    %59 = vector.load %arg4[%c0_35, %c0_36] : memref<1x64xf32, #tpu.memory_space<vmem>>, vector<1x64xf32>
    %60 = vector.broadcast %59 : vector<1x64xf32> to vector<64x64xf32>
    %61 = arith.addf %58, %60 : vector<64x64xf32>
    %cst_37 = arith.constant 0.000000e+00 : f32
    %62 = vector.broadcast %cst_37 : f32 to vector<64x64xf32>
    %63 = arith.maximumf %61, %62 : vector<64x64xf32>
    %c0_38 = arith.constant 0 : index
    %c0_39 = arith.constant 0 : index
    %c0_40 = arith.constant 0 : index
    %64 = vector.load %arg6[%c0_38, %c0_39, %c0_40] : memref<9x64x128xf32, #tpu.memory_space<vmem>>, vector<1x64x128xf32>
    %65 = vector.shape_cast %64 : vector<1x64x128xf32> to vector<64x128xf32>
    %cst_41 = arith.constant dense<0.000000e+00> : vector<64x128xf32>
    %66 = tpu.matmul %63, %65, %cst_41 {dimension_numbers = #tpu.dot_dimension_numbers<[1], [0], [0], [1], [0, 0, 1, 1], [], []>} : vector<64x64xf32>, vector<64x128xf32>, vector<64x128xf32> -> vector<64x128xf32>
    %c0_42 = arith.constant 0 : index
    %c0_43 = arith.constant 0 : index
    %67 = vector.load %arg16[%c0_42, %c0_43] : memref<576x128xf32, #tpu.memory_space<vmem>>, vector<64x128xf32>
    tpu.vector_store %arg16[%c0_42, %c0_43], %66 {strides = array<i32>} : memref<576x128xf32, #tpu.memory_space<vmem>>, vector<64x128xf32>,
    %c1_44 = arith.constant 1 : index
    %c0_45 = arith.constant 0 : index
    %c0_46 = arith.constant 0 : index
    %68 = vector.load %arg6[%c1_44, %c0_45, %c0_46] : memref<9x64x128xf32, #tpu.memory_space<vmem>>, vector<1x64x128xf32>
    %69 = vector.shape_cast %68 : vector<1x64x128xf32> to vector<64x128xf32>
    %cst_47 = arith.constant dense<0.000000e+00> : vector<64x128xf32>
    %70 = tpu.matmul %63, %69, %cst_47 {dimension_numbers = #tpu.dot_dimension_numbers<[1], [0], [0], [1], [0, 0, 1, 1], [], []>} : vector<64x64xf32>, vector<64x128xf32>, vector<64x128xf32> -> vector<64x128xf32>
    %c64 = arith.constant 64 : index
    %c0_48 = arith.constant 0 : index
    %71 = vector.load %arg16[%c64, %c0_48] : memref<576x128xf32, #tpu.memory_space<vmem>>, vector<64x128xf32>
    tpu.vector_store %arg16[%c64, %c0_48], %70 {strides = array<i32>} : memref<576x128xf32, #tpu.memory_space<vmem>>, vector<64x128xf32>,
    %c2_49 = arith.constant 2 : index
    %c0_50 = arith.constant 0 : index
    %c0_51 = arith.constant 0 : index
    %72 = vector.load %arg6[%c2_49, %c0_50, %c0_51] : memref<9x64x128xf32, #tpu.memory_space<vmem>>, vector<1x64x128xf32>
    %73 = vector.shape_cast %72 : vector<1x64x128xf32> to vector<64x128xf32>
    %cst_52 = arith.constant dense<0.000000e+00> : vector<64x128xf32>
    %74 = tpu.matmul %63, %73, %cst_52 {dimension_numbers = #tpu.dot_dimension_numbers<[1], [0], [0], [1], [0, 0, 1, 1], [], []>} : vector<64x64xf32>, vector<64x128xf32>, vector<64x128xf32> -> vector<64x128xf32>
    %c128 = arith.constant 128 : index
    %c0_53 = arith.constant 0 : index
    %75 = vector.load %arg16[%c128, %c0_53] : memref<576x128xf32, #tpu.memory_space<vmem>>, vector<64x128xf32>
    tpu.vector_store %arg16[%c128, %c0_53], %74 {strides = array<i32>} : memref<576x128xf32, #tpu.memory_space<vmem>>, vector<64x128xf32>,
    %c3_54 = arith.constant 3 : index
    %c0_55 = arith.constant 0 : index
    %c0_56 = arith.constant 0 : index
    %76 = vector.load %arg6[%c3_54, %c0_55, %c0_56] : memref<9x64x128xf32, #tpu.memory_space<vmem>>, vector<1x64x128xf32>
    %77 = vector.shape_cast %76 : vector<1x64x128xf32> to vector<64x128xf32>
    %cst_57 = arith.constant dense<0.000000e+00> : vector<64x128xf32>
    %78 = tpu.matmul %63, %77, %cst_57 {dimension_numbers = #tpu.dot_dimension_numbers<[1], [0], [0], [1], [0, 0, 1, 1], [], []>} : vector<64x64xf32>, vector<64x128xf32>, vector<64x128xf32> -> vector<64x128xf32>
    %c192 = arith.constant 192 : index
    %c0_58 = arith.constant 0 : index
    %79 = vector.load %arg16[%c192, %c0_58] : memref<576x128xf32, #tpu.memory_space<vmem>>, vector<64x128xf32>
    tpu.vector_store %arg16[%c192, %c0_58], %78 {strides = array<i32>} : memref<576x128xf32, #tpu.memory_space<vmem>>, vector<64x128xf32>,
    %c4_59 = arith.constant 4 : index
    %c0_60 = arith.constant 0 : index
    %c0_61 = arith.constant 0 : index
    %80 = vector.load %arg6[%c4_59, %c0_60, %c0_61] : memref<9x64x128xf32, #tpu.memory_space<vmem>>, vector<1x64x128xf32>
    %81 = vector.shape_cast %80 : vector<1x64x128xf32> to vector<64x128xf32>
    %cst_62 = arith.constant dense<0.000000e+00> : vector<64x128xf32>
    %82 = tpu.matmul %63, %81, %cst_62 {dimension_numbers = #tpu.dot_dimension_numbers<[1], [0], [0], [1], [0, 0, 1, 1], [], []>} : vector<64x64xf32>, vector<64x128xf32>, vector<64x128xf32> -> vector<64x128xf32>
    %c256_63 = arith.constant 256 : index
    %c0_64 = arith.constant 0 : index
    %83 = vector.load %arg16[%c256_63, %c0_64] : memref<576x128xf32, #tpu.memory_space<vmem>>, vector<64x128xf32>
    tpu.vector_store %arg16[%c256_63, %c0_64], %82 {strides = array<i32>} : memref<576x128xf32, #tpu.memory_space<vmem>>, vector<64x128xf32>,
    %c5_65 = arith.constant 5 : index
    %c0_66 = arith.constant 0 : index
    %c0_67 = arith.constant 0 : index
    %84 = vector.load %arg6[%c5_65, %c0_66, %c0_67] : memref<9x64x128xf32, #tpu.memory_space<vmem>>, vector<1x64x128xf32>
    %85 = vector.shape_cast %84 : vector<1x64x128xf32> to vector<64x128xf32>
    %cst_68 = arith.constant dense<0.000000e+00> : vector<64x128xf32>
    %86 = tpu.matmul %63, %85, %cst_68 {dimension_numbers = #tpu.dot_dimension_numbers<[1], [0], [0], [1], [0, 0, 1, 1], [], []>} : vector<64x64xf32>, vector<64x128xf32>, vector<64x128xf32> -> vector<64x128xf32>
    %c320 = arith.constant 320 : index
    %c0_69 = arith.constant 0 : index
    %87 = vector.load %arg16[%c320, %c0_69] : memref<576x128xf32, #tpu.memory_space<vmem>>, vector<64x128xf32>
    tpu.vector_store %arg16[%c320, %c0_69], %86 {strides = array<i32>} : memref<576x128xf32, #tpu.memory_space<vmem>>, vector<64x128xf32>,
    %c6_70 = arith.constant 6 : index
    %c0_71 = arith.constant 0 : index
    %c0_72 = arith.constant 0 : index
    %88 = vector.load %arg6[%c6_70, %c0_71, %c0_72] : memref<9x64x128xf32, #tpu.memory_space<vmem>>, vector<1x64x128xf32>
    %89 = vector.shape_cast %88 : vector<1x64x128xf32> to vector<64x128xf32>
    %cst_73 = arith.constant dense<0.000000e+00> : vector<64x128xf32>
    %90 = tpu.matmul %63, %89, %cst_73 {dimension_numbers = #tpu.dot_dimension_numbers<[1], [0], [0], [1], [0, 0, 1, 1], [], []>} : vector<64x64xf32>, vector<64x128xf32>, vector<64x128xf32> -> vector<64x128xf32>
    %c384 = arith.constant 384 : index
    %c0_74 = arith.constant 0 : index
    %91 = vector.load %arg16[%c384, %c0_74] : memref<576x128xf32, #tpu.memory_space<vmem>>, vector<64x128xf32>
    tpu.vector_store %arg16[%c384, %c0_74], %90 {strides = array<i32>} : memref<576x128xf32, #tpu.memory_space<vmem>>, vector<64x128xf32>,
    %c7_75 = arith.constant 7 : index
    %c0_76 = arith.constant 0 : index
    %c0_77 = arith.constant 0 : index
    %92 = vector.load %arg6[%c7_75, %c0_76, %c0_77] : memref<9x64x128xf32, #tpu.memory_space<vmem>>, vector<1x64x128xf32>
    %93 = vector.shape_cast %92 : vector<1x64x128xf32> to vector<64x128xf32>
    %cst_78 = arith.constant dense<0.000000e+00> : vector<64x128xf32>
    %94 = tpu.matmul %63, %93, %cst_78 {dimension_numbers = #tpu.dot_dimension_numbers<[1], [0], [0], [1], [0, 0, 1, 1], [], []>} : vector<64x64xf32>, vector<64x128xf32>, vector<64x128xf32> -> vector<64x128xf32>
    %c448 = arith.constant 448 : index
    %c0_79 = arith.constant 0 : index
    %95 = vector.load %arg16[%c448, %c0_79] : memref<576x128xf32, #tpu.memory_space<vmem>>, vector<64x128xf32>
    tpu.vector_store %arg16[%c448, %c0_79], %94 {strides = array<i32>} : memref<576x128xf32, #tpu.memory_space<vmem>>, vector<64x128xf32>,
    %c8_80 = arith.constant 8 : index
    %c0_81 = arith.constant 0 : index
    %c0_82 = arith.constant 0 : index
    %96 = vector.load %arg6[%c8_80, %c0_81, %c0_82] : memref<9x64x128xf32, #tpu.memory_space<vmem>>, vector<1x64x128xf32>
    %97 = vector.shape_cast %96 : vector<1x64x128xf32> to vector<64x128xf32>
    %cst_83 = arith.constant dense<0.000000e+00> : vector<64x128xf32>
    %98 = tpu.matmul %63, %97, %cst_83 {dimension_numbers = #tpu.dot_dimension_numbers<[1], [0], [0], [1], [0, 0, 1, 1], [], []>} : vector<64x64xf32>, vector<64x128xf32>, vector<64x128xf32> -> vector<64x128xf32>
    %c512_84 = arith.constant 512 : index
    %c0_85 = arith.constant 0 : index
    %99 = vector.load %arg16[%c512_84, %c0_85] : memref<576x128xf32, #tpu.memory_space<vmem>>, vector<64x128xf32>
    tpu.vector_store %arg16[%c512_84, %c0_85], %98 {strides = array<i32>} : memref<576x128xf32, #tpu.memory_space<vmem>>, vector<64x128xf32>,
    %c0_86 = arith.constant 0 : index
    %c0_87 = arith.constant 0 : index
    %100 = vector.load %arg5[%c0_86, %c0_87] : memref<16x576xf32, #tpu.memory_space<vmem>>, vector<16x576xf32>
    %c0_88 = arith.constant 0 : index
    %c0_89 = arith.constant 0 : index
    %101 = vector.load %arg16[%c0_88, %c0_89] : memref<576x128xf32, #tpu.memory_space<vmem>>, vector<576x128xf32>
    %cst_90 = arith.constant dense<0.000000e+00> : vector<16x128xf32>
    %102 = tpu.matmul %100, %101, %cst_90 {dimension_numbers = #tpu.dot_dimension_numbers<[1], [0], [0], [1], [0, 0, 1, 1], [], []>} : vector<16x576xf32>, vector<576x128xf32>, vector<16x128xf32> -> vector<16x128xf32>
    %c0_91 = arith.constant 0 : index
    %c0_92 = arith.constant 0 : index
    %103 = vector.load %arg7[%c0_91, %c0_92] : memref<1x128xf32, #tpu.memory_space<vmem>>, vector<1x128xf32>
    %104 = vector.broadcast %103 : vector<1x128xf32> to vector<16x128xf32>
    %105 = arith.addf %102, %104 : vector<16x128xf32>
    %cst_93 = arith.constant 0.000000e+00 : f32
    %106 = vector.broadcast %cst_93 : f32 to vector<16x128xf32>
    %107 = arith.maximumf %105, %106 : vector<16x128xf32>
    %c0_94 = arith.constant 0 : index
    %c0_95 = arith.constant 0 : index
    %c0_96 = arith.constant 0 : index
    %108 = vector.load %arg9[%c0_94, %c0_95, %c0_96] : memref<9x128x64xf32, #tpu.memory_space<vmem>>, vector<1x128x64xf32>
    %109 = vector.shape_cast %108 : vector<1x128x64xf32> to vector<128x64xf32>
    %cst_97 = arith.constant dense<0.000000e+00> : vector<16x64xf32>
    %110 = tpu.matmul %107, %109, %cst_97 {dimension_numbers = #tpu.dot_dimension_numbers<[1], [0], [0], [1], [0, 0, 1, 1], [], []>} : vector<16x128xf32>, vector<128x64xf32>, vector<16x64xf32> -> vector<16x64xf32>
    %c0_98 = arith.constant 0 : index
    %c0_99 = arith.constant 0 : index
    %111 = vector.load %arg17[%c0_98, %c0_99] : memref<144x64xf32, #tpu.memory_space<vmem>>, vector<16x64xf32>
    tpu.vector_store %arg17[%c0_98, %c0_99], %110 {strides = array<i32>} : memref<144x64xf32, #tpu.memory_space<vmem>>, vector<16x64xf32>,
    %c1_100 = arith.constant 1 : index
    %c0_101 = arith.constant 0 : index
    %c0_102 = arith.constant 0 : index
    %112 = vector.load %arg9[%c1_100, %c0_101, %c0_102] : memref<9x128x64xf32, #tpu.memory_space<vmem>>, vector<1x128x64xf32>
    %113 = vector.shape_cast %112 : vector<1x128x64xf32> to vector<128x64xf32>
    %cst_103 = arith.constant dense<0.000000e+00> : vector<16x64xf32>
    %114 = tpu.matmul %107, %113, %cst_103 {dimension_numbers = #tpu.dot_dimension_numbers<[1], [0], [0], [1], [0, 0, 1, 1], [], []>} : vector<16x128xf32>, vector<128x64xf32>, vector<16x64xf32> -> vector<16x64xf32>
    %c16 = arith.constant 16 : index
    %c0_104 = arith.constant 0 : index
    %115 = vector.load %arg17[%c16, %c0_104] : memref<144x64xf32, #tpu.memory_space<vmem>>, vector<16x64xf32>
    tpu.vector_store %arg17[%c16, %c0_104], %114 {strides = array<i32>} : memref<144x64xf32, #tpu.memory_space<vmem>>, vector<16x64xf32>,
    %c2_105 = arith.constant 2 : index
    %c0_106 = arith.constant 0 : index
    %c0_107 = arith.constant 0 : index
    %116 = vector.load %arg9[%c2_105, %c0_106, %c0_107] : memref<9x128x64xf32, #tpu.memory_space<vmem>>, vector<1x128x64xf32>
    %117 = vector.shape_cast %116 : vector<1x128x64xf32> to vector<128x64xf32>
    %cst_108 = arith.constant dense<0.000000e+00> : vector<16x64xf32>
    %118 = tpu.matmul %107, %117, %cst_108 {dimension_numbers = #tpu.dot_dimension_numbers<[1], [0], [0], [1], [0, 0, 1, 1], [], []>} : vector<16x128xf32>, vector<128x64xf32>, vector<16x64xf32> -> vector<16x64xf32>
    %c32 = arith.constant 32 : index
    %c0_109 = arith.constant 0 : index
    %119 = vector.load %arg17[%c32, %c0_109] : memref<144x64xf32, #tpu.memory_space<vmem>>, vector<16x64xf32>
    tpu.vector_store %arg17[%c32, %c0_109], %118 {strides = array<i32>} : memref<144x64xf32, #tpu.memory_space<vmem>>, vector<16x64xf32>,
    %c3_110 = arith.constant 3 : index
    %c0_111 = arith.constant 0 : index
    %c0_112 = arith.constant 0 : index
    %120 = vector.load %arg9[%c3_110, %c0_111, %c0_112] : memref<9x128x64xf32, #tpu.memory_space<vmem>>, vector<1x128x64xf32>
    %121 = vector.shape_cast %120 : vector<1x128x64xf32> to vector<128x64xf32>
    %cst_113 = arith.constant dense<0.000000e+00> : vector<16x64xf32>
    %122 = tpu.matmul %107, %121, %cst_113 {dimension_numbers = #tpu.dot_dimension_numbers<[1], [0], [0], [1], [0, 0, 1, 1], [], []>} : vector<16x128xf32>, vector<128x64xf32>, vector<16x64xf32> -> vector<16x64xf32>
    %c48 = arith.constant 48 : index
    %c0_114 = arith.constant 0 : index
    %123 = vector.load %arg17[%c48, %c0_114] : memref<144x64xf32, #tpu.memory_space<vmem>>, vector<16x64xf32>
    tpu.vector_store %arg17[%c48, %c0_114], %122 {strides = array<i32>} : memref<144x64xf32, #tpu.memory_space<vmem>>, vector<16x64xf32>,
    %c4_115 = arith.constant 4 : index
    %c0_116 = arith.constant 0 : index
    %c0_117 = arith.constant 0 : index
    %124 = vector.load %arg9[%c4_115, %c0_116, %c0_117] : memref<9x128x64xf32, #tpu.memory_space<vmem>>, vector<1x128x64xf32>
    %125 = vector.shape_cast %124 : vector<1x128x64xf32> to vector<128x64xf32>
    %cst_118 = arith.constant dense<0.000000e+00> : vector<16x64xf32>
    %126 = tpu.matmul %107, %125, %cst_118 {dimension_numbers = #tpu.dot_dimension_numbers<[1], [0], [0], [1], [0, 0, 1, 1], [], []>} : vector<16x128xf32>, vector<128x64xf32>, vector<16x64xf32> -> vector<16x64xf32>
    %c64_119 = arith.constant 64 : index
    %c0_120 = arith.constant 0 : index
    %127 = vector.load %arg17[%c64_119, %c0_120] : memref<144x64xf32, #tpu.memory_space<vmem>>, vector<16x64xf32>
    tpu.vector_store %arg17[%c64_119, %c0_120], %126 {strides = array<i32>} : memref<144x64xf32, #tpu.memory_space<vmem>>, vector<16x64xf32>,
    %c5_121 = arith.constant 5 : index
    %c0_122 = arith.constant 0 : index
    %c0_123 = arith.constant 0 : index
    %128 = vector.load %arg9[%c5_121, %c0_122, %c0_123] : memref<9x128x64xf32, #tpu.memory_space<vmem>>, vector<1x128x64xf32>
    %129 = vector.shape_cast %128 : vector<1x128x64xf32> to vector<128x64xf32>
    %cst_124 = arith.constant dense<0.000000e+00> : vector<16x64xf32>
    %130 = tpu.matmul %107, %129, %cst_124 {dimension_numbers = #tpu.dot_dimension_numbers<[1], [0], [0], [1], [0, 0, 1, 1], [], []>} : vector<16x128xf32>, vector<128x64xf32>, vector<16x64xf32> -> vector<16x64xf32>
    %c80 = arith.constant 80 : index
    %c0_125 = arith.constant 0 : index
    %131 = vector.load %arg17[%c80, %c0_125] : memref<144x64xf32, #tpu.memory_space<vmem>>, vector<16x64xf32>
    tpu.vector_store %arg17[%c80, %c0_125], %130 {strides = array<i32>} : memref<144x64xf32, #tpu.memory_space<vmem>>, vector<16x64xf32>,
    %c6_126 = arith.constant 6 : index
    %c0_127 = arith.constant 0 : index
    %c0_128 = arith.constant 0 : index
    %132 = vector.load %arg9[%c6_126, %c0_127, %c0_128] : memref<9x128x64xf32, #tpu.memory_space<vmem>>, vector<1x128x64xf32>
    %133 = vector.shape_cast %132 : vector<1x128x64xf32> to vector<128x64xf32>
    %cst_129 = arith.constant dense<0.000000e+00> : vector<16x64xf32>
    %134 = tpu.matmul %107, %133, %cst_129 {dimension_numbers = #tpu.dot_dimension_numbers<[1], [0], [0], [1], [0, 0, 1, 1], [], []>} : vector<16x128xf32>, vector<128x64xf32>, vector<16x64xf32> -> vector<16x64xf32>
    %c96 = arith.constant 96 : index
    %c0_130 = arith.constant 0 : index
    %135 = vector.load %arg17[%c96, %c0_130] : memref<144x64xf32, #tpu.memory_space<vmem>>, vector<16x64xf32>
    tpu.vector_store %arg17[%c96, %c0_130], %134 {strides = array<i32>} : memref<144x64xf32, #tpu.memory_space<vmem>>, vector<16x64xf32>,
    %c7_131 = arith.constant 7 : index
    %c0_132 = arith.constant 0 : index
    %c0_133 = arith.constant 0 : index
    %136 = vector.load %arg9[%c7_131, %c0_132, %c0_133] : memref<9x128x64xf32, #tpu.memory_space<vmem>>, vector<1x128x64xf32>
    %137 = vector.shape_cast %136 : vector<1x128x64xf32> to vector<128x64xf32>
    %cst_134 = arith.constant dense<0.000000e+00> : vector<16x64xf32>
    %138 = tpu.matmul %107, %137, %cst_134 {dimension_numbers = #tpu.dot_dimension_numbers<[1], [0], [0], [1], [0, 0, 1, 1], [], []>} : vector<16x128xf32>, vector<128x64xf32>, vector<16x64xf32> -> vector<16x64xf32>
    %c112 = arith.constant 112 : index
    %c0_135 = arith.constant 0 : index
    %139 = vector.load %arg17[%c112, %c0_135] : memref<144x64xf32, #tpu.memory_space<vmem>>, vector<16x64xf32>
    tpu.vector_store %arg17[%c112, %c0_135], %138 {strides = array<i32>} : memref<144x64xf32, #tpu.memory_space<vmem>>, vector<16x64xf32>,
    %c8_136 = arith.constant 8 : index
    %c0_137 = arith.constant 0 : index
    %c0_138 = arith.constant 0 : index
    %140 = vector.load %arg9[%c8_136, %c0_137, %c0_138] : memref<9x128x64xf32, #tpu.memory_space<vmem>>, vector<1x128x64xf32>
    %141 = vector.shape_cast %140 : vector<1x128x64xf32> to vector<128x64xf32>
    %cst_139 = arith.constant dense<0.000000e+00> : vector<16x64xf32>
    %142 = tpu.matmul %107, %141, %cst_139 {dimension_numbers = #tpu.dot_dimension_numbers<[1], [0], [0], [1], [0, 0, 1, 1], [], []>} : vector<16x128xf32>, vector<128x64xf32>, vector<16x64xf32> -> vector<16x64xf32>
    %c128_140 = arith.constant 128 : index
    %c0_141 = arith.constant 0 : index
    %143 = vector.load %arg17[%c128_140, %c0_141] : memref<144x64xf32, #tpu.memory_space<vmem>>, vector<16x64xf32>
    tpu.vector_store %arg17[%c128_140, %c0_141], %142 {strides = array<i32>} : memref<144x64xf32, #tpu.memory_space<vmem>>, vector<16x64xf32>,
    %c0_142 = arith.constant 0 : index
    %c0_143 = arith.constant 0 : index
    %144 = vector.load %arg8[%c0_142, %c0_143] : memref<64x144xf32, #tpu.memory_space<vmem>>, vector<64x144xf32>
    %c0_144 = arith.constant 0 : index
    %c0_145 = arith.constant 0 : index
    %145 = vector.load %arg17[%c0_144, %c0_145] : memref<144x64xf32, #tpu.memory_space<vmem>>, vector<144x64xf32>
    %cst_146 = arith.constant dense<0.000000e+00> : vector<64x64xf32>
    %146 = tpu.matmul %144, %145, %cst_146 {dimension_numbers = #tpu.dot_dimension_numbers<[1], [0], [0], [1], [0, 0, 1, 1], [], []>} : vector<64x144xf32>, vector<144x64xf32>, vector<64x64xf32> -> vector<64x64xf32>
    %c0_147 = arith.constant 0 : index
    %c0_148 = arith.constant 0 : index
    %147 = vector.load %arg10[%c0_147, %c0_148] : memref<1x64xf32, #tpu.memory_space<vmem>>, vector<1x64xf32>
    %148 = vector.broadcast %147 : vector<1x64xf32> to vector<64x64xf32>
    %149 = arith.addf %146, %148 : vector<64x64xf32>
    %cst_149 = arith.constant 0.000000e+00 : f32
    %150 = vector.broadcast %cst_149 : f32 to vector<64x64xf32>
    %151 = arith.maximumf %149, %150 : vector<64x64xf32>
    %c0_150 = arith.constant 0 : index
    %c0_151 = arith.constant 0 : index
    %152 = vector.load %arg12[%c0_150, %c0_151] : memref<9x64xf32, #tpu.memory_space<vmem>>, vector<9x64xf32>
    "tpu.trace_start"() <{level = 10 : i32, message = "tc,mc->tm"}> : () -> ()
    %cst_152 = arith.constant dense<0.000000e+00> : vector<9x64xf32>
    %153 = tpu.matmul %152, %151, %cst_152 {dimension_numbers = #tpu.dot_dimension_numbers<[1], [1], [0], [0], [0, 0, 1, 0], [], []>} : vector<9x64xf32>, vector<64x64xf32>, vector<9x64xf32> -> vector<9x64xf32>
    "tpu.trace_stop"() : () -> ()
    %154 = vector.extract_strided_slice %153 {offsets = [0, 0], sizes = [1, 64], strides = [1, 1]} : vector<9x64xf32> to vector<1x64xf32>
    %c0_153 = arith.constant 0 : index
    %c0_154 = arith.constant 0 : index
    %c0_155 = arith.constant 0 : index
    %155 = vector.load %arg11[%c0_153, %c0_154, %c0_155] : memref<9x64x256xf32, #tpu.memory_space<vmem>>, vector<1x64x256xf32>
    %156 = vector.shape_cast %155 : vector<1x64x256xf32> to vector<64x256xf32>
    %cst_156 = arith.constant dense<0.000000e+00> : vector<1x256xf32>
    %157 = tpu.matmul %154, %156, %cst_156 {dimension_numbers = #tpu.dot_dimension_numbers<[1], [0], [0], [1], [0, 0, 1, 1], [], []>} : vector<1x64xf32>, vector<64x256xf32>, vector<1x256xf32> -> vector<1x256xf32>
    %158 = vector.extract_strided_slice %153 {offsets = [1, 0], sizes = [1, 64], strides = [1, 1]} : vector<9x64xf32> to vector<1x64xf32>
    %c1_157 = arith.constant 1 : index
    %c0_158 = arith.constant 0 : index
    %c0_159 = arith.constant 0 : index
    %159 = vector.load %arg11[%c1_157, %c0_158, %c0_159] : memref<9x64x256xf32, #tpu.memory_space<vmem>>, vector<1x64x256xf32>
    %160 = vector.shape_cast %159 : vector<1x64x256xf32> to vector<64x256xf32>
    %cst_160 = arith.constant dense<0.000000e+00> : vector<1x256xf32>
    %161 = tpu.matmul %158, %160, %cst_160 {dimension_numbers = #tpu.dot_dimension_numbers<[1], [0], [0], [1], [0, 0, 1, 1], [], []>} : vector<1x64xf32>, vector<64x256xf32>, vector<1x256xf32> -> vector<1x256xf32>
    %162 = arith.addf %157, %161 : vector<1x256xf32>
    %163 = vector.extract_strided_slice %153 {offsets = [2, 0], sizes = [1, 64], strides = [1, 1]} : vector<9x64xf32> to vector<1x64xf32>
    %c2_161 = arith.constant 2 : index
    %c0_162 = arith.constant 0 : index
    %c0_163 = arith.constant 0 : index
    %164 = vector.load %arg11[%c2_161, %c0_162, %c0_163] : memref<9x64x256xf32, #tpu.memory_space<vmem>>, vector<1x64x256xf32>
    %165 = vector.shape_cast %164 : vector<1x64x256xf32> to vector<64x256xf32>
    %cst_164 = arith.constant dense<0.000000e+00> : vector<1x256xf32>
    %166 = tpu.matmul %163, %165, %cst_164 {dimension_numbers = #tpu.dot_dimension_numbers<[1], [0], [0], [1], [0, 0, 1, 1], [], []>} : vector<1x64xf32>, vector<64x256xf32>, vector<1x256xf32> -> vector<1x256xf32>
    %167 = arith.addf %162, %166 : vector<1x256xf32>
    %168 = vector.extract_strided_slice %153 {offsets = [3, 0], sizes = [1, 64], strides = [1, 1]} : vector<9x64xf32> to vector<1x64xf32>
    %c3_165 = arith.constant 3 : index
    %c0_166 = arith.constant 0 : index
    %c0_167 = arith.constant 0 : index
    %169 = vector.load %arg11[%c3_165, %c0_166, %c0_167] : memref<9x64x256xf32, #tpu.memory_space<vmem>>, vector<1x64x256xf32>
    %170 = vector.shape_cast %169 : vector<1x64x256xf32> to vector<64x256xf32>
    %cst_168 = arith.constant dense<0.000000e+00> : vector<1x256xf32>
    %171 = tpu.matmul %168, %170, %cst_168 {dimension_numbers = #tpu.dot_dimension_numbers<[1], [0], [0], [1], [0, 0, 1, 1], [], []>} : vector<1x64xf32>, vector<64x256xf32>, vector<1x256xf32> -> vector<1x256xf32>
    %172 = arith.addf %167, %171 : vector<1x256xf32>
    %173 = vector.extract_strided_slice %153 {offsets = [4, 0], sizes = [1, 64], strides = [1, 1]} : vector<9x64xf32> to vector<1x64xf32>
    %c4_169 = arith.constant 4 : index
    %c0_170 = arith.constant 0 : index
    %c0_171 = arith.constant 0 : index
    %174 = vector.load %arg11[%c4_169, %c0_170, %c0_171] : memref<9x64x256xf32, #tpu.memory_space<vmem>>, vector<1x64x256xf32>
    %175 = vector.shape_cast %174 : vector<1x64x256xf32> to vector<64x256xf32>
    %cst_172 = arith.constant dense<0.000000e+00> : vector<1x256xf32>
    %176 = tpu.matmul %173, %175, %cst_172 {dimension_numbers = #tpu.dot_dimension_numbers<[1], [0], [0], [1], [0, 0, 1, 1], [], []>} : vector<1x64xf32>, vector<64x256xf32>, vector<1x256xf32> -> vector<1x256xf32>
    %177 = arith.addf %172, %176 : vector<1x256xf32>
    %178 = vector.extract_strided_slice %153 {offsets = [5, 0], sizes = [1, 64], strides = [1, 1]} : vector<9x64xf32> to vector<1x64xf32>
    %c5_173 = arith.constant 5 : index
    %c0_174 = arith.constant 0 : index
    %c0_175 = arith.constant 0 : index
    %179 = vector.load %arg11[%c5_173, %c0_174, %c0_175] : memref<9x64x256xf32, #tpu.memory_space<vmem>>, vector<1x64x256xf32>
    %180 = vector.shape_cast %179 : vector<1x64x256xf32> to vector<64x256xf32>
    %cst_176 = arith.constant dense<0.000000e+00> : vector<1x256xf32>
    %181 = tpu.matmul %178, %180, %cst_176 {dimension_numbers = #tpu.dot_dimension_numbers<[1], [0], [0], [1], [0, 0, 1, 1], [], []>} : vector<1x64xf32>, vector<64x256xf32>, vector<1x256xf32> -> vector<1x256xf32>
    %182 = arith.addf %177, %181 : vector<1x256xf32>
    %183 = vector.extract_strided_slice %153 {offsets = [6, 0], sizes = [1, 64], strides = [1, 1]} : vector<9x64xf32> to vector<1x64xf32>
    %c6_177 = arith.constant 6 : index
    %c0_178 = arith.constant 0 : index
    %c0_179 = arith.constant 0 : index
    %184 = vector.load %arg11[%c6_177, %c0_178, %c0_179] : memref<9x64x256xf32, #tpu.memory_space<vmem>>, vector<1x64x256xf32>
    %185 = vector.shape_cast %184 : vector<1x64x256xf32> to vector<64x256xf32>
    %cst_180 = arith.constant dense<0.000000e+00> : vector<1x256xf32>
    %186 = tpu.matmul %183, %185, %cst_180 {dimension_numbers = #tpu.dot_dimension_numbers<[1], [0], [0], [1], [0, 0, 1, 1], [], []>} : vector<1x64xf32>, vector<64x256xf32>, vector<1x256xf32> -> vector<1x256xf32>
    %187 = arith.addf %182, %186 : vector<1x256xf32>
    %188 = vector.extract_strided_slice %153 {offsets = [7, 0], sizes = [1, 64], strides = [1, 1]} : vector<9x64xf32> to vector<1x64xf32>
    %c7_181 = arith.constant 7 : index
    %c0_182 = arith.constant 0 : index
    %c0_183 = arith.constant 0 : index
    %189 = vector.load %arg11[%c7_181, %c0_182, %c0_183] : memref<9x64x256xf32, #tpu.memory_space<vmem>>, vector<1x64x256xf32>
    %190 = vector.shape_cast %189 : vector<1x64x256xf32> to vector<64x256xf32>
    %cst_184 = arith.constant dense<0.000000e+00> : vector<1x256xf32>
    %191 = tpu.matmul %188, %190, %cst_184 {dimension_numbers = #tpu.dot_dimension_numbers<[1], [0], [0], [1], [0, 0, 1, 1], [], []>} : vector<1x64xf32>, vector<64x256xf32>, vector<1x256xf32> -> vector<1x256xf32>
    %192 = arith.addf %187, %191 : vector<1x256xf32>
    %193 = vector.extract_strided_slice %153 {offsets = [8, 0], sizes = [1, 64], strides = [1, 1]} : vector<9x64xf32> to vector<1x64xf32>
    %c8_185 = arith.constant 8 : index
    %c0_186 = arith.constant 0 : index
    %c0_187 = arith.constant 0 : index
    %194 = vector.load %arg11[%c8_185, %c0_186, %c0_187] : memref<9x64x256xf32, #tpu.memory_space<vmem>>, vector<1x64x256xf32>
    %195 = vector.shape_cast %194 : vector<1x64x256xf32> to vector<64x256xf32>
    %cst_188 = arith.constant dense<0.000000e+00> : vector<1x256xf32>
    %196 = tpu.matmul %193, %195, %cst_188 {dimension_numbers = #tpu.dot_dimension_numbers<[1], [0], [0], [1], [0, 0, 1, 1], [], []>} : vector<1x64xf32>, vector<64x256xf32>, vector<1x256xf32> -> vector<1x256xf32>
    %197 = arith.addf %192, %196 : vector<1x256xf32>
    %c0_189 = arith.constant 0 : index
    %c0_190 = arith.constant 0 : index
    %198 = vector.load %arg13[%c0_189, %c0_190] : memref<1x1xf32, #tpu.memory_space<vmem>>, vector<1x1xf32>
    %199 = vector.broadcast %198 : vector<1x1xf32> to vector<1x256xf32>
    %200 = arith.addf %197, %199 : vector<1x256xf32>
    %201 = math.absf %200 : vector<1x256xf32>
    %cst_191 = arith.constant 0.000000e+00 : f32
    %202 = vector.broadcast %cst_191 : f32 to vector<1x256xf32>
    %203 = arith.subf %202, %201 : vector<1x256xf32>
    %204 = math.exp %203 : vector<1x256xf32>
    %cst_192 = arith.constant 1.000000e+00 : f32
    %205 = vector.broadcast %cst_192 : f32 to vector<1x256xf32>
    %206 = arith.addf %205, %204 : vector<1x256xf32>
    %207 = tpu.reciprocal %206 {approx = true} : vector<1x256xf32> -> vector<1x256xf32>
    %cst_193 = arith.constant 0.000000e+00 : f32
    %208 = vector.broadcast %cst_193 : f32 to vector<1x256xf32>
    %209 = arith.cmpf oge, %200, %208 : vector<1x256xf32>
    %210 = arith.mulf %204, %207 : vector<1x256xf32>
    %211 = arith.select %209, %207, %210 : vector<1x256xi1>, vector<1x256xf32>
    %c0_194 = arith.constant 0 : index
    %c0_195 = arith.constant 0 : index
    %c0_196 = arith.constant 0 : index
    %212 = vector.load %arg14[%c0_194, %c0_195, %c0_196] : memref<1x1x256xf32, #tpu.memory_space<vmem>>, vector<1x1x256xf32>
    %213 = vector.shape_cast %212 : vector<1x1x256xf32> to vector<1x256xf32>
    %214 = vector.shape_cast %211 : vector<1x256xf32> to vector<1x1x256xf32>
    tpu.vector_store %arg14[%c0_194, %c0_195, %c0_196], %214 {strides = array<i32>} : memref<1x1x256xf32, #tpu.memory_space<vmem>>, vector<1x1x256xf32>,
    return
  }
  func.func @transform_0(%arg0: i32) -> (i32, i32, i32) {
    %c0_i32 = arith.constant 0 : i32
    %c0_i32_0 = arith.constant 0 : i32
    %c0_i32_1 = arith.constant 0 : i32
    return %arg0, %c0_i32, %c0_i32_0 : i32, i32, i32
  }
  func.func @transform_1(%arg0: i32) -> (i32, i32) {
    %c0_i32 = arith.constant 0 : i32
    %c0_i32_0 = arith.constant 0 : i32
    %c0_i32_1 = arith.constant 0 : i32
    return %c0_i32, %c0_i32_0 : i32, i32
  }
  func.func @transform_2(%arg0: i32) -> (i32, i32, i32) {
    %c0_i32 = arith.constant 0 : i32
    %c0_i32_0 = arith.constant 0 : i32
    %c0_i32_1 = arith.constant 0 : i32
    %c0_i32_2 = arith.constant 0 : i32
    return %c0_i32, %c0_i32_0, %c0_i32_1 : i32, i32, i32
  }
  func.func @transform_3(%arg0: i32) -> (i32, i32) {
    %c0_i32 = arith.constant 0 : i32
    %c0_i32_0 = arith.constant 0 : i32
    %c0_i32_1 = arith.constant 0 : i32
    return %c0_i32, %c0_i32_0 : i32, i32
  }
  func.func @transform_4(%arg0: i32) -> (i32, i32) {
    %c0_i32 = arith.constant 0 : i32
    %c0_i32_0 = arith.constant 0 : i32
    %c0_i32_1 = arith.constant 0 : i32
    return %c0_i32, %c0_i32_0 : i32, i32
  }
  func.func @transform_5(%arg0: i32) -> (i32, i32, i32) {
    %c0_i32 = arith.constant 0 : i32
    %c0_i32_0 = arith.constant 0 : i32
    %c0_i32_1 = arith.constant 0 : i32
    %c0_i32_2 = arith.constant 0 : i32
    return %c0_i32, %c0_i32_0, %c0_i32_1 : i32, i32, i32
  }
  func.func @transform_6(%arg0: i32) -> (i32, i32) {
    %c0_i32 = arith.constant 0 : i32
    %c0_i32_0 = arith.constant 0 : i32
    %c0_i32_1 = arith.constant 0 : i32
    return %c0_i32, %c0_i32_0 : i32, i32
  }
  func.func @transform_7(%arg0: i32) -> (i32, i32) {
    %c0_i32 = arith.constant 0 : i32
    %c0_i32_0 = arith.constant 0 : i32
    %c0_i32_1 = arith.constant 0 : i32
    return %c0_i32, %c0_i32_0 : i32, i32
  }
  func.func @transform_8(%arg0: i32) -> (i32, i32, i32) {
    %c0_i32 = arith.constant 0 : i32
    %c0_i32_0 = arith.constant 0 : i32
    %c0_i32_1 = arith.constant 0 : i32
    %c0_i32_2 = arith.constant 0 : i32
    return %c0_i32, %c0_i32_0, %c0_i32_1 : i32, i32, i32
  }
  func.func @transform_9(%arg0: i32) -> (i32, i32) {
    %c0_i32 = arith.constant 0 : i32
    %c0_i32_0 = arith.constant 0 : i32
    %c0_i32_1 = arith.constant 0 : i32
    return %c0_i32, %c0_i32_0 : i32, i32
  }
  func.func @transform_10(%arg0: i32) -> (i32, i32, i32) {
    %c0_i32 = arith.constant 0 : i32
    %c0_i32_0 = arith.constant 0 : i32
    %c0_i32_1 = arith.constant 0 : i32
    %c0_i32_2 = arith.constant 0 : i32
    return %c0_i32, %c0_i32_0, %c0_i32_1 : i32, i32, i32
  }
  func.func @transform_11(%arg0: i32) -> (i32, i32) {
    %c0_i32 = arith.constant 0 : i32
    %c0_i32_0 = arith.constant 0 : i32
    %c0_i32_1 = arith.constant 0 : i32
    return %c0_i32, %c0_i32_0 : i32, i32
  }
  func.func @transform_12(%arg0: i32) -> (i32, i32) {
    %c0_i32 = arith.constant 0 : i32
    %c0_i32_0 = arith.constant 0 : i32
    %c0_i32_1 = arith.constant 0 : i32
    return %c0_i32, %c0_i32_0 : i32, i32
  }
  func.func @transform_13(%arg0: i32) -> (i32, i32, i32) {
    %c0_i32 = arith.constant 0 : i32
    %c0_i32_0 = arith.constant 0 : i32
    %c0_i32_1 = arith.constant 0 : i32
    return %arg0, %c0_i32, %c0_i32_0 : i32, i32, i32
  }
}

</mosaic_0001>

<bundles_post_ra>
// kernel: _lambda_.1
= control target key start
LH: loop header
LB: loop body
LE: loop exit
PB: predicated region body
PF: predicated region fallthrough
CT: control target
= control target key end

     0   :  { %s10754_s0 = inlined_call_operand.vmem [shape: f32[2,256,1], index: 0, kind: input, shape index: {}]   ;;  %s10755_s1 = inlined_call_operand.hbm [shape: f32[64,2304], index: 1, kind: input, shape index: {}]   ;;  %s10756_s2 = inlined_call_operand.vmem [shape: f32[9,1,64], index: 2, kind: input, shape index: {}]   ;;  %s10757_s3 = inlined_call_operand.vmem [shape: f32[1,64], index: 3, kind: input, shape index: {}]   ;;  %s10758_s4 = inlined_call_operand.vmem [shape: f32[16,576], index: 4, kind: input, shape index: {}]   ;;  %s10759_s5 = inlined_call_operand.hbm [shape: f32[9,64,128], index: 5, kind: input, shape index: {}]   ;;  %s10760_s6 = inlined_call_operand.vmem [shape: f32[1,128], index: 6, kind: input, shape index: {}]   ;;  %s10761_s7 = inlined_call_operand.vmem [shape: f32[64,144], index: 7, kind: input, shape index: {}]   ;;  %s10762_s8 = inlined_call_operand.hbm [shape: f32[9,128,64], index: 8, kind: input, shape index: {}]   ;;  %s10763_s9 = inlined_call_operand.vmem [shape: f32[1,64], index: 9, kind: input, shape index: {}]   ;;  %s10764_s10 = inlined_call_operand.hbm [shape: f32[9,64,256], index: 10, kind: input, shape index: {}]   ;;  %s10765_s11 = inlined_call_operand.vmem [shape: f32[9,64], index: 11, kind: input, shape index: {}]   ;;  %s10766_s12 = inlined_call_operand.<no memory space> [shape: f32[1,1], index: 12, kind: input, shape index: {}]   ;;  %s10767_s13 = inlined_call_operand.vmem [shape: f32[2,1,256], index: 13, kind: output, shape index: {}]  }
   0x1   :  { %10773 = sst [smem:[#allocation17_spill]] %s10759_s5  ;;  %v18_v0 = vstv %s10766_s12 }
   0x2   :  { %19 = vst [vmem:[#allocation5] sm:$0x1] %v18_v0 }
   0x3   :  { %20 = vsyncpa [#allocation7], 0 }
   0x4   :  { %21 = vsyncpa [#allocation9], 0 }
   0x5   :  { %22 = vsyncpa [#allocation12], 0  ;;  %s9244_s27 = smov 0  }
   0x6 LB: > { %10774 = sst [smem:[#allocation16_spill]] %s9155_s27  ;;  %s9157_s28 = smov [#allocation8]   ;;  %s9155_s27 = sphi %s9244_s27, %s28_s27  }
   0x7   : > { %s371_s29 = sshll.u32 %s9157_s28, 4  ;;  %s9250_s30 = sadd.s32 4294967295, %s9155_s27   ;;  %s9255_s29 = int_to_ptr.vmem [resolvable:$true] %s371_s29 }
   0x8   : > { %p6287_p0 = scmp.ge.s32.totalorder %s9155_s27, 1  ;;  %p337_p1 = scmp.lt.s32.totalorder %s9155_s27, 3 }
   0x9   : > { %p10771_p2 = scmp.eq.s32.totalorder %s9250_s30, 0  ;;  %s9158_s14 = smov [#allocation6]  }
   0xa   : > { %p9257_p3 = pnand %p6287_p0, %p337_p1  ;;  %s349_s15 = sshll.u32 %s9158_s14, 4  ;;  %s9263_s15 = int_to_ptr.vmem [resolvable:$true] %s349_s15 }
   0xb   : > { %s9159_s17 = smov [#allocation10]   ;;  %s10777_s5 = sld [smem:[#allocation17_spill]] }
   0xc   : > { %s10775_s12 = scalar_select %p9257_p3, 1, 0 }
   0xd   : > { %p8963_p4 = pneg %p9257_p3  ;;  %s9271_s18 = sshll.u32 %s9159_s17, 4  ;;  %s391_s18 = int_to_ptr.vmem [resolvable:$true] %s9271_s18 }
   0xf   : > { %p9267_p5 = pnand %p10771_p2, %p8963_p4 }
  0x11   : > { %s9025_s21 = scalar_lea.hbm %s10777_s5, 9216  ;;  %p9281_p7 = pneg %p9267_p5 }
  0x12   : > { %p9026_p6 = scmp.ne.s32.totalorder %s10777_s5, %s9025_s21  ;;  %p9032_p10 = scmp.lt.u32.totalorder %s9025_s21, %s10777_s5 }
  0x14   : > { %p9028_p8 = pnand %p9281_p7, %p9026_p6 }
  0x16   : > { %p9029_p9 = pneg %p9028_p8 }
  0x18   : > { %p9034_p11 = pnand %p9032_p10, %p9029_p9 }
  0x1a   : > { %9037 = shalt.err (!%p9034_p11)
}
  0x1b   : > { %s9038_s28 = scalar_lea.vmem %s9255_s29, 9216  ;;  %p9046_p1 = scmp.lt.s32.totalorder %s9255_s29, %s9255_s29 }
  0x1c   : > { %p9039_p12 = scmp.ne.s32.totalorder %s9255_s29, %s9038_s28  ;;  %p9047_p4 = scmp.lt.s32.totalorder %s9038_s28, %s9038_s28 }
  0x1e   : > { %p9041_p13 = pnand %p9039_p12, %p9281_p7  ;;  %p9048_p6 = por %p9047_p4, %p9046_p1 }
  0x20   : > { %p9042_p0 = pneg %p9041_p13 }
  0x22   : > { %p9049_p8 = pnand %p9048_p6, %p9042_p0 }
  0x24   : > { %9052 = shalt.err (!%p9049_p8)
}
  0x25   : > { %s10769_s14 = smov 128   ;;  %s10770_s17 = smov 8  }
  0x26   : > { %8969 = dma.hbm_to_vmem [thread:$0]  (!%p9267_p5), %s10777_s5, 9216, %s9255_s29, [#allocation9], %s10769_s14, %s10769_s14, %s10770_s17  }
  0x27   : > { %s9053_s23 = scalar_lea.hbm %s10755_s1, 18432 }
  0x28   : > { %p9054_p9 = scmp.ne.s32.totalorder %s10755_s1, %s9053_s23  ;;  %p9060_p12 = scmp.lt.u32.totalorder %s9053_s23, %s10755_s1 }
  0x2a   : > { %p9056_p10 = pnand %p9054_p9, %p9281_p7 }
  0x2c   : > { %p9057_p11 = pneg %p9056_p10 }
  0x2e   : > { %p9062_p13 = pnand %p9060_p12, %p9057_p11 }
  0x30   : > { %9065 = shalt.err (!%p9062_p13)
}
  0x31   : > { %s9066_s29 = scalar_lea.vmem %s9263_s15, 18432  ;;  %p9074_p6 = scmp.lt.s32.totalorder %s9263_s15, %s9263_s15 }
  0x32   : > { %p9067_p0 = scmp.ne.s32.totalorder %s9263_s15, %s9066_s29  ;;  %p9075_p8 = scmp.lt.s32.totalorder %s9066_s29, %s9066_s29 }
  0x34   : > { %p9069_p1 = pnand %p9067_p0, %p9281_p7  ;;  %p9076_p9 = por %p9075_p8, %p9074_p6 }
  0x36   : > { %p9070_p4 = pneg %p9069_p1 }
  0x38   : > { %p9077_p10 = pnand %p9076_p9, %p9070_p4 }
  0x3a   : > { %9080 = shalt.err (!%p9077_p10)
}
  0x3b   : > { %s9162_s19 = smov 2304   ;;  %s9163_s27 = smov 144  }
  0x3c   : > { %8966 = dma.hbm_to_vmem [thread:$0]  (!%p9267_p5), %s10755_s1, 18432, %s9263_s15, [#allocation7], %s9162_s19, %s9162_s19, %s9163_s27  }
  0x3d   : > { %s9164_s22 = smov [#allocation11]   ;;  %s9081_s28 = scalar_lea.hbm %s10762_s8, 18432 }
  0x3e   : > { %s406_s23 = sshll.u32 %s9164_s22, 4  ;;  %p9082_p11 = scmp.ne.s32.totalorder %s10762_s8, %s9081_s28  ;;  %s407_s23 = int_to_ptr.vmem [resolvable:$true] %s406_s23 }
  0x3f   : > { %p9088_p0 = scmp.lt.u32.totalorder %s9081_s28, %s10762_s8 }
  0x40   : > { %p9084_p12 = pnand %p9082_p11, %p9281_p7 }
  0x42   : > { %p9085_p13 = pneg %p9084_p12 }
  0x44   : > { %p9090_p1 = pnand %p9088_p0, %p9085_p13 }
  0x46   : > { %9093 = shalt.err (!%p9090_p1)
}
  0x47   : > { %s9094_s15 = scalar_lea.vmem %s391_s18, 18432  ;;  %p9102_p9 = scmp.lt.s32.totalorder %s391_s18, %s391_s18 }
  0x48   : > { %p9095_p4 = scmp.ne.s32.totalorder %s391_s18, %s9094_s15  ;;  %p9103_p10 = scmp.lt.s32.totalorder %s9094_s15, %s9094_s15 }
  0x4a   : > { %p9097_p6 = pnand %p9095_p4, %p9281_p7  ;;  %p9104_p2 = por %p9103_p10, %p9102_p9 }
  0x4c   : > { %p9098_p8 = pneg %p9097_p6 }
  0x4e   : > { %p9105_p3 = pnand %p9104_p2, %p9098_p8 }
  0x50   : > { %9108 = shalt.err (!%p9105_p3)
}
  0x51   : > { %s10779_s14 = smov 8   ;;  %s10780_s19 = smov 128  }
  0x52   : > { %8972 = dma.hbm_to_vmem [thread:$0]  (!%p9267_p5), %s10762_s8, 18432, %s391_s18, [#allocation9], %s10780_s19, %s10780_s19, %s10779_s14  }
  0x53   : > { %s9109_s21 = scalar_lea.hbm %s10764_s10, 18432 }
  0x54   : > { %p9110_p2 = scmp.ne.s32.totalorder %s10764_s10, %s9109_s21  ;;  %p9116_p12 = scmp.lt.u32.totalorder %s9109_s21, %s10764_s10 }
  0x56   : > { %p9112_p3 = pnand %p9110_p2, %p9281_p7 }
  0x58   : > { %p9113_p11 = pneg %p9112_p3 }
  0x5a   : > { %p9118_p13 = pnand %p9116_p12, %p9113_p11 }
  0x5c   : > { %9121 = shalt.err (!%p9118_p13)
}
  0x5d   : > { %s9122_s29 = scalar_lea.vmem %s407_s23, 18432  ;;  %p9130_p6 = scmp.lt.s32.totalorder %s407_s23, %s407_s23 }
  0x5e   : > { %p9123_p0 = scmp.ne.s32.totalorder %s407_s23, %s9122_s29  ;;  %p9131_p8 = scmp.lt.s32.totalorder %s9122_s29, %s9122_s29 }
  0x60   : > { %p9125_p1 = pnand %p9123_p0, %p9281_p7  ;;  %p9132_p9 = por %p9131_p8, %p9130_p6 }
  0x62   : > { %p9126_p4 = pneg %p9125_p1 }
  0x64   : > { %p9133_p10 = pnand %p9132_p9, %p9126_p4 }
  0x66   : > { %9136 = shalt.err (!%p9133_p10)
}
  0x67   : > { %s9165_s18 = smov 256   ;;  %s9166_s15 = smov 16  }
  0x68   : > { %8975 = dma.hbm_to_vmem [thread:$0]  (!%p9267_p5), %s10764_s10, 18432, %s407_s23, [#allocation12], %s9165_s18, %s9165_s18, %s9166_s15  }
  0x69   : > { %p10781_p2 = scmp.ne.s32.totalorder %s10775_s12, 0 }
  0x6a   : > { %p10782_p3 = scmp.eq.s32.totalorder (!%p10781_p2), %s9250_s30, 0 }
  0x6b   : > { %436 = sbr.rel (%p10781_p2) target bundleno = 2500 (0x9c4), region = 72 }
  0x72   : > { %9142 = dma.done.wait (%p10782_p3), [#allocation7], 18432   ;;  %p10783_p7 = pmov %p10782_p3 }
  0x73   : > { %p10784_p11 = pmov %p10782_p3 }
  0x74   : > { %9144 = vsyncadd (%p10783_p7), [#allocation7], 4294948864 }
  0x75   : > { %9146 = dma.done.wait (%p10784_p11), [#allocation9], 27648   ;;  %p10785_p12 = pmov %p10782_p3 }
  0x76   : > { %p10786_p13 = pmov %p10782_p3 }
  0x77   : > { %9148 = vsyncadd (%p10785_p12), [#allocation9], 4294939648 }
  0x78   : > { %9150 = dma.done.wait (%p10786_p13), [#allocation12], 18432   ;;  %p10787_p5 = pmov %p10782_p3 }
  0x79   : > { %p491_p0 = scmp.lt.s32.totalorder %s9250_s30, 1  ;;  %v9167_v1 = vmov 0   ;;  %v6138_v34 = vld [vmem:[#allocation5] sm:$0x1]  ;;  %v1341_v35 = vld [vmem:[#allocation6 + $0x8] sm:$0xff]  ;;  %vm731_vm0 = vcmask 523264  }
  0x7a   : > { %9152 = vsyncadd (%p10787_p5), [#allocation12], 4294948864  ;;  %9007 = vset.pattern.permute.xlu1 %v9167_v1  ;;  %9006 = vset.pattern.permute.xlu0 %v9167_v1  ;;  %v1343_v36 = vld [vmem:[#allocation6 + $0x18] sm:$0xff]  ;;  %v9427_v37 = vld [vmem:[%s10756_s2] ss:$0 sm:$0xff]  ;;  %vm5061_vm1 = vcmask 130048  }
  0x7b   : > { %s10792_s30 = smov (!%p491_p0, %s9250_s30), 1  ;;  %1843 = vmatprep.mubr.f32.mxu0 %v1341_v35  ;;  %1948 = vmatprep.mubr.f32.mxu1 %v1343_v36  ;;  %v9432_v38 = vld [vmem:[%s10756_s2 + $0x1] ss:$0 sm:$0xff]  ;;  %v9437_v39 = vld [vmem:[%s10756_s2 + $0x2] ss:$0 sm:$0xff]  ;;  %vm10692_vm2 = vmpackc.low %vm731_vm0, %vm731_vm0 }
  0x7c   : > { %s6424_s12 = sshll.u32 %s10792_s30, 8  ;;  %v9442_v40 = vld [vmem:[%s10756_s2 + $0x3] ss:$0 sm:$0xff]  ;;  %v9447_v41 = vld [vmem:[%s10756_s2 + $0x4] ss:$0 sm:$0xff]  ;;  %s6300_s28 = sshll.u32 %s10792_s30, 1 }
  0x7d   : > { %s9390_s23 = scalar_lea.vmem %s10754_s0, %s6424_s12  ;;  %v9452_v42 = vld [vmem:[%s10756_s2 + $0x5] ss:$0 sm:$0xff]  ;;  %v9457_v43 = vld [vmem:[%s10756_s2 + $0x6] ss:$0 sm:$0xff]  ;;  %v9462_v44 = vld [vmem:[%s10756_s2 + $0x7] ss:$0 sm:$0xff]  ;;  %s499_s15 = scalar_lea.vmem %s10767_s13, %s6300_s28 }
  0x7e   : > { %v516_v2 = vld [vmem:[%s9390_s23 + $0x80] sm:$0xff]  ;;  %v517_v4 = vld [vmem:[%s9390_s23 + $0x88] sm:$0xff]  ;;  %v518_v6 = vld [vmem:[%s9390_s23 + $0x90] sm:$0xff] }
  0x7f   : > { %v500_v3 = vld [vmem:[%s9390_s23] sm:$0xff]  ;;  %615 = vperm.xlu0 %9006, %v516_v2   ;;  %v501_v5 = vld [vmem:[%s9390_s23 + $0x8] sm:$0xff]  ;;  %v519_v7 = vld [vmem:[%s9390_s23 + $0x98] sm:$0xff] }
  0x80   : > { %535 = vperm.xlu1 %9007, %v500_v3   ;;  %v502_v8 = vld [vmem:[%s9390_s23 + $0x10] sm:$0xff]  ;;  %v503_v9 = vld [vmem:[%s9390_s23 + $0x18] sm:$0xff]  ;;  %v520_v10 = vld [vmem:[%s9390_s23 + $0xa0] sm:$0xff] }
  0x81   : > { %v521_v11 = vld [vmem:[%s9390_s23 + $0xa8] sm:$0xff]  ;;  %v504_v12 = vld [vmem:[%s9390_s23 + $0x20] sm:$0xff]  ;;  %v522_v14 = vld [vmem:[%s9390_s23 + $0xb0] sm:$0xff] }
  0x82   : > { %v505_v13 = vld [vmem:[%s9390_s23 + $0x28] sm:$0xff]  ;;  %v523_v15 = vld [vmem:[%s9390_s23 + $0xb8] sm:$0xff]  ;;  %v506_v16 = vld [vmem:[%s9390_s23 + $0x30] sm:$0xff] }
  0x83   : > { %620 = vperm.xlu0 %9006, %v517_v4   ;;  %v507_v17 = vld [vmem:[%s9390_s23 + $0x38] sm:$0xff]  ;;  %v524_v18 = vld [vmem:[%s9390_s23 + $0xc0] sm:$0xff]  ;;  %v525_v19 = vld [vmem:[%s9390_s23 + $0xc8] sm:$0xff] }
  0x84   : > { %540 = vperm.xlu1 %9007, %v501_v5   ;;  %v508_v20 = vld [vmem:[%s9390_s23 + $0x40] sm:$0xff]  ;;  %v509_v21 = vld [vmem:[%s9390_s23 + $0x48] sm:$0xff]  ;;  %v526_v22 = vld [vmem:[%s9390_s23 + $0xd0] sm:$0xff] }
  0x85   : > { %v527_v23 = vld [vmem:[%s9390_s23 + $0xd8] sm:$0xff]  ;;  %v510_v24 = vld [vmem:[%s9390_s23 + $0x50] sm:$0xff]  ;;  %v528_v26 = vld [vmem:[%s9390_s23 + $0xe0] sm:$0xff] }
  0x86   : > { %v511_v25 = vld [vmem:[%s9390_s23 + $0x58] sm:$0xff]  ;;  %v529_v27 = vld [vmem:[%s9390_s23 + $0xe8] sm:$0xff]  ;;  %v512_v28 = vld [vmem:[%s9390_s23 + $0x60] sm:$0xff] }
  0x87   : > { %625 = vperm.xlu0 %9006, %v518_v6   ;;  %v513_v29 = vld [vmem:[%s9390_s23 + $0x68] sm:$0xff]  ;;  %v530_v30 = vld [vmem:[%s9390_s23 + $0xf0] sm:$0xff]  ;;  %v531_v31 = vld [vmem:[%s9390_s23 + $0xf8] sm:$0xff] }
  0x88   : > { %630 = vperm.xlu1 %9007, %v519_v7   ;;  %v514_v32 = vld [vmem:[%s9390_s23 + $0x70] sm:$0xff]  ;;  %v515_v33 = vld [vmem:[%s9390_s23 + $0x78] sm:$0xff]  ;;  %v9467_v45 = vld [vmem:[%s10756_s2 + $0x8] ss:$0 sm:$0xff] }
  0x8b   : > { %545 = vperm.xlu0 %9006, %v502_v8  }
  0x8c   : > { %550 = vperm.xlu1 %9007, %v503_v9  }
  0x8f   : > { %635 = vperm.xlu0 %9006, %v520_v10  }
  0x90   : > { %640 = vperm.xlu1 %9007, %v521_v11  }
  0x93   : > { %555 = vperm.xlu0 %9006, %v504_v12  }
  0x94   : > { %560 = vperm.xlu1 %9007, %v505_v13  }
  0x97   : > { %645 = vperm.xlu0 %9006, %v522_v14  }
  0x98   : > { %650 = vperm.xlu1 %9007, %v523_v15  }
  0x9b   : > { %565 = vperm.xlu0 %9006, %v506_v16  }
  0x9c   : > { %570 = vperm.xlu1 %9007, %v507_v17  }
  0x9f   : > { %655 = vperm.xlu0 %9006, %v524_v18  }
  0xa0   : > { %660 = vperm.xlu1 %9007, %v525_v19  }
  0xa3   : > { %575 = vperm.xlu0 %9006, %v508_v20  }
  0xa4   : > { %580 = vperm.xlu1 %9007, %v509_v21  }
  0xa7   : > { %665 = vperm.xlu0 %9006, %v526_v22  }
  0xa8   : > { %670 = vperm.xlu1 %9007, %v527_v23  }
  0xab   : > { %585 = vperm.xlu0 %9006, %v510_v24  }
  0xac   : > { %590 = vperm.xlu1 %9007, %v511_v25  }
  0xaf   : > { %675 = vperm.xlu0 %9006, %v528_v26  }
  0xb0   : > { %680 = vperm.xlu1 %9007, %v529_v27  }
  0xb3   : > { %595 = vperm.xlu0 %9006, %v512_v28  }
  0xb4   : > { %600 = vperm.xlu1 %9007, %v513_v29  }
  0xb7   : > { %685 = vperm.xlu0 %9006, %v530_v30  }
  0xb8   : > { %690 = vperm.xlu1 %9007, %v531_v31  }
  0xbb   : > { %605 = vperm.xlu0 %9006, %v514_v32  }
  0xbc   : > { %610 = vperm.xlu1 %9007, %v515_v33  }
  0xbf   : > { %6141 = vperm.xlu0 %9006, %v6138_v34  }
  0xfe   : > { %v616_v46 = vpop.permute.xlu0 %615 }
  0xff   : > { %v536_v47 = vpop.permute.xlu1 %535  ;;  %v715_v48 = vmul.f32 %v9427_v37, %v616_v46  ;;  %v788_v49 = vmul.f32 %v9432_v38, %v616_v46  ;;  %v860_v50 = vmul.f32 %v9437_v39, %v616_v46  ;;  %v932_v51 = vmul.f32 %v9442_v40, %v616_v46 }
 0x100   : > { %v1004_v52 = vmul.f32 %v9447_v41, %v616_v46  ;;  %v1076_v53 = vmul.f32 %v9452_v42, %v616_v46  ;;  %v1148_v54 = vmul.f32 %v9457_v43, %v616_v46  ;;  %v1220_v55 = vmul.f32 %v9462_v44, %v616_v46 }
 0x101   : > { %748 = vst.msk [vmem:[#allocation2 + $0x80] sm:$0xff] %vm731_vm0, %v715_v48  ;;  %820 = vst.msk [vmem:[#allocation2 + $0x180] sm:$0xff] %vm731_vm0, %v788_v49  ;;  %v1292_v56 = vmul.f32 %v9467_v45, %v616_v46  ;;  %v699_v57 = vmul.f32 %v9427_v37, %v536_v47  ;;  %v772_v58 = vmul.f32 %v9432_v38, %v536_v47 }
 0x102   : > { %892 = vst.msk [vmem:[#allocation2 + $0x280] sm:$0xff] %vm731_vm0, %v860_v50  ;;  %964 = vst.msk [vmem:[#allocation2 + $0x380] sm:$0xff] %vm731_vm0, %v932_v51  ;;  %v844_v59 = vmul.f32 %v9437_v39, %v536_v47  ;;  %v916_v60 = vmul.f32 %v9442_v40, %v536_v47  ;;  %v988_v61 = vmul.f32 %v9447_v41, %v536_v47  ;;  %v621_v0 = vpop.permute.xlu0 %620 }
 0x103   : > { %1036 = vst.msk [vmem:[#allocation2 + $0x480] sm:$0xff] %vm731_vm0, %v1004_v52  ;;  %1108 = vst.msk [vmem:[#allocation2 + $0x580] sm:$0xff] %vm731_vm0, %v1076_v53  ;;  %v1060_v62 = vmul.f32 %v9452_v42, %v536_v47  ;;  %v1132_v63 = vmul.f32 %v9457_v43, %v536_v47  ;;  %v541_v1 = vpop.permute.xlu1 %540  ;;  %v1204_v2 = vmul.f32 %v9462_v44, %v536_v47 }
 0x104   : > { %1180 = vst.msk [vmem:[#allocation2 + $0x680] sm:$0xff] %vm731_vm0, %v1148_v54  ;;  %1252 = vst.msk [vmem:[#allocation2 + $0x780] sm:$0xff] %vm731_vm0, %v1220_v55  ;;  %v1276_v3 = vmul.f32 %v9467_v45, %v536_v47  ;;  %v716_v4 = vmul.f32 %v9427_v37, %v621_v0  ;;  %v789_v5 = vmul.f32 %v9432_v38, %v621_v0 }
 0x105   : > { %1324 = vst.msk [vmem:[#allocation2 + $0x880] sm:$0xff] %vm731_vm0, %v1292_v56  ;;  %732 = vst.msk [vmem:[#allocation2] sm:$0xff] %vm731_vm0, %v699_v57  ;;  %v861_v6 = vmul.f32 %v9437_v39, %v621_v0  ;;  %v933_v7 = vmul.f32 %v9442_v40, %v621_v0  ;;  %v1005_v8 = vmul.f32 %v9447_v41, %v621_v0 }
 0x106   : > { %804 = vst.msk [vmem:[#allocation2 + $0x100] sm:$0xff] %vm731_vm0, %v772_v58  ;;  %876 = vst.msk [vmem:[#allocation2 + $0x200] sm:$0xff] %vm731_vm0, %v844_v59  ;;  %v1077_v9 = vmul.f32 %v9452_v42, %v621_v0  ;;  %v1149_v10 = vmul.f32 %v9457_v43, %v621_v0  ;;  %v1221_v11 = vmul.f32 %v9462_v44, %v621_v0  ;;  %v626_v18 = vpop.permute.xlu0 %625 }
 0x107   : > { %948 = vst.msk [vmem:[#allocation2 + $0x300] sm:$0xff] %vm731_vm0, %v916_v60  ;;  %1020 = vst.msk [vmem:[#allocation2 + $0x400] sm:$0xff] %vm731_vm0, %v988_v61  ;;  %v1293_v12 = vmul.f32 %v9467_v45, %v621_v0  ;;  %v700_v13 = vmul.f32 %v9427_v37, %v541_v1  ;;  %v773_v14 = vmul.f32 %v9432_v38, %v541_v1  ;;  %v631_v19 = vpop.permute.xlu1 %630 }
 0x108   : > { %1092 = vst.msk [vmem:[#allocation2 + $0x500] sm:$0xff] %vm731_vm0, %v1060_v62  ;;  %1164 = vst.msk [vmem:[#allocation2 + $0x600] sm:$0xff] %vm731_vm0, %v1132_v63  ;;  %v845_v15 = vmul.f32 %v9437_v39, %v541_v1  ;;  %v917_v16 = vmul.f32 %v9442_v40, %v541_v1  ;;  %v989_v17 = vmul.f32 %v9447_v41, %v541_v1 }
 0x109   : > { %1236 = vst.msk [vmem:[#allocation2 + $0x700] sm:$0xff] %vm731_vm0, %v1204_v2  ;;  %1308 = vst.msk [vmem:[#allocation2 + $0x800] sm:$0xff] %vm731_vm0, %v1276_v3  ;;  %v1061_v20 = vmul.f32 %v9452_v42, %v541_v1  ;;  %v1133_v21 = vmul.f32 %v9457_v43, %v541_v1  ;;  %v1205_v22 = vmul.f32 %v9462_v44, %v541_v1 }
 0x10a   : > { %749 = vst.msk [vmem:[#allocation2 + $0x88] sm:$0xff] %vm731_vm0, %v716_v4  ;;  %821 = vst.msk [vmem:[#allocation2 + $0x188] sm:$0xff] %vm731_vm0, %v789_v5  ;;  %v1277_v23 = vmul.f32 %v9467_v45, %v541_v1  ;;  %v717_v24 = vmul.f32 %v9427_v37, %v626_v18  ;;  %v790_v25 = vmul.f32 %v9432_v38, %v626_v18  ;;  %v546_v36 = vpop.permute.xlu0 %545 }
 0x10b   : > { %893 = vst.msk [vmem:[#allocation2 + $0x288] sm:$0xff] %vm731_vm0, %v861_v6  ;;  %965 = vst.msk [vmem:[#allocation2 + $0x388] sm:$0xff] %vm731_vm0, %v933_v7  ;;  %v862_v26 = vmul.f32 %v9437_v39, %v626_v18  ;;  %v934_v27 = vmul.f32 %v9442_v40, %v626_v18  ;;  %v1006_v28 = vmul.f32 %v9447_v41, %v626_v18  ;;  %v551_v46 = vpop.permute.xlu1 %550 }
 0x10c   : > { %1037 = vst.msk [vmem:[#allocation2 + $0x488] sm:$0xff] %vm731_vm0, %v1005_v8  ;;  %1109 = vst.msk [vmem:[#allocation2 + $0x588] sm:$0xff] %vm731_vm0, %v1077_v9  ;;  %v1078_v29 = vmul.f32 %v9452_v42, %v626_v18  ;;  %v1150_v30 = vmul.f32 %v9457_v43, %v626_v18  ;;  %v1222_v31 = vmul.f32 %v9462_v44, %v626_v18 }
 0x10d   : > { %1181 = vst.msk [vmem:[#allocation2 + $0x688] sm:$0xff] %vm731_vm0, %v1149_v10  ;;  %1253 = vst.msk [vmem:[#allocation2 + $0x788] sm:$0xff] %vm731_vm0, %v1221_v11  ;;  %v1294_v32 = vmul.f32 %v9467_v45, %v626_v18  ;;  %v718_v33 = vmul.f32 %v9427_v37, %v631_v19  ;;  %v791_v34 = vmul.f32 %v9432_v38, %v631_v19 }
 0x10e   : > { %1325 = vst.msk [vmem:[#allocation2 + $0x888] sm:$0xff] %vm731_vm0, %v1293_v12  ;;  %733 = vst.msk [vmem:[#allocation2 + $0x8] sm:$0xff] %vm731_vm0, %v700_v13  ;;  %v863_v35 = vmul.f32 %v9437_v39, %v631_v19  ;;  %v935_v47 = vmul.f32 %v9442_v40, %v631_v19  ;;  %v1007_v48 = vmul.f32 %v9447_v41, %v631_v19  ;;  %v636_v63 = vpop.permute.xlu0 %635 }
 0x10f   : > { %805 = vst.msk [vmem:[#allocation2 + $0x108] sm:$0xff] %vm731_vm0, %v773_v14  ;;  %877 = vst.msk [vmem:[#allocation2 + $0x208] sm:$0xff] %vm731_vm0, %v845_v15  ;;  %v1079_v49 = vmul.f32 %v9452_v42, %v631_v19  ;;  %v1151_v50 = vmul.f32 %v9457_v43, %v631_v19  ;;  %v1223_v51 = vmul.f32 %v9462_v44, %v631_v19  ;;  %v641_v0 = vpop.permute.xlu1 %640 }
 0x110   : > { %949 = vst.msk [vmem:[#allocation2 + $0x308] sm:$0xff] %vm731_vm0, %v917_v16  ;;  %1021 = vst.msk [vmem:[#allocation2 + $0x408] sm:$0xff] %vm731_vm0, %v989_v17  ;;  %v1295_v52 = vmul.f32 %v9467_v45, %v631_v19  ;;  %v701_v53 = vmul.f32 %v9427_v37, %v546_v36  ;;  %v774_v54 = vmul.f32 %v9432_v38, %v546_v36 }
 0x111   : > { %1093 = vst.msk [vmem:[#allocation2 + $0x508] sm:$0xff] %vm731_vm0, %v1061_v20  ;;  %1165 = vst.msk [vmem:[#allocation2 + $0x608] sm:$0xff] %vm731_vm0, %v1133_v21  ;;  %v846_v55 = vmul.f32 %v9437_v39, %v546_v36  ;;  %v918_v56 = vmul.f32 %v9442_v40, %v546_v36  ;;  %v990_v57 = vmul.f32 %v9447_v41, %v546_v36  ;;  %v1501_v17 = vld [vmem:[#allocation2 + $0x88] sm:$0xff] }
 0x112   : > { %1237 = vst.msk [vmem:[#allocation2 + $0x708] sm:$0xff] %vm731_vm0, %v1205_v22  ;;  %1309 = vst.msk [vmem:[#allocation2 + $0x808] sm:$0xff] %vm731_vm0, %v1277_v23  ;;  %v1062_v58 = vmul.f32 %v9452_v42, %v546_v36  ;;  %v1134_v59 = vmul.f32 %v9457_v43, %v546_v36  ;;  %v1206_v60 = vmul.f32 %v9462_v44, %v546_v36  ;;  %v1533_v18 = vld [vmem:[#allocation2 + $0x188] sm:$0xff]  ;;  %v9621_v19 = vpop.permute.xlu0 %555 }
 0x113   : > { %750 = vst.msk [vmem:[#allocation2 + $0x90] sm:$0xff] %vm731_vm0, %v717_v24  ;;  %822 = vst.msk [vmem:[#allocation2 + $0x190] sm:$0xff] %vm731_vm0, %v790_v25  ;;  %v1278_v61 = vmul.f32 %v9467_v45, %v546_v36  ;;  %v702_v62 = vmul.f32 %v9427_v37, %v551_v46  ;;  %v775_v1 = vmul.f32 %v9432_v38, %v551_v46  ;;  %v9623_v20 = vpop.permute.xlu1 %560 }
 0x114   : > { %894 = vst.msk [vmem:[#allocation2 + $0x290] sm:$0xff] %vm731_vm0, %v862_v26  ;;  %966 = vst.msk [vmem:[#allocation2 + $0x390] sm:$0xff] %vm731_vm0, %v934_v27  ;;  %v847_v2 = vmul.f32 %v9437_v39, %v551_v46  ;;  %v919_v3 = vmul.f32 %v9442_v40, %v551_v46  ;;  %v991_v4 = vmul.f32 %v9447_v41, %v551_v46 }
 0x115   : > { %1038 = vst.msk [vmem:[#allocation2 + $0x490] sm:$0xff] %vm731_vm0, %v1006_v28  ;;  %1110 = vst.msk [vmem:[#allocation2 + $0x590] sm:$0xff] %vm731_vm0, %v1078_v29  ;;  %v1063_v5 = vmul.f32 %v9452_v42, %v551_v46  ;;  %v1135_v6 = vmul.f32 %v9457_v43, %v551_v46  ;;  %v1207_v7 = vmul.f32 %v9462_v44, %v551_v46  ;;  %v1485_v25 = vld [vmem:[#allocation2 + $0x8] sm:$0xff] }
 0x116   : > { %1182 = vst.msk [vmem:[#allocation2 + $0x690] sm:$0xff] %vm731_vm0, %v1150_v30  ;;  %1254 = vst.msk [vmem:[#allocation2 + $0x790] sm:$0xff] %vm731_vm0, %v1222_v31  ;;  %v1279_v8 = vmul.f32 %v9467_v45, %v551_v46  ;;  %v719_v9 = vmul.f32 %v9427_v37, %v636_v63  ;;  %v792_v10 = vmul.f32 %v9432_v38, %v636_v63  ;;  %v1517_v26 = vld [vmem:[#allocation2 + $0x108] sm:$0xff]  ;;  %v1500_v31 = vld [vmem:[#allocation2 + $0x80] sm:$0xff] }
 0x117   : > { %1326 = vst.msk [vmem:[#allocation2 + $0x890] sm:$0xff] %vm731_vm0, %v1294_v32  ;;  %751 = vst.msk [vmem:[#allocation2 + $0x98] sm:$0xff] %vm731_vm0, %v718_v33  ;;  %v864_v11 = vmul.f32 %v9437_v39, %v636_v63  ;;  %v936_v12 = vmul.f32 %v9442_v40, %v636_v63  ;;  %v1008_v13 = vmul.f32 %v9447_v41, %v636_v63  ;;  %v1532_v32 = vld [vmem:[#allocation2 + $0x180] sm:$0xff] }
 0x118   : > { %823 = vst.msk [vmem:[#allocation2 + $0x198] sm:$0xff] %vm731_vm0, %v791_v34  ;;  %895 = vst.msk [vmem:[#allocation2 + $0x298] sm:$0xff] %vm731_vm0, %v863_v35  ;;  %v1080_v14 = vmul.f32 %v9452_v42, %v636_v63  ;;  %v1152_v15 = vmul.f32 %v9457_v43, %v636_v63  ;;  %v1224_v16 = vmul.f32 %v9462_v44, %v636_v63  ;;  %v1484_v46 = vld [vmem:[#allocation2] sm:$0xff] }
 0x119   : > { %967 = vst.msk [vmem:[#allocation2 + $0x398] sm:$0xff] %vm731_vm0, %v935_v47  ;;  %1039 = vst.msk [vmem:[#allocation2 + $0x498] sm:$0xff] %vm731_vm0, %v1007_v48  ;;  %v1296_v21 = vmul.f32 %v9467_v45, %v636_v63  ;;  %v720_v22 = vmul.f32 %v9427_v37, %v641_v0  ;;  %v793_v23 = vmul.f32 %v9432_v38, %v641_v0  ;;  %v1516_v47 = vld [vmem:[#allocation2 + $0x100] sm:$0xff] }
 0x11a   : > { %1111 = vst.msk [vmem:[#allocation2 + $0x598] sm:$0xff] %vm731_vm0, %v1079_v49  ;;  %1183 = vst.msk [vmem:[#allocation2 + $0x698] sm:$0xff] %vm731_vm0, %v1151_v50  ;;  %v865_v24 = vmul.f32 %v9437_v39, %v641_v0  ;;  %v937_v27 = vmul.f32 %v9442_v40, %v641_v0  ;;  %v1009_v28 = vmul.f32 %v9447_v41, %v641_v0 }
 0x11b   : > { %1255 = vst.msk [vmem:[#allocation2 + $0x798] sm:$0xff] %vm731_vm0, %v1223_v51  ;;  %1327 = vst.msk [vmem:[#allocation2 + $0x898] sm:$0xff] %vm731_vm0, %v1295_v52  ;;  %v1081_v29 = vmul.f32 %v9452_v42, %v641_v0  ;;  %v1153_v30 = vmul.f32 %v9457_v43, %v641_v0  ;;  %v1225_v33 = vmul.f32 %v9462_v44, %v641_v0  ;;  %v9655_v52 = vpop.permute.xlu0 %645 }
 0x11c   : > { %734 = vst.msk [vmem:[#allocation2 + $0x10] sm:$0xff] %vm731_vm0, %v701_v53  ;;  %806 = vst.msk [vmem:[#allocation2 + $0x110] sm:$0xff] %vm731_vm0, %v774_v54  ;;  %v1297_v34 = vmul.f32 %v9467_v45, %v641_v0  ;;  %v7936_v35 = vpack.c.bf16 %v1501_v17, %v1500_v31  ;;  %v7968_v36 = vpack.c.bf16 %v1533_v18, %v1532_v32  ;;  %v9657_v53 = vpop.permute.xlu1 %650 }
 0x11d   : > { %878 = vst.msk [vmem:[#allocation2 + $0x210] sm:$0xff] %vm731_vm0, %v846_v55  ;;  %950 = vst.msk [vmem:[#allocation2 + $0x310] sm:$0xff] %vm731_vm0, %v918_v56  ;;  %v7938_v48 = vpack.c.bf16 %v1485_v25, %v1484_v46  ;;  %v7970_v49 = vpack.c.bf16 %v1517_v26, %v1516_v47  ;;  %v703_v50 = vmul.f32 %v9427_v37, %v9621_v19 }
 0x11e   : > { %1022 = vst.msk [vmem:[#allocation2 + $0x410] sm:$0xff] %vm731_vm0, %v990_v57  ;;  %1094 = vst.msk [vmem:[#allocation2 + $0x510] sm:$0xff] %vm731_vm0, %v1062_v58  ;;  %v776_v51 = vmul.f32 %v9432_v38, %v9621_v19  ;;  %7937 = vmatprep.subr.bf16.mxu0 %v7936_v35  ;;  %7969 = vmatprep.subr.bf16.mxu1 %v7968_v36  ;;  %v848_v54 = vmul.f32 %v9437_v39, %v9621_v19  ;;  %v1502_v57 = vld [vmem:[#allocation2 + $0x90] sm:$0xff] }
 0x11f   : > { %1166 = vst.msk [vmem:[#allocation2 + $0x610] sm:$0xff] %vm731_vm0, %v1134_v59  ;;  %1238 = vst.msk [vmem:[#allocation2 + $0x710] sm:$0xff] %vm731_vm0, %v1206_v60  ;;  %v920_v55 = vmul.f32 %v9442_v40, %v9621_v19  ;;  %v992_v56 = vmul.f32 %v9447_v41, %v9621_v19  ;;  %7939 = vmatpush3.bf16.msra.mxu0 %v7938_v48  ;;  %7971 = vmatpush3.bf16.msra.mxu1 %v7970_v49  ;;  %v1535_v63 = vld [vmem:[#allocation2 + $0x198] sm:$0xff] }
 0x120   : > { %1310 = vst.msk [vmem:[#allocation2 + $0x810] sm:$0xff] %vm731_vm0, %v1278_v61  ;;  %735 = vst.msk [vmem:[#allocation2 + $0x18] sm:$0xff] %vm731_vm0, %v702_v62  ;;  %v1064_v58 = vmul.f32 %v9452_v42, %v9621_v19  ;;  %v1136_v59 = vmul.f32 %v9457_v43, %v9621_v19  ;;  %v1208_v60 = vmul.f32 %v9462_v44, %v9621_v19  ;;  %v1503_v61 = vld [vmem:[#allocation2 + $0x98] sm:$0xff]  ;;  %v1534_v62 = vld [vmem:[#allocation2 + $0x190] sm:$0xff] }
 0x121   : > { %807 = vst.msk [vmem:[#allocation2 + $0x118] sm:$0xff] %vm731_vm0, %v775_v1  ;;  %879 = vst.msk [vmem:[#allocation2 + $0x218] sm:$0xff] %vm731_vm0, %v847_v2  ;;  %v1280_v0 = vmul.f32 %v9467_v45, %v9621_v19  ;;  %v704_v1 = vmul.f32 %v9427_v37, %v9623_v20  ;;  %v777_v2 = vmul.f32 %v9432_v38, %v9623_v20 }
 0x122   : > { %951 = vst.msk [vmem:[#allocation2 + $0x318] sm:$0xff] %vm731_vm0, %v919_v3  ;;  %1023 = vst.msk [vmem:[#allocation2 + $0x418] sm:$0xff] %vm731_vm0, %v991_v4  ;;  %v849_v3 = vmul.f32 %v9437_v39, %v9623_v20  ;;  %v921_v4 = vmul.f32 %v9442_v40, %v9623_v20  ;;  %v938_v17 = vmul.f32 %v9442_v40, %v9655_v52 }
 0x123   : > { %1095 = vst.msk [vmem:[#allocation2 + $0x518] sm:$0xff] %vm731_vm0, %v1063_v5  ;;  %1167 = vst.msk [vmem:[#allocation2 + $0x618] sm:$0xff] %vm731_vm0, %v1135_v6  ;;  %v993_v5 = vmul.f32 %v9447_v41, %v9623_v20  ;;  %v1065_v6 = vmul.f32 %v9452_v42, %v9623_v20  ;;  %v1010_v18 = vmul.f32 %v9447_v41, %v9655_v52 }
 0x124   : > { %1239 = vst.msk [vmem:[#allocation2 + $0x718] sm:$0xff] %vm731_vm0, %v1207_v7  ;;  %1311 = vst.msk [vmem:[#allocation2 + $0x818] sm:$0xff] %vm731_vm0, %v1279_v8  ;;  %v1137_v7 = vmul.f32 %v9457_v43, %v9623_v20  ;;  %v9697_v8 = vpop.permute.xlu0 %565  ;;  %v1082_v19 = vmul.f32 %v9452_v42, %v9655_v52  ;;  %v722_v25 = vmul.f32 %v9427_v37, %v9657_v53 }
 0x125   : > { %752 = vst.msk [vmem:[#allocation2 + $0xa0] sm:$0xff] %vm731_vm0, %v719_v9  ;;  %824 = vst.msk [vmem:[#allocation2 + $0x1a0] sm:$0xff] %vm731_vm0, %v792_v10  ;;  %v9699_v9 = vpop.permute.xlu1 %570  ;;  %v1209_v10 = vmul.f32 %v9462_v44, %v9623_v20  ;;  %v795_v26 = vmul.f32 %v9432_v38, %v9657_v53  ;;  %v867_v31 = vmul.f32 %v9437_v39, %v9657_v53 }
 0x126   : > { %896 = vst.msk [vmem:[#allocation2 + $0x2a0] sm:$0xff] %vm731_vm0, %v864_v11  ;;  %968 = vst.msk [vmem:[#allocation2 + $0x3a0] sm:$0xff] %vm731_vm0, %v936_v12  ;;  %v1281_v11 = vmul.f32 %v9467_v45, %v9623_v20  ;;  %v7940_v12 = vpack.c.bf16 %v1503_v61, %v1502_v57  ;;  %v1154_v20 = vmul.f32 %v9457_v43, %v9655_v52 }
 0x127   : > { %1040 = vst.msk [vmem:[#allocation2 + $0x4a0] sm:$0xff] %vm731_vm0, %v1008_v13  ;;  %1112 = vst.msk [vmem:[#allocation2 + $0x5a0] sm:$0xff] %vm731_vm0, %v1080_v14  ;;  %v7972_v13 = vpack.c.bf16 %v1535_v63, %v1534_v62  ;;  %v721_v14 = vmul.f32 %v9427_v37, %v9655_v52  ;;  %v939_v32 = vmul.f32 %v9442_v40, %v9657_v53 }
 0x128   : > { %1184 = vst.msk [vmem:[#allocation2 + $0x6a0] sm:$0xff] %vm731_vm0, %v1152_v15  ;;  %1256 = vst.msk [vmem:[#allocation2 + $0x7a0] sm:$0xff] %vm731_vm0, %v1224_v16  ;;  %v794_v15 = vmul.f32 %v9432_v38, %v9655_v52  ;;  %v866_v16 = vmul.f32 %v9437_v39, %v9655_v52  ;;  %7941 = vmatprep.subr.bf16.mxu0 %v7940_v12  ;;  %v1155_v35 = vmul.f32 %v9457_v43, %v9657_v53 }
 0x129   : > { %1328 = vst.msk [vmem:[#allocation2 + $0x8a0] sm:$0xff] %vm731_vm0, %v1296_v21  ;;  %753 = vst.msk [vmem:[#allocation2 + $0xa8] sm:$0xff] %vm731_vm0, %v720_v22  ;;  %7973 = vmatprep.subr.bf16.mxu1 %v7972_v13  ;;  %v1486_v21 = vld [vmem:[#allocation2 + $0x10] sm:$0xff]  ;;  %v1487_v22 = vld [vmem:[#allocation2 + $0x18] sm:$0xff]  ;;  %v1227_v36 = vmul.f32 %v9462_v44, %v9657_v53  ;;  %v1299_v46 = vmul.f32 %v9467_v45, %v9657_v53  ;;  %v705_v49 = vmul.f32 %v9427_v37, %v9697_v8 }
 0x12a   : > { %825 = vst.msk [vmem:[#allocation2 + $0x1a8] sm:$0xff] %vm731_vm0, %v793_v23  ;;  %897 = vst.msk [vmem:[#allocation2 + $0x2a8] sm:$0xff] %vm731_vm0, %v865_v24  ;;  %v1226_v23 = vmul.f32 %v9462_v44, %v9655_v52  ;;  %v1298_v24 = vmul.f32 %v9467_v45, %v9655_v52  ;;  %v7942_v47 = vpack.c.bf16 %v1487_v22, %v1486_v21 }
 0x12b   : > { %969 = vst.msk [vmem:[#allocation2 + $0x3a8] sm:$0xff] %vm731_vm0, %v937_v27  ;;  %1041 = vst.msk [vmem:[#allocation2 + $0x4a8] sm:$0xff] %vm731_vm0, %v1009_v28  ;;  %v1518_v27 = vld [vmem:[#allocation2 + $0x110] sm:$0xff]  ;;  %v1519_v28 = vld [vmem:[#allocation2 + $0x118] sm:$0xff]  ;;  %v922_v52 = vmul.f32 %v9442_v40, %v9697_v8  ;;  %v706_v61 = vmul.f32 %v9427_v37, %v9699_v9  ;;  %v779_v62 = vmul.f32 %v9432_v38, %v9699_v9 }
 0x12c   : > { %1113 = vst.msk [vmem:[#allocation2 + $0x5a8] sm:$0xff] %vm731_vm0, %v1081_v29  ;;  %1185 = vst.msk [vmem:[#allocation2 + $0x6a8] sm:$0xff] %vm731_vm0, %v1153_v30  ;;  %v9741_v29 = vpop.permute.xlu0 %655  ;;  %v9743_v30 = vpop.permute.xlu1 %660  ;;  %v7974_v48 = vpack.c.bf16 %v1519_v28, %v1518_v27  ;;  %7943 = vmatpush3.bf16.msra.mxu0 %v7942_v47  ;;  %v1536_v63 = vld [vmem:[#allocation2 + $0x1a0] sm:$0xff] }
 0x12d   : > { %1257 = vst.msk [vmem:[#allocation2 + $0x7a8] sm:$0xff] %vm731_vm0, %v1225_v33  ;;  %1329 = vst.msk [vmem:[#allocation2 + $0x8a8] sm:$0xff] %vm731_vm0, %v1297_v34  ;;  %v1011_v33 = vmul.f32 %v9447_v41, %v9657_v53  ;;  %v1083_v34 = vmul.f32 %v9452_v42, %v9657_v53  ;;  %v994_v53 = vmul.f32 %v9447_v41, %v9697_v8 }
 0x12e   : > { %736 = vst.msk [vmem:[#allocation2 + $0x20] sm:$0xff] %vm731_vm0, %v703_v50  ;;  %808 = vst.msk [vmem:[#allocation2 + $0x120] sm:$0xff] %vm731_vm0, %v776_v51  ;;  %v778_v50 = vmul.f32 %v9432_v38, %v9697_v8  ;;  %v850_v51 = vmul.f32 %v9437_v39, %v9697_v8  ;;  %7975 = vmatpush3.bf16.msra.mxu1 %v7974_v48  ;;  %v723_v12 = vmul.f32 %v9427_v37, %v9741_v29 }
 0x12f   : > { %880 = vst.msk [vmem:[#allocation2 + $0x220] sm:$0xff] %vm731_vm0, %v848_v54  ;;  %952 = vst.msk [vmem:[#allocation2 + $0x320] sm:$0xff] %vm731_vm0, %v920_v55  ;;  %v1066_v54 = vmul.f32 %v9452_v42, %v9697_v8  ;;  %v1138_v55 = vmul.f32 %v9457_v43, %v9697_v8  ;;  %v796_v13 = vmul.f32 %v9432_v38, %v9741_v29 }
 0x130   : > { %1024 = vst.msk [vmem:[#allocation2 + $0x420] sm:$0xff] %vm731_vm0, %v992_v56  ;;  %1096 = vst.msk [vmem:[#allocation2 + $0x520] sm:$0xff] %vm731_vm0, %v1064_v58  ;;  %v1504_v56 = vld [vmem:[#allocation2 + $0xa0] sm:$0xff]  ;;  %v1505_v57 = vld [vmem:[#allocation2 + $0xa8] sm:$0xff]  ;;  %v9787_v58 = vpop.permute.xlu0 %575  ;;  %v1300_v21 = vmul.f32 %v9467_v45, %v9741_v29  ;;  %v724_v22 = vmul.f32 %v9427_v37, %v9743_v30  ;;  %v869_v27 = vmul.f32 %v9437_v39, %v9743_v30 }
 0x131   : > { %1168 = vst.msk [vmem:[#allocation2 + $0x620] sm:$0xff] %vm731_vm0, %v1136_v59  ;;  %1240 = vst.msk [vmem:[#allocation2 + $0x720] sm:$0xff] %vm731_vm0, %v1208_v60  ;;  %v1210_v59 = vmul.f32 %v9462_v44, %v9697_v8  ;;  %v1282_v60 = vmul.f32 %v9467_v45, %v9697_v8  ;;  %v1283_v8 = vmul.f32 %v9467_v45, %v9699_v9 }
 0x132   : > { %1312 = vst.msk [vmem:[#allocation2 + $0x820] sm:$0xff] %vm731_vm0, %v1280_v0  ;;  %737 = vst.msk [vmem:[#allocation2 + $0x28] sm:$0xff] %vm731_vm0, %v704_v1  ;;  %v1537_v0 = vld [vmem:[#allocation2 + $0x1a8] sm:$0xff]  ;;  %v851_v1 = vmul.f32 %v9437_v39, %v9699_v9  ;;  %v941_v28 = vmul.f32 %v9442_v40, %v9743_v30  ;;  %v707_v47 = vmul.f32 %v9427_v37, %v9787_v58 }
 0x133   : > { %809 = vst.msk [vmem:[#allocation2 + $0x128] sm:$0xff] %vm731_vm0, %v777_v2  ;;  %881 = vst.msk [vmem:[#allocation2 + $0x228] sm:$0xff] %vm731_vm0, %v849_v3  ;;  %v923_v2 = vmul.f32 %v9442_v40, %v9699_v9  ;;  %v995_v3 = vmul.f32 %v9447_v41, %v9699_v9  ;;  %v780_v48 = vmul.f32 %v9432_v38, %v9787_v58 }
 0x134   : > { %953 = vst.msk [vmem:[#allocation2 + $0x328] sm:$0xff] %vm731_vm0, %v921_v4  ;;  %1025 = vst.msk [vmem:[#allocation2 + $0x428] sm:$0xff] %vm731_vm0, %v993_v5  ;;  %v1067_v4 = vmul.f32 %v9452_v42, %v9699_v9  ;;  %v9812_v5 = vpop.permute.xlu1 %580 }
 0x135   : > { %1097 = vst.msk [vmem:[#allocation2 + $0x528] sm:$0xff] %vm731_vm0, %v1065_v6  ;;  %1169 = vst.msk [vmem:[#allocation2 + $0x628] sm:$0xff] %vm731_vm0, %v1137_v7  ;;  %v1139_v6 = vmul.f32 %v9457_v43, %v9699_v9  ;;  %v1211_v7 = vmul.f32 %v9462_v44, %v9699_v9  ;;  %v940_v9 = vmul.f32 %v9442_v40, %v9741_v29 }
 0x136   : > { %1241 = vst.msk [vmem:[#allocation2 + $0x728] sm:$0xff] %vm731_vm0, %v1209_v10  ;;  %1313 = vst.msk [vmem:[#allocation2 + $0x828] sm:$0xff] %vm731_vm0, %v1281_v11  ;;  %v7944_v10 = vpack.c.bf16 %v1505_v57, %v1504_v56  ;;  %v7976_v11 = vpack.c.bf16 %v1537_v0, %v1536_v63  ;;  %v1284_v56 = vmul.f32 %v9467_v45, %v9787_v58 }
 0x137   : > { %754 = vst.msk [vmem:[#allocation2 + $0xb0] sm:$0xff] %vm731_vm0, %v721_v14  ;;  %826 = vst.msk [vmem:[#allocation2 + $0x1b0] sm:$0xff] %vm731_vm0, %v794_v15  ;;  %v868_v14 = vmul.f32 %v9437_v39, %v9741_v29  ;;  %v1012_v15 = vmul.f32 %v9447_v41, %v9741_v29  ;;  %v708_v57 = vmul.f32 %v9427_v37, %v9812_v5 }
 0x138   : > { %898 = vst.msk [vmem:[#allocation2 + $0x2b0] sm:$0xff] %vm731_vm0, %v866_v16  ;;  %970 = vst.msk [vmem:[#allocation2 + $0x3b0] sm:$0xff] %vm731_vm0, %v938_v17  ;;  %7945 = vmatprep.subr.bf16.mxu0 %v7944_v10  ;;  %v1084_v16 = vmul.f32 %v9452_v42, %v9741_v29  ;;  %v1156_v17 = vmul.f32 %v9457_v43, %v9741_v29  ;;  %7977 = vmatprep.subr.bf16.mxu1 %v7976_v11 }
 0x139   : > { %1042 = vst.msk [vmem:[#allocation2 + $0x4b0] sm:$0xff] %vm731_vm0, %v1010_v18  ;;  %1114 = vst.msk [vmem:[#allocation2 + $0x5b0] sm:$0xff] %vm731_vm0, %v1082_v19  ;;  %v1488_v18 = vld [vmem:[#allocation2 + $0x20] sm:$0xff]  ;;  %v1489_v19 = vld [vmem:[#allocation2 + $0x28] sm:$0xff]  ;;  %v997_v63 = vmul.f32 %v9447_v41, %v9812_v5  ;;  %v1069_v0 = vmul.f32 %v9452_v42, %v9812_v5 }
 0x13a   : > { %1186 = vst.msk [vmem:[#allocation2 + $0x6b0] sm:$0xff] %vm731_vm0, %v1154_v20  ;;  %1258 = vst.msk [vmem:[#allocation2 + $0x7b0] sm:$0xff] %vm731_vm0, %v1226_v23  ;;  %v1228_v20 = vmul.f32 %v9462_v44, %v9741_v29  ;;  %v797_v23 = vmul.f32 %v9432_v38, %v9743_v30  ;;  %v1013_v29 = vmul.f32 %v9447_v41, %v9743_v30 }
 0x13b   : > { %1330 = vst.msk [vmem:[#allocation2 + $0x8b0] sm:$0xff] %vm731_vm0, %v1298_v24  ;;  %755 = vst.msk [vmem:[#allocation2 + $0xb8] sm:$0xff] %vm731_vm0, %v722_v25  ;;  %v1520_v24 = vld [vmem:[#allocation2 + $0x120] sm:$0xff]  ;;  %v1521_v25 = vld [vmem:[#allocation2 + $0x128] sm:$0xff] }
 0x13c   : > { %827 = vst.msk [vmem:[#allocation2 + $0x1b8] sm:$0xff] %vm731_vm0, %v795_v26  ;;  %899 = vst.msk [vmem:[#allocation2 + $0x2b8] sm:$0xff] %vm731_vm0, %v867_v31  ;;  %v9856_v26 = vpop.permute.xlu0 %665  ;;  %v1085_v31 = vmul.f32 %v9452_v42, %v9743_v30 }
 0x13d   : > { %971 = vst.msk [vmem:[#allocation2 + $0x3b8] sm:$0xff] %vm731_vm0, %v939_v32  ;;  %1043 = vst.msk [vmem:[#allocation2 + $0x4b8] sm:$0xff] %vm731_vm0, %v1011_v33  ;;  %v1157_v32 = vmul.f32 %v9457_v43, %v9743_v30  ;;  %v1229_v33 = vmul.f32 %v9462_v44, %v9743_v30  ;;  %v798_v10 = vmul.f32 %v9432_v38, %v9856_v26 }
 0x13e   : > { %1115 = vst.msk [vmem:[#allocation2 + $0x5b8] sm:$0xff] %vm731_vm0, %v1083_v34  ;;  %1187 = vst.msk [vmem:[#allocation2 + $0x6b8] sm:$0xff] %vm731_vm0, %v1155_v35  ;;  %v1301_v34 = vmul.f32 %v9467_v45, %v9743_v30  ;;  %v7946_v35 = vpack.c.bf16 %v1489_v19, %v1488_v18  ;;  %v852_v30 = vmul.f32 %v9437_v39, %v9787_v58 }
 0x13f   : > { %1259 = vst.msk [vmem:[#allocation2 + $0x7b8] sm:$0xff] %vm731_vm0, %v1227_v36  ;;  %1331 = vst.msk [vmem:[#allocation2 + $0x8b8] sm:$0xff] %vm731_vm0, %v1299_v46  ;;  %v9880_v36 = vpop.permute.xlu1 %670  ;;  %v7978_v46 = vpack.c.bf16 %v1521_v25, %v1520_v24  ;;  %v870_v11 = vmul.f32 %v9437_v39, %v9856_v26  ;;  %v1302_v18 = vmul.f32 %v9467_v45, %v9856_v26 }
 0x140   : > { %738 = vst.msk [vmem:[#allocation2 + $0x30] sm:$0xff] %vm731_vm0, %v705_v49  ;;  %810 = vst.msk [vmem:[#allocation2 + $0x130] sm:$0xff] %vm731_vm0, %v778_v50  ;;  %7947 = vmatpush3.bf16.msra.mxu0 %v7946_v35  ;;  %v924_v49 = vmul.f32 %v9442_v40, %v9787_v58  ;;  %v996_v50 = vmul.f32 %v9447_v41, %v9787_v58  ;;  %v726_v19 = vmul.f32 %v9427_v37, %v9880_v36 }
 0x141   : > { %882 = vst.msk [vmem:[#allocation2 + $0x230] sm:$0xff] %vm731_vm0, %v850_v51  ;;  %954 = vst.msk [vmem:[#allocation2 + $0x330] sm:$0xff] %vm731_vm0, %v922_v52  ;;  %v1068_v51 = vmul.f32 %v9452_v42, %v9787_v58  ;;  %v1140_v52 = vmul.f32 %v9457_v43, %v9787_v58  ;;  %7979 = vmatpush3.bf16.msra.mxu1 %v7978_v46  ;;  %v943_v24 = vmul.f32 %v9442_v40, %v9880_v36 }
 0x142   : > { %1026 = vst.msk [vmem:[#allocation2 + $0x430] sm:$0xff] %vm731_vm0, %v994_v53  ;;  %1098 = vst.msk [vmem:[#allocation2 + $0x530] sm:$0xff] %vm731_vm0, %v1066_v54  ;;  %v1506_v53 = vld [vmem:[#allocation2 + $0xb0] sm:$0xff]  ;;  %v1507_v54 = vld [vmem:[#allocation2 + $0xb8] sm:$0xff]  ;;  %v1015_v25 = vmul.f32 %v9447_v41, %v9880_v36 }
 0x143   : > { %1170 = vst.msk [vmem:[#allocation2 + $0x630] sm:$0xff] %vm731_vm0, %v1138_v55  ;;  %1242 = vst.msk [vmem:[#allocation2 + $0x730] sm:$0xff] %vm731_vm0, %v1210_v59  ;;  %v1212_v55 = vmul.f32 %v9462_v44, %v9787_v58  ;;  %v781_v59 = vmul.f32 %v9432_v38, %v9812_v5  ;;  %v925_v58 = vmul.f32 %v9442_v40, %v9812_v5 }
 0x144   : > { %1314 = vst.msk [vmem:[#allocation2 + $0x830] sm:$0xff] %vm731_vm0, %v1282_v60  ;;  %739 = vst.msk [vmem:[#allocation2 + $0x38] sm:$0xff] %vm731_vm0, %v706_v61  ;;  %v1538_v60 = vld [vmem:[#allocation2 + $0x1b0] sm:$0xff]  ;;  %v1539_v61 = vld [vmem:[#allocation2 + $0x1b8] sm:$0xff] }
 0x145   : > { %811 = vst.msk [vmem:[#allocation2 + $0x138] sm:$0xff] %vm731_vm0, %v779_v62  ;;  %883 = vst.msk [vmem:[#allocation2 + $0x238] sm:$0xff] %vm731_vm0, %v851_v1  ;;  %v853_v62 = vmul.f32 %v9437_v39, %v9812_v5  ;;  %v9926_v1 = vpop.permute.xlu0 %585 }
 0x146   : > { %955 = vst.msk [vmem:[#allocation2 + $0x338] sm:$0xff] %vm731_vm0, %v923_v2  ;;  %1027 = vst.msk [vmem:[#allocation2 + $0x438] sm:$0xff] %vm731_vm0, %v995_v3  ;;  %v1141_v2 = vmul.f32 %v9457_v43, %v9812_v5  ;;  %v1213_v3 = vmul.f32 %v9462_v44, %v9812_v5  ;;  %v782_v35 = vmul.f32 %v9432_v38, %v9926_v1 }
 0x147   : > { %1099 = vst.msk [vmem:[#allocation2 + $0x538] sm:$0xff] %vm731_vm0, %v1067_v4  ;;  %1171 = vst.msk [vmem:[#allocation2 + $0x638] sm:$0xff] %vm731_vm0, %v1139_v6  ;;  %v1285_v4 = vmul.f32 %v9467_v45, %v9812_v5  ;;  %v7948_v6 = vpack.c.bf16 %v1507_v54, %v1506_v53  ;;  %v9948_v5 = vpop.permute.xlu1 %590  ;;  %v926_v46 = vmul.f32 %v9442_v40, %v9926_v1  ;;  %v10051_v53 = vld [vmem:[%s10756_s2 + $0x4] ss:$0 sm:$0xff] }
 0x148   : > { %1243 = vst.msk [vmem:[#allocation2 + $0x738] sm:$0xff] %vm731_vm0, %v1211_v7  ;;  %1315 = vst.msk [vmem:[#allocation2 + $0x838] sm:$0xff] %vm731_vm0, %v1283_v8  ;;  %v7980_v7 = vpack.c.bf16 %v1539_v61, %v1538_v60  ;;  %v725_v8 = vmul.f32 %v9427_v37, %v9856_v26  ;;  %v999_v54 = vmul.f32 %v10051_v53, %v9948_v5  ;;  %v10076_v60 = vld [vmem:[%s10756_s2 + $0x7] ss:$0 sm:$0xff] }
 0x149   : > { %756 = vst.msk [vmem:[#allocation2 + $0xc0] sm:$0xff] %vm731_vm0, %v723_v12  ;;  %828 = vst.msk [vmem:[#allocation2 + $0x1c0] sm:$0xff] %vm731_vm0, %v796_v13  ;;  %7949 = vmatprep.subr.bf16.mxu0 %v7948_v6  ;;  %v942_v12 = vmul.f32 %v9442_v40, %v9856_v26  ;;  %v1014_v13 = vmul.f32 %v9447_v41, %v9856_v26  ;;  %v1214_v40 = vmul.f32 %v9462_v44, %v9926_v1 }
 0x14a   : > { %900 = vst.msk [vmem:[#allocation2 + $0x2c0] sm:$0xff] %vm731_vm0, %v868_v14  ;;  %972 = vst.msk [vmem:[#allocation2 + $0x3c0] sm:$0xff] %vm731_vm0, %v940_v9  ;;  %v1086_v14 = vmul.f32 %v9452_v42, %v9856_v26  ;;  %v1158_v9 = vmul.f32 %v9457_v43, %v9856_v26  ;;  %7981 = vmatprep.subr.bf16.mxu1 %v7980_v7  ;;  %v1215_v61 = vmul.f32 %v10076_v60, %v9948_v5 }
 0x14b   : > { %1044 = vst.msk [vmem:[#allocation2 + $0x4c0] sm:$0xff] %vm731_vm0, %v1012_v15  ;;  %1116 = vst.msk [vmem:[#allocation2 + $0x5c0] sm:$0xff] %vm731_vm0, %v1084_v16  ;;  %v1490_v15 = vld [vmem:[#allocation2 + $0x30] sm:$0xff]  ;;  %v1491_v16 = vld [vmem:[#allocation2 + $0x38] sm:$0xff] }
 0x14c   : > { %1188 = vst.msk [vmem:[#allocation2 + $0x6c0] sm:$0xff] %vm731_vm0, %v1156_v17  ;;  %1260 = vst.msk [vmem:[#allocation2 + $0x7c0] sm:$0xff] %vm731_vm0, %v1228_v20  ;;  %v1230_v17 = vmul.f32 %v9462_v44, %v9856_v26  ;;  %v799_v20 = vmul.f32 %v9432_v38, %v9880_v36  ;;  %v1087_v26 = vmul.f32 %v9452_v42, %v9880_v36 }
 0x14d   : > { %1332 = vst.msk [vmem:[#allocation2 + $0x8c0] sm:$0xff] %vm731_vm0, %v1300_v21  ;;  %757 = vst.msk [vmem:[#allocation2 + $0xc8] sm:$0xff] %vm731_vm0, %v724_v22  ;;  %v1522_v21 = vld [vmem:[#allocation2 + $0x130] sm:$0xff]  ;;  %v1523_v22 = vld [vmem:[#allocation2 + $0x138] sm:$0xff] }
 0x14e   : > { %829 = vst.msk [vmem:[#allocation2 + $0x1c8] sm:$0xff] %vm731_vm0, %v797_v23  ;;  %901 = vst.msk [vmem:[#allocation2 + $0x2c8] sm:$0xff] %vm731_vm0, %v869_v27  ;;  %v871_v23 = vmul.f32 %v9437_v39, %v9880_v36  ;;  %v1159_v27 = vmul.f32 %v9457_v43, %v9880_v36 }
 0x14f   : > { %973 = vst.msk [vmem:[#allocation2 + $0x3c8] sm:$0xff] %vm731_vm0, %v941_v28  ;;  %1045 = vst.msk [vmem:[#allocation2 + $0x4c8] sm:$0xff] %vm731_vm0, %v1013_v29  ;;  %v1231_v28 = vmul.f32 %v9462_v44, %v9880_v36  ;;  %v1303_v29 = vmul.f32 %v9467_v45, %v9880_v36  ;;  %v854_v36 = vmul.f32 %v9437_v39, %v9926_v1  ;;  %v10037_v44 = vld [vmem:[%s10756_s2 + $0x2] ss:$0 sm:$0xff] }
 0x150   : > { %1117 = vst.msk [vmem:[#allocation2 + $0x5c8] sm:$0xff] %vm731_vm0, %v1085_v31  ;;  %1189 = vst.msk [vmem:[#allocation2 + $0x6c8] sm:$0xff] %vm731_vm0, %v1157_v32  ;;  %v7950_v31 = vpack.c.bf16 %v1491_v16, %v1490_v15  ;;  %v9994_v32 = vpop.permute.xlu0 %675  ;;  %v1508_v39 = vld [vmem:[#allocation2 + $0xc0] sm:$0xff] }
 0x151   : > { %1261 = vst.msk [vmem:[#allocation2 + $0x7c8] sm:$0xff] %vm731_vm0, %v1229_v33  ;;  %1333 = vst.msk [vmem:[#allocation2 + $0x8c8] sm:$0xff] %vm731_vm0, %v1301_v34  ;;  %v7982_v33 = vpack.c.bf16 %v1523_v22, %v1522_v21  ;;  %v709_v34 = vmul.f32 %v9427_v37, %v9926_v1  ;;  %v872_v6 = vmul.f32 %v10037_v44, %v9994_v32 }
 0x152   : > { %740 = vst.msk [vmem:[#allocation2 + $0x40] sm:$0xff] %vm731_vm0, %v707_v47  ;;  %812 = vst.msk [vmem:[#allocation2 + $0x140] sm:$0xff] %vm731_vm0, %v780_v48  ;;  %7951 = vmatpush3.bf16.msra.mxu0 %v7950_v31  ;;  %v998_v47 = vmul.f32 %v9447_v41, %v9926_v1  ;;  %v1070_v48 = vmul.f32 %v9452_v42, %v9926_v1  ;;  %v1286_v41 = vmul.f32 %v9467_v45, %v9926_v1 }
 0x153   : > { %884 = vst.msk [vmem:[#allocation2 + $0x240] sm:$0xff] %vm731_vm0, %v852_v30  ;;  %956 = vst.msk [vmem:[#allocation2 + $0x340] sm:$0xff] %vm731_vm0, %v924_v49  ;;  %v1142_v30 = vmul.f32 %v9457_v43, %v9926_v1  ;;  %7983 = vmatpush3.bf16.msra.mxu1 %v7982_v33  ;;  %v710_v42 = vmul.f32 %v9427_v37, %v9948_v5  ;;  %v783_v43 = vmul.f32 %v9432_v38, %v9948_v5  ;;  %v10044_v38 = vld [vmem:[%s10756_s2 + $0x3] ss:$0 sm:$0xff]  ;;  %v10094_v1 = vld [vmem:[%s10756_s2] ss:$0 sm:$0xff] }
 0x154   : > { %1028 = vst.msk [vmem:[#allocation2 + $0x440] sm:$0xff] %vm731_vm0, %v996_v50  ;;  %1100 = vst.msk [vmem:[#allocation2 + $0x540] sm:$0xff] %vm731_vm0, %v1068_v51  ;;  %v1509_v49 = vld [vmem:[#allocation2 + $0xc8] sm:$0xff]  ;;  %v10017_v50 = vpop.permute.xlu1 %680  ;;  %v1540_v51 = vld [vmem:[#allocation2 + $0x1c0] sm:$0xff]  ;;  %v855_v37 = vmul.f32 %v10037_v44, %v9948_v5  ;;  %v927_v45 = vmul.f32 %v10044_v38, %v9948_v5  ;;  %v596_v7 = vpop.permute.xlu0 %595 }
 0x155   : > { %1172 = vst.msk [vmem:[#allocation2 + $0x640] sm:$0xff] %vm731_vm0, %v1140_v52  ;;  %1244 = vst.msk [vmem:[#allocation2 + $0x740] sm:$0xff] %vm731_vm0, %v1212_v55  ;;  %v1541_v52 = vld [vmem:[#allocation2 + $0x1c8] sm:$0xff]  ;;  %v10058_v55 = vld [vmem:[%s10756_s2 + $0x5] ss:$0 sm:$0xff]  ;;  %v728_v15 = vmul.f32 %v10094_v1, %v10017_v50  ;;  %v945_v21 = vmul.f32 %v10044_v38, %v10017_v50  ;;  %v1017_v22 = vmul.f32 %v10051_v53, %v10017_v50 }
 0x156   : > { %1316 = vst.msk [vmem:[#allocation2 + $0x840] sm:$0xff] %vm731_vm0, %v1284_v56  ;;  %741 = vst.msk [vmem:[#allocation2 + $0x48] sm:$0xff] %vm731_vm0, %v708_v57  ;;  %v1071_v56 = vmul.f32 %v10058_v55, %v9948_v5  ;;  %v10069_v57 = vld [vmem:[%s10756_s2 + $0x6] ss:$0 sm:$0xff]  ;;  %v928_v33 = vmul.f32 %v10044_v38, %v596_v7 }
 0x157   : > { %813 = vst.msk [vmem:[#allocation2 + $0x148] sm:$0xff] %vm731_vm0, %v781_v59  ;;  %885 = vst.msk [vmem:[#allocation2 + $0x248] sm:$0xff] %vm731_vm0, %v853_v62  ;;  %v1143_v59 = vmul.f32 %v10069_v57, %v9948_v5  ;;  %v10083_v62 = vld [vmem:[%s10756_s2 + $0x8] ss:$0 sm:$0xff] }
 0x158   : > { %957 = vst.msk [vmem:[#allocation2 + $0x348] sm:$0xff] %vm731_vm0, %v925_v58  ;;  %1029 = vst.msk [vmem:[#allocation2 + $0x448] sm:$0xff] %vm731_vm0, %v997_v63  ;;  %v1287_v58 = vmul.f32 %v10083_v62, %v9948_v5  ;;  %v7952_v63 = vpack.c.bf16 %v1509_v49, %v1508_v39  ;;  %v1160_v5 = vmul.f32 %v10069_v57, %v9994_v32 }
 0x159   : > { %1101 = vst.msk [vmem:[#allocation2 + $0x548] sm:$0xff] %vm731_vm0, %v1069_v0  ;;  %1173 = vst.msk [vmem:[#allocation2 + $0x648] sm:$0xff] %vm731_vm0, %v1141_v2  ;;  %v7984_v0 = vpack.c.bf16 %v1541_v52, %v1540_v51  ;;  %v727_v2 = vmul.f32 %v10094_v1, %v9994_v32  ;;  %v1288_v39 = vmul.f32 %v10083_v62, %v596_v7 }
 0x15a   : > { %1245 = vst.msk [vmem:[#allocation2 + $0x748] sm:$0xff] %vm731_vm0, %v1213_v3  ;;  %1317 = vst.msk [vmem:[#allocation2 + $0x848] sm:$0xff] %vm731_vm0, %v1285_v4  ;;  %v10101_v3 = vld [vmem:[%s10756_s2 + $0x1] ss:$0 sm:$0xff]  ;;  %7953 = vmatprep.subr.bf16.mxu0 %v7952_v63 }
 0x15b   : > { %758 = vst.msk [vmem:[#allocation2 + $0xd0] sm:$0xff] %vm731_vm0, %v725_v8  ;;  %830 = vst.msk [vmem:[#allocation2 + $0x1d0] sm:$0xff] %vm731_vm0, %v798_v10  ;;  %v800_v4 = vmul.f32 %v10101_v3, %v9994_v32  ;;  %v944_v8 = vmul.f32 %v10044_v38, %v9994_v32  ;;  %v1016_v10 = vmul.f32 %v10051_v53, %v9994_v32  ;;  %7985 = vmatprep.subr.bf16.mxu1 %v7984_v0 }
 0x15c   : > { %902 = vst.msk [vmem:[#allocation2 + $0x2d0] sm:$0xff] %vm731_vm0, %v870_v11  ;;  %974 = vst.msk [vmem:[#allocation2 + $0x3d0] sm:$0xff] %vm731_vm0, %v942_v12  ;;  %v1088_v11 = vmul.f32 %v10058_v55, %v9994_v32  ;;  %v1492_v12 = vld [vmem:[#allocation2 + $0x40] sm:$0xff]  ;;  %v801_v16 = vmul.f32 %v10101_v3, %v10017_v50  ;;  %v784_v31 = vmul.f32 %v10101_v3, %v596_v7 }
 0x15d   : > { %1046 = vst.msk [vmem:[#allocation2 + $0x4d0] sm:$0xff] %vm731_vm0, %v1014_v13  ;;  %1118 = vst.msk [vmem:[#allocation2 + $0x5d0] sm:$0xff] %vm731_vm0, %v1086_v14  ;;  %v1493_v13 = vld [vmem:[#allocation2 + $0x48] sm:$0xff]  ;;  %v1232_v14 = vmul.f32 %v10076_v60, %v9994_v32 }
 0x15e   : > { %1190 = vst.msk [vmem:[#allocation2 + $0x6d0] sm:$0xff] %vm731_vm0, %v1158_v9  ;;  %1262 = vst.msk [vmem:[#allocation2 + $0x7d0] sm:$0xff] %vm731_vm0, %v1230_v17  ;;  %v1304_v9 = vmul.f32 %v10083_v62, %v9994_v32  ;;  %v1524_v17 = vld [vmem:[#allocation2 + $0x140] sm:$0xff]  ;;  %v856_v32 = vmul.f32 %v10037_v44, %v596_v7 }
 0x15f   : > { %1334 = vst.msk [vmem:[#allocation2 + $0x8d0] sm:$0xff] %vm731_vm0, %v1302_v18  ;;  %759 = vst.msk [vmem:[#allocation2 + $0xd8] sm:$0xff] %vm731_vm0, %v726_v19  ;;  %v1525_v18 = vld [vmem:[#allocation2 + $0x148] sm:$0xff]  ;;  %v601_v19 = vpop.permute.xlu1 %600 }
 0x160   : > { %831 = vst.msk [vmem:[#allocation2 + $0x1d8] sm:$0xff] %vm731_vm0, %v799_v20  ;;  %903 = vst.msk [vmem:[#allocation2 + $0x2d8] sm:$0xff] %vm731_vm0, %v871_v23  ;;  %v873_v20 = vmul.f32 %v10037_v44, %v10017_v50  ;;  %v1089_v23 = vmul.f32 %v10058_v55, %v10017_v50  ;;  %v712_v49 = vmul.f32 %v10094_v1, %v601_v19 }
 0x161   : > { %975 = vst.msk [vmem:[#allocation2 + $0x3d8] sm:$0xff] %vm731_vm0, %v943_v24  ;;  %1047 = vst.msk [vmem:[#allocation2 + $0x4d8] sm:$0xff] %vm731_vm0, %v1015_v25  ;;  %v1161_v24 = vmul.f32 %v10069_v57, %v10017_v50  ;;  %v1233_v25 = vmul.f32 %v10076_v60, %v10017_v50  ;;  %v1001_v51 = vmul.f32 %v10051_v53, %v601_v19 }
 0x162   : > { %1119 = vst.msk [vmem:[#allocation2 + $0x5d8] sm:$0xff] %vm731_vm0, %v1087_v26  ;;  %1191 = vst.msk [vmem:[#allocation2 + $0x6d8] sm:$0xff] %vm731_vm0, %v1159_v27  ;;  %v1305_v26 = vmul.f32 %v10083_v62, %v10017_v50  ;;  %v7954_v27 = vpack.c.bf16 %v1493_v13, %v1492_v12  ;;  %v785_v50 = vmul.f32 %v10101_v3, %v601_v19 }
 0x163   : > { %1263 = vst.msk [vmem:[#allocation2 + $0x7d8] sm:$0xff] %vm731_vm0, %v1231_v28  ;;  %1335 = vst.msk [vmem:[#allocation2 + $0x8d8] sm:$0xff] %vm731_vm0, %v1303_v29  ;;  %v7986_v28 = vpack.c.bf16 %v1525_v18, %v1524_v17  ;;  %v711_v29 = vmul.f32 %v10094_v1, %v596_v7  ;;  %v1073_v52 = vmul.f32 %v10058_v55, %v601_v19 }
 0x164   : > { %742 = vst.msk [vmem:[#allocation2 + $0x50] sm:$0xff] %vm731_vm0, %v709_v34  ;;  %814 = vst.msk [vmem:[#allocation2 + $0x150] sm:$0xff] %vm731_vm0, %v782_v35  ;;  %7955 = vmatpush3.bf16.msra.mxu0 %v7954_v27  ;;  %v1000_v34 = vmul.f32 %v10051_v53, %v596_v7  ;;  %v1072_v35 = vmul.f32 %v10058_v55, %v596_v7 }
 0x165   : > { %886 = vst.msk [vmem:[#allocation2 + $0x250] sm:$0xff] %vm731_vm0, %v854_v36  ;;  %958 = vst.msk [vmem:[#allocation2 + $0x350] sm:$0xff] %vm731_vm0, %v926_v46  ;;  %v1144_v36 = vmul.f32 %v10069_v57, %v596_v7  ;;  %v1510_v46 = vld [vmem:[#allocation2 + $0xd0] sm:$0xff]  ;;  %7987 = vmatpush3.bf16.msra.mxu1 %v7986_v28 }
 0x166   : > { %1030 = vst.msk [vmem:[#allocation2 + $0x450] sm:$0xff] %vm731_vm0, %v998_v47  ;;  %1102 = vst.msk [vmem:[#allocation2 + $0x550] sm:$0xff] %vm731_vm0, %v1070_v48  ;;  %v1511_v47 = vld [vmem:[#allocation2 + $0xd8] sm:$0xff]  ;;  %v686_v48 = vpop.permute.xlu0 %685 }
 0x167   : > { %1174 = vst.msk [vmem:[#allocation2 + $0x650] sm:$0xff] %vm731_vm0, %v1142_v30  ;;  %1246 = vst.msk [vmem:[#allocation2 + $0x750] sm:$0xff] %vm731_vm0, %v1214_v40  ;;  %v1216_v30 = vmul.f32 %v10076_v60, %v596_v7  ;;  %v1542_v40 = vld [vmem:[#allocation2 + $0x1d0] sm:$0xff]  ;;  %v802_v63 = vmul.f32 %v10101_v3, %v686_v48  ;;  %v874_v0 = vmul.f32 %v10037_v44, %v686_v48 }
 0x168   : > { %1318 = vst.msk [vmem:[#allocation2 + $0x850] sm:$0xff] %vm731_vm0, %v1286_v41  ;;  %743 = vst.msk [vmem:[#allocation2 + $0x58] sm:$0xff] %vm731_vm0, %v710_v42  ;;  %v1543_v41 = vld [vmem:[#allocation2 + $0x1d8] sm:$0xff]  ;;  %v857_v42 = vmul.f32 %v10037_v44, %v601_v19  ;;  %v1162_v7 = vmul.f32 %v10069_v57, %v686_v48 }
 0x169   : > { %815 = vst.msk [vmem:[#allocation2 + $0x158] sm:$0xff] %vm731_vm0, %v783_v43  ;;  %887 = vst.msk [vmem:[#allocation2 + $0x258] sm:$0xff] %vm731_vm0, %v855_v37  ;;  %v929_v43 = vmul.f32 %v10044_v38, %v601_v19  ;;  %v691_v37 = vpop.permute.xlu1 %690 }
 0x16a   : > { %959 = vst.msk [vmem:[#allocation2 + $0x358] sm:$0xff] %vm731_vm0, %v927_v45  ;;  %1031 = vst.msk [vmem:[#allocation2 + $0x458] sm:$0xff] %vm731_vm0, %v999_v54  ;;  %v1145_v45 = vmul.f32 %v10069_v57, %v601_v19  ;;  %v1217_v54 = vmul.f32 %v10076_v60, %v601_v19  ;;  %v730_v12 = vmul.f32 %v10094_v1, %v691_v37 }
 0x16b   : > { %1103 = vst.msk [vmem:[#allocation2 + $0x558] sm:$0xff] %vm731_vm0, %v1071_v56  ;;  %1175 = vst.msk [vmem:[#allocation2 + $0x658] sm:$0xff] %vm731_vm0, %v1143_v59  ;;  %v1289_v56 = vmul.f32 %v10083_v62, %v601_v19  ;;  %v7956_v59 = vpack.c.bf16 %v1511_v47, %v1510_v46  ;;  %v803_v13 = vmul.f32 %v10101_v3, %v691_v37 }
 0x16c   : > { %1247 = vst.msk [vmem:[#allocation2 + $0x758] sm:$0xff] %vm731_vm0, %v1215_v61  ;;  %1319 = vst.msk [vmem:[#allocation2 + $0x858] sm:$0xff] %vm731_vm0, %v1287_v58  ;;  %v7988_v61 = vpack.c.bf16 %v1543_v41, %v1542_v40  ;;  %v729_v58 = vmul.f32 %v10094_v1, %v686_v48  ;;  %v947_v17 = vmul.f32 %v10044_v38, %v691_v37 }
 0x16d   : > { %760 = vst.msk [vmem:[#allocation2 + $0xe0] sm:$0xff] %vm731_vm0, %v727_v2  ;;  %832 = vst.msk [vmem:[#allocation2 + $0x1e0] sm:$0xff] %vm731_vm0, %v800_v4  ;;  %7957 = vmatprep.subr.bf16.mxu0 %v7956_v59  ;;  %v946_v2 = vmul.f32 %v10044_v38, %v686_v48  ;;  %v1018_v4 = vmul.f32 %v10051_v53, %v686_v48  ;;  %v1019_v18 = vmul.f32 %v10051_v53, %v691_v37 }
 0x16e   : > { %904 = vst.msk [vmem:[#allocation2 + $0x2e0] sm:$0xff] %vm731_vm0, %v872_v6  ;;  %976 = vst.msk [vmem:[#allocation2 + $0x3e0] sm:$0xff] %vm731_vm0, %v944_v8  ;;  %v1090_v6 = vmul.f32 %v10058_v55, %v686_v48  ;;  %v1494_v8 = vld [vmem:[#allocation2 + $0x50] sm:$0xff]  ;;  %7989 = vmatprep.subr.bf16.mxu1 %v7988_v61  ;;  %v1091_v19 = vmul.f32 %v10058_v55, %v691_v37 }
 0x16f   : > { %1048 = vst.msk [vmem:[#allocation2 + $0x4e0] sm:$0xff] %vm731_vm0, %v1016_v10  ;;  %1120 = vst.msk [vmem:[#allocation2 + $0x5e0] sm:$0xff] %vm731_vm0, %v1088_v11  ;;  %v1495_v10 = vld [vmem:[#allocation2 + $0x58] sm:$0xff]  ;;  %v1234_v11 = vmul.f32 %v10076_v60, %v686_v48 }
 0x170   : > { %1192 = vst.msk [vmem:[#allocation2 + $0x6e0] sm:$0xff] %vm731_vm0, %v1160_v5  ;;  %1264 = vst.msk [vmem:[#allocation2 + $0x7e0] sm:$0xff] %vm731_vm0, %v1232_v14  ;;  %v1306_v5 = vmul.f32 %v10083_v62, %v686_v48  ;;  %v1526_v14 = vld [vmem:[#allocation2 + $0x150] sm:$0xff] }
 0x171   : > { %1336 = vst.msk [vmem:[#allocation2 + $0x8e0] sm:$0xff] %vm731_vm0, %v1304_v9  ;;  %761 = vst.msk [vmem:[#allocation2 + $0xe8] sm:$0xff] %vm731_vm0, %v728_v15  ;;  %v1527_v9 = vld [vmem:[#allocation2 + $0x158] sm:$0xff]  ;;  %v606_v15 = vpop.permute.xlu0 %605 }
 0x172   : > { %833 = vst.msk [vmem:[#allocation2 + $0x1e8] sm:$0xff] %vm731_vm0, %v801_v16  ;;  %905 = vst.msk [vmem:[#allocation2 + $0x2e8] sm:$0xff] %vm731_vm0, %v873_v20  ;;  %v875_v16 = vmul.f32 %v10037_v44, %v691_v37  ;;  %v1163_v20 = vmul.f32 %v10069_v57, %v691_v37  ;;  %v786_v27 = vmul.f32 %v10101_v3, %v606_v15 }
 0x173   : > { %977 = vst.msk [vmem:[#allocation2 + $0x3e8] sm:$0xff] %vm731_vm0, %v945_v21  ;;  %1049 = vst.msk [vmem:[#allocation2 + $0x4e8] sm:$0xff] %vm731_vm0, %v1017_v22  ;;  %v1235_v21 = vmul.f32 %v10076_v60, %v691_v37  ;;  %v1307_v22 = vmul.f32 %v10083_v62, %v691_v37  ;;  %v858_v28 = vmul.f32 %v10037_v44, %v606_v15 }
 0x174   : > { %1121 = vst.msk [vmem:[#allocation2 + $0x5e8] sm:$0xff] %vm731_vm0, %v1089_v23  ;;  %1193 = vst.msk [vmem:[#allocation2 + $0x6e8] sm:$0xff] %vm731_vm0, %v1161_v24  ;;  %v7958_v23 = vpack.c.bf16 %v1495_v10, %v1494_v8  ;;  %v611_v24 = vpop.permute.xlu1 %610  ;;  %v1218_v48 = vmul.f32 %v10076_v60, %v606_v15  ;;  %v1596_v8 = vld [vmem:[#allocation2 + $0x380] sm:$0xff]  ;;  %v1340_v10 = vld [vmem:[#allocation6] sm:$0xff] }
 0x175   : > { %1265 = vst.msk [vmem:[#allocation2 + $0x7e8] sm:$0xff] %vm731_vm0, %v1233_v25  ;;  %1337 = vst.msk [vmem:[#allocation2 + $0x8e8] sm:$0xff] %vm731_vm0, %v1305_v26  ;;  %v7990_v25 = vpack.c.bf16 %v1527_v9, %v1526_v14  ;;  %v713_v26 = vmul.f32 %v10094_v1, %v606_v15  ;;  %v1581_v14 = vld [vmem:[#allocation2 + $0x308] sm:$0xff]  ;;  %v1566_v9 = vld [vmem:[#allocation2 + $0x290] sm:$0xff] }
 0x176   : > { %744 = vst.msk [vmem:[#allocation2 + $0x60] sm:$0xff] %vm731_vm0, %v711_v29  ;;  %816 = vst.msk [vmem:[#allocation2 + $0x160] sm:$0xff] %vm731_vm0, %v784_v31  ;;  %v1512_v29 = vld [vmem:[#allocation2 + $0xe0] sm:$0xff]  ;;  %7959 = vmatpush3.bf16.msra.mxu0 %v7958_v23 }
 0x177   : > { %888 = vst.msk [vmem:[#allocation2 + $0x260] sm:$0xff] %vm731_vm0, %v856_v32  ;;  %960 = vst.msk [vmem:[#allocation2 + $0x360] sm:$0xff] %vm731_vm0, %v928_v33  ;;  %v1544_v31 = vld [vmem:[#allocation2 + $0x1e0] sm:$0xff]  ;;  %v930_v32 = vmul.f32 %v10044_v38, %v606_v15  ;;  %v1002_v33 = vmul.f32 %v10051_v53, %v606_v15  ;;  %7991 = vmatpush3.bf16.msra.mxu1 %v7990_v25  ;;  %v1360_v25 = vld [vmem:[#allocation6 + $0xa0] sm:$0xff] }
 0x178   : > { %1032 = vst.msk [vmem:[#allocation2 + $0x460] sm:$0xff] %vm731_vm0, %v1000_v34  ;;  %1104 = vst.msk [vmem:[#allocation2 + $0x560] sm:$0xff] %vm731_vm0, %v1072_v35  ;;  %v1074_v34 = vmul.f32 %v10058_v55, %v606_v15  ;;  %v1146_v35 = vmul.f32 %v10069_v57, %v606_v15 }
 0x179   : > { %1176 = vst.msk [vmem:[#allocation2 + $0x660] sm:$0xff] %vm731_vm0, %v1144_v36  ;;  %1248 = vst.msk [vmem:[#allocation2 + $0x760] sm:$0xff] %vm731_vm0, %v1216_v30  ;;  %v1513_v36 = vld [vmem:[#allocation2 + $0xe8] sm:$0xff]  ;;  %v1290_v30 = vmul.f32 %v10083_v62, %v606_v15  ;;  %v1567_v15 = vld [vmem:[#allocation2 + $0x298] sm:$0xff] }
 0x17a   : > { %1320 = vst.msk [vmem:[#allocation2 + $0x860] sm:$0xff] %vm731_vm0, %v1288_v39  ;;  %745 = vst.msk [vmem:[#allocation2 + $0x68] sm:$0xff] %vm731_vm0, %v712_v49  ;;  %v1545_v46 = vld [vmem:[#allocation2 + $0x1e8] sm:$0xff]  ;;  %v714_v39 = vmul.f32 %v10094_v1, %v611_v24  ;;  %v787_v49 = vmul.f32 %v10101_v3, %v611_v24  ;;  %v1075_v1 = vmul.f32 %v10058_v55, %v611_v24 }
 0x17b   : > { %817 = vst.msk [vmem:[#allocation2 + $0x168] sm:$0xff] %vm731_vm0, %v785_v50  ;;  %889 = vst.msk [vmem:[#allocation2 + $0x268] sm:$0xff] %vm731_vm0, %v857_v42  ;;  %v859_v42 = vmul.f32 %v10037_v44, %v611_v24  ;;  %v1147_v3 = vmul.f32 %v10069_v57, %v611_v24  ;;  %v1291_v44 = vmul.f32 %v10083_v62, %v611_v24 }
 0x17c   : > { %961 = vst.msk [vmem:[#allocation2 + $0x368] sm:$0xff] %vm731_vm0, %v929_v43  ;;  %1033 = vst.msk [vmem:[#allocation2 + $0x468] sm:$0xff] %vm731_vm0, %v1001_v51  ;;  %v931_v43 = vmul.f32 %v10044_v38, %v611_v24  ;;  %v1003_v51 = vmul.f32 %v10051_v53, %v611_v24  ;;  %v7960_v37 = vpack.c.bf16 %v1513_v36, %v1512_v29  ;;  %v1601_v36 = vld [vmem:[#allocation2 + $0x3a8] sm:$0xff] }
 0x17d   : > { %1105 = vst.msk [vmem:[#allocation2 + $0x568] sm:$0xff] %vm731_vm0, %v1073_v52  ;;  %1177 = vst.msk [vmem:[#allocation2 + $0x668] sm:$0xff] %vm731_vm0, %v1145_v45  ;;  %v1496_v47 = vld [vmem:[#allocation2 + $0x60] sm:$0xff]  ;;  %v1219_v52 = vmul.f32 %v10076_v60, %v611_v24  ;;  %v7992_v53 = vpack.c.bf16 %v1545_v46, %v1544_v31  ;;  %v1551_v31 = vld [vmem:[#allocation2 + $0x218] sm:$0xff] }
 0x17e   : > { %1249 = vst.msk [vmem:[#allocation2 + $0x768] sm:$0xff] %vm731_vm0, %v1217_v54  ;;  %1321 = vst.msk [vmem:[#allocation2 + $0x868] sm:$0xff] %vm731_vm0, %v1289_v56  ;;  %v1528_v40 = vld [vmem:[#allocation2 + $0x160] sm:$0xff]  ;;  %7961 = vmatprep.subr.bf16.mxu0 %v7960_v37  ;;  %v1395_v37 = vld [vmem:[#allocation6 + $0x1b8] sm:$0xff] }
 0x17f   : > { %762 = vst.msk [vmem:[#allocation2 + $0xf0] sm:$0xff] %vm731_vm0, %v729_v58  ;;  %834 = vst.msk [vmem:[#allocation2 + $0x1f0] sm:$0xff] %vm731_vm0, %v802_v63  ;;  %7993 = vmatprep.subr.bf16.mxu1 %v7992_v53  ;;  %v1565_v58 = vld [vmem:[#allocation2 + $0x288] sm:$0xff]  ;;  %v1377_v46 = vld [vmem:[#allocation6 + $0x128] sm:$0xff] }
 0x180   : > { %906 = vst.msk [vmem:[#allocation2 + $0x2f0] sm:$0xff] %vm731_vm0, %v874_v0  ;;  %978 = vst.msk [vmem:[#allocation2 + $0x3f0] sm:$0xff] %vm731_vm0, %v946_v2  ;;  %v1597_v63 = vld [vmem:[#allocation2 + $0x388] sm:$0xff] }
 0x181   : > { %1050 = vst.msk [vmem:[#allocation2 + $0x4f0] sm:$0xff] %vm731_vm0, %v1018_v4  ;;  %1122 = vst.msk [vmem:[#allocation2 + $0x5f0] sm:$0xff] %vm731_vm0, %v1090_v6  ;;  %v1497_v50 = vld [vmem:[#allocation2 + $0x68] sm:$0xff] }
 0x182   : > { %1194 = vst.msk [vmem:[#allocation2 + $0x6f0] sm:$0xff] %vm731_vm0, %v1162_v7  ;;  %1266 = vst.msk [vmem:[#allocation2 + $0x7f0] sm:$0xff] %vm731_vm0, %v1234_v11  ;;  %v1529_v41 = vld [vmem:[#allocation2 + $0x168] sm:$0xff]  ;;  %v7962_v55 = vpack.c.bf16 %v1497_v50, %v1496_v47  ;;  %v1564_v7 = vld [vmem:[#allocation2 + $0x280] sm:$0xff] }
 0x183   : > { %1338 = vst.msk [vmem:[#allocation2 + $0x8f0] sm:$0xff] %vm731_vm0, %v1306_v5  ;;  %763 = vst.msk [vmem:[#allocation2 + $0xf8] sm:$0xff] %vm731_vm0, %v730_v12  ;;  %v7994_v54 = vpack.c.bf16 %v1529_v41, %v1528_v40  ;;  %v1342_v11 = vld [vmem:[#allocation6 + $0x10] sm:$0xff]  ;;  %v8000_v5 = vpack.c.bf16 %v1565_v58, %v1564_v7  ;;  %v8032_v12 = vpack.c.bf16 %v1597_v63, %v1596_v8  ;;  %v1379_v47 = vld [vmem:[#allocation6 + $0x138] sm:$0xff] }
 0x184   : > { %835 = vst.msk [vmem:[#allocation2 + $0x1f8] sm:$0xff] %vm731_vm0, %v803_v13  ;;  %907 = vst.msk [vmem:[#allocation2 + $0x2f8] sm:$0xff] %vm731_vm0, %v875_v16  ;;  %7963 = vmatpush3.bf16.msra.mxu0 %v7962_v55  ;;  %v1549_v13 = vld [vmem:[#allocation2 + $0x208] sm:$0xff]  ;;  %v1598_v16 = vld [vmem:[#allocation2 + $0x390] sm:$0xff] }
 0x185   : > { %979 = vst.msk [vmem:[#allocation2 + $0x3f8] sm:$0xff] %vm731_vm0, %v947_v17  ;;  %1051 = vst.msk [vmem:[#allocation2 + $0x4f8] sm:$0xff] %vm731_vm0, %v1019_v18  ;;  %7995 = vmatpush3.bf16.msra.mxu1 %v7994_v54  ;;  %v1599_v17 = vld [vmem:[#allocation2 + $0x398] sm:$0xff]  ;;  %v1548_v18 = vld [vmem:[#allocation2 + $0x200] sm:$0xff] }
 0x186   : > { %1123 = vst.msk [vmem:[#allocation2 + $0x5f8] sm:$0xff] %vm731_vm0, %v1091_v19  ;;  %1195 = vst.msk [vmem:[#allocation2 + $0x6f8] sm:$0xff] %vm731_vm0, %v1163_v20  ;;  %v1514_v38 = vld [vmem:[#allocation2 + $0xf0] sm:$0xff]  ;;  %v1580_v19 = vld [vmem:[#allocation2 + $0x300] sm:$0xff]  ;;  %v8036_v29 = vpack.c.bf16 %v1599_v17, %v1598_v16 }
 0x187   : > { %1267 = vst.msk [vmem:[#allocation2 + $0x7f8] sm:$0xff] %vm731_vm0, %v1235_v21  ;;  %1339 = vst.msk [vmem:[#allocation2 + $0x8f8] sm:$0xff] %vm731_vm0, %v1307_v22  ;;  %v1546_v45 = vld [vmem:[#allocation2 + $0x1f0] sm:$0xff]  ;;  %v1361_v21 = vld [vmem:[#allocation6 + $0xa8] sm:$0xff]  ;;  %v8002_v22 = vpack.c.bf16 %v1549_v13, %v1548_v18  ;;  %v8034_v23 = vpack.c.bf16 %v1581_v14, %v1580_v19 }
 0x188   : > { %746 = vst.msk [vmem:[#allocation2 + $0x70] sm:$0xff] %vm731_vm0, %v713_v26  ;;  %818 = vst.msk [vmem:[#allocation2 + $0x170] sm:$0xff] %vm731_vm0, %v786_v27  ;;  %v1359_v20 = vld [vmem:[#allocation6 + $0x98] sm:$0xff]  ;;  %v1358_v24 = vld [vmem:[#allocation6 + $0x90] sm:$0xff] }
 0x189   : > { %890 = vst.msk [vmem:[#allocation2 + $0x270] sm:$0xff] %vm731_vm0, %v858_v28  ;;  %962 = vst.msk [vmem:[#allocation2 + $0x370] sm:$0xff] %vm731_vm0, %v930_v32  ;;  %v1550_v26 = vld [vmem:[#allocation2 + $0x210] sm:$0xff]  ;;  %v8004_v28 = vpack.c.bf16 %v1567_v15, %v1566_v9  ;;  %v1583_v32 = vld [vmem:[#allocation2 + $0x318] sm:$0xff] }
 0x18a   : > { %1034 = vst.msk [vmem:[#allocation2 + $0x470] sm:$0xff] %vm731_vm0, %v1002_v33  ;;  %1106 = vst.msk [vmem:[#allocation2 + $0x570] sm:$0xff] %vm731_vm0, %v1074_v34  ;;  %v1515_v57 = vld [vmem:[#allocation2 + $0xf8] sm:$0xff]  ;;  %v1582_v27 = vld [vmem:[#allocation2 + $0x310] sm:$0xff] }
 0x18b   : > { %1178 = vst.msk [vmem:[#allocation2 + $0x670] sm:$0xff] %vm731_vm0, %v1146_v35  ;;  %1250 = vst.msk [vmem:[#allocation2 + $0x770] sm:$0xff] %vm731_vm0, %v1218_v48  ;;  %v1547_v60 = vld [vmem:[#allocation2 + $0x1f8] sm:$0xff]  ;;  %v7964_v62 = vpack.c.bf16 %v1515_v57, %v1514_v38  ;;  %v1568_v33 = vld [vmem:[#allocation2 + $0x2a0] sm:$0xff]  ;;  %v8006_v48 = vpack.c.bf16 %v1551_v31, %v1550_v26 }
 0x18c   : > { %1322 = vst.msk [vmem:[#allocation2 + $0x870] sm:$0xff] %vm731_vm0, %v1290_v30  ;;  %747 = vst.msk [vmem:[#allocation2 + $0x78] sm:$0xff] %vm731_vm0, %v714_v39  ;;  %v7996_v56 = vpack.c.bf16 %v1547_v60, %v1546_v45  ;;  %v1569_v34 = vld [vmem:[#allocation2 + $0x2a8] sm:$0xff]  ;;  %v1600_v35 = vld [vmem:[#allocation2 + $0x3a0] sm:$0xff]  ;;  %v8038_v30 = vpack.c.bf16 %v1583_v32, %v1582_v27 }
 0x18d   : > { %819 = vst.msk [vmem:[#allocation2 + $0x178] sm:$0xff] %vm731_vm0, %v787_v49  ;;  %891 = vst.msk [vmem:[#allocation2 + $0x278] sm:$0xff] %vm731_vm0, %v859_v42  ;;  %7965 = vmatprep.subr.bf16.mxu0 %v7964_v62  ;;  %v1376_v39 = vld [vmem:[#allocation6 + $0x120] sm:$0xff]  ;;  %v1378_v49 = vld [vmem:[#allocation6 + $0x130] sm:$0xff]  ;;  %v8008_v41 = vpack.c.bf16 %v1569_v34, %v1568_v33  ;;  %v8040_v42 = vpack.c.bf16 %v1601_v36, %v1600_v35 }
 0x18e   : > { %963 = vst.msk [vmem:[#allocation2 + $0x378] sm:$0xff] %vm731_vm0, %v931_v43  ;;  %1035 = vst.msk [vmem:[#allocation2 + $0x478] sm:$0xff] %vm731_vm0, %v1003_v51  ;;  %7997 = vmatprep.subr.bf16.mxu1 %v7996_v56  ;;  %v1552_v50 = vld [vmem:[#allocation2 + $0x220] sm:$0xff]  ;;  %v1553_v43 = vld [vmem:[#allocation2 + $0x228] sm:$0xff] }
 0x18f   : > { %1107 = vst.msk [vmem:[#allocation2 + $0x578] sm:$0xff] %vm731_vm0, %v1075_v1  ;;  %1179 = vst.msk [vmem:[#allocation2 + $0x678] sm:$0xff] %vm731_vm0, %v1147_v3  ;;  %v1498_v59 = vld [vmem:[#allocation2 + $0x70] sm:$0xff]  ;;  %v1584_v40 = vld [vmem:[#allocation2 + $0x320] sm:$0xff]  ;;  %v8010_v45 = vpack.c.bf16 %v1553_v43, %v1552_v50 }
 0x190   : > { %1251 = vst.msk [vmem:[#allocation2 + $0x778] sm:$0xff] %vm731_vm0, %v1219_v52  ;;  %1323 = vst.msk [vmem:[#allocation2 + $0x878] sm:$0xff] %vm731_vm0, %v1291_v44  ;;  %v1530_v61 = vld [vmem:[#allocation2 + $0x170] sm:$0xff]  ;;  %v1585_v51 = vld [vmem:[#allocation2 + $0x328] sm:$0xff] }
 0x191   : > { %v1570_v1 = vld [vmem:[#allocation2 + $0x2b0] sm:$0xff]  ;;  %v1571_v3 = vld [vmem:[#allocation2 + $0x2b8] sm:$0xff]  ;;  %v8042_v53 = vpack.c.bf16 %v1585_v51, %v1584_v40  ;;  %v1394_v55 = vld [vmem:[#allocation6 + $0x1b0] sm:$0xff] }
 0x192   : > { %v1602_v52 = vld [vmem:[#allocation2 + $0x3b0] sm:$0xff]  ;;  %v1603_v44 = vld [vmem:[#allocation2 + $0x3b8] sm:$0xff]  ;;  %v8012_v62 = vpack.c.bf16 %v1571_v3, %v1570_v1  ;;  %v1572_v58 = vld [vmem:[#allocation2 + $0x2c0] sm:$0xff] }
 0x193   : > { %v1499_v0 = vld [vmem:[#allocation2 + $0x78] sm:$0xff]  ;;  %v1554_v57 = vld [vmem:[#allocation2 + $0x230] sm:$0xff]  ;;  %v8044_v56 = vpack.c.bf16 %v1603_v44, %v1602_v52  ;;  %v1573_v63 = vld [vmem:[#allocation2 + $0x2c8] sm:$0xff] }
 0x194   : > { %v1531_v2 = vld [vmem:[#allocation2 + $0x178] sm:$0xff]  ;;  %v7966_v4 = vpack.c.bf16 %v1499_v0, %v1498_v59  ;;  %v1586_v60 = vld [vmem:[#allocation2 + $0x330] sm:$0xff]  ;;  %v1604_v0 = vld [vmem:[#allocation2 + $0x3c0] sm:$0xff]  ;;  %v8016_v13 = vpack.c.bf16 %v1573_v63, %v1572_v58 }
 0x195   : > { %v7998_v6 = vpack.c.bf16 %v1531_v2, %v1530_v61  ;;  %v1397_v38 = vld [vmem:[#allocation6 + $0x1c8] sm:$0xff]  ;;  %v1396_v54 = vld [vmem:[#allocation6 + $0x1c0] sm:$0xff]  ;;  %v1605_v2 = vld [vmem:[#allocation2 + $0x3c8] sm:$0xff] }
 0x196   : > { %7967 = vmatpush3.bf16.msra.mxu0 %v7966_v4  ;;  %v1555_v59 = vld [vmem:[#allocation2 + $0x238] sm:$0xff]  ;;  %v8048_v14 = vpack.c.bf16 %v1605_v2, %v1604_v0  ;;  %v1557_v9 = vld [vmem:[#allocation2 + $0x248] sm:$0xff]  ;;  %v1574_v16 = vld [vmem:[#allocation2 + $0x2d0] sm:$0xff] }
 0x197   : > { %7999 = vmatpush3.bf16.msra.mxu1 %v7998_v6  ;;  %8001 = vmatprep.subr.bf16.mxu0 %v8000_v5  ;;  %v1587_v61 = vld [vmem:[#allocation2 + $0x338] sm:$0xff]  ;;  %v1415_v6 = vld [vmem:[#allocation6 + $0x258] sm:$0xff]  ;;  %v8014_v7 = vpack.c.bf16 %v1555_v59, %v1554_v57  ;;  %v1556_v5 = vld [vmem:[#allocation2 + $0x240] sm:$0xff] }
 0x198   : > { %8033 = vmatprep.subr.bf16.mxu1 %v8032_v12  ;;  %v1413_v4 = vld [vmem:[#allocation6 + $0x248] sm:$0xff]  ;;  %v8046_v8 = vpack.c.bf16 %v1587_v61, %v1586_v60  ;;  %v1589_v15 = vld [vmem:[#allocation2 + $0x348] sm:$0xff]  ;;  %v1606_v18 = vld [vmem:[#allocation2 + $0x3d0] sm:$0xff] }
 0x199   : > { %1844 = vmatmul.mubr.f32.vlgmr.msra.gmra.mrb[0].mxu0 %v1340_v10  ;;  %v1412_v10 = vld [vmem:[#allocation6 + $0x240] sm:$0xff]  ;;  %v1588_v12 = vld [vmem:[#allocation2 + $0x340] sm:$0xff]  ;;  %v1577_v34 = vld [vmem:[#allocation2 + $0x2e8] sm:$0xff] }
 0x19a   : > { %1949 = vmatmul.mubr.f32.vlgmr.msra.gmra.mrb[0].mxu1 %v1342_v11  ;;  %8003 = vmatpush3.bf16.msra.mxu0 %v8002_v22  ;;  %v1414_v11 = vld [vmem:[#allocation6 + $0x250] sm:$0xff]  ;;  %v1575_v17 = vld [vmem:[#allocation2 + $0x2d8] sm:$0xff]  ;;  %v8018_v22 = vpack.c.bf16 %v1557_v9, %v1556_v5  ;;  %v1558_v26 = vld [vmem:[#allocation2 + $0x250] sm:$0xff] }
 0x19b   : > { %8035 = vmatpush3.bf16.msra.mxu1 %v8034_v23  ;;  %8005 = vmatprep.subr.bf16.mxu0 %v8004_v28  ;;  %v1607_v19 = vld [vmem:[#allocation2 + $0x3d8] sm:$0xff]  ;;  %v8050_v23 = vpack.c.bf16 %v1589_v15, %v1588_v12  ;;  %v1590_v27 = vld [vmem:[#allocation2 + $0x350] sm:$0xff]  ;;  %v8020_v28 = vpack.c.bf16 %v1575_v17, %v1574_v16  ;;  %v1576_v33 = vld [vmem:[#allocation2 + $0x2e0] sm:$0xff] }
 0x19c   : > { %8037 = vmatprep.subr.bf16.mxu1 %v8036_v29  ;;  %1848 = vmatprep.mubr.f32.mxu0 %v1359_v20  ;;  %v1431_v20 = vld [vmem:[#allocation6 + $0x2d8] sm:$0xff]  ;;  %v8052_v29 = vpack.c.bf16 %v1607_v19, %v1606_v18  ;;  %v1559_v31 = vld [vmem:[#allocation2 + $0x258] sm:$0xff]  ;;  %v1608_v35 = vld [vmem:[#allocation2 + $0x3e0] sm:$0xff] }
 0x19d   : > { %1953 = vmatprep.mubr.f32.mxu1 %v1361_v21  ;;  %1849 = vmatmul.mubr.f32.gmra.mrb[2].mxu0 %v1358_v24  ;;  %v1433_v21 = vld [vmem:[#allocation6 + $0x2e8] sm:$0xff]  ;;  %v1430_v24 = vld [vmem:[#allocation6 + $0x2d0] sm:$0xff]  ;;  %v1578_v1 = vld [vmem:[#allocation2 + $0x2f0] sm:$0xff] }
 0x19e   : > { %1954 = vmatmul.mubr.f32.gmra.mrb[2].mxu1 %v1360_v25  ;;  %8007 = vmatpush3.bf16.msra.mxu0 %v8006_v48  ;;  %v1432_v25 = vld [vmem:[#allocation6 + $0x2e0] sm:$0xff]  ;;  %v1609_v36 = vld [vmem:[#allocation2 + $0x3e8] sm:$0xff]  ;;  %v8022_v48 = vpack.c.bf16 %v1559_v31, %v1558_v26  ;;  %v1560_v50 = vld [vmem:[#allocation2 + $0x260] sm:$0xff] }
 0x19f   : > { %8039 = vmatpush3.bf16.msra.mxu1 %v8038_v30  ;;  %8009 = vmatprep.subr.bf16.mxu0 %v8008_v41  ;;  %v1591_v32 = vld [vmem:[#allocation2 + $0x358] sm:$0xff]  ;;  %v1592_v40 = vld [vmem:[#allocation2 + $0x360] sm:$0xff]  ;;  %v8024_v41 = vpack.c.bf16 %v1577_v34, %v1576_v33  ;;  %v1561_v43 = vld [vmem:[#allocation2 + $0x268] sm:$0xff] }
 0x1a0   : > { %8041 = vmatprep.subr.bf16.mxu1 %v8040_v42  ;;  %1853 = vmatprep.mubr.f32.mxu0 %v1377_v46  ;;  %v1449_v46 = vld [vmem:[#allocation6 + $0x368] sm:$0xff]  ;;  %v8054_v30 = vpack.c.bf16 %v1591_v32, %v1590_v27  ;;  %v8056_v42 = vpack.c.bf16 %v1609_v36, %v1608_v35  ;;  %v1593_v51 = vld [vmem:[#allocation2 + $0x368] sm:$0xff]  ;;  %v1610_v52 = vld [vmem:[#allocation2 + $0x3f0] sm:$0xff] }
 0x1a1   : > { %1958 = vmatprep.mubr.f32.mxu1 %v1379_v47  ;;  %1854 = vmatmul.mubr.f32.gmra.mrb[4].mxu0 %v1376_v39  ;;  %v1451_v47 = vld [vmem:[#allocation6 + $0x378] sm:$0xff]  ;;  %v1448_v39 = vld [vmem:[#allocation6 + $0x360] sm:$0xff]  ;;  %v1345_v0 = vld [vmem:[#allocation6 + $0x28] sm:$0xff] }
 0x1a2   : > { %1959 = vmatmul.mubr.f32.gmra.mrb[4].mxu1 %v1378_v49  ;;  %8011 = vmatpush3.bf16.msra.mxu0 %v8010_v45  ;;  %v1450_v49 = vld [vmem:[#allocation6 + $0x370] sm:$0xff]  ;;  %v1579_v3 = vld [vmem:[#allocation2 + $0x2f8] sm:$0xff]  ;;  %v8058_v45 = vpack.c.bf16 %v1593_v51, %v1592_v40  ;;  %v1347_v2 = vld [vmem:[#allocation6 + $0x38] sm:$0xff] }
 0x1a3   : > { %8043 = vmatpush3.bf16.msra.mxu1 %v8042_v53  ;;  %8013 = vmatprep.subr.bf16.mxu0 %v8012_v62  ;;  %v1611_v44 = vld [vmem:[#allocation2 + $0x3f8] sm:$0xff]  ;;  %v1466_v53 = vld [vmem:[#allocation6 + $0x3f0] sm:$0xff]  ;;  %v8028_v57 = vpack.c.bf16 %v1579_v3, %v1578_v1  ;;  %v1630_v9 = vld [vmem:[#allocation2 + $0x490] sm:$0xff] }
 0x1a4   : > { %8045 = vmatprep.subr.bf16.mxu1 %v8044_v56  ;;  %1858 = vmatprep.mubr.f32.mxu0 %v1395_v37  ;;  %v1467_v37 = vld [vmem:[#allocation6 + $0x3f8] sm:$0xff]  ;;  %v8060_v60 = vpack.c.bf16 %v1611_v44, %v1610_v52  ;;  %v1563_v62 = vld [vmem:[#allocation2 + $0x278] sm:$0xff]  ;;  %v1612_v18 = vld [vmem:[#allocation2 + $0x400] sm:$0xff] }
 0x1a5   : > { %1963 = vmatprep.mubr.f32.mxu1 %v1397_v38  ;;  %1859 = vmatmul.mubr.f32.gmra.mrb[6].mxu0 %v1394_v55  ;;  %v8026_v38 = vpack.c.bf16 %v1561_v43, %v1560_v50  ;;  %v1469_v55 = vld [vmem:[#allocation6 + $0x408] sm:$0xff]  ;;  %v1594_v56 = vld [vmem:[#allocation2 + $0x370] sm:$0xff]  ;;  %v1629_v58 = vld [vmem:[#allocation2 + $0x488] sm:$0xff] }
 0x1a6   : > { %1964 = vmatmul.mubr.f32.gmra.mrb[6].mxu1 %v1396_v54  ;;  %8015 = vmatpush3.bf16.msra.mxu0 %v8014_v7  ;;  %v1562_v54 = vld [vmem:[#allocation2 + $0x270] sm:$0xff]  ;;  %v1595_v59 = vld [vmem:[#allocation2 + $0x378] sm:$0xff]  ;;  %v1661_v63 = vld [vmem:[#allocation2 + $0x588] sm:$0xff] }
 0x1a7   : > { %8047 = vmatpush3.bf16.msra.mxu1 %v8046_v8  ;;  %8017 = vmatprep.subr.bf16.mxu0 %v8016_v13  ;;  %v1468_v61 = vld [vmem:[#allocation6 + $0x400] sm:$0xff]  ;;  %v1628_v7 = vld [vmem:[#allocation2 + $0x480] sm:$0xff]  ;;  %v1613_v13 = vld [vmem:[#allocation2 + $0x408] sm:$0xff] }
 0x1a8   : > { %8049 = vmatprep.subr.bf16.mxu1 %v8048_v14  ;;  %1863 = vmatprep.mubr.f32.mxu0 %v1413_v4  ;;  %v8030_v4 = vpack.c.bf16 %v1563_v62, %v1562_v54  ;;  %v1660_v8 = vld [vmem:[#allocation2 + $0x580] sm:$0xff]  ;;  %v8064_v5 = vpack.c.bf16 %v1629_v58, %v1628_v7  ;;  %v1645_v14 = vld [vmem:[#allocation2 + $0x508] sm:$0xff]  ;;  %v1631_v15 = vld [vmem:[#allocation2 + $0x498] sm:$0xff] }
 0x1a9   : > { %1968 = vmatprep.mubr.f32.mxu1 %v1415_v6  ;;  %1864 = vmatmul.mubr.f32.gmra.mrb[8].mxu0 %v1412_v10  ;;  %v8062_v6 = vpack.c.bf16 %v1595_v59, %v1594_v56  ;;  %v1344_v10 = vld [vmem:[#allocation6 + $0x20] sm:$0xff]  ;;  %v8096_v12 = vpack.c.bf16 %v1661_v63, %v1660_v8  ;;  %v1644_v19 = vld [vmem:[#allocation2 + $0x500] sm:$0xff]  ;;  %v1633_v34 = vld [vmem:[#allocation2 + $0x4a8] sm:$0xff] }
 0x1aa   : > { %1969 = vmatmul.mubr.f32.gmra.mrb[8].mxu1 %v1414_v11  ;;  %8019 = vmatpush3.bf16.msra.mxu0 %v8018_v22  ;;  %v1346_v11 = vld [vmem:[#allocation6 + $0x30] sm:$0xff]  ;;  %v1662_v16 = vld [vmem:[#allocation2 + $0x590] sm:$0xff]  ;;  %v1663_v17 = vld [vmem:[#allocation2 + $0x598] sm:$0xff]  ;;  %v8066_v22 = vpack.c.bf16 %v1613_v13, %v1612_v18 }
 0x1ab   : > { %8051 = vmatpush3.bf16.msra.mxu1 %v8050_v23  ;;  %8021 = vmatprep.subr.bf16.mxu0 %v8020_v28  ;;  %v8098_v23 = vpack.c.bf16 %v1645_v14, %v1644_v19  ;;  %v1614_v26 = vld [vmem:[#allocation2 + $0x410] sm:$0xff]  ;;  %v8068_v28 = vpack.c.bf16 %v1631_v15, %v1630_v9  ;;  %v1615_v31 = vld [vmem:[#allocation2 + $0x418] sm:$0xff]  ;;  %v1632_v33 = vld [vmem:[#allocation2 + $0x4a0] sm:$0xff] }
 0x1ac   : > { %8053 = vmatprep.subr.bf16.mxu1 %v8052_v29  ;;  %1868 = vmatprep.mubr.f32.mxu0 %v1431_v20  ;;  %v1363_v20 = vld [vmem:[#allocation6 + $0xb8] sm:$0xff]  ;;  %v8100_v29 = vpack.c.bf16 %v1663_v17, %v1662_v16  ;;  %v1647_v32 = vld [vmem:[#allocation2 + $0x518] sm:$0xff]  ;;  %v1664_v35 = vld [vmem:[#allocation2 + $0x5a0] sm:$0xff] }
 0x1ad   : > { %1973 = vmatprep.mubr.f32.mxu1 %v1433_v21  ;;  %1869 = vmatmul.mubr.f32.gmra.mrb[10].mxu0 %v1430_v24  ;;  %v1365_v21 = vld [vmem:[#allocation6 + $0xc8] sm:$0xff]  ;;  %v1362_v24 = vld [vmem:[#allocation6 + $0xb0] sm:$0xff]  ;;  %v1646_v27 = vld [vmem:[#allocation2 + $0x510] sm:$0xff] }
 0x1ae   : > { %1974 = vmatmul.mubr.f32.gmra.mrb[10].mxu1 %v1432_v25  ;;  %8023 = vmatpush3.bf16.msra.mxu0 %v8022_v48  ;;  %v1364_v25 = vld [vmem:[#allocation6 + $0xc0] sm:$0xff]  ;;  %v1665_v36 = vld [vmem:[#allocation2 + $0x5a8] sm:$0xff]  ;;  %v8070_v48 = vpack.c.bf16 %v1615_v31, %v1614_v26  ;;  %v1616_v50 = vld [vmem:[#allocation2 + $0x420] sm:$0xff] }
 0x1af   : > { %8055 = vmatpush3.bf16.msra.mxu1 %v8054_v30  ;;  %8025 = vmatprep.subr.bf16.mxu0 %v8024_v41  ;;  %v8102_v30 = vpack.c.bf16 %v1647_v32, %v1646_v27  ;;  %v1648_v40 = vld [vmem:[#allocation2 + $0x520] sm:$0xff]  ;;  %v8072_v41 = vpack.c.bf16 %v1633_v34, %v1632_v33  ;;  %v1617_v43 = vld [vmem:[#allocation2 + $0x428] sm:$0xff]  ;;  %v1634_v1 = vld [vmem:[#allocation2 + $0x4b0] sm:$0xff] }
 0x1b0   : > { %8057 = vmatprep.subr.bf16.mxu1 %v8056_v42  ;;  %1873 = vmatprep.mubr.f32.mxu0 %v1449_v46  ;;  %v1381_v46 = vld [vmem:[#allocation6 + $0x148] sm:$0xff]  ;;  %v8104_v42 = vpack.c.bf16 %v1665_v36, %v1664_v35  ;;  %v1649_v51 = vld [vmem:[#allocation2 + $0x528] sm:$0xff]  ;;  %v1666_v52 = vld [vmem:[#allocation2 + $0x5b0] sm:$0xff] }
 0x1b1   : > { %1978 = vmatprep.mubr.f32.mxu1 %v1451_v47  ;;  %1874 = vmatmul.mubr.f32.gmra.mrb[12].mxu0 %v1448_v39  ;;  %v1383_v47 = vld [vmem:[#allocation6 + $0x158] sm:$0xff]  ;;  %v1380_v39 = vld [vmem:[#allocation6 + $0x140] sm:$0xff]  ;;  %v1636_v58 = vld [vmem:[#allocation2 + $0x4c0] sm:$0xff] }
 0x1b2   : > { %1979 = vmatmul.mubr.f32.gmra.mrb[12].mxu1 %v1450_v49  ;;  %8027 = vmatpush3.bf16.msra.mxu0 %v8026_v38  ;;  %v1382_v49 = vld [vmem:[#allocation6 + $0x150] sm:$0xff]  ;;  %v1635_v3 = vld [vmem:[#allocation2 + $0x4b8] sm:$0xff]  ;;  %v1638_v16 = vld [vmem:[#allocation2 + $0x4d0] sm:$0xff] }
 0x1b3   : > { %8059 = vmatpush3.bf16.msra.mxu1 %v8058_v45  ;;  %8029 = vmatprep.subr.bf16.mxu0 %v8028_v57  ;;  %v1667_v44 = vld [vmem:[#allocation2 + $0x5b8] sm:$0xff]  ;;  %v8074_v45 = vpack.c.bf16 %v1617_v43, %v1616_v50  ;;  %v1618_v57 = vld [vmem:[#allocation2 + $0x430] sm:$0xff]  ;;  %v8076_v62 = vpack.c.bf16 %v1635_v3, %v1634_v1  ;;  %v1637_v63 = vld [vmem:[#allocation2 + $0x4c8] sm:$0xff] }
 0x1b4   : > { %8061 = vmatprep.subr.bf16.mxu1 %v8060_v60  ;;  %1878 = vmatprep.mubr.f32.mxu0 %v1467_v37  ;;  %v1399_v37 = vld [vmem:[#allocation6 + $0x1d8] sm:$0xff]  ;;  %v1401_v38 = vld [vmem:[#allocation6 + $0x1e8] sm:$0xff]  ;;  %v1400_v54 = vld [vmem:[#allocation6 + $0x1e0] sm:$0xff]  ;;  %v8108_v56 = vpack.c.bf16 %v1667_v44, %v1666_v52  ;;  %v8080_v13 = vpack.c.bf16 %v1637_v63, %v1636_v58 }
 0x1b5   : > { %1983 = vmatprep.mubr.f32.mxu1 %v1469_v55  ;;  %1879 = vmatmul.mubr.f32.gmra.mrb[14].mxu0 %v1466_v53  ;;  %v8106_v53 = vpack.c.bf16 %v1649_v51, %v1648_v40  ;;  %v1398_v55 = vld [vmem:[#allocation6 + $0x1d0] sm:$0xff]  ;;  %v1650_v60 = vld [vmem:[#allocation2 + $0x530] sm:$0xff]  ;;  %v1619_v59 = vld [vmem:[#allocation2 + $0x438] sm:$0xff] }
 0x1b6   : > { %1984 = vmatmul.mubr.f32.gmra.mrb[14].mxu1 %v1468_v61  ;;  %8031 = vmatpush3.bf16.msra.mxu0 %v8030_v4  ;;  %v1651_v61 = vld [vmem:[#allocation2 + $0x538] sm:$0xff]  ;;  %v8078_v7 = vpack.c.bf16 %v1619_v59, %v1618_v57  ;;  %v1621_v9 = vld [vmem:[#allocation2 + $0x448] sm:$0xff]  ;;  %v1670_v18 = vld [vmem:[#allocation2 + $0x5d0] sm:$0xff] }
 0x1b7   : > { %8063 = vmatpush3.bf16.msra.mxu1 %v8062_v6  ;;  %8065 = vmatprep.subr.bf16.mxu0 %v8064_v5  ;;  %v1417_v4 = vld [vmem:[#allocation6 + $0x268] sm:$0xff]  ;;  %v1419_v6 = vld [vmem:[#allocation6 + $0x278] sm:$0xff]  ;;  %v8110_v8 = vpack.c.bf16 %v1651_v61, %v1650_v60  ;;  %v1472_v61 = vld [vmem:[#allocation6 + $0x420] sm:$0xff] }
 0x1b8   : > { %8097 = vmatprep.subr.bf16.mxu1 %v8096_v12  ;;  %2053 = vmatprep.mubr.f32.mxu0 %v1345_v0  ;;  %v1668_v0 = vld [vmem:[#allocation2 + $0x5c0] sm:$0xff]  ;;  %v1653_v15 = vld [vmem:[#allocation2 + $0x548] sm:$0xff]  ;;  %v1639_v17 = vld [vmem:[#allocation2 + $0x4d8] sm:$0xff] }
 0x1b9   : > { %2158 = vmatprep.mubr.f32.mxu1 %v1347_v2  ;;  %2054 = vmatmul.mubr.f32.vlgmr.msra.gmra.mrb[16].mxu0 %v1344_v10  ;;  %v1669_v2 = vld [vmem:[#allocation2 + $0x5c8] sm:$0xff]  ;;  %v1416_v10 = vld [vmem:[#allocation6 + $0x260] sm:$0xff]  ;;  %v1620_v5 = vld [vmem:[#allocation2 + $0x440] sm:$0xff] }
 0x1ba   : > { %2159 = vmatmul.mubr.f32.vlgmr.msra.gmra.mrb[16].mxu1 %v1346_v11  ;;  %8067 = vmatpush3.bf16.msra.mxu0 %v8066_v22  ;;  %v1418_v11 = vld [vmem:[#allocation6 + $0x270] sm:$0xff]  ;;  %v8112_v14 = vpack.c.bf16 %v1669_v2, %v1668_v0  ;;  %v1671_v19 = vld [vmem:[#allocation2 + $0x5d8] sm:$0xff]  ;;  %v8082_v22 = vpack.c.bf16 %v1621_v9, %v1620_v5  ;;  %v1622_v26 = vld [vmem:[#allocation2 + $0x450] sm:$0xff] }
 0x1bb   : > { %8099 = vmatpush3.bf16.msra.mxu1 %v8098_v23  ;;  %8069 = vmatprep.subr.bf16.mxu0 %v8068_v28  ;;  %v1652_v12 = vld [vmem:[#allocation2 + $0x540] sm:$0xff]  ;;  %v1654_v27 = vld [vmem:[#allocation2 + $0x550] sm:$0xff]  ;;  %v8084_v28 = vpack.c.bf16 %v1639_v17, %v1638_v16  ;;  %v1623_v31 = vld [vmem:[#allocation2 + $0x458] sm:$0xff] }
 0x1bc   : > { %8101 = vmatprep.subr.bf16.mxu1 %v8100_v29  ;;  %2058 = vmatprep.mubr.f32.mxu0 %v1363_v20  ;;  %v1435_v20 = vld [vmem:[#allocation6 + $0x2f8] sm:$0xff]  ;;  %v8114_v23 = vpack.c.bf16 %v1653_v15, %v1652_v12  ;;  %v8116_v29 = vpack.c.bf16 %v1671_v19, %v1670_v18  ;;  %v1655_v32 = vld [vmem:[#allocation2 + $0x558] sm:$0xff]  ;;  %v1640_v33 = vld [vmem:[#allocation2 + $0x4e0] sm:$0xff] }
 0x1bd   : > { %2163 = vmatprep.mubr.f32.mxu1 %v1365_v21  ;;  %2059 = vmatmul.mubr.f32.gmra.mrb[18].mxu0 %v1362_v24  ;;  %v1437_v21 = vld [vmem:[#allocation6 + $0x308] sm:$0xff]  ;;  %v1434_v24 = vld [vmem:[#allocation6 + $0x2f0] sm:$0xff]  ;;  %v1642_v1 = vld [vmem:[#allocation2 + $0x4f0] sm:$0xff] }
 0x1be   : > { %2164 = vmatmul.mubr.f32.gmra.mrb[18].mxu1 %v1364_v25  ;;  %8071 = vmatpush3.bf16.msra.mxu0 %v8070_v48  ;;  %v1436_v25 = vld [vmem:[#allocation6 + $0x300] sm:$0xff]  ;;  %v1641_v34 = vld [vmem:[#allocation2 + $0x4e8] sm:$0xff]  ;;  %v1672_v35 = vld [vmem:[#allocation2 + $0x5e0] sm:$0xff]  ;;  %v8086_v48 = vpack.c.bf16 %v1623_v31, %v1622_v26 }
 0x1bf   : > { %8103 = vmatpush3.bf16.msra.mxu1 %v8102_v30  ;;  %8073 = vmatprep.subr.bf16.mxu0 %v8072_v41  ;;  %v1673_v36 = vld [vmem:[#allocation2 + $0x5e8] sm:$0xff]  ;;  %v8118_v30 = vpack.c.bf16 %v1655_v32, %v1654_v27  ;;  %v1624_v50 = vld [vmem:[#allocation2 + $0x460] sm:$0xff]  ;;  %v8088_v41 = vpack.c.bf16 %v1641_v34, %v1640_v33  ;;  %v1643_v3 = vld [vmem:[#allocation2 + $0x4f8] sm:$0xff] }
 0x1c0   : > { %8105 = vmatprep.subr.bf16.mxu1 %v8104_v42  ;;  %2063 = vmatprep.mubr.f32.mxu0 %v1381_v46  ;;  %v1453_v46 = vld [vmem:[#allocation6 + $0x388] sm:$0xff]  ;;  %v8120_v42 = vpack.c.bf16 %v1673_v36, %v1672_v35  ;;  %v1625_v43 = vld [vmem:[#allocation2 + $0x468] sm:$0xff]  ;;  %v1674_v52 = vld [vmem:[#allocation2 + $0x5f0] sm:$0xff]  ;;  %v8092_v57 = vpack.c.bf16 %v1643_v3, %v1642_v1 }
 0x1c1   : > { %2168 = vmatprep.mubr.f32.mxu1 %v1383_v47  ;;  %2064 = vmatmul.mubr.f32.gmra.mrb[20].mxu0 %v1380_v39  ;;  %v1455_v47 = vld [vmem:[#allocation6 + $0x398] sm:$0xff]  ;;  %v1452_v39 = vld [vmem:[#allocation6 + $0x380] sm:$0xff]  ;;  %v1656_v40 = vld [vmem:[#allocation2 + $0x560] sm:$0xff] }
 0x1c2   : > { %2169 = vmatmul.mubr.f32.gmra.mrb[20].mxu1 %v1382_v49  ;;  %8075 = vmatpush3.bf16.msra.mxu0 %v8074_v45  ;;  %v1454_v49 = vld [vmem:[#allocation6 + $0x390] sm:$0xff]  ;;  %v1675_v44 = vld [vmem:[#allocation2 + $0x5f8] sm:$0xff]  ;;  %v1694_v15 = vld [vmem:[#allocation2 + $0x690] sm:$0xff] }
 0x1c3   : > { %8107 = vmatpush3.bf16.msra.mxu1 %v8106_v53  ;;  %8077 = vmatprep.subr.bf16.mxu0 %v8076_v62  ;;  %v1657_v51 = vld [vmem:[#allocation2 + $0x568] sm:$0xff]  ;;  %v8124_v60 = vpack.c.bf16 %v1675_v44, %v1674_v52  ;;  %v1627_v62 = vld [vmem:[#allocation2 + $0x478] sm:$0xff]  ;;  %v1692_v0 = vld [vmem:[#allocation2 + $0x680] sm:$0xff] }
 0x1c4   : > { %8109 = vmatprep.subr.bf16.mxu1 %v8108_v56  ;;  %2068 = vmatprep.mubr.f32.mxu0 %v1399_v37  ;;  %v1471_v37 = vld [vmem:[#allocation6 + $0x418] sm:$0xff]  ;;  %v8122_v45 = vpack.c.bf16 %v1657_v51, %v1656_v40  ;;  %v1470_v53 = vld [vmem:[#allocation6 + $0x410] sm:$0xff]  ;;  %v1659_v59 = vld [vmem:[#allocation2 + $0x578] sm:$0xff] }
 0x1c5   : > { %2173 = vmatprep.mubr.f32.mxu1 %v1401_v38  ;;  %2069 = vmatmul.mubr.f32.gmra.mrb[22].mxu0 %v1398_v55  ;;  %v8090_v38 = vpack.c.bf16 %v1625_v43, %v1624_v50  ;;  %v1473_v55 = vld [vmem:[#allocation6 + $0x428] sm:$0xff]  ;;  %v1658_v56 = vld [vmem:[#allocation2 + $0x570] sm:$0xff]  ;;  %v1693_v58 = vld [vmem:[#allocation2 + $0x688] sm:$0xff] }
 0x1c6   : > { %2174 = vmatmul.mubr.f32.gmra.mrb[22].mxu1 %v1400_v54  ;;  %8079 = vmatpush3.bf16.msra.mxu0 %v8078_v7  ;;  %v1626_v54 = vld [vmem:[#allocation2 + $0x470] sm:$0xff]  ;;  %v1725_v63 = vld [vmem:[#allocation2 + $0x788] sm:$0xff]  ;;  %v1724_v2 = vld [vmem:[#allocation2 + $0x780] sm:$0xff]  ;;  %v8126_v7 = vpack.c.bf16 %v1659_v59, %v1658_v56  ;;  %v8128_v5 = vpack.c.bf16 %v1693_v58, %v1692_v0 }
 0x1c7   : > { %8111 = vmatpush3.bf16.msra.mxu1 %v8110_v8  ;;  %8081 = vmatprep.subr.bf16.mxu0 %v8080_v13  ;;  %v1348_v8 = vld [vmem:[#allocation6 + $0x40] sm:$0xff]  ;;  %v8160_v12 = vpack.c.bf16 %v1725_v63, %v1724_v2  ;;  %v1676_v13 = vld [vmem:[#allocation2 + $0x600] sm:$0xff]  ;;  %v1709_v9 = vld [vmem:[#allocation2 + $0x708] sm:$0xff] }
 0x1c8   : > { %8113 = vmatprep.subr.bf16.mxu1 %v8112_v14  ;;  %2073 = vmatprep.mubr.f32.mxu0 %v1417_v4  ;;  %v1349_v4 = vld [vmem:[#allocation6 + $0x48] sm:$0xff]  ;;  %v1677_v14 = vld [vmem:[#allocation2 + $0x608] sm:$0xff]  ;;  %v1726_v17 = vld [vmem:[#allocation2 + $0x790] sm:$0xff] }
 0x1c9   : > { %2178 = vmatprep.mubr.f32.mxu1 %v1419_v6  ;;  %2074 = vmatmul.mubr.f32.gmra.mrb[24].mxu0 %v1416_v10  ;;  %v8094_v6 = vpack.c.bf16 %v1627_v62, %v1626_v54  ;;  %v1351_v10 = vld [vmem:[#allocation6 + $0x58] sm:$0xff]  ;;  %v1695_v16 = vld [vmem:[#allocation2 + $0x698] sm:$0xff]  ;;  %v1708_v19 = vld [vmem:[#allocation2 + $0x700] sm:$0xff] }
 0x1ca   : > { %2179 = vmatmul.mubr.f32.gmra.mrb[24].mxu1 %v1418_v11  ;;  %8083 = vmatpush3.bf16.msra.mxu0 %v8082_v22  ;;  %v1350_v11 = vld [vmem:[#allocation6 + $0x50] sm:$0xff]  ;;  %v1727_v18 = vld [vmem:[#allocation2 + $0x798] sm:$0xff]  ;;  %v8130_v22 = vpack.c.bf16 %v1677_v14, %v1676_v13  ;;  %v1710_v27 = vld [vmem:[#allocation2 + $0x710] sm:$0xff] }
 0x1cb   : > { %8115 = vmatpush3.bf16.msra.mxu1 %v8114_v23  ;;  %8085 = vmatprep.subr.bf16.mxu0 %v8084_v28  ;;  %v8162_v23 = vpack.c.bf16 %v1709_v9, %v1708_v19  ;;  %v1679_v26 = vld [vmem:[#allocation2 + $0x618] sm:$0xff]  ;;  %v8132_v28 = vpack.c.bf16 %v1695_v16, %v1694_v15  ;;  %v1696_v33 = vld [vmem:[#allocation2 + $0x6a0] sm:$0xff]  ;;  %v1697_v34 = vld [vmem:[#allocation2 + $0x6a8] sm:$0xff] }
 0x1cc   : > { %8117 = vmatprep.subr.bf16.mxu1 %v8116_v29  ;;  %2078 = vmatprep.mubr.f32.mxu0 %v1435_v20  ;;  %v1367_v20 = vld [vmem:[#allocation6 + $0xd8] sm:$0xff]  ;;  %v8164_v29 = vpack.c.bf16 %v1727_v18, %v1726_v17  ;;  %v1711_v31 = vld [vmem:[#allocation2 + $0x718] sm:$0xff]  ;;  %v1728_v35 = vld [vmem:[#allocation2 + $0x7a0] sm:$0xff] }
 0x1cd   : > { %2183 = vmatprep.mubr.f32.mxu1 %v1437_v21  ;;  %2079 = vmatmul.mubr.f32.gmra.mrb[26].mxu0 %v1434_v24  ;;  %v1369_v21 = vld [vmem:[#allocation6 + $0xe8] sm:$0xff]  ;;  %v1366_v24 = vld [vmem:[#allocation6 + $0xd0] sm:$0xff]  ;;  %v1368_v32 = vld [vmem:[#allocation6 + $0xe0] sm:$0xff] }
 0x1ce   : > { %2184 = vmatmul.mubr.f32.gmra.mrb[26].mxu1 %v1436_v25  ;;  %8087 = vmatpush3.bf16.msra.mxu0 %v8086_v48  ;;  %v1678_v25 = vld [vmem:[#allocation2 + $0x610] sm:$0xff]  ;;  %v1729_v36 = vld [vmem:[#allocation2 + $0x7a8] sm:$0xff]  ;;  %v1712_v40 = vld [vmem:[#allocation2 + $0x720] sm:$0xff] }
 0x1cf   : > { %8119 = vmatpush3.bf16.msra.mxu1 %v8118_v30  ;;  %8089 = vmatprep.subr.bf16.mxu0 %v8088_v41  ;;  %v8134_v48 = vpack.c.bf16 %v1679_v26, %v1678_v25  ;;  %v8166_v30 = vpack.c.bf16 %v1711_v31, %v1710_v27  ;;  %v1681_v50 = vld [vmem:[#allocation2 + $0x628] sm:$0xff]  ;;  %v8136_v41 = vpack.c.bf16 %v1697_v34, %v1696_v33  ;;  %v1698_v1 = vld [vmem:[#allocation2 + $0x6b0] sm:$0xff]  ;;  %v1699_v3 = vld [vmem:[#allocation2 + $0x6b8] sm:$0xff] }
 0x1d0   : > { %8121 = vmatprep.subr.bf16.mxu1 %v8120_v42  ;;  %2083 = vmatprep.mubr.f32.mxu0 %v1453_v46  ;;  %v1385_v46 = vld [vmem:[#allocation6 + $0x168] sm:$0xff]  ;;  %v8168_v42 = vpack.c.bf16 %v1729_v36, %v1728_v35  ;;  %v1713_v43 = vld [vmem:[#allocation2 + $0x728] sm:$0xff]  ;;  %v1730_v52 = vld [vmem:[#allocation2 + $0x7b0] sm:$0xff]  ;;  %v8140_v62 = vpack.c.bf16 %v1699_v3, %v1698_v1 }
 0x1d1   : > { %2188 = vmatprep.mubr.f32.mxu1 %v1455_v47  ;;  %2084 = vmatmul.mubr.f32.gmra.mrb[28].mxu0 %v1452_v39  ;;  %v1387_v47 = vld [vmem:[#allocation6 + $0x178] sm:$0xff]  ;;  %v1384_v39 = vld [vmem:[#allocation6 + $0x160] sm:$0xff]  ;;  %v1386_v51 = vld [vmem:[#allocation6 + $0x170] sm:$0xff] }
 0x1d2   : > { %2189 = vmatmul.mubr.f32.gmra.mrb[28].mxu1 %v1454_v49  ;;  %8091 = vmatpush3.bf16.msra.mxu0 %v8090_v38  ;;  %v1680_v49 = vld [vmem:[#allocation2 + $0x620] sm:$0xff]  ;;  %v1731_v44 = vld [vmem:[#allocation2 + $0x7b8] sm:$0xff]  ;;  %v1682_v54 = vld [vmem:[#allocation2 + $0x630] sm:$0xff] }
 0x1d3   : > { %8123 = vmatpush3.bf16.msra.mxu1 %v8122_v45  ;;  %8093 = vmatprep.subr.bf16.mxu0 %v8092_v57  ;;  %v1405_v38 = vld [vmem:[#allocation6 + $0x208] sm:$0xff]  ;;  %v8138_v45 = vpack.c.bf16 %v1681_v50, %v1680_v49  ;;  %v8172_v56 = vpack.c.bf16 %v1731_v44, %v1730_v52  ;;  %v1701_v63 = vld [vmem:[#allocation2 + $0x6c8] sm:$0xff]  ;;  %v1702_v16 = vld [vmem:[#allocation2 + $0x6d0] sm:$0xff] }
 0x1d4   : > { %8125 = vmatprep.subr.bf16.mxu1 %v8124_v60  ;;  %2088 = vmatprep.mubr.f32.mxu0 %v1471_v37  ;;  %v1403_v37 = vld [vmem:[#allocation6 + $0x1f8] sm:$0xff]  ;;  %v1683_v57 = vld [vmem:[#allocation2 + $0x638] sm:$0xff]  ;;  %v1700_v58 = vld [vmem:[#allocation2 + $0x6c0] sm:$0xff] }
 0x1d5   : > { %2193 = vmatprep.mubr.f32.mxu1 %v1473_v55  ;;  %2089 = vmatmul.mubr.f32.gmra.mrb[30].mxu0 %v1470_v53  ;;  %v8170_v53 = vpack.c.bf16 %v1713_v43, %v1712_v40  ;;  %v1402_v55 = vld [vmem:[#allocation6 + $0x1f0] sm:$0xff]  ;;  %v1714_v60 = vld [vmem:[#allocation2 + $0x730] sm:$0xff]  ;;  %v1715_v59 = vld [vmem:[#allocation2 + $0x738] sm:$0xff]  ;;  %v8144_v13 = vpack.c.bf16 %v1701_v63, %v1700_v58 }
 0x1d6   : > { %2194 = vmatmul.mubr.f32.gmra.mrb[30].mxu1 %v1472_v61  ;;  %8095 = vmatpush3.bf16.msra.mxu0 %v8094_v6  ;;  %v1404_v61 = vld [vmem:[#allocation6 + $0x200] sm:$0xff]  ;;  %v1732_v0 = vld [vmem:[#allocation2 + $0x7c0] sm:$0xff]  ;;  %v1733_v2 = vld [vmem:[#allocation2 + $0x7c8] sm:$0xff] }
 0x1d7   : > { %8127 = vmatpush3.bf16.msra.mxu1 %v8126_v7  ;;  %8129 = vmatprep.subr.bf16.mxu0 %v8128_v5  ;;  %v1423_v6 = vld [vmem:[#allocation6 + $0x298] sm:$0xff]  ;;  %v8142_v7 = vpack.c.bf16 %v1683_v57, %v1682_v54  ;;  %v8176_v14 = vpack.c.bf16 %v1733_v2, %v1732_v0  ;;  %v1422_v15 = vld [vmem:[#allocation6 + $0x290] sm:$0xff]  ;;  %v1703_v17 = vld [vmem:[#allocation2 + $0x6d8] sm:$0xff] }
 0x1d8   : > { %8161 = vmatprep.subr.bf16.mxu1 %v8160_v12  ;;  %2263 = vmatprep.mubr.f32.mxu0 %v1349_v4  ;;  %v1421_v4 = vld [vmem:[#allocation6 + $0x288] sm:$0xff]  ;;  %v1685_v5 = vld [vmem:[#allocation2 + $0x648] sm:$0xff]  ;;  %v1734_v18 = vld [vmem:[#allocation2 + $0x7d0] sm:$0xff] }
 0x1d9   : > { %2368 = vmatprep.mubr.f32.mxu1 %v1351_v10  ;;  %2264 = vmatmul.mubr.f32.vlgmr.msra.gmra.mrb[32].mxu0 %v1348_v8  ;;  %v8174_v8 = vpack.c.bf16 %v1715_v59, %v1714_v60  ;;  %v1420_v10 = vld [vmem:[#allocation6 + $0x280] sm:$0xff]  ;;  %v1716_v12 = vld [vmem:[#allocation2 + $0x740] sm:$0xff]  ;;  %v1717_v9 = vld [vmem:[#allocation2 + $0x748] sm:$0xff] }
 0x1da   : > { %2369 = vmatmul.mubr.f32.vlgmr.msra.gmra.mrb[32].mxu1 %v1350_v11  ;;  %8131 = vmatpush3.bf16.msra.mxu0 %v8130_v22  ;;  %v1684_v11 = vld [vmem:[#allocation2 + $0x640] sm:$0xff]  ;;  %v1735_v19 = vld [vmem:[#allocation2 + $0x7d8] sm:$0xff]  ;;  %v1686_v25 = vld [vmem:[#allocation2 + $0x650] sm:$0xff] }
 0x1db   : > { %8163 = vmatpush3.bf16.msra.mxu1 %v8162_v23  ;;  %8133 = vmatprep.subr.bf16.mxu0 %v8132_v28  ;;  %v8146_v22 = vpack.c.bf16 %v1685_v5, %v1684_v11  ;;  %v8178_v23 = vpack.c.bf16 %v1717_v9, %v1716_v12  ;;  %v1687_v26 = vld [vmem:[#allocation2 + $0x658] sm:$0xff]  ;;  %v1718_v27 = vld [vmem:[#allocation2 + $0x750] sm:$0xff]  ;;  %v8148_v28 = vpack.c.bf16 %v1703_v17, %v1702_v16  ;;  %v1704_v33 = vld [vmem:[#allocation2 + $0x6e0] sm:$0xff] }
 0x1dc   : > { %8165 = vmatprep.subr.bf16.mxu1 %v8164_v29  ;;  %2268 = vmatprep.mubr.f32.mxu0 %v1367_v20  ;;  %v1439_v20 = vld [vmem:[#allocation6 + $0x318] sm:$0xff]  ;;  %v8180_v29 = vpack.c.bf16 %v1735_v19, %v1734_v18  ;;  %v1719_v31 = vld [vmem:[#allocation2 + $0x758] sm:$0xff]  ;;  %v1736_v35 = vld [vmem:[#allocation2 + $0x7e0] sm:$0xff] }
 0x1dd   : > { %2373 = vmatprep.mubr.f32.mxu1 %v1369_v21  ;;  %2269 = vmatmul.mubr.f32.gmra.mrb[34].mxu0 %v1366_v24  ;;  %v1441_v21 = vld [vmem:[#allocation6 + $0x328] sm:$0xff]  ;;  %v1438_v24 = vld [vmem:[#allocation6 + $0x310] sm:$0xff]  ;;  %v1706_v1 = vld [vmem:[#allocation2 + $0x6f0] sm:$0xff] }
 0x1de   : > { %2374 = vmatmul.mubr.f32.gmra.mrb[34].mxu1 %v1368_v32  ;;  %8135 = vmatpush3.bf16.msra.mxu0 %v8134_v48  ;;  %v1440_v32 = vld [vmem:[#allocation6 + $0x320] sm:$0xff]  ;;  %v1705_v34 = vld [vmem:[#allocation2 + $0x6e8] sm:$0xff]  ;;  %v8150_v48 = vpack.c.bf16 %v1687_v26, %v1686_v25  ;;  %v1688_v49 = vld [vmem:[#allocation2 + $0x660] sm:$0xff] }
 0x1df   : > { %8167 = vmatpush3.bf16.msra.mxu1 %v8166_v30  ;;  %8137 = vmatprep.subr.bf16.mxu0 %v8136_v41  ;;  %v1737_v36 = vld [vmem:[#allocation2 + $0x7e8] sm:$0xff]  ;;  %v8182_v30 = vpack.c.bf16 %v1719_v31, %v1718_v27  ;;  %v1720_v40 = vld [vmem:[#allocation2 + $0x760] sm:$0xff]  ;;  %v8152_v41 = vpack.c.bf16 %v1705_v34, %v1704_v33  ;;  %v1707_v3 = vld [vmem:[#allocation2 + $0x6f8] sm:$0xff] }
 0x1e0   : > { %8169 = vmatprep.subr.bf16.mxu1 %v8168_v42  ;;  %2273 = vmatprep.mubr.f32.mxu0 %v1385_v46  ;;  %v1457_v46 = vld [vmem:[#allocation6 + $0x3a8] sm:$0xff]  ;;  %v1689_v50 = vld [vmem:[#allocation2 + $0x668] sm:$0xff]  ;;  %v8184_v42 = vpack.c.bf16 %v1737_v36, %v1736_v35  ;;  %v1738_v52 = vld [vmem:[#allocation2 + $0x7f0] sm:$0xff]  ;;  %v8156_v54 = vpack.c.bf16 %v1707_v3, %v1706_v1 }
 0x1e1   : > { %2378 = vmatprep.mubr.f32.mxu1 %v1387_v47  ;;  %2274 = vmatmul.mubr.f32.gmra.mrb[36].mxu0 %v1384_v39  ;;  %v1459_v47 = vld [vmem:[#allocation6 + $0x3b8] sm:$0xff]  ;;  %v1456_v39 = vld [vmem:[#allocation6 + $0x3a0] sm:$0xff]  ;;  %v1474_v59 = vld [vmem:[#allocation6 + $0x430] sm:$0xff] }
 0x1e2   : > { %2379 = vmatmul.mubr.f32.gmra.mrb[36].mxu1 %v1386_v51  ;;  %8139 = vmatpush3.bf16.msra.mxu0 %v8138_v45  ;;  %v1721_v43 = vld [vmem:[#allocation2 + $0x768] sm:$0xff]  ;;  %v1739_v44 = vld [vmem:[#allocation2 + $0x7f8] sm:$0xff]  ;;  %v1756_v2 = vld [vmem:[#allocation2 + $0x880] sm:$0xff] }
 0x1e3   : > { %8171 = vmatpush3.bf16.msra.mxu1 %v8170_v53  ;;  %8141 = vmatprep.subr.bf16.mxu0 %v8140_v62  ;;  %v1458_v51 = vld [vmem:[#allocation6 + $0x3b0] sm:$0xff]  ;;  %v1475_v45 = vld [vmem:[#allocation6 + $0x438] sm:$0xff]  ;;  %v1477_v53 = vld [vmem:[#allocation6 + $0x448] sm:$0xff]  ;;  %v8188_v57 = vpack.c.bf16 %v1739_v44, %v1738_v52 }
 0x1e4   : > { %8173 = vmatprep.subr.bf16.mxu1 %v8172_v56  ;;  %2278 = vmatprep.mubr.f32.mxu0 %v1403_v37  ;;  %v8154_v37 = vpack.c.bf16 %v1689_v50, %v1688_v49  ;;  %v1691_v60 = vld [vmem:[#allocation2 + $0x678] sm:$0xff]  ;;  %v1722_v62 = vld [vmem:[#allocation2 + $0x770] sm:$0xff]  ;;  %v1757_v58 = vld [vmem:[#allocation2 + $0x888] sm:$0xff] }
 0x1e5   : > { %2383 = vmatprep.mubr.f32.mxu1 %v1405_v38  ;;  %2279 = vmatmul.mubr.f32.gmra.mrb[38].mxu0 %v1402_v55  ;;  %v8186_v38 = vpack.c.bf16 %v1721_v43, %v1720_v40  ;;  %v1690_v55 = vld [vmem:[#allocation2 + $0x670] sm:$0xff]  ;;  %v1723_v56 = vld [vmem:[#allocation2 + $0x778] sm:$0xff]  ;;  %v1354_v11 = vld [vmem:[#allocation6 + $0x70] sm:$0xff] }
 0x1e6   : > { %2384 = vmatmul.mubr.f32.gmra.mrb[38].mxu1 %v1404_v61  ;;  %8143 = vmatpush3.bf16.msra.mxu0 %v8142_v7  ;;  %v1476_v61 = vld [vmem:[#allocation6 + $0x440] sm:$0xff]  ;;  %v8158_v63 = vpack.c.bf16 %v1691_v60, %v1690_v55  ;;  %v8190_v0 = vpack.c.bf16 %v1723_v56, %v1722_v62  ;;  %v1370_v17 = vld [vmem:[#allocation6 + $0xf0] sm:$0xff]  ;;  %v1391_v25 = vld [vmem:[#allocation6 + $0x198] sm:$0xff] }
 0x1e7   : > { %8175 = vmatpush3.bf16.msra.mxu1 %v8174_v8  ;;  %8145 = vmatprep.subr.bf16.mxu0 %v8144_v13  ;;  %v1352_v7 = vld [vmem:[#allocation6 + $0x60] sm:$0xff]  ;;  %v1355_v8 = vld [vmem:[#allocation6 + $0x78] sm:$0xff]  ;;  %v1740_v13 = vld [vmem:[#allocation2 + $0x800] sm:$0xff] }
 0x1e8   : > { %8177 = vmatprep.subr.bf16.mxu1 %v8176_v14  ;;  %2283 = vmatprep.mubr.f32.mxu0 %v1421_v4  ;;  %v1353_v4 = vld [vmem:[#allocation6 + $0x68] sm:$0xff]  ;;  %v1758_v5 = vld [vmem:[#allocation2 + $0x890] sm:$0xff]  ;;  %v1390_v31 = vld [vmem:[#allocation6 + $0x190] sm:$0xff] }
 0x1e9   : > { %2388 = vmatprep.mubr.f32.mxu1 %v1423_v6  ;;  %2284 = vmatmul.mubr.f32.gmra.mrb[40].mxu0 %v1420_v10  ;;  %v8192_v6 = vpack.c.bf16 %v1757_v58, %v1756_v2  ;;  %v1741_v10 = vld [vmem:[#allocation2 + $0x808] sm:$0xff]  ;;  %v1759_v12 = vld [vmem:[#allocation2 + $0x898] sm:$0xff]  ;;  %v1742_v18 = vld [vmem:[#allocation2 + $0x810] sm:$0xff] }
 0x1ea   : > { %2389 = vmatmul.mubr.f32.gmra.mrb[40].mxu1 %v1422_v15  ;;  %8147 = vmatpush3.bf16.msra.mxu0 %v8146_v22  ;;  %v1371_v14 = vld [vmem:[#allocation6 + $0xf8] sm:$0xff]  ;;  %v8194_v9 = vpack.c.bf16 %v1741_v10, %v1740_v13  ;;  %v1373_v15 = vld [vmem:[#allocation6 + $0x108] sm:$0xff]  ;;  %v8196_v16 = vpack.c.bf16 %v1759_v12, %v1758_v5  ;;  %v1388_v27 = vld [vmem:[#allocation6 + $0x180] sm:$0xff] }
 0x1eb   : > { %8179 = vmatpush3.bf16.msra.mxu1 %v8178_v23  ;;  %8149 = vmatprep.subr.bf16.mxu0 %v8148_v28  ;;  %v1743_v19 = vld [vmem:[#allocation2 + $0x818] sm:$0xff]  ;;  %v1761_v22 = vld [vmem:[#allocation2 + $0x8a8] sm:$0xff]  ;;  %v1744_v28 = vld [vmem:[#allocation2 + $0x820] sm:$0xff] }
 0x1ec   : > { %8181 = vmatprep.subr.bf16.mxu1 %v8180_v29  ;;  %2288 = vmatprep.mubr.f32.mxu0 %v1439_v20  ;;  %v1372_v20 = vld [vmem:[#allocation6 + $0x100] sm:$0xff]  ;;  %v1389_v23 = vld [vmem:[#allocation6 + $0x188] sm:$0xff]  ;;  %v1745_v29 = vld [vmem:[#allocation2 + $0x828] sm:$0xff] }
 0x1ed   : > { %2393 = vmatprep.mubr.f32.mxu1 %v1441_v21  ;;  %2289 = vmatmul.mubr.f32.gmra.mrb[42].mxu0 %v1438_v24  ;;  %v1760_v21 = vld [vmem:[#allocation2 + $0x8a0] sm:$0xff]  ;;  %v8198_v24 = vpack.c.bf16 %v1743_v19, %v1742_v18  ;;  %v1763_v33 = vld [vmem:[#allocation2 + $0x8b8] sm:$0xff]  ;;  %v1407_v34 = vld [vmem:[#allocation6 + $0x218] sm:$0xff]  ;;  %v8202_v35 = vpack.c.bf16 %v1745_v29, %v1744_v28 }
 0x1ee   : > { %2394 = vmatmul.mubr.f32.gmra.mrb[42].mxu1 %v1440_v32  ;;  %8151 = vmatpush3.bf16.msra.mxu0 %v8150_v48  ;;  %v8200_v26 = vpack.c.bf16 %v1761_v22, %v1760_v21  ;;  %v1762_v32 = vld [vmem:[#allocation2 + $0x8b0] sm:$0xff]  ;;  %v1409_v36 = vld [vmem:[#allocation6 + $0x228] sm:$0xff]  ;;  %v1765_v50 = vld [vmem:[#allocation2 + $0x8c8] sm:$0xff] }
 0x1ef   : > { %8183 = vmatpush3.bf16.msra.mxu1 %v8182_v30  ;;  %8153 = vmatprep.subr.bf16.mxu0 %v8152_v41  ;;  %v1746_v48 = vld [vmem:[#allocation2 + $0x830] sm:$0xff]  ;;  %v1747_v30 = vld [vmem:[#allocation2 + $0x838] sm:$0xff]  ;;  %v1764_v49 = vld [vmem:[#allocation2 + $0x8c0] sm:$0xff] }
 0x1f0   : > { %8185 = vmatprep.subr.bf16.mxu1 %v8184_v42  ;;  %2293 = vmatprep.mubr.f32.mxu0 %v1457_v46  ;;  %v8204_v46 = vpack.c.bf16 %v1763_v33, %v1762_v32  ;;  %v1425_v40 = vld [vmem:[#allocation6 + $0x2a8] sm:$0xff]  ;;  %v8206_v41 = vpack.c.bf16 %v1747_v30, %v1746_v48  ;;  %v1427_v42 = vld [vmem:[#allocation6 + $0x2b8] sm:$0xff]  ;;  %v8208_v43 = vpack.c.bf16 %v1765_v50, %v1764_v49  ;;  %v1426_v52 = vld [vmem:[#allocation6 + $0x2b0] sm:$0xff] }
 0x1f1   : > { %2398 = vmatprep.mubr.f32.mxu1 %v1459_v47  ;;  %2294 = vmatmul.mubr.f32.gmra.mrb[44].mxu0 %v1456_v39  ;;  %v1406_v47 = vld [vmem:[#allocation6 + $0x210] sm:$0xff]  ;;  %v1408_v39 = vld [vmem:[#allocation6 + $0x220] sm:$0xff]  ;;  %v1481_v12 = vld [vmem:[#allocation6 + $0x468] sm:$0xff] }
 0x1f2   : > { %2399 = vmatmul.mubr.f32.gmra.mrb[44].mxu1 %v1458_v51  ;;  %8155 = vmatpush3.bf16.msra.mxu0 %v8154_v37  ;;  %v1424_v51 = vld [vmem:[#allocation6 + $0x2a0] sm:$0xff]  ;;  %v1748_v1 = vld [vmem:[#allocation2 + $0x840] sm:$0xff]  ;;  %v1749_v3 = vld [vmem:[#allocation2 + $0x848] sm:$0xff] }
 0x1f3   : > { %8187 = vmatpush3.bf16.msra.mxu1 %v8186_v38  ;;  %8157 = vmatprep.subr.bf16.mxu0 %v8156_v54  ;;  %v1766_v44 = vld [vmem:[#allocation2 + $0x8d0] sm:$0xff]  ;;  %v1767_v37 = vld [vmem:[#allocation2 + $0x8d8] sm:$0xff]  ;;  %v1442_v54 = vld [vmem:[#allocation6 + $0x330] sm:$0xff] }
 0x1f4   : > { %8189 = vmatprep.subr.bf16.mxu1 %v8188_v57  ;;  %2298 = vmatprep.mubr.f32.mxu0 %v1475_v45  ;;  %v1443_v38 = vld [vmem:[#allocation6 + $0x338] sm:$0xff]  ;;  %v8210_v45 = vpack.c.bf16 %v1749_v3, %v1748_v1  ;;  %v8212_v55 = vpack.c.bf16 %v1767_v37, %v1766_v44  ;;  %v1751_v60 = vld [vmem:[#allocation2 + $0x858] sm:$0xff]  ;;  %v1768_v56 = vld [vmem:[#allocation2 + $0x8e0] sm:$0xff] }
 0x1f5   : > { %2403 = vmatprep.mubr.f32.mxu1 %v1477_v53  ;;  %2299 = vmatmul.mubr.f32.gmra.mrb[46].mxu0 %v1474_v59  ;;  %v1445_v53 = vld [vmem:[#allocation6 + $0x348] sm:$0xff]  ;;  %v1750_v57 = vld [vmem:[#allocation2 + $0x850] sm:$0xff]  ;;  %v1769_v59 = vld [vmem:[#allocation2 + $0x8e8] sm:$0xff] }
 0x1f6   : > { %2404 = vmatmul.mubr.f32.gmra.mrb[46].mxu1 %v1476_v61  ;;  %8159 = vmatpush3.bf16.msra.mxu0 %v8158_v63  ;;  %v1444_v62 = vld [vmem:[#allocation6 + $0x340] sm:$0xff]  ;;  %v1461_v61 = vld [vmem:[#allocation6 + $0x3c8] sm:$0xff]  ;;  %v8214_v58 = vpack.c.bf16 %v1751_v60, %v1750_v57  ;;  %v1463_v63 = vld [vmem:[#allocation6 + $0x3d8] sm:$0xff] }
 0x1f7   : > { %8191 = vmatpush3.bf16.msra.mxu1 %v8190_v0  ;;  %8193 = vmatprep.subr.bf16.mxu0 %v8192_v6  ;;  %v8216_v0 = vpack.c.bf16 %v1769_v59, %v1768_v56  ;;  %v1460_v2 = vld [vmem:[#allocation6 + $0x3c0] sm:$0xff]  ;;  %v1753_v6 = vld [vmem:[#allocation2 + $0x868] sm:$0xff]  ;;  %v1393_v22 = vld [vmem:[#allocation6 + $0x1a8] sm:$0xff] }
 0x1f8   : > { %2473 = vmatprep.mubr.f32.mxu0 %v1353_v4  ;;  %2578 = vmatprep.mubr.f32.mxu1 %v1355_v8  ;;  %v1752_v4 = vld [vmem:[#allocation2 + $0x860] sm:$0xff]  ;;  %v1770_v8 = vld [vmem:[#allocation2 + $0x8f0] sm:$0xff]  ;;  %v1771_v10 = vld [vmem:[#allocation2 + $0x8f8] sm:$0xff] }
 0x1f9   : > { %2474 = vmatmul.mubr.f32.vlgmr.msra.gmra.mrb[48].mxu0 %v1352_v7  ;;  %v1462_v7 = vld [vmem:[#allocation6 + $0x3d0] sm:$0xff]  ;;  %v8218_v5 = vpack.c.bf16 %v1753_v6, %v1752_v4  ;;  %v8220_v13 = vpack.c.bf16 %v1771_v10, %v1770_v8  ;;  %v1356_v19 = vld [vmem:[#allocation6 + $0x80] sm:$0xff]  ;;  %v1447_v28 = vld [vmem:[#allocation6 + $0x358] sm:$0xff] }
 0x1fa   : > { %2579 = vmatmul.mubr.f32.vlgmr.msra.gmra.mrb[48].mxu1 %v1354_v11  ;;  %8195 = vmatpush3.bf16.msra.mxu0 %v8194_v9  ;;  %v1479_v11 = vld [vmem:[#allocation6 + $0x458] sm:$0xff]  ;;  %v1755_v9 = vld [vmem:[#allocation2 + $0x878] sm:$0xff]  ;;  %v1374_v21 = vld [vmem:[#allocation6 + $0x110] sm:$0xff] }
 0x1fb   : > { %2478 = vmatprep.mubr.f32.mxu0 %v1371_v14  ;;  %8197 = vmatprep.subr.bf16.mxu0 %v8196_v16  ;;  %v1754_v14 = vld [vmem:[#allocation2 + $0x870] sm:$0xff]  ;;  %v1446_v29 = vld [vmem:[#allocation6 + $0x350] sm:$0xff]  ;;  %v2879_v48 = vld [vmem:[#allocation8 + $0x48] sm:$0xff] }
 0x1fc   : > { %2583 = vmatprep.mubr.f32.mxu1 %v1373_v15  ;;  %v1478_v15 = vld [vmem:[#allocation6 + $0x450] sm:$0xff]  ;;  %v1480_v16 = vld [vmem:[#allocation6 + $0x460] sm:$0xff]  ;;  %v8222_v18 = vpack.c.bf16 %v1755_v9, %v1754_v14  ;;  %v1483_v33 = vld [vmem:[#allocation6 + $0x478] sm:$0xff] }
 0x1fd   : > { %2479 = vmatmul.mubr.f32.gmra.mrb[50].mxu0 %v1370_v17  ;;  %v1357_v17 = vld [vmem:[#allocation6 + $0x88] sm:$0xff]  ;;  %v1464_v32 = vld [vmem:[#allocation6 + $0x3e0] sm:$0xff]  ;;  %v2735_v1 = vld [vmem:[#allocation8 + $0x18] sm:$0xff] }
 0x1fe   : > { %2584 = vmatmul.mubr.f32.gmra.mrb[50].mxu1 %v1372_v20  ;;  %8199 = vmatpush3.bf16.msra.mxu0 %v8198_v24  ;;  %v1375_v20 = vld [vmem:[#allocation6 + $0x118] sm:$0xff]  ;;  %v10269_v50 = vld [vmem:[%s10757_s3] ss:$0 sm:$0xff]  ;;  %v2880_v3 = vld [vmem:[#allocation8 + $0x50] sm:$0xff] }
 0x1ff   : > { %2483 = vmatprep.mubr.f32.mxu0 %v1389_v23  ;;  %8201 = vmatprep.subr.bf16.mxu0 %v8200_v26  ;;  %v1392_v23 = vld [vmem:[#allocation6 + $0x1a0] sm:$0xff]  ;;  %v1411_v24 = vld [vmem:[#allocation6 + $0x238] sm:$0xff]  ;;  %v1429_v26 = vld [vmem:[#allocation6 + $0x2c8] sm:$0xff] }
 0x200   : > { %2588 = vmatprep.mubr.f32.mxu1 %v1391_v25  ;;  %v1410_v25 = vld [vmem:[#allocation6 + $0x230] sm:$0xff]  ;;  %v2881_v44 = vld [vmem:[#allocation8 + $0x58] sm:$0xff]  ;;  %v2736_v56 = vld [vmem:[#allocation8 + $0x20] sm:$0xff] }
 0x201   : > { %2484 = vmatmul.mubr.f32.gmra.mrb[52].mxu0 %v1388_v27  ;;  %v1428_v27 = vld [vmem:[#allocation6 + $0x2c0] sm:$0xff]  ;;  %v2737_v59 = vld [vmem:[#allocation8 + $0x28] sm:$0xff]  ;;  %v2884_v14 = vld [vmem:[#allocation8 + $0x70] sm:$0xff] }
 0x202   : > { %2589 = vmatmul.mubr.f32.gmra.mrb[52].mxu1 %v1390_v31  ;;  %8203 = vmatpush3.bf16.msra.mxu0 %v8202_v35  ;;  %v1465_v31 = vld [vmem:[#allocation6 + $0x3e8] sm:$0xff]  ;;  %v2732_v35 = vld [vmem:[#allocation8] sm:$0xff] }
 0x203   : > { %2488 = vmatprep.mubr.f32.mxu0 %v1407_v34  ;;  %8205 = vmatprep.subr.bf16.mxu0 %v8204_v46  ;;  %v1482_v34 = vld [vmem:[#allocation6 + $0x470] sm:$0xff] }
 0x204   : > { %2593 = vmatprep.mubr.f32.mxu1 %v1409_v36  ;;  %v2733_v36 = vld [vmem:[#allocation8 + $0x8] sm:$0xff] }
 0x205   : > { %2489 = vmatmul.mubr.f32.gmra.mrb[54].mxu0 %v1406_v47  ;;  %v8224_v46 = vpack.c.bf16 %v2733_v36, %v2732_v35  ;;  %v2878_v47 = vld [vmem:[#allocation8 + $0x40] sm:$0xff] }
 0x206   : > { %2594 = vmatmul.mubr.f32.gmra.mrb[54].mxu1 %v1408_v39  ;;  %8207 = vmatpush3.bf16.msra.mxu0 %v8206_v41  ;;  %v8240_v30 = vpack.c.bf16 %v2879_v48, %v2878_v47 }
 0x207   : > { %2493 = vmatprep.mubr.f32.mxu0 %v1425_v40  ;;  %8209 = vmatprep.subr.bf16.mxu0 %v8208_v43 }
 0x208   : > { %2598 = vmatprep.mubr.f32.mxu1 %v1427_v42  ;;  %8241 = vmatprep.subr.bf16.mxu1 %v8240_v30 }
 0x209   : > { %2494 = vmatmul.mubr.f32.gmra.mrb[56].mxu0 %v1424_v51  ;;  %8243 = vmatpush3.bf16.msra.mxu1 %v8240_v30  ;;  %v2734_v51 = vld [vmem:[#allocation8 + $0x10] sm:$0xff] }
 0x20a   : > { %2599 = vmatmul.mubr.f32.gmra.mrb[56].mxu1 %v1426_v52  ;;  %8211 = vmatpush3.bf16.msra.mxu0 %v8210_v45  ;;  %v8228_v52 = vpack.c.bf16 %v2735_v1, %v2734_v51 }
 0x20b   : > { %2498 = vmatprep.mubr.f32.mxu0 %v1443_v38  ;;  %8213 = vmatprep.subr.bf16.mxu0 %v8212_v55 }
 0x20c   : > { %2603 = vmatprep.mubr.f32.mxu1 %v1445_v53  ;;  %v8244_v53 = vpack.c.bf16 %v2881_v44, %v2880_v3  ;;  %v3001_v44 = vld [vmem:[#allocation8 + $0x88] sm:$0xff] }
 0x20d   : > { %2499 = vmatmul.mubr.f32.gmra.mrb[58].mxu0 %v1442_v54 }
 0x20e   : > { %2604 = vmatmul.mubr.f32.gmra.mrb[58].mxu1 %v1444_v62  ;;  %8215 = vmatpush3.bf16.msra.mxu0 %v8214_v58  ;;  %v8232_v58 = vpack.c.bf16 %v2737_v59, %v2736_v56 }
 0x20f   : > { %2503 = vmatprep.mubr.f32.mxu0 %v1461_v61  ;;  %8217 = vmatprep.subr.bf16.mxu0 %v8216_v0  ;;  %v2882_v61 = vld [vmem:[#allocation8 + $0x60] sm:$0xff] }
 0x210   : > { %2608 = vmatprep.mubr.f32.mxu1 %v1463_v63  ;;  %8245 = vmatprep.subr.bf16.mxu1 %v8244_v53  ;;  %v2883_v63 = vld [vmem:[#allocation8 + $0x68] sm:$0xff] }
 0x211   : > { %2504 = vmatmul.mubr.f32.gmra.mrb[60].mxu0 %v1460_v2  ;;  %8247 = vmatpush3.bf16.msra.mxu1 %v8244_v53  ;;  %v8248_v6 = vpack.c.bf16 %v2883_v63, %v2882_v61 }
 0x212   : > { %2609 = vmatmul.mubr.f32.gmra.mrb[60].mxu1 %v1462_v7  ;;  %8219 = vmatpush3.bf16.msra.mxu0 %v8218_v5 }
 0x213   : > { %2508 = vmatprep.mubr.f32.mxu0 %v1479_v11  ;;  %8221 = vmatprep.subr.bf16.mxu0 %v8220_v13  ;;  %v2739_v13 = vld [vmem:[#allocation8 + $0x38] sm:$0xff] }
 0x214   : > { %2613 = vmatprep.mubr.f32.mxu1 %v1481_v12  ;;  %8249 = vmatprep.subr.bf16.mxu1 %v8248_v6  ;;  %v2738_v12 = vld [vmem:[#allocation8 + $0x30] sm:$0xff] }
 0x215   : > { %2509 = vmatmul.mubr.f32.gmra.mrb[62].mxu0 %v1478_v15  ;;  %8251 = vmatpush3.bf16.msra.mxu1 %v8248_v6  ;;  %v8236_v9 = vpack.c.bf16 %v2739_v13, %v2738_v12  ;;  %v2885_v15 = vld [vmem:[#allocation8 + $0x78] sm:$0xff] }
 0x216   : > { %2614 = vmatmul.mubr.f32.gmra.mrb[62].mxu1 %v1480_v16  ;;  %8223 = vmatpush3.bf16.msra.mxu0 %v8222_v18 }
 0x217   : > { %2683 = vmatprep.mubr.f32.mxu0 %v1357_v17  ;;  %8225 = vmatprep.subr.bf16.mxu0 %v8224_v46 }
 0x219   : > { %2684 = vmatmul.mubr.f32.vlgmr.msra.gmra.mrb[64].mxu0 %v1356_v19  ;;  %v8252_v19 = vpack.c.bf16 %v2885_v15, %v2884_v14 }
 0x21a   : > { %2688 = vmatprep.mubr.f32.mxu0 %v1375_v20  ;;  %8227 = vmatpush3.bf16.msra.mxu0 %v8224_v46 }
 0x21b   : > { %8229 = vmatprep.subr.bf16.mxu0 %v8228_v52  ;;  %8253 = vmatprep.subr.bf16.mxu1 %v8252_v19 }
 0x21c   : > { %8255 = vmatpush3.bf16.msra.mxu1 %v8252_v19 }
 0x21d   : > { %2689 = vmatmul.mubr.f32.gmra.mrb[66].mxu0 %v1374_v21 }
 0x21e   : > { %2693 = vmatprep.mubr.f32.mxu0 %v1393_v22  ;;  %8231 = vmatpush3.bf16.msra.mxu0 %v8228_v52  ;;  %v3000_v52 = vld [vmem:[#allocation8 + $0x80] sm:$0xff] }
 0x21f   : > { %8233 = vmatprep.subr.bf16.mxu0 %v8232_v58 }
 0x221   : > { %2694 = vmatmul.mubr.f32.gmra.mrb[68].mxu0 %v1392_v23 }
 0x222   : > { %2698 = vmatprep.mubr.f32.mxu0 %v1411_v24  ;;  %8235 = vmatpush3.bf16.msra.mxu0 %v8232_v58 }
 0x223   : > { %8237 = vmatprep.subr.bf16.mxu0 %v8236_v9 }
 0x225   : > { %2699 = vmatmul.mubr.f32.gmra.mrb[70].mxu0 %v1410_v25 }
 0x226   : > { %2703 = vmatprep.mubr.f32.mxu0 %v1429_v26  ;;  %8239 = vmatpush3.bf16.msra.mxu0 %v8236_v9 }
 0x229   : > { %2704 = vmatmul.mubr.f32.gmra.mrb[72].mxu0 %v1428_v27 }
 0x22a   : > { %2708 = vmatprep.mubr.f32.mxu0 %v1447_v28 }
 0x22d   : > { %2709 = vmatmul.mubr.f32.gmra.mrb[74].mxu0 %v1446_v29 }
 0x22e   : > { %2713 = vmatprep.mubr.f32.mxu0 %v1465_v31 }
 0x231   : > { %2714 = vmatmul.mubr.f32.gmra.mrb[76].mxu0 %v1464_v32 }
 0x232   : > { %2718 = vmatprep.mubr.f32.mxu0 %v1483_v33 }
 0x235   : > { %2719 = vmatmul.mubr.f32.gmra.mrb[78].mxu0 %v1482_v34 }
 0x26c   : > { %v6457_v39 = vpop.f32.mrb[0].mxu0 }
 0x26d   : > { %v6513_v49 = vpop.f32.mrb[0].mxu1  ;;  %v6458_v40 = vpop.f32.mrb[1].mxu0 }
 0x26e   : > { %v6514_v41 = vpop.f32.mrb[1].mxu1  ;;  %v6459_v42 = vadd.f32 %v6458_v40, %v6457_v39 }
 0x26f   : > { %v6515_v43 = vadd.f32 %v6514_v41, %v6513_v49 }
 0x270   : > { %v1846_v37 = vadd.f32 %v6459_v42, %v10269_v50  ;;  %v6460_v38 = vpop.f32.mrb[2].mxu0 }
 0x271   : > { %v6516_v45 = vpop.f32.mrb[2].mxu1  ;;  %v6461_v55 = vpop.f32.mrb[3].mxu0 }
 0x272   : > { %v6517_v54 = vpop.f32.mrb[3].mxu1  ;;  %v10272_v57 = vadd.f32 %v6515_v43, %v1846_v37  ;;  %v6462_v60 = vadd.f32 %v6461_v55, %v6460_v38  ;;  %v3122_v37 = vld [vmem:[#allocation8 + $0xc0] sm:$0xff]  ;;  %v10289_v38 = vpack.c.bf16 %v3001_v44, %v3000_v52 }
 0x273   : > { %v6518_v62 = vadd.f32 %v6517_v54, %v6516_v45  ;;  %v3123_v45 = vld [vmem:[#allocation8 + $0xc8] sm:$0xff] }
 0x274   : > { %v1851_v0 = vadd.f32 %v6462_v60, %v10269_v50  ;;  %v6463_v2 = vpop.f32.mrb[4].mxu0  ;;  %v10292_v60 = vpack.c.bf16 %v3123_v45, %v3122_v37  ;;  %8257 = vmatprep.subr.bf16.mxu0 %v10289_v38 }
 0x275   : > { %v6519_v4 = vpop.f32.mrb[4].mxu1  ;;  %v6464_v7 = vpop.f32.mrb[5].mxu0 }
 0x276   : > { %v6520_v8 = vpop.f32.mrb[5].mxu1  ;;  %v10275_v10 = vadd.f32 %v6518_v62, %v1851_v0  ;;  %v6465_v11 = vadd.f32 %v6464_v7, %v6463_v2  ;;  %8273 = vmatprep.subr.bf16.mxu1 %v10292_v60 }
 0x277   : > { %v6521_v5 = vadd.f32 %v6520_v8, %v6519_v4 }
 0x278   : > { %v1856_v16 = vadd.f32 %v6465_v11, %v10269_v50  ;;  %v6466_v17 = vpop.f32.mrb[6].mxu0 }
 0x279   : > { %v6522_v18 = vpop.f32.mrb[6].mxu1  ;;  %v6467_v20 = vpop.f32.mrb[7].mxu0 }
 0x27a   : > { %v6523_v21 = vpop.f32.mrb[7].mxu1  ;;  %v10278_v22 = vadd.f32 %v6521_v5, %v1856_v16  ;;  %v6468_v23 = vadd.f32 %v6467_v20, %v6466_v17 }
 0x27b   : > { %v6524_v24 = vadd.f32 %v6523_v21, %v6522_v18 }
 0x27c   : > { %v1861_v25 = vadd.f32 %v6468_v23, %v10269_v50  ;;  %v6469_v26 = vpop.f32.mrb[8].mxu0 }
 0x27d   : > { %v6525_v27 = vpop.f32.mrb[8].mxu1  ;;  %v6470_v28 = vpop.f32.mrb[9].mxu0 }
 0x27e   : > { %v6526_v29 = vpop.f32.mrb[9].mxu1  ;;  %v10281_v31 = vadd.f32 %v6524_v24, %v1861_v25  ;;  %v6471_v32 = vadd.f32 %v6470_v28, %v6469_v26 }
 0x27f   : > { %v6527_v33 = vadd.f32 %v6526_v29, %v6525_v27 }
 0x280   : > { %v1866_v34 = vadd.f32 %v6471_v32, %v10269_v50  ;;  %v6472_v35 = vpop.f32.mrb[10].mxu0 }
 0x281   : > { %v6528_v36 = vpop.f32.mrb[10].mxu1  ;;  %v6473_v46 = vpop.f32.mrb[11].mxu0 }
 0x282   : > { %v6529_v47 = vpop.f32.mrb[11].mxu1  ;;  %v10284_v48 = vadd.f32 %v6527_v33, %v1866_v34  ;;  %v6474_v30 = vadd.f32 %v6473_v46, %v6472_v35 }
 0x283   : > { %v6530_v39 = vadd.f32 %v6529_v47, %v6528_v36 }
 0x284   : > { %v1871_v49 = vadd.f32 %v6474_v30, %v10269_v50  ;;  %v6475_v40 = vpop.f32.mrb[12].mxu0 }
 0x285   : > { %v6531_v41 = vpop.f32.mrb[12].mxu1  ;;  %v6476_v42 = vpop.f32.mrb[13].mxu0 }
 0x286   : > { %v6532_v43 = vpop.f32.mrb[13].mxu1  ;;  %v10287_v51 = vadd.f32 %v6530_v39, %v1871_v49  ;;  %v6477_v1 = vadd.f32 %v6476_v42, %v6475_v40 }
 0x287   : > { %v6533_v3 = vadd.f32 %v6532_v43, %v6531_v41 }
 0x288   : > { %v1876_v53 = vadd.f32 %v6477_v1, %v10269_v50  ;;  %v6478_v55 = vpop.f32.mrb[14].mxu0 }
 0x289   : > { %v6534_v54 = vpop.f32.mrb[14].mxu1  ;;  %v6479_v62 = vpop.f32.mrb[15].mxu0 }
 0x28a   : > { %v6535_v56 = vpop.f32.mrb[15].mxu1  ;;  %v1981_v59 = vadd.f32 %v6533_v3, %v1876_v53  ;;  %v6480_v61 = vadd.f32 %v6479_v62, %v6478_v55 }
 0x28b   : > { %v6536_v58 = vadd.f32 %v6535_v56, %v6534_v54 }
 0x28c   : > { %v1881_v63 = vadd.f32 %v6480_v61, %v10269_v50  ;;  %v6569_v0 = vpop.f32.mrb[16].mxu0 }
 0x28d   : > { %v6625_v2 = vpop.f32.mrb[16].mxu1  ;;  %v6570_v4 = vpop.f32.mrb[17].mxu0 }
 0x28e   : > { %v6626_v6 = vpop.f32.mrb[17].mxu1  ;;  %v1986_v7 = vadd.f32 %v6536_v58, %v1881_v63  ;;  %v6571_v8 = vadd.f32 %v6570_v4, %v6569_v0 }
 0x28f   : > { %v6627_v11 = vadd.f32 %v6626_v6, %v6625_v2 }
 0x290   : > { %v2056_v5 = vadd.f32 %v6571_v8, %v10272_v57  ;;  %v6572_v12 = vpop.f32.mrb[18].mxu0 }
 0x291   : > { %v6628_v13 = vpop.f32.mrb[18].mxu1  ;;  %v6573_v14 = vpop.f32.mrb[19].mxu0 }
 0x292   : > { %v6629_v9 = vpop.f32.mrb[19].mxu1  ;;  %v2161_v15 = vadd.f32 %v6627_v11, %v2056_v5  ;;  %v6574_v16 = vadd.f32 %v6573_v14, %v6572_v12 }
 0x293   : > { %v6630_v17 = vadd.f32 %v6629_v9, %v6628_v13 }
 0x294   : > { %v2061_v18 = vadd.f32 %v6574_v16, %v10275_v10  ;;  %v6575_v19 = vpop.f32.mrb[20].mxu0 }
 0x295   : > { %v6631_v50 = vpop.f32.mrb[20].mxu1  ;;  %v6576_v20 = vpop.f32.mrb[21].mxu0 }
 0x296   : > { %v6632_v21 = vpop.f32.mrb[21].mxu1  ;;  %v2166_v23 = vadd.f32 %v6630_v17, %v2061_v18  ;;  %v6577_v24 = vadd.f32 %v6576_v20, %v6575_v19 }
 0x297   : > { %v6633_v25 = vadd.f32 %v6632_v21, %v6631_v50 }
 0x298   : > { %v2066_v26 = vadd.f32 %v6577_v24, %v10278_v22  ;;  %v6578_v27 = vpop.f32.mrb[22].mxu0 }
 0x299   : > { %v6634_v57 = vpop.f32.mrb[22].mxu1  ;;  %v6579_v28 = vpop.f32.mrb[23].mxu0 }
 0x29a   : > { %v6635_v29 = vpop.f32.mrb[23].mxu1  ;;  %v2171_v32 = vadd.f32 %v6633_v25, %v2066_v26  ;;  %v6580_v33 = vadd.f32 %v6579_v28, %v6578_v27 }
 0x29b   : > { %v6636_v34 = vadd.f32 %v6635_v29, %v6634_v57 }
 0x29c   : > { %v2071_v35 = vadd.f32 %v6580_v33, %v10281_v31  ;;  %v6581_v36 = vpop.f32.mrb[24].mxu0 }
 0x29d   : > { %v6637_v10 = vpop.f32.mrb[24].mxu1  ;;  %v6582_v46 = vpop.f32.mrb[25].mxu0 }
 0x29e   : > { %v6638_v47 = vpop.f32.mrb[25].mxu1  ;;  %v2176_v30 = vadd.f32 %v6636_v34, %v2071_v35  ;;  %v6583_v39 = vadd.f32 %v6582_v46, %v6581_v36 }
 0x29f   : > { %v6639_v49 = vadd.f32 %v6638_v47, %v6637_v10 }
 0x2a0   : > { %v2076_v40 = vadd.f32 %v6583_v39, %v10284_v48  ;;  %v6584_v41 = vpop.f32.mrb[26].mxu0 }
 0x2a1   : > { %v6640_v22 = vpop.f32.mrb[26].mxu1  ;;  %v6585_v42 = vpop.f32.mrb[27].mxu0 }
 0x2a2   : > { %v6641_v43 = vpop.f32.mrb[27].mxu1  ;;  %v2181_v1 = vadd.f32 %v6639_v49, %v2076_v40  ;;  %v6586_v3 = vadd.f32 %v6585_v42, %v6584_v41 }
 0x2a3   : > { %v6642_v52 = vadd.f32 %v6641_v43, %v6640_v22 }
 0x2a4   : > { %v2081_v44 = vadd.f32 %v6586_v3, %v10287_v51  ;;  %v6587_v37 = vpop.f32.mrb[28].mxu0 }
 0x2a5   : > { %v6643_v31 = vpop.f32.mrb[28].mxu1  ;;  %v6588_v45 = vpop.f32.mrb[29].mxu0 }
 0x2a6   : > { %v6644_v53 = vpop.f32.mrb[29].mxu1  ;;  %v2186_v55 = vadd.f32 %v6642_v52, %v2081_v44  ;;  %v6589_v54 = vadd.f32 %v6588_v45, %v6587_v37 }
 0x2a7   : > { %v6645_v62 = vadd.f32 %v6644_v53, %v6643_v31 }
 0x2a8   : > { %v2086_v56 = vadd.f32 %v6589_v54, %v1981_v59  ;;  %v6590_v61 = vpop.f32.mrb[30].mxu0 }
 0x2a9   : > { %v6646_v58 = vpop.f32.mrb[30].mxu1  ;;  %v6591_v48 = vpop.f32.mrb[31].mxu0 }
 0x2aa   : > { %v6647_v63 = vpop.f32.mrb[31].mxu1  ;;  %v2191_v0 = vadd.f32 %v6645_v62, %v2086_v56  ;;  %v6592_v2 = vadd.f32 %v6591_v48, %v6590_v61 }
 0x2ab   : > { %v6648_v4 = vadd.f32 %v6647_v63, %v6646_v58 }
 0x2ac   : > { %v2091_v6 = vadd.f32 %v6592_v2, %v1986_v7  ;;  %v6681_v8 = vpop.f32.mrb[32].mxu0 }
 0x2ad   : > { %v6737_v11 = vpop.f32.mrb[32].mxu1  ;;  %v6682_v5 = vpop.f32.mrb[33].mxu0 }
 0x2ae   : > { %v6738_v51 = vpop.f32.mrb[33].mxu1  ;;  %v2196_v12 = vadd.f32 %v6648_v4, %v2091_v6  ;;  %v6683_v13 = vadd.f32 %v6682_v5, %v6681_v8 }
 0x2af   : > { %v6739_v14 = vadd.f32 %v6738_v51, %v6737_v11 }
 0x2b0   : > { %v2266_v9 = vadd.f32 %v6683_v13, %v2161_v15  ;;  %v6684_v16 = vpop.f32.mrb[34].mxu0 }
 0x2b1   : > { %v6740_v17 = vpop.f32.mrb[34].mxu1  ;;  %v6685_v18 = vpop.f32.mrb[35].mxu0 }
 0x2b2   : > { %v6741_v59 = vpop.f32.mrb[35].mxu1  ;;  %v2371_v19 = vadd.f32 %v6739_v14, %v2266_v9  ;;  %v6686_v50 = vadd.f32 %v6685_v18, %v6684_v16 }
 0x2b3   : > { %v6742_v20 = vadd.f32 %v6741_v59, %v6740_v17 }
 0x2b4   : > { %v2271_v21 = vadd.f32 %v6686_v50, %v2166_v23  ;;  %v6687_v24 = vpop.f32.mrb[36].mxu0 }
 0x2b5   : > { %v6743_v25 = vpop.f32.mrb[36].mxu1  ;;  %v6688_v26 = vpop.f32.mrb[37].mxu0 }
 0x2b6   : > { %v6744_v7 = vpop.f32.mrb[37].mxu1  ;;  %v2376_v27 = vadd.f32 %v6742_v20, %v2271_v21  ;;  %v6689_v57 = vadd.f32 %v6688_v26, %v6687_v24 }
 0x2b7   : > { %v6745_v28 = vadd.f32 %v6744_v7, %v6743_v25 }
 0x2b8   : > { %v2276_v29 = vadd.f32 %v6689_v57, %v2171_v32  ;;  %v6690_v33 = vpop.f32.mrb[38].mxu0 }
 0x2b9   : > { %v6746_v34 = vpop.f32.mrb[38].mxu1  ;;  %v6691_v35 = vpop.f32.mrb[39].mxu0 }
 0x2ba   : > { %v6747_v15 = vpop.f32.mrb[39].mxu1  ;;  %v2381_v36 = vadd.f32 %v6745_v28, %v2276_v29  ;;  %v6692_v10 = vadd.f32 %v6691_v35, %v6690_v33 }
 0x2bb   : > { %v6748_v46 = vadd.f32 %v6747_v15, %v6746_v34 }
 0x2bc   : > { %v2281_v47 = vadd.f32 %v6692_v10, %v2176_v30  ;;  %v6693_v39 = vpop.f32.mrb[40].mxu0 }
 0x2bd   : > { %v6749_v49 = vpop.f32.mrb[40].mxu1  ;;  %v6694_v40 = vpop.f32.mrb[41].mxu0 }
 0x2be   : > { %v6750_v23 = vpop.f32.mrb[41].mxu1  ;;  %v2386_v41 = vadd.f32 %v6748_v46, %v2281_v47  ;;  %v6695_v22 = vadd.f32 %v6694_v40, %v6693_v39 }
 0x2bf   : > { %v6751_v42 = vadd.f32 %v6750_v23, %v6749_v49 }
 0x2c0   : > { %v2286_v43 = vadd.f32 %v6695_v22, %v2181_v1  ;;  %v6696_v3 = vpop.f32.mrb[42].mxu0 }
 0x2c1   : > { %v6752_v52 = vpop.f32.mrb[42].mxu1  ;;  %v6697_v44 = vpop.f32.mrb[43].mxu0 }
 0x2c2   : > { %v6753_v32 = vpop.f32.mrb[43].mxu1  ;;  %v2391_v37 = vadd.f32 %v6751_v42, %v2286_v43  ;;  %v6698_v31 = vadd.f32 %v6697_v44, %v6696_v3 }
 0x2c3   : > { %v6754_v45 = vadd.f32 %v6753_v32, %v6752_v52 }
 0x2c4   : > { %v2291_v53 = vadd.f32 %v6698_v31, %v2186_v55  ;;  %v6699_v54 = vpop.f32.mrb[44].mxu0 }
 0x2c5   : > { %v6755_v62 = vpop.f32.mrb[44].mxu1  ;;  %v6700_v56 = vpop.f32.mrb[45].mxu0 }
 0x2c6   : > { %v6756_v30 = vpop.f32.mrb[45].mxu1  ;;  %v2396_v61 = vadd.f32 %v6754_v45, %v2291_v53  ;;  %v6701_v58 = vadd.f32 %v6700_v56, %v6699_v54 }
 0x2c7   : > { %v6757_v48 = vadd.f32 %v6756_v30, %v6755_v62 }
 0x2c8   : > { %v2296_v63 = vadd.f32 %v6701_v58, %v2191_v0  ;;  %v6702_v2 = vpop.f32.mrb[46].mxu0 }
 0x2c9   : > { %v6758_v4 = vpop.f32.mrb[46].mxu1  ;;  %v6703_v6 = vpop.f32.mrb[47].mxu0 }
 0x2ca   : > { %v6759_v1 = vpop.f32.mrb[47].mxu1  ;;  %v2401_v8 = vadd.f32 %v6757_v48, %v2296_v63  ;;  %v6704_v11 = vadd.f32 %v6703_v6, %v6702_v2 }
 0x2cb   : > { %v6760_v5 = vadd.f32 %v6759_v1, %v6758_v4 }
 0x2cc   : > { %v2301_v51 = vadd.f32 %v6704_v11, %v2196_v12  ;;  %v6793_v13 = vpop.f32.mrb[48].mxu0 }
 0x2cd   : > { %v6849_v14 = vpop.f32.mrb[48].mxu1  ;;  %v6794_v9 = vpop.f32.mrb[49].mxu0 }
 0x2ce   : > { %v6850_v55 = vpop.f32.mrb[49].mxu1  ;;  %v2406_v16 = vadd.f32 %v6760_v5, %v2301_v51  ;;  %v6795_v17 = vadd.f32 %v6794_v9, %v6793_v13 }
 0x2cf   : > { %v6851_v18 = vadd.f32 %v6850_v55, %v6849_v14 }
 0x2d0   : > { %v2476_v59 = vadd.f32 %v6795_v17, %v2371_v19  ;;  %v6796_v50 = vpop.f32.mrb[50].mxu0 }
 0x2d1   : > { %v6852_v20 = vpop.f32.mrb[50].mxu1  ;;  %v6797_v21 = vpop.f32.mrb[51].mxu0 }
 0x2d2   : > { %v6853_v0 = vpop.f32.mrb[51].mxu1  ;;  %v2581_v24 = vadd.f32 %v6851_v18, %v2476_v59  ;;  %v6798_v25 = vadd.f32 %v6797_v21, %v6796_v50 }
 0x2d3   : > { %v6854_v26 = vadd.f32 %v6853_v0, %v6852_v20 }
 0x2d4   : > { %v2481_v7 = vadd.f32 %v6798_v25, %v2376_v27  ;;  %v6799_v57 = vpop.f32.mrb[52].mxu0  ;;  %v3002_v25 = vld [vmem:[#allocation8 + $0x90] sm:$0xff] }
 0x2d5   : > { %v6855_v28 = vpop.f32.mrb[52].mxu1  ;;  %v6800_v29 = vpop.f32.mrb[53].mxu0 }
 0x2d6   : > { %v6856_v12 = vpop.f32.mrb[53].mxu1  ;;  %v2586_v33 = vadd.f32 %v6854_v26, %v2481_v7  ;;  %v6801_v34 = vadd.f32 %v6800_v29, %v6799_v57  ;;  %v3003_v26 = vld [vmem:[#allocation8 + $0x98] sm:$0xff]  ;;  %v3124_v7 = vld [vmem:[#allocation8 + $0xd0] sm:$0xff] }
 0x2d7   : > { %v6857_v35 = vadd.f32 %v6856_v12, %v6855_v28  ;;  %v3125_v57 = vld [vmem:[#allocation8 + $0xd8] sm:$0xff] }
 0x2d8   : > { %v2486_v15 = vadd.f32 %v6801_v34, %v2381_v36  ;;  %v6802_v10 = vpop.f32.mrb[54].mxu0  ;;  %v8260_v34 = vpack.c.bf16 %v3003_v26, %v3002_v25  ;;  %v3249_v25 = vld [vmem:[#allocation8 + $0x128] sm:$0xff]  ;;  %v3370_v26 = vld [vmem:[#allocation8 + $0x160] sm:$0xff] }
 0x2d9   : > { %v6858_v46 = vpop.f32.mrb[54].mxu1  ;;  %v6803_v47 = vpop.f32.mrb[55].mxu0 }
 0x2da   : > { %v6859_v19 = vpop.f32.mrb[55].mxu1  ;;  %v2591_v39 = vadd.f32 %v6857_v35, %v2486_v15  ;;  %v6804_v49 = vadd.f32 %v6803_v47, %v6802_v10  ;;  %v8276_v35 = vpack.c.bf16 %v3125_v57, %v3124_v7  ;;  %v3004_v15 = vld [vmem:[#allocation8 + $0xa0] sm:$0xff]  ;;  %v3005_v10 = vld [vmem:[#allocation8 + $0xa8] sm:$0xff] }
 0x2db   : > { %v6860_v40 = vadd.f32 %v6859_v19, %v6858_v46  ;;  %v3126_v46 = vld [vmem:[#allocation8 + $0xe0] sm:$0xff]  ;;  %v3127_v47 = vld [vmem:[#allocation8 + $0xe8] sm:$0xff] }
 0x2dc   : > { %v2491_v23 = vadd.f32 %v6804_v49, %v2386_v41  ;;  %v6805_v22 = vpop.f32.mrb[56].mxu0  ;;  %v3371_v7 = vld [vmem:[#allocation8 + $0x168] sm:$0xff] }
 0x2dd   : > { %v6861_v42 = vpop.f32.mrb[56].mxu1  ;;  %v6806_v43 = vpop.f32.mrb[57].mxu0 }
 0x2de   : > { %v6862_v27 = vpop.f32.mrb[57].mxu1  ;;  %v10303_v3 = vadd.f32 %v6860_v40, %v2491_v23  ;;  %v6807_v52 = vadd.f32 %v6806_v43, %v6805_v22  ;;  %v8264_v22 = vpack.c.bf16 %v3005_v10, %v3004_v15  ;;  %v3007_v43 = vld [vmem:[#allocation8 + $0xb8] sm:$0xff]  ;;  %v3488_v10 = vld [vmem:[#allocation8 + $0x180] sm:$0xff] }
 0x2df   : > { %v6863_v44 = vadd.f32 %v6862_v27, %v6861_v42  ;;  %v8280_v42 = vpack.c.bf16 %v3127_v47, %v3126_v46  ;;  %v3128_v27 = vld [vmem:[#allocation8 + $0xf0] sm:$0xff]  ;;  %v3489_v46 = vld [vmem:[#allocation8 + $0x188] sm:$0xff]  ;;  %v3610_v47 = vld [vmem:[#allocation8 + $0x1c0] sm:$0xff] }
 0x2e0   : > { %v2496_v32 = vadd.f32 %v6807_v52, %v2391_v37  ;;  %v6808_v31 = vpop.f32.mrb[58].mxu0  ;;  %v3129_v52 = vld [vmem:[#allocation8 + $0xf8] sm:$0xff] }
 0x2e1   : > { %v6864_v45 = vpop.f32.mrb[58].mxu1  ;;  %v6809_v36 = vpop.f32.mrb[59].mxu0 }
 0x2e2   : > { %v6865_v53 = vpop.f32.mrb[59].mxu1  ;;  %v10305_v54 = vadd.f32 %v6863_v44, %v2496_v32  ;;  %v6810_v62 = vadd.f32 %v6809_v36, %v6808_v31  ;;  %v8284_v36 = vpack.c.bf16 %v3129_v52, %v3128_v27  ;;  %v3492_v52 = vld [vmem:[#allocation8 + $0x1a0] sm:$0xff] }
 0x2e3   : > { %v6866_v56 = vadd.f32 %v6865_v53, %v6864_v45  ;;  %v3244_v53 = vld [vmem:[#allocation8 + $0x100] sm:$0xff] }
 0x2e4   : > { %v2501_v30 = vadd.f32 %v6810_v62, %v2396_v61  ;;  %v6811_v58 = vpop.f32.mrb[60].mxu0  ;;  %v3245_v62 = vld [vmem:[#allocation8 + $0x108] sm:$0xff] }
 0x2e5   : > { %v6867_v41 = vpop.f32.mrb[60].mxu1  ;;  %v6812_v48 = vpop.f32.mrb[61].mxu0 }
 0x2e6   : > { %v6868_v63 = vpop.f32.mrb[61].mxu1  ;;  %v10307_v2 = vadd.f32 %v6866_v56, %v2501_v30  ;;  %v6813_v4 = vadd.f32 %v6812_v48, %v6811_v58  ;;  %v3367_v56 = vld [vmem:[#allocation8 + $0x148] sm:$0xff] }
 0x2e7   : > { %v6869_v6 = vadd.f32 %v6868_v63, %v6867_v41 }
 0x2e8   : > { %v2506_v1 = vadd.f32 %v6813_v4, %v2401_v8  ;;  %v6814_v11 = vpop.f32.mrb[62].mxu0  ;;  %v8288_v4 = vpack.c.bf16 %v3245_v62, %v3244_v53  ;;  %v3495_v53 = vld [vmem:[#allocation8 + $0x1b8] sm:$0xff]  ;;  %v3616_v62 = vld [vmem:[#allocation8 + $0x1f0] sm:$0xff] }
 0x2e9   : > { %v6870_v37 = vpop.f32.mrb[62].mxu1  ;;  %v6815_v5 = vpop.f32.mrb[63].mxu0 }
 0x2ea   : > { %v6871_v51 = vpop.f32.mrb[63].mxu1  ;;  %v10309_v13 = vadd.f32 %v6869_v6, %v2506_v1  ;;  %v6816_v14 = vadd.f32 %v6815_v5, %v6814_v11 }
 0x2eb   : > { %v6872_v9 = vadd.f32 %v6871_v51, %v6870_v37 }
 0x2ec   : > { %v2511_v55 = vadd.f32 %v6816_v14, %v2406_v16  ;;  %v6905_v17 = vpop.f32.mrb[64].mxu0 }
 0x2ed   : > { %v6906_v61 = vpop.f32.mrb[65].mxu0 }
 0x2ee   : > { %v10311_v18 = vadd.f32 %v6872_v9, %v2511_v55  ;;  %v6907_v59 = vadd.f32 %v6906_v61, %v6905_v17  ;;  %v3246_v61 = vld [vmem:[#allocation8 + $0x110] sm:$0xff] }
 0x2f0   : > { %v2686_v50 = vadd.f32 %v6907_v59, %v2581_v24  ;;  %v6908_v20 = vpop.f32.mrb[66].mxu0  ;;  %v3247_v59 = vld [vmem:[#allocation8 + $0x118] sm:$0xff] }
 0x2f1   : > { %v6909_v21 = vpop.f32.mrb[67].mxu0 }
 0x2f2   : > { %v10313_v0 = vmax.f32 %v2686_v50, 0.0  ;;  %v6910_v8 = vadd.f32 %v6909_v21, %v6908_v20  ;;  %v3368_v50 = vld [vmem:[#allocation8 + $0x150] sm:$0xff]  ;;  %v3369_v20 = vld [vmem:[#allocation8 + $0x158] sm:$0xff] }
 0x2f3   : > { %v8308_v21 = vpack.c.bf16 %v3369_v20, %v3368_v50 }
 0x2f4   : > { %v2691_v28 = vadd.f32 %v6910_v8, %v2586_v33  ;;  %v6911_v29 = vpop.f32.mrb[68].mxu0  ;;  %7347 = vmatprep.mubr.msk.f32.mxu0 %vm731_vm0, %v10313_v0  ;;  %7375 = vmatprep.mubr.msk.f32.mxu1 %vm731_vm0, %v10313_v0  ;;  %v3248_v8 = vld [vmem:[#allocation8 + $0x120] sm:$0xff] }
 0x2f5   : > { %v6912_v16 = vpop.f32.mrb[69].mxu0  ;;  %v8296_v57 = vpack.c.bf16 %v3249_v25, %v3248_v8 }
 0x2f6   : > { %v10319_v12 = vmax.f32 %v2691_v28, 0.0  ;;  %v6913_v24 = vadd.f32 %v6912_v16, %v6911_v29  ;;  %v8312_v28 = vpack.c.bf16 %v3371_v7, %v3370_v26  ;;  %v3250_v29 = vld [vmem:[#allocation8 + $0x130] sm:$0xff]  ;;  %v3251_v16 = vld [vmem:[#allocation8 + $0x138] sm:$0xff] }
 0x2f8   : > { %v2696_v19 = vadd.f32 %v6913_v24, %v2591_v39  ;;  %v6914_v49 = vpop.f32.mrb[70].mxu0  ;;  %7348 = vmatmul.mubr.msk.f32.vlgmr.msra.gmra.mrb[80].mxu0 %vm731_vm0, %v10319_v12  ;;  %7376 = vmatmul.mubr.msk.f32.vlgmr.msra.gmra.mrb[64].mxu1 %vm731_vm0, %v10319_v12  ;;  %v3006_v39 = vld [vmem:[#allocation8 + $0xb0] sm:$0xff] }
 0x2f9   : > { %v6915_v33 = vpop.f32.mrb[71].mxu0  ;;  %8259 = vmatpush3.bf16.msra.mxu0 %v10289_v38  ;;  %8275 = vmatpush3.bf16.msra.mxu1 %v10292_v60  ;;  %v8268_v45 = vpack.c.bf16 %v3007_v43, %v3006_v39  ;;  %v3372_v24 = vld [vmem:[#allocation8 + $0x170] sm:$0xff]  ;;  %v3613_v39 = vld [vmem:[#allocation8 + $0x1d8] sm:$0xff] }
 0x2fa   : > { %v10327_v40 = vmax.f32 %v2696_v19, 0.0  ;;  %v6916_v23 = vadd.f32 %v6915_v33, %v6914_v49  ;;  %8261 = vmatprep.subr.bf16.mxu0 %v8260_v34  ;;  %8277 = vmatprep.subr.bf16.mxu1 %v8276_v35  ;;  %v3611_v19 = vld [vmem:[#allocation8 + $0x1c8] sm:$0xff]  ;;  %v8320_v49 = vpack.c.bf16 %v3489_v46, %v3488_v10 }
 0x2fb   : > { %v8336_v33 = vpack.c.bf16 %v3611_v19, %v3610_v47 }
 0x2fc   : > { %v2701_v44 = vadd.f32 %v6916_v23, %v10303_v3  ;;  %v6917_v32 = vpop.f32.mrb[72].mxu0  ;;  %7350 = vmatprep.mubr.msk.f32.mxu0 %vm731_vm0, %v10327_v40  ;;  %7378 = vmatprep.mubr.msk.f32.mxu1 %vm731_vm0, %v10327_v40  ;;  %v3366_v3 = vld [vmem:[#allocation8 + $0x140] sm:$0xff]  ;;  %v3490_v23 = vld [vmem:[#allocation8 + $0x190] sm:$0xff] }
 0x2fd   : > { %v6918_v38 = vpop.f32.mrb[73].mxu0  ;;  %8263 = vmatpush3.bf16.msra.mxu0 %v8260_v34  ;;  %8279 = vmatpush3.bf16.msra.mxu1 %v8276_v35  ;;  %v8304_v6 = vpack.c.bf16 %v3367_v56, %v3366_v3  ;;  %v3373_v34 = vld [vmem:[#allocation8 + $0x178] sm:$0xff]  ;;  %v8300_v35 = vpack.c.bf16 %v3251_v16, %v3250_v29 }
 0x2fe   : > { %v10334_v60 = vmax.f32 %v2701_v44, 0.0  ;;  %v6919_v31 = vadd.f32 %v6918_v38, %v6917_v32  ;;  %8265 = vmatprep.subr.bf16.mxu0 %v8264_v22  ;;  %8281 = vmatprep.subr.bf16.mxu1 %v8280_v42  ;;  %v8316_v15 = vpack.c.bf16 %v3373_v34, %v3372_v24  ;;  %v3493_v44 = vld [vmem:[#allocation8 + $0x1a8] sm:$0xff]  ;;  %v3614_v32 = vld [vmem:[#allocation8 + $0x1e0] sm:$0xff]  ;;  %v3617_v3 = vld [vmem:[#allocation8 + $0x1f8] sm:$0xff] }
 0x2ff   : > { %v3615_v38 = vld [vmem:[#allocation8 + $0x1e8] sm:$0xff] }
 0x300   : > { %v2706_v30 = vadd.f32 %v6919_v31, %v10305_v54  ;;  %v6920_v58 = vpop.f32.mrb[74].mxu0  ;;  %7351 = vmatmul.mubr.msk.f32.gmra.mrb[82].mxu0 %vm731_vm0, %v10334_v60  ;;  %7379 = vmatmul.mubr.msk.f32.gmra.mrb[66].mxu1 %vm731_vm0, %v10334_v60  ;;  %v8328_v31 = vpack.c.bf16 %v3493_v44, %v3492_v52 }
 0x301   : > { %v6921_v41 = vpop.f32.mrb[75].mxu0  ;;  %8267 = vmatpush3.bf16.msra.mxu0 %v8264_v22  ;;  %8283 = vmatpush3.bf16.msra.mxu1 %v8280_v42  ;;  %v3491_v22 = vld [vmem:[#allocation8 + $0x198] sm:$0xff]  ;;  %v3612_v42 = vld [vmem:[#allocation8 + $0x1d0] sm:$0xff] }
 0x302   : > { %v10341_v48 = vmax.f32 %v2706_v30, 0.0  ;;  %v6922_v63 = vadd.f32 %v6921_v41, %v6920_v58  ;;  %8269 = vmatprep.subr.bf16.mxu0 %v8268_v45  ;;  %8285 = vmatprep.subr.bf16.mxu1 %v8284_v36  ;;  %v8324_v43 = vpack.c.bf16 %v3491_v22, %v3490_v23  ;;  %v8340_v27 = vpack.c.bf16 %v3613_v39, %v3612_v42  ;;  %v3732_v58 = vld [vmem:[#allocation8 + $0x200] sm:$0xff]  ;;  %v3733_v41 = vld [vmem:[#allocation8 + $0x208] sm:$0xff] }
 0x303   : > { %v8348_v30 = vpack.c.bf16 %v3617_v3, %v3616_v62 }
 0x304   : > { %v2711_v1 = vadd.f32 %v6922_v63, %v10307_v2  ;;  %v6923_v54 = vpop.f32.mrb[76].mxu0  ;;  %7353 = vmatprep.mubr.msk.f32.mxu0 %vm731_vm0, %v10341_v48  ;;  %7381 = vmatprep.mubr.msk.f32.mxu1 %vm731_vm0, %v10341_v48  ;;  %v8352_v63 = vpack.c.bf16 %v3733_v41, %v3732_v58 }
 0x305   : > { %v6924_v11 = vpop.f32.mrb[77].mxu0  ;;  %8271 = vmatpush3.bf16.msra.mxu0 %v8268_v45  ;;  %8287 = vmatpush3.bf16.msra.mxu1 %v8284_v36  ;;  %v8344_v45 = vpack.c.bf16 %v3615_v38, %v3614_v32  ;;  %v3494_v36 = vld [vmem:[#allocation8 + $0x1b0] sm:$0xff] }
 0x306   : > { %v10348_v37 = vmax.f32 %v2711_v1, 0.0  ;;  %v6925_v5 = vadd.f32 %v6924_v11, %v6923_v54  ;;  %8289 = vmatprep.subr.bf16.mxu0 %v8288_v4  ;;  %8305 = vmatprep.subr.bf16.mxu1 %v8304_v6  ;;  %v8332_v56 = vpack.c.bf16 %v3495_v53, %v3494_v36  ;;  %v3736_v54 = vld [vmem:[#allocation8 + $0x220] sm:$0xff]  ;;  %v3737_v11 = vld [vmem:[#allocation8 + $0x228] sm:$0xff] }
 0x308   : > { %v2716_v51 = vadd.f32 %v6925_v5, %v10309_v13  ;;  %v6926_v14 = vpop.f32.mrb[78].mxu0  ;;  %7354 = vmatmul.mubr.msk.f32.gmra.mrb[84].mxu0 %vm731_vm0, %v10348_v37  ;;  %7382 = vmatmul.mubr.msk.f32.gmra.mrb[68].mxu1 %vm731_vm0, %v10348_v37  ;;  %v8360_v5 = vpack.c.bf16 %v3737_v11, %v3736_v54 }
 0x309   : > { %v6927_v2 = vpop.f32.mrb[79].mxu0 }
 0x30a   : > { %v10355_v9 = vmax.f32 %v2716_v51, 0.0  ;;  %v6928_v55 = vadd.f32 %v6927_v2, %v6926_v14  ;;  %v3738_v51 = vld [vmem:[#allocation8 + $0x230] sm:$0xff]  ;;  %v3739_v14 = vld [vmem:[#allocation8 + $0x238] sm:$0xff] }
 0x30b   : > { %v8364_v2 = vpack.c.bf16 %v3739_v14, %v3738_v51 }
 0x30c   : > { %v2721_v17 = vadd.f32 %v6928_v55, %v10311_v18  ;;  %7356 = vmatprep.mubr.msk.f32.mxu0 %vm731_vm0, %v10355_v9  ;;  %7384 = vmatprep.mubr.msk.f32.mxu1 %vm731_vm0, %v10355_v9  ;;  %v8292_v18 = vpack.c.bf16 %v3247_v59, %v3246_v61 }
 0x30e   : > { %v10362_v13 = vmax.f32 %v2721_v17, 0.0 }
 0x310   : > { %7357 = vmatmul.mubr.msk.f32.gmra.mrb[86].mxu0 %vm731_vm0, %v10362_v13  ;;  %7385 = vmatmul.mubr.msk.f32.gmra.mrb[70].mxu1 %vm731_vm0, %v10362_v13 }
 0x311   : > { %7403 = vmatprep.mubr.msk.f32.mxu0 %vm731_vm0, %v10313_v0  ;;  %7431 = vmatprep.mubr.msk.f32.mxu1 %vm731_vm0, %v10313_v0 }
 0x314   : > { %7404 = vmatmul.mubr.msk.f32.vlgmr.msra.gmra.mrb[88].mxu0 %vm731_vm0, %v10319_v12  ;;  %7432 = vmatmul.mubr.msk.f32.vlgmr.msra.gmra.mrb[72].mxu1 %vm731_vm0, %v10319_v12 }
 0x315   : > { %7406 = vmatprep.mubr.msk.f32.mxu0 %vm731_vm0, %v10327_v40  ;;  %7434 = vmatprep.mubr.msk.f32.mxu1 %vm731_vm0, %v10327_v40 }
 0x316   : > { %8291 = vmatpush3.bf16.msra.mxu0 %v8288_v4  ;;  %8307 = vmatpush3.bf16.msra.mxu1 %v8304_v6  ;;  %v3734_v4 = vld [vmem:[#allocation8 + $0x210] sm:$0xff]  ;;  %v3735_v6 = vld [vmem:[#allocation8 + $0x218] sm:$0xff] }
 0x317   : > { %8293 = vmatprep.subr.bf16.mxu0 %v8292_v18  ;;  %8309 = vmatprep.subr.bf16.mxu1 %v8308_v21  ;;  %v8356_v1 = vpack.c.bf16 %v3735_v6, %v3734_v4 }
 0x318   : > { %7407 = vmatmul.mubr.msk.f32.gmra.mrb[90].mxu0 %vm731_vm0, %v10334_v60  ;;  %7435 = vmatmul.mubr.msk.f32.gmra.mrb[74].mxu1 %vm731_vm0, %v10334_v60 }
 0x319   : > { %7409 = vmatprep.mubr.msk.f32.mxu0 %vm731_vm0, %v10341_v48  ;;  %7437 = vmatprep.mubr.msk.f32.mxu1 %vm731_vm0, %v10341_v48 }
 0x31a   : > { %8295 = vmatpush3.bf16.msra.mxu0 %v8292_v18  ;;  %8311 = vmatpush3.bf16.msra.mxu1 %v8308_v21 }
 0x31b   : > { %8297 = vmatprep.subr.bf16.mxu0 %v8296_v57  ;;  %8313 = vmatprep.subr.bf16.mxu1 %v8312_v28 }
 0x31c   : > { %7410 = vmatmul.mubr.msk.f32.gmra.mrb[92].mxu0 %vm731_vm0, %v10348_v37  ;;  %7438 = vmatmul.mubr.msk.f32.gmra.mrb[76].mxu1 %vm731_vm0, %v10348_v37 }
 0x31d   : > { %7412 = vmatprep.mubr.msk.f32.mxu0 %vm731_vm0, %v10355_v9  ;;  %7440 = vmatprep.mubr.msk.f32.mxu1 %vm731_vm0, %v10355_v9 }
 0x31e   : > { %8299 = vmatpush3.bf16.msra.mxu0 %v8296_v57  ;;  %8315 = vmatpush3.bf16.msra.mxu1 %v8312_v28 }
 0x31f   : > { %8301 = vmatprep.subr.bf16.mxu0 %v8300_v35  ;;  %8317 = vmatprep.subr.bf16.mxu1 %v8316_v15 }
 0x320   : > { %7413 = vmatmul.mubr.msk.f32.gmra.mrb[94].mxu0 %vm731_vm0, %v10362_v13  ;;  %7441 = vmatmul.mubr.msk.f32.gmra.mrb[78].mxu1 %vm731_vm0, %v10362_v13 }
 0x321   : > { %7459 = vmatprep.mubr.msk.f32.mxu0 %vm731_vm0, %v10313_v0  ;;  %7487 = vmatprep.mubr.msk.f32.mxu1 %vm731_vm0, %v10313_v0 }
 0x322   : > { %8303 = vmatpush3.bf16.msra.mxu0 %v8300_v35  ;;  %8319 = vmatpush3.bf16.msra.mxu1 %v8316_v15 }
 0x323   : > { %8321 = vmatprep.subr.bf16.mxu0 %v8320_v49  ;;  %8337 = vmatprep.subr.bf16.mxu1 %v8336_v33 }
 0x325   : > { %7460 = vmatmul.mubr.msk.f32.vlgmr.msra.gmra.mrb[96].mxu0 %vm731_vm0, %v10319_v12  ;;  %7488 = vmatmul.mubr.msk.f32.vlgmr.msra.gmra.mrb[80].mxu1 %vm731_vm0, %v10319_v12 }
 0x326   : > { %7462 = vmatprep.mubr.msk.f32.mxu0 %vm731_vm0, %v10327_v40  ;;  %7490 = vmatprep.mubr.msk.f32.mxu1 %vm731_vm0, %v10327_v40 }
 0x327   : > { %8323 = vmatpush3.bf16.msra.mxu0 %v8320_v49  ;;  %8339 = vmatpush3.bf16.msra.mxu1 %v8336_v33 }
 0x328   : > { %8325 = vmatprep.subr.bf16.mxu0 %v8324_v43  ;;  %8341 = vmatprep.subr.bf16.mxu1 %v8340_v27 }
 0x329   : > { %7463 = vmatmul.mubr.msk.f32.gmra.mrb[98].mxu0 %vm731_vm0, %v10334_v60  ;;  %7491 = vmatmul.mubr.msk.f32.gmra.mrb[82].mxu1 %vm731_vm0, %v10334_v60 }
 0x32a   : > { %7465 = vmatprep.mubr.msk.f32.mxu0 %vm731_vm0, %v10341_v48  ;;  %7493 = vmatprep.mubr.msk.f32.mxu1 %vm731_vm0, %v10341_v48 }
 0x32b   : > { %8327 = vmatpush3.bf16.msra.mxu0 %v8324_v43  ;;  %8343 = vmatpush3.bf16.msra.mxu1 %v8340_v27 }
 0x32c   : > { %8329 = vmatprep.subr.bf16.mxu0 %v8328_v31  ;;  %8345 = vmatprep.subr.bf16.mxu1 %v8344_v45 }
 0x32d   : > { %7466 = vmatmul.mubr.msk.f32.gmra.mrb[100].mxu0 %vm731_vm0, %v10348_v37  ;;  %7494 = vmatmul.mubr.msk.f32.gmra.mrb[84].mxu1 %vm731_vm0, %v10348_v37 }
 0x32e   : > { %7468 = vmatprep.mubr.msk.f32.mxu0 %vm731_vm0, %v10355_v9  ;;  %7496 = vmatprep.mubr.msk.f32.mxu1 %vm731_vm0, %v10355_v9 }
 0x32f   : > { %8331 = vmatpush3.bf16.msra.mxu0 %v8328_v31  ;;  %8347 = vmatpush3.bf16.msra.mxu1 %v8344_v45 }
 0x330   : > { %8333 = vmatprep.subr.bf16.mxu0 %v8332_v56  ;;  %8349 = vmatprep.subr.bf16.mxu1 %v8348_v30 }
 0x331   : > { %7469 = vmatmul.mubr.msk.f32.gmra.mrb[102].mxu0 %vm731_vm0, %v10362_v13  ;;  %7497 = vmatmul.mubr.msk.f32.gmra.mrb[86].mxu1 %vm731_vm0, %v10362_v13 }
 0x332   : > { %7515 = vmatprep.mubr.msk.f32.mxu0 %vm731_vm0, %v10313_v0  ;;  %7543 = vmatprep.mubr.msk.f32.mxu1 %vm731_vm0, %v10313_v0 }
 0x333   : > { %8335 = vmatpush3.bf16.msra.mxu0 %v8332_v56  ;;  %8351 = vmatpush3.bf16.msra.mxu1 %v8348_v30 }
 0x334   : > { %8353 = vmatprep.subr.bf16.mxu0 %v8352_v63 }
 0x336   : > { %7516 = vmatmul.mubr.msk.f32.vlgmr.msra.gmra.mrb[104].mxu0 %vm731_vm0, %v10319_v12  ;;  %7544 = vmatmul.mubr.msk.f32.vlgmr.msra.gmra.mrb[88].mxu1 %vm731_vm0, %v10319_v12 }
 0x337   : > { %7518 = vmatprep.mubr.msk.f32.mxu0 %vm731_vm0, %v10327_v40  ;;  %7546 = vmatprep.mubr.msk.f32.mxu1 %vm731_vm0, %v10327_v40 }
 0x338   : > { %8355 = vmatpush3.bf16.msra.mxu0 %v8352_v63 }
 0x339   : > { %8357 = vmatprep.subr.bf16.mxu0 %v8356_v1 }
 0x33a   : > { %7519 = vmatmul.mubr.msk.f32.gmra.mrb[106].mxu0 %vm731_vm0, %v10334_v60  ;;  %7547 = vmatmul.mubr.msk.f32.gmra.mrb[90].mxu1 %vm731_vm0, %v10334_v60 }
 0x33b   : > { %7521 = vmatprep.mubr.msk.f32.mxu0 %vm731_vm0, %v10341_v48  ;;  %7549 = vmatprep.mubr.msk.f32.mxu1 %vm731_vm0, %v10341_v48 }
 0x33c   : > { %8359 = vmatpush3.bf16.msra.mxu0 %v8356_v1 }
 0x33d   : > { %8361 = vmatprep.subr.bf16.mxu0 %v8360_v5 }
 0x33e   : > { %7522 = vmatmul.mubr.msk.f32.gmra.mrb[108].mxu0 %vm731_vm0, %v10348_v37  ;;  %7550 = vmatmul.mubr.msk.f32.gmra.mrb[92].mxu1 %vm731_vm0, %v10348_v37 }
 0x33f   : > { %7524 = vmatprep.mubr.msk.f32.mxu0 %vm731_vm0, %v10355_v9  ;;  %7552 = vmatprep.mubr.msk.f32.mxu1 %vm731_vm0, %v10355_v9 }
 0x340   : > { %8363 = vmatpush3.bf16.msra.mxu0 %v8360_v5 }
 0x341   : > { %8365 = vmatprep.subr.bf16.mxu0 %v8364_v2 }
 0x342   : > { %7525 = vmatmul.mubr.msk.f32.gmra.mrb[110].mxu0 %vm731_vm0, %v10362_v13  ;;  %7553 = vmatmul.mubr.msk.f32.gmra.mrb[94].mxu1 %vm731_vm0, %v10362_v13 }
 0x343   : > { %7571 = vmatprep.mubr.msk.f32.mxu0 %vm731_vm0, %v10313_v0  ;;  %v3854_v0 = vld [vmem:[%s10758_s4 + $0x8] sm:$0xff] }
 0x344   : > { %8367 = vmatpush3.bf16.msra.mxu0 %v8364_v2  ;;  %4012 = vmatprep.mubr.f32.mxu1 %v3854_v0 }
 0x347   : > { %7572 = vmatmul.mubr.msk.f32.vlgmr.msra.gmra.mrb[112].mxu0 %vm731_vm0, %v10319_v12  ;;  %v3856_v12 = vld [vmem:[%s10758_s4 + $0x18] sm:$0xff] }
 0x348   : > { %7574 = vmatprep.mubr.msk.f32.mxu0 %vm731_vm0, %v10327_v40 }
 0x34b   : > { %7575 = vmatmul.mubr.msk.f32.gmra.mrb[114].mxu0 %vm731_vm0, %v10334_v60 }
 0x34c   : > { %7577 = vmatprep.mubr.msk.f32.mxu0 %vm731_vm0, %v10341_v48 }
 0x34f   : > { %7578 = vmatmul.mubr.msk.f32.gmra.mrb[116].mxu0 %vm731_vm0, %v10348_v37 }
 0x350   : > { %7580 = vmatprep.mubr.msk.f32.mxu0 %vm731_vm0, %v10355_v9 }
 0x353   : > { %7581 = vmatmul.mubr.msk.f32.gmra.mrb[118].mxu0 %vm731_vm0, %v10362_v13 }
 0x354   : > { %4087 = vmatprep.mubr.f32.mxu0 %v3856_v12 }
 0x3cb   : > { %v7349_v40 = vpop.f32.mrb[80].mxu0  ;;  %v10486_v60 = vpop.f32.mrb[64].mxu1 }
 0x3cc   : > { %v2830_v48 = vpop.f32.mrb[81].mxu0  ;;  %v2952_v37 = vpop.f32.mrb[65].mxu1 }
 0x3cd   : > { %v8370_v55 = vpack.c.bf16 %v7349_v40, %v2830_v48  ;;  %v8386_v9 = vpack.c.bf16 %v10486_v60, %v2952_v37 }
 0x3d3   : > { %v7352_v17 = vpop.f32.mrb[82].mxu0  ;;  %v10489_v13 = vpop.f32.mrb[66].mxu1 }
 0x3d4   : > { %v2840_v61 = vpop.f32.mrb[83].mxu0  ;;  %v10491_v59 = vpop.f32.mrb[67].mxu1 }
 0x3d5   : > { %v8374_v50 = vpack.c.bf16 %v7352_v17, %v2840_v61  ;;  %v8390_v20 = vpack.c.bf16 %v10489_v13, %v10491_v59  ;;  %v3853_v61 = vld [vmem:[%s10758_s4] sm:$0xff] }
 0x3db   : > { %v7355_v18 = vpop.f32.mrb[84].mxu0  ;;  %v10495_v21 = vpop.f32.mrb[68].mxu1 }
 0x3dc   : > { %v2850_v8 = vpop.f32.mrb[85].mxu0  ;;  %v10497_v25 = vpop.f32.mrb[69].mxu1 }
 0x3dd   : > { %v8378_v26 = vpack.c.bf16 %v7355_v18, %v2850_v8  ;;  %v8394_v7 = vpack.c.bf16 %v10495_v21, %v10497_v25 }
 0x3e3   : > { %v7358_v57 = vpop.f32.mrb[86].mxu0  ;;  %v10501_v28 = vpop.f32.mrb[70].mxu1 }
 0x3e4   : > { %v2860_v29 = vpop.f32.mrb[87].mxu0  ;;  %v10503_v16 = vpop.f32.mrb[71].mxu1 }
 0x3e5   : > { %v8382_v24 = vpack.c.bf16 %v7358_v57, %v2860_v29  ;;  %v8398_v34 = vpack.c.bf16 %v10501_v28, %v10503_v16  ;;  %v3857_v28 = vld [vmem:[%s10758_s4 + $0x20] sm:$0xff] }
 0x3e7   : > { %v7405_v35 = vpop.f32.mrb[88].mxu0  ;;  %v7433_v15 = vpop.f32.mrb[72].mxu1 }
 0x3e8   : > { %v3074_v10 = vpop.f32.mrb[89].mxu0  ;;  %v3196_v46 = vpop.f32.mrb[73].mxu1 }
 0x3e9   : > { %v8368_v47 = vpack.c.bf16 %v7405_v35, %v3074_v10  ;;  %v8384_v19 = vpack.c.bf16 %v7433_v15, %v3196_v46 }
 0x3eb   : > { %v7408_v49 = vpop.f32.mrb[90].mxu0  ;;  %v7436_v33 = vpop.f32.mrb[74].mxu1  ;;  %8369 = vmatprep.subr.bf16.mxu1 %v8368_v47 }
 0x3ec   : > { %v3084_v23 = vpop.f32.mrb[91].mxu0  ;;  %v3206_v22 = vpop.f32.mrb[75].mxu1  ;;  %8371 = vmatpush3.bf16.msra.mxu1 %v8370_v55 }
 0x3ed   : > { %v8372_v42 = vpack.c.bf16 %v7408_v49, %v3084_v23  ;;  %v8388_v39 = vpack.c.bf16 %v7436_v33, %v3206_v22 }
 0x3ef   : > { %v7411_v43 = vpop.f32.mrb[92].mxu0  ;;  %v7439_v27 = vpop.f32.mrb[76].mxu1  ;;  %8373 = vmatprep.subr.bf16.mxu1 %v8372_v42 }
 0x3f0   : > { %v3094_v52 = vpop.f32.mrb[93].mxu0  ;;  %v3216_v44 = vpop.f32.mrb[77].mxu1  ;;  %8375 = vmatpush3.bf16.msra.mxu1 %v8374_v50 }
 0x3f1   : > { %v8376_v32 = vpack.c.bf16 %v7411_v43, %v3094_v52  ;;  %v8392_v38 = vpack.c.bf16 %v7439_v27, %v3216_v44 }
 0x3f3   : > { %v7414_v31 = vpop.f32.mrb[94].mxu0  ;;  %v7442_v45 = vpop.f32.mrb[78].mxu1  ;;  %8377 = vmatprep.subr.bf16.mxu1 %v8376_v32 }
 0x3f4   : > { %v3104_v36 = vpop.f32.mrb[95].mxu0  ;;  %v3226_v53 = vpop.f32.mrb[79].mxu1  ;;  %8379 = vmatpush3.bf16.msra.mxu1 %v8378_v26  ;;  %v3858_v26 = vld [vmem:[%s10758_s4 + $0x28] sm:$0xff] }
 0x3f5   : > { %v8380_v62 = vpack.c.bf16 %v7414_v31, %v3104_v36  ;;  %v8396_v3 = vpack.c.bf16 %v7442_v45, %v3226_v53  ;;  %v4175_v53 = vld [vmem:[#allocation10] sm:$0xff] }
 0x3f7   : > { %8381 = vmatprep.subr.bf16.mxu1 %v8380_v62  ;;  %v4176_v62 = vld [vmem:[#allocation10 + $0x8] sm:$0xff] }
 0x3f8   : > { %v7461_v56 = vpop.f32.mrb[96].mxu0  ;;  %v10507_v30 = vpop.f32.mrb[80].mxu1  ;;  %8383 = vmatpush3.bf16.msra.mxu1 %v8382_v24 }
 0x3f9   : > { %v3318_v58 = vpop.f32.mrb[97].mxu0  ;;  %v10509_v41 = vpop.f32.mrb[81].mxu1  ;;  %8385 = vmatprep.subr.bf16.mxu1 %v8384_v19 }
 0x3fa   : > { %v8402_v63 = vpack.c.bf16 %v7461_v56, %v3318_v58  ;;  %v8418_v4 = vpack.c.bf16 %v10507_v30, %v10509_v41  ;;  %v4270_v56 = vld [vmem:[#allocation10 + $0x88] sm:$0xff]  ;;  %v8448_v41 = vpack.c.bf16 %v4176_v62, %v4175_v53 }
 0x3fc   : > { %v7464_v6 = vpop.f32.mrb[98].mxu0  ;;  %v10513_v1 = vpop.f32.mrb[82].mxu1  ;;  %8387 = vmatpush3.bf16.msra.mxu1 %v8386_v9 }
 0x3fd   : > { %v3328_v54 = vpop.f32.mrb[99].mxu0  ;;  %v10515_v11 = vpop.f32.mrb[83].mxu1  ;;  %8389 = vmatprep.subr.bf16.mxu1 %v8388_v39 }
 0x3fe   : > { %v8406_v5 = vpack.c.bf16 %v7464_v6, %v3328_v54  ;;  %v8422_v51 = vpack.c.bf16 %v10513_v1, %v10515_v11  ;;  %v4177_v6 = vld [vmem:[#allocation10 + $0x10] sm:$0xff]  ;;  %v4178_v1 = vld [vmem:[#allocation10 + $0x18] sm:$0xff] }
 0x3ff   : > { %v4271_v54 = vld [vmem:[#allocation10 + $0x90] sm:$0xff]  ;;  %v4272_v11 = vld [vmem:[#allocation10 + $0x98] sm:$0xff] }
 0x400   : > { %v7467_v14 = vpop.f32.mrb[100].mxu0  ;;  %v10519_v2 = vpop.f32.mrb[84].mxu1  ;;  %8391 = vmatpush3.bf16.msra.mxu1 %v8390_v20  ;;  %v3859_v20 = vld [vmem:[%s10758_s4 + $0x30] sm:$0xff] }
 0x401   : > { %v3338_v0 = vpop.f32.mrb[101].mxu0  ;;  %v10521_v12 = vpop.f32.mrb[85].mxu1  ;;  %8393 = vmatprep.subr.bf16.mxu1 %v8392_v38 }
 0x402   : > { %v8410_v40 = vpack.c.bf16 %v7467_v14, %v3338_v0  ;;  %v8426_v60 = vpack.c.bf16 %v10519_v2, %v10521_v12  ;;  %v3862_v14 = vld [vmem:[%s10758_s4 + $0x48] sm:$0xff]  ;;  %v8452_v2 = vpack.c.bf16 %v4178_v1, %v4177_v6  ;;  %v8484_v0 = vpack.c.bf16 %v4272_v11, %v4271_v54  ;;  %v4179_v12 = vld [vmem:[#allocation10 + $0x20] sm:$0xff] }
 0x404   : > { %v7470_v48 = vpop.f32.mrb[102].mxu0  ;;  %v10525_v37 = vpop.f32.mrb[86].mxu1  ;;  %8395 = vmatpush3.bf16.msra.mxu1 %v8394_v7 }
 0x405   : > { %v3348_v55 = vpop.f32.mrb[103].mxu0  ;;  %v10530_v9 = vpop.f32.mrb[87].mxu1  ;;  %8397 = vmatprep.subr.bf16.mxu1 %v8396_v3  ;;  %v4269_v3 = vld [vmem:[#allocation10 + $0x80] sm:$0xff] }
 0x406   : > { %v8414_v17 = vpack.c.bf16 %v7470_v48, %v3348_v55  ;;  %v8430_v13 = vpack.c.bf16 %v10525_v37, %v10530_v9  ;;  %v4274_v48 = vld [vmem:[#allocation10 + $0xa8] sm:$0xff] }
 0x407   : > { %v3860_v37 = vld [vmem:[%s10758_s4 + $0x38] sm:$0xff] }
 0x408   : > { %8399 = vmatpush3.bf16.msra.mxu1 %v8398_v34 }
 0x409   : > { %v7517_v59 = vpop.f32.mrb[104].mxu0  ;;  %v7545_v50 = vpop.f32.mrb[88].mxu1 }
 0x40a   : > { %v3562_v18 = vpop.f32.mrb[105].mxu0  ;;  %v3684_v21 = vpop.f32.mrb[89].mxu1 }
 0x40b   : > { %v8400_v8 = vpack.c.bf16 %v7517_v59, %v3562_v18  ;;  %v8416_v25 = vpack.c.bf16 %v7545_v50, %v3684_v21  ;;  %4013 = vmatmul.mubr.f32.vlgmr.msra.gmra.mrb[96].mxu1 %v3853_v61  ;;  %v4275_v61 = vld [vmem:[#allocation10 + $0xb0] sm:$0xff]  ;;  %v4276_v50 = vld [vmem:[#allocation10 + $0xb8] sm:$0xff]  ;;  %v4184_v18 = vld [vmem:[#allocation10 + $0x48] sm:$0xff] }
 0x40c   : > { %4017 = vmatprep.mubr.f32.mxu1 %v3859_v20  ;;  %v4183_v20 = vld [vmem:[#allocation10 + $0x40] sm:$0xff]  ;;  %v8492_v21 = vpack.c.bf16 %v4276_v50, %v4275_v61  ;;  %v4368_v61 = vld [vmem:[#allocation10 + $0x128] sm:$0xff] }
 0x40d   : > { %v7520_v7 = vpop.f32.mrb[106].mxu0  ;;  %v7548_v57 = vpop.f32.mrb[90].mxu1  ;;  %8401 = vmatprep.subr.bf16.mxu0 %v8400_v8  ;;  %v8464_v8 = vpack.c.bf16 %v4184_v18, %v4183_v20  ;;  %v4462_v50 = vld [vmem:[#allocation10 + $0x1a8] sm:$0xff] }
 0x40e   : > { %v3572_v29 = vpop.f32.mrb[107].mxu0  ;;  %v3694_v16 = vpop.f32.mrb[91].mxu1  ;;  %8403 = vmatpush3.bf16.msra.mxu0 %v8402_v63 }
 0x40f   : > { %v8404_v24 = vpack.c.bf16 %v7520_v7, %v3572_v29  ;;  %v8420_v34 = vpack.c.bf16 %v7548_v57, %v3694_v16  ;;  %4018 = vmatmul.mubr.f32.gmra.mrb[98].mxu1 %v3858_v26  ;;  %v4278_v26 = vld [vmem:[#allocation10 + $0xc8] sm:$0xff]  ;;  %v4185_v57 = vld [vmem:[#allocation10 + $0x50] sm:$0xff] }
 0x410   : > { %7599 = vmatprep.mubr.msk.f32.mxu1 %vm731_vm0, %v3857_v28  ;;  %v4186_v28 = vld [vmem:[#allocation10 + $0x58] sm:$0xff]  ;;  %v4279_v29 = vld [vmem:[#allocation10 + $0xd0] sm:$0xff] }
 0x411   : > { %v7523_v35 = vpop.f32.mrb[108].mxu0  ;;  %v7551_v15 = vpop.f32.mrb[92].mxu1  ;;  %8405 = vmatprep.subr.bf16.mxu0 %v8404_v24  ;;  %v8468_v16 = vpack.c.bf16 %v4186_v28, %v4185_v57  ;;  %v4280_v24 = vld [vmem:[#allocation10 + $0xd8] sm:$0xff]  ;;  %v4371_v28 = vld [vmem:[#allocation10 + $0x140] sm:$0xff] }
 0x412   : > { %v3582_v10 = vpop.f32.mrb[109].mxu0  ;;  %v3704_v46 = vpop.f32.mrb[93].mxu1  ;;  %8407 = vmatpush3.bf16.msra.mxu0 %v8406_v5  ;;  %v3855_v5 = vld [vmem:[%s10758_s4 + $0x10] sm:$0xff] }
 0x413   : > { %v8408_v47 = vpack.c.bf16 %v7523_v35, %v3582_v10  ;;  %v8424_v19 = vpack.c.bf16 %v7551_v15, %v3704_v46  ;;  %v4187_v35 = vld [vmem:[#allocation10 + $0x60] sm:$0xff]  ;;  %v4188_v15 = vld [vmem:[#allocation10 + $0x68] sm:$0xff] }
 0x414   : > { %v4281_v10 = vld [vmem:[#allocation10 + $0xe0] sm:$0xff]  ;;  %v8472_v46 = vpack.c.bf16 %v4188_v15, %v4187_v35  ;;  %v4373_v15 = vld [vmem:[#allocation10 + $0x150] sm:$0xff] }
 0x415   : > { %v7526_v49 = vpop.f32.mrb[110].mxu0  ;;  %v7554_v33 = vpop.f32.mrb[94].mxu1  ;;  %8409 = vmatprep.subr.bf16.mxu0 %v8408_v47  ;;  %v4282_v47 = vld [vmem:[#allocation10 + $0xe8] sm:$0xff] }
 0x416   : > { %v3592_v23 = vpop.f32.mrb[111].mxu0  ;;  %v3714_v22 = vpop.f32.mrb[95].mxu1  ;;  %8411 = vmatpush3.bf16.msra.mxu0 %v8410_v40  ;;  %v4180_v40 = vld [vmem:[#allocation10 + $0x28] sm:$0xff] }
 0x417   : > { %v8412_v42 = vpack.c.bf16 %v7526_v49, %v3592_v23  ;;  %v8428_v39 = vpack.c.bf16 %v7554_v33, %v3714_v22  ;;  %v8456_v55 = vpack.c.bf16 %v4180_v40, %v4179_v12  ;;  %v4190_v49 = vld [vmem:[#allocation10 + $0x78] sm:$0xff]  ;;  %v8504_v33 = vpack.c.bf16 %v4282_v47, %v4281_v10  ;;  %v4283_v22 = vld [vmem:[#allocation10 + $0xf0] sm:$0xff] }
 0x418   : > { %v4365_v12 = vld [vmem:[#allocation10 + $0x110] sm:$0xff]  ;;  %v4374_v10 = vld [vmem:[#allocation10 + $0x158] sm:$0xff] }
 0x419   : > { %8413 = vmatprep.subr.bf16.mxu0 %v8412_v42  ;;  %v4284_v42 = vld [vmem:[#allocation10 + $0xf8] sm:$0xff] }
 0x41a   : > { %v7573_v43 = vpop.f32.mrb[112].mxu0  ;;  %8415 = vmatpush3.bf16.msra.mxu0 %v8414_v17  ;;  %v4181_v17 = vld [vmem:[#allocation10 + $0x30] sm:$0xff]  ;;  %v4468_v47 = vld [vmem:[#allocation10 + $0x1d8] sm:$0xff] }
 0x41b   : > { %v3806_v27 = vpop.f32.mrb[113].mxu0  ;;  %8417 = vmatprep.subr.bf16.mxu0 %v8416_v25  ;;  %v4277_v25 = vld [vmem:[#allocation10 + $0xc0] sm:$0xff] }
 0x41c   : > { %v8432_v52 = vpack.c.bf16 %v7573_v43, %v3806_v27  ;;  %v8496_v7 = vpack.c.bf16 %v4278_v26, %v4277_v25  ;;  %v8508_v43 = vpack.c.bf16 %v4284_v42, %v4283_v22  ;;  %v4364_v27 = vld [vmem:[#allocation10 + $0x108] sm:$0xff]  ;;  %v4463_v25 = vld [vmem:[#allocation10 + $0x1b0] sm:$0xff]  ;;  %v4464_v26 = vld [vmem:[#allocation10 + $0x1b8] sm:$0xff] }
 0x41d   : > { %v8556_v57 = vpack.c.bf16 %v4464_v26, %v4463_v25  ;;  %v4469_v22 = vld [vmem:[#allocation10 + $0x1e0] sm:$0xff]  ;;  %v4470_v42 = vld [vmem:[#allocation10 + $0x1e8] sm:$0xff] }
 0x41e   : > { %v7576_v44 = vpop.f32.mrb[114].mxu0  ;;  %8433 = vmatprep.subr.bf16.mxu1 %v8432_v52  ;;  %8419 = vmatpush3.bf16.msra.mxu0 %v8418_v4  ;;  %v8480_v4 = vpack.c.bf16 %v4270_v56, %v4269_v3  ;;  %v6391_v56 = vld [vmem:[%s10760_s6] ss:$0 sm:$0xff] }
 0x41f   : > { %v3816_v32 = vpop.f32.mrb[115].mxu0  ;;  %8435 = vmatpush3.bf16.msra.mxu1 %v8432_v52  ;;  %8421 = vmatprep.subr.bf16.mxu0 %v8420_v34  ;;  %v8500_v34 = vpack.c.bf16 %v4280_v24, %v4279_v29  ;;  %v4457_v52 = vld [vmem:[#allocation10 + $0x180] sm:$0xff]  ;;  %v4372_v29 = vld [vmem:[#allocation10 + $0x148] sm:$0xff] }
 0x420   : > { %v8436_v38 = vpack.c.bf16 %v7576_v44, %v3816_v32  ;;  %v4458_v44 = vld [vmem:[#allocation10 + $0x188] sm:$0xff] }
 0x421   : > { %v4466_v24 = vld [vmem:[#allocation10 + $0x1c8] sm:$0xff] }
 0x422   : > { %v7579_v31 = vpop.f32.mrb[116].mxu0  ;;  %8437 = vmatprep.subr.bf16.mxu1 %v8436_v38  ;;  %8423 = vmatpush3.bf16.msra.mxu0 %v8422_v51  ;;  %v3861_v51 = vld [vmem:[%s10758_s4 + $0x40] sm:$0xff] }
 0x423   : > { %v3826_v45 = vpop.f32.mrb[117].mxu0  ;;  %8439 = vmatpush3.bf16.msra.mxu1 %v8436_v38  ;;  %8425 = vmatprep.subr.bf16.mxu0 %v8424_v19  ;;  %v4189_v19 = vld [vmem:[#allocation10 + $0x70] sm:$0xff]  ;;  %v8544_v38 = vpack.c.bf16 %v4458_v44, %v4457_v52  ;;  %v4378_v52 = vld [vmem:[#allocation10 + $0x178] sm:$0xff] }
 0x424   : > { %v8440_v36 = vpack.c.bf16 %v7579_v31, %v3826_v45  ;;  %v8476_v23 = vpack.c.bf16 %v4190_v49, %v4189_v19  ;;  %v8532_v19 = vpack.c.bf16 %v4374_v10, %v4373_v15  ;;  %v4471_v44 = vld [vmem:[#allocation10 + $0x1f0] sm:$0xff]  ;;  %v4660_v10 = vld [vmem:[#allocation10 + $0x2f8] sm:$0xff] }
 0x425   : > { %v4659_v15 = vld [vmem:[#allocation10 + $0x2f0] sm:$0xff] }
 0x426   : > { %v7582_v30 = vpop.f32.mrb[118].mxu0  ;;  %8441 = vmatprep.subr.bf16.mxu1 %v8440_v36  ;;  %8427 = vmatpush3.bf16.msra.mxu0 %v8426_v60  ;;  %v4273_v60 = vld [vmem:[#allocation10 + $0xa0] sm:$0xff] }
 0x427   : > { %v3836_v58 = vpop.f32.mrb[119].mxu0  ;;  %8443 = vmatpush3.bf16.msra.mxu1 %v8440_v36  ;;  %8429 = vmatprep.subr.bf16.mxu0 %v8428_v39  ;;  %v8488_v9 = vpack.c.bf16 %v4274_v48, %v4273_v60  ;;  %v4363_v39 = vld [vmem:[#allocation10 + $0x100] sm:$0xff]  ;;  %v4366_v60 = vld [vmem:[#allocation10 + $0x118] sm:$0xff]  ;;  %v4459_v48 = vld [vmem:[#allocation10 + $0x190] sm:$0xff] }
 0x428   : > { %v8444_v63 = vpack.c.bf16 %v7582_v30, %v3836_v58  ;;  %v8512_v32 = vpack.c.bf16 %v4364_v27, %v4363_v39  ;;  %v4377_v27 = vld [vmem:[#allocation10 + $0x170] sm:$0xff] }
 0x42a   : > { %8445 = vmatprep.subr.bf16.mxu1 %v8444_v63  ;;  %8431 = vmatpush3.bf16.msra.mxu0 %v8430_v13  ;;  %v4182_v13 = vld [vmem:[#allocation10 + $0x38] sm:$0xff] }
 0x42b   : > { %8447 = vmatpush3.bf16.msra.mxu1 %v8444_v63  ;;  %8449 = vmatprep.subr.bf16.mxu0 %v8448_v41  ;;  %v8460_v59 = vpack.c.bf16 %v4182_v13, %v4181_v17  ;;  %v8516_v17 = vpack.c.bf16 %v4366_v60, %v4365_v12  ;;  %v4558_v12 = vld [vmem:[#allocation10 + $0x238] sm:$0xff] }
 0x42c   : > { %8481 = vmatprep.subr.bf16.mxu1 %v8480_v4  ;;  %v4652_v60 = vld [vmem:[#allocation10 + $0x2b8] sm:$0xff] }
 0x42d   : > { %4088 = vmatmul.mubr.f32.vlgmr.msra.gmra.mrb[120].mxu0 %v3855_v5 }
 0x42e   : > { %4092 = vmatprep.mubr.f32.mxu0 %v3861_v51  ;;  %7600 = vmatmul.mubr.msk.f32.vlgmr.msra.gmra.mrb[100].mxu1 %vm731_vm0, %v3862_v14 }
 0x42f   : > { %8451 = vmatpush3.bf16.msra.mxu0 %v8448_v41  ;;  %8483 = vmatpush3.bf16.msra.mxu1 %v8480_v4 }
 0x430   : > { %8453 = vmatprep.subr.bf16.mxu0 %v8452_v2  ;;  %8485 = vmatprep.subr.bf16.mxu1 %v8484_v0 }
 0x431   : > { %4093 = vmatmul.mubr.f32.gmra.mrb[122].mxu0 %v3860_v37  ;;  %v4460_v37 = vld [vmem:[#allocation10 + $0x198] sm:$0xff] }
 0x432   : > { %v8548_v13 = vpack.c.bf16 %v4460_v37, %v4459_v48 }
 0x433   : > { %8455 = vmatpush3.bf16.msra.mxu0 %v8452_v2  ;;  %8487 = vmatpush3.bf16.msra.mxu1 %v8484_v0 }
 0x434   : > { %8457 = vmatprep.subr.bf16.mxu0 %v8456_v55  ;;  %8489 = vmatprep.subr.bf16.mxu1 %v8488_v9 }
 0x437   : > { %8459 = vmatpush3.bf16.msra.mxu0 %v8456_v55  ;;  %8491 = vmatpush3.bf16.msra.mxu1 %v8488_v9  ;;  %v4367_v9 = vld [vmem:[#allocation10 + $0x120] sm:$0xff] }
 0x438   : > { %8461 = vmatprep.subr.bf16.mxu0 %v8460_v59  ;;  %8493 = vmatprep.subr.bf16.mxu1 %v8492_v21  ;;  %v8520_v20 = vpack.c.bf16 %v4368_v61, %v4367_v9  ;;  %v4559_v9 = vld [vmem:[#allocation10 + $0x240] sm:$0xff]  ;;  %v4654_v61 = vld [vmem:[#allocation10 + $0x2c8] sm:$0xff] }
 0x43b   : > { %8463 = vmatpush3.bf16.msra.mxu0 %v8460_v59  ;;  %8495 = vmatpush3.bf16.msra.mxu1 %v8492_v21  ;;  %v4461_v59 = vld [vmem:[#allocation10 + $0x1a0] sm:$0xff]  ;;  %v4369_v21 = vld [vmem:[#allocation10 + $0x130] sm:$0xff] }
 0x43c   : > { %8465 = vmatprep.subr.bf16.mxu0 %v8464_v8  ;;  %8497 = vmatprep.subr.bf16.mxu1 %v8496_v7  ;;  %v8552_v18 = vpack.c.bf16 %v4462_v50, %v4461_v59 }
 0x43f   : > { %8467 = vmatpush3.bf16.msra.mxu0 %v8464_v8  ;;  %8499 = vmatpush3.bf16.msra.mxu1 %v8496_v7  ;;  %v4370_v8 = vld [vmem:[#allocation10 + $0x138] sm:$0xff] }
 0x440   : > { %8469 = vmatprep.subr.bf16.mxu0 %v8468_v16  ;;  %8501 = vmatprep.subr.bf16.mxu1 %v8500_v34  ;;  %v8524_v7 = vpack.c.bf16 %v4370_v8, %v4369_v21  ;;  %v4655_v21 = vld [vmem:[#allocation10 + $0x2d0] sm:$0xff]  ;;  %v4656_v8 = vld [vmem:[#allocation10 + $0x2d8] sm:$0xff] }
 0x441   : > { %v8628_v26 = vpack.c.bf16 %v4656_v8, %v4655_v21 }
 0x443   : > { %8471 = vmatpush3.bf16.msra.mxu0 %v8468_v16  ;;  %8503 = vmatpush3.bf16.msra.mxu1 %v8500_v34  ;;  %v4465_v16 = vld [vmem:[#allocation10 + $0x1c0] sm:$0xff]  ;;  %v8528_v34 = vpack.c.bf16 %v4372_v29, %v4371_v28  ;;  %v4658_v29 = vld [vmem:[#allocation10 + $0x2e8] sm:$0xff] }
 0x444   : > { %8473 = vmatprep.subr.bf16.mxu0 %v8472_v46  ;;  %8505 = vmatprep.subr.bf16.mxu1 %v8504_v33  ;;  %v8560_v35 = vpack.c.bf16 %v4466_v24, %v4465_v16  ;;  %v4657_v28 = vld [vmem:[#allocation10 + $0x2e0] sm:$0xff] }
 0x445   : > { %v8632_v24 = vpack.c.bf16 %v4658_v29, %v4657_v28  ;;  %v4930_v28 = vld [vmem:[#allocation10 + $0x418] sm:$0xff] }
 0x447   : > { %8475 = vmatpush3.bf16.msra.mxu0 %v8472_v46  ;;  %8507 = vmatpush3.bf16.msra.mxu1 %v8504_v33  ;;  %v4467_v46 = vld [vmem:[#allocation10 + $0x1d0] sm:$0xff]  ;;  %v4375_v33 = vld [vmem:[#allocation10 + $0x160] sm:$0xff] }
 0x448   : > { %8477 = vmatprep.subr.bf16.mxu0 %v8476_v23  ;;  %8509 = vmatprep.subr.bf16.mxu1 %v8508_v43  ;;  %v8564_v49 = vpack.c.bf16 %v4468_v47, %v4467_v46  ;;  %v8636_v47 = vpack.c.bf16 %v4660_v10, %v4659_v15  ;;  %v4934_v15 = vld [vmem:[#allocation10 + $0x438] sm:$0xff] }
 0x44b   : > { %8479 = vmatpush3.bf16.msra.mxu0 %v8476_v23  ;;  %8511 = vmatpush3.bf16.msra.mxu1 %v8508_v43  ;;  %v4376_v23 = vld [vmem:[#allocation10 + $0x168] sm:$0xff]  ;;  %v8568_v43 = vpack.c.bf16 %v4470_v42, %v4469_v22 }
 0x44c   : > { %8513 = vmatprep.subr.bf16.mxu0 %v8512_v32  ;;  %8545 = vmatprep.subr.bf16.mxu1 %v8544_v38  ;;  %v8536_v39 = vpack.c.bf16 %v4376_v23, %v4375_v33  ;;  %v4833_v33 = vld [vmem:[#allocation10 + $0x380] sm:$0xff]  ;;  %v4834_v23 = vld [vmem:[#allocation10 + $0x388] sm:$0xff] }
 0x44d   : > { %v8672_v42 = vpack.c.bf16 %v4834_v23, %v4833_v33  ;;  %v4938_v33 = vld [vmem:[#allocation10 + $0x458] sm:$0xff] }
 0x4de   : > { %v7105_v31 = vpop.f32.mrb[96].mxu1 }
 0x4df   : > { %v7106_v45 = vpop.f32.mrb[97].mxu1 }
 0x4e0   : > { %v7107_v36 = vadd.f32 %v7106_v45, %v7105_v31  ;;  %v4551_v45 = vld [vmem:[#allocation10 + $0x200] sm:$0xff] }
 0x4e2   : > { %v7108_v53 = vpop.f32.mrb[98].mxu1  ;;  %v4015_v63 = vadd.f32 %v7107_v36, %v6391_v56  ;;  %v4552_v36 = vld [vmem:[#allocation10 + $0x208] sm:$0xff] }
 0x4e3   : > { %v7109_v62 = vpop.f32.mrb[99].mxu1 }
 0x4e4   : > { %v7110_v3 = vadd.f32 %v7109_v62, %v7108_v53  ;;  %v4645_v53 = vld [vmem:[#allocation10 + $0x280] sm:$0xff]  ;;  %v4646_v62 = vld [vmem:[#allocation10 + $0x288] sm:$0xff] }
 0x4e6   : > { %v4020_v1 = vadd.f32 %v7110_v3, %v6391_v56  ;;  %v8576_v3 = vpack.c.bf16 %v4552_v36, %v4551_v45  ;;  %v8608_v56 = vpack.c.bf16 %v4646_v62, %v4645_v53  ;;  %v4837_v45 = vld [vmem:[#allocation10 + $0x3a0] sm:$0xff]  ;;  %v4838_v36 = vld [vmem:[#allocation10 + $0x3a8] sm:$0xff] }
 0x4e7   : > { %v8680_v62 = vpack.c.bf16 %v4838_v36, %v4837_v45 }
 0x500   : > { %v7143_v30 = vpop.f32.mrb[120].mxu0 }
 0x501   : > { %v7144_v58 = vpop.f32.mrb[121].mxu0  ;;  %v7601_v41 = vpop.f32.mrb[100].mxu1 }
 0x502   : > { %v7145_v4 = vadd.f32 %v7144_v58, %v7143_v30  ;;  %v4164_v6 = vpop.f32.mrb[101].mxu1  ;;  %v4553_v30 = vld [vmem:[#allocation10 + $0x210] sm:$0xff]  ;;  %v4554_v58 = vld [vmem:[#allocation10 + $0x218] sm:$0xff] }
 0x504   : > { %v7146_v54 = vpop.f32.mrb[122].mxu0  ;;  %v4090_v11 = vadd.f32 %v7145_v4, %v4015_v63  ;;  %v4648_v63 = vld [vmem:[#allocation10 + $0x298] sm:$0xff]  ;;  %v8580_v4 = vpack.c.bf16 %v4554_v58, %v4553_v30  ;;  %v4839_v30 = vld [vmem:[#allocation10 + $0x3b0] sm:$0xff] }
 0x505   : > { %v7147_v5 = vpop.f32.mrb[123].mxu0  ;;  %v4840_v58 = vld [vmem:[#allocation10 + $0x3b8] sm:$0xff] }
 0x506   : > { %v7148_v51 = vadd.f32 %v7147_v5, %v7146_v54  ;;  %v4165_v14 = vadd.f32 %v4164_v6, %v4090_v11  ;;  %v4556_v54 = vld [vmem:[#allocation10 + $0x228] sm:$0xff]  ;;  %v4649_v11 = vld [vmem:[#allocation10 + $0x2a0] sm:$0xff] }
 0x507   : > { %v4650_v5 = vld [vmem:[#allocation10 + $0x2a8] sm:$0xff] }
 0x508   : > { %v4095_v2 = vadd.f32 %v7148_v51, %v4020_v1  ;;  %v10578_v0 = vmax.f32 %v4165_v14, 0.0  ;;  %v4555_v1 = vld [vmem:[#allocation10 + $0x220] sm:$0xff]  ;;  %v8616_v14 = vpack.c.bf16 %v4650_v5, %v4649_v11 }
 0x509   : > { %v8584_v51 = vpack.c.bf16 %v4556_v54, %v4555_v1  ;;  %v4841_v1 = vld [vmem:[#allocation10 + $0x3c0] sm:$0xff]  ;;  %v4842_v54 = vld [vmem:[#allocation10 + $0x3c8] sm:$0xff] }
 0x50a   : > { %v4170_v40 = vadd.f32 %v7601_v41, %v4095_v2  ;;  %7634 = vmatprep.mubr.f32.mxu0 %v10578_v0  ;;  %7669 = vmatprep.mubr.f32.mxu1 %v10578_v0  ;;  %v4647_v41 = vld [vmem:[#allocation10 + $0x290] sm:$0xff]  ;;  %v8688_v5 = vpack.c.bf16 %v4842_v54, %v4841_v1 }
 0x50b   : > { %v8612_v6 = vpack.c.bf16 %v4648_v63, %v4647_v41  ;;  %v4557_v2 = vld [vmem:[#allocation10 + $0x230] sm:$0xff]  ;;  %v8684_v63 = vpack.c.bf16 %v4840_v58, %v4839_v30 }
 0x50c   : > { %v10582_v55 = vmax.f32 %v4170_v40, 0.0  ;;  %v4651_v40 = vld [vmem:[#allocation10 + $0x2b0] sm:$0xff]  ;;  %v8588_v48 = vpack.c.bf16 %v4558_v12, %v4557_v2  ;;  %v4844_v12 = vld [vmem:[#allocation10 + $0x3d8] sm:$0xff] }
 0x50d   : > { %v8620_v37 = vpack.c.bf16 %v4652_v60, %v4651_v40  ;;  %v4843_v2 = vld [vmem:[#allocation10 + $0x3d0] sm:$0xff] }
 0x50e   : > { %7635 = vmatmul.mubr.f32.vlgmr.msra.gmra.mrb[124].mxu0 %v10582_v55  ;;  %7670 = vmatmul.mubr.f32.vlgmr.msra.gmra.mrb[102].mxu1 %v10582_v55  ;;  %v8692_v60 = vpack.c.bf16 %v4844_v12, %v4843_v2 }
 0x50f   : > { %8515 = vmatpush3.bf16.msra.mxu0 %v8512_v32  ;;  %8547 = vmatpush3.bf16.msra.mxu1 %v8544_v38  ;;  %v4472_v32 = vld [vmem:[#allocation10 + $0x1f8] sm:$0xff]  ;;  %v8540_v38 = vpack.c.bf16 %v4378_v52, %v4377_v27  ;;  %v4835_v27 = vld [vmem:[#allocation10 + $0x390] sm:$0xff] }
 0x510   : > { %7704 = vmatprep.mubr.f32.mxu0 %v10578_v0  ;;  %7739 = vmatprep.mubr.f32.mxu1 %v10578_v0  ;;  %v8572_v31 = vpack.c.bf16 %v4472_v32, %v4471_v44  ;;  %v4836_v52 = vld [vmem:[#allocation10 + $0x398] sm:$0xff]  ;;  %v4743_v32 = vld [vmem:[#allocation10 + $0x320] sm:$0xff] }
 0x511   : > { %8517 = vmatprep.subr.bf16.mxu0 %v8516_v17  ;;  %8549 = vmatprep.subr.bf16.mxu1 %v8548_v13 }
 0x513   : > { %8519 = vmatpush3.bf16.msra.mxu0 %v8516_v17  ;;  %8551 = vmatpush3.bf16.msra.mxu1 %v8548_v13  ;;  %v4560_v17 = vld [vmem:[#allocation10 + $0x248] sm:$0xff]  ;;  %v4653_v13 = vld [vmem:[#allocation10 + $0x2c0] sm:$0xff] }
 0x514   : > { %8521 = vmatprep.subr.bf16.mxu0 %v8520_v20  ;;  %8553 = vmatprep.subr.bf16.mxu1 %v8552_v18  ;;  %v8592_v59 = vpack.c.bf16 %v4560_v17, %v4559_v9  ;;  %v8624_v50 = vpack.c.bf16 %v4654_v61, %v4653_v13  ;;  %v4845_v9 = vld [vmem:[#allocation10 + $0x3e0] sm:$0xff]  ;;  %v4846_v17 = vld [vmem:[#allocation10 + $0x3e8] sm:$0xff] }
 0x515   : > { %v8696_v61 = vpack.c.bf16 %v4846_v17, %v4845_v9 }
 0x517   : > { %8523 = vmatpush3.bf16.msra.mxu0 %v8520_v20  ;;  %8555 = vmatpush3.bf16.msra.mxu1 %v8552_v18  ;;  %v4561_v20 = vld [vmem:[#allocation10 + $0x250] sm:$0xff]  ;;  %v4562_v18 = vld [vmem:[#allocation10 + $0x258] sm:$0xff] }
 0x518   : > { %8525 = vmatprep.subr.bf16.mxu0 %v8524_v7  ;;  %8557 = vmatprep.subr.bf16.mxu1 %v8556_v57  ;;  %v8596_v25 = vpack.c.bf16 %v4562_v18, %v4561_v20  ;;  %v4847_v20 = vld [vmem:[#allocation10 + $0x3f0] sm:$0xff]  ;;  %v4848_v18 = vld [vmem:[#allocation10 + $0x3f8] sm:$0xff] }
 0x519   : > { %v8700_v8 = vpack.c.bf16 %v4848_v18, %v4847_v20 }
 0x51b   : > { %8527 = vmatpush3.bf16.msra.mxu0 %v8524_v7  ;;  %8559 = vmatpush3.bf16.msra.mxu1 %v8556_v57  ;;  %v4563_v7 = vld [vmem:[#allocation10 + $0x260] sm:$0xff]  ;;  %v4564_v57 = vld [vmem:[#allocation10 + $0x268] sm:$0xff] }
 0x51c   : > { %8529 = vmatprep.subr.bf16.mxu0 %v8528_v34  ;;  %8561 = vmatprep.subr.bf16.mxu1 %v8560_v35  ;;  %v8600_v16 = vpack.c.bf16 %v4564_v57, %v4563_v7  ;;  %v4929_v57 = vld [vmem:[#allocation10 + $0x410] sm:$0xff] }
 0x51d   : > { %v8708_v29 = vpack.c.bf16 %v4930_v28, %v4929_v57 }
 0x51f   : > { %8531 = vmatpush3.bf16.msra.mxu0 %v8528_v34  ;;  %8563 = vmatpush3.bf16.msra.mxu1 %v8560_v35  ;;  %v4565_v34 = vld [vmem:[#allocation10 + $0x270] sm:$0xff]  ;;  %v4566_v35 = vld [vmem:[#allocation10 + $0x278] sm:$0xff] }
 0x520   : > { %8533 = vmatprep.subr.bf16.mxu0 %v8532_v19  ;;  %8565 = vmatprep.subr.bf16.mxu1 %v8564_v49  ;;  %v8604_v46 = vpack.c.bf16 %v4566_v35, %v4565_v34  ;;  %v4933_v35 = vld [vmem:[#allocation10 + $0x430] sm:$0xff] }
 0x521   : > { %v8716_v10 = vpack.c.bf16 %v4934_v15, %v4933_v35  ;;  %v5022_v35 = vld [vmem:[%s10761_s7 + $0x10] sm:$0xff]  ;;  %v5025_v15 = vld [vmem:[%s10761_s7 + $0x28] sm:$0xff] }
 0x523   : > { %8535 = vmatpush3.bf16.msra.mxu0 %v8532_v19  ;;  %8567 = vmatpush3.bf16.msra.mxu1 %v8564_v49  ;;  %v4739_v19 = vld [vmem:[#allocation10 + $0x300] sm:$0xff]  ;;  %v4740_v49 = vld [vmem:[#allocation10 + $0x308] sm:$0xff] }
 0x524   : > { %8537 = vmatprep.subr.bf16.mxu0 %v8536_v39  ;;  %8569 = vmatprep.subr.bf16.mxu1 %v8568_v43  ;;  %v8640_v22 = vpack.c.bf16 %v4740_v49, %v4739_v19  ;;  %v4937_v49 = vld [vmem:[#allocation10 + $0x450] sm:$0xff] }
 0x525   : > { %v8724_v23 = vpack.c.bf16 %v4938_v33, %v4937_v49  ;;  %v5028_v49 = vld [vmem:[%s10761_s7 + $0x40] sm:$0xff]  ;;  %v5031_v33 = vld [vmem:[%s10761_s7 + $0x58] sm:$0xff] }
 0x527   : > { %8539 = vmatpush3.bf16.msra.mxu0 %v8536_v39  ;;  %8571 = vmatpush3.bf16.msra.mxu1 %v8568_v43  ;;  %v4741_v39 = vld [vmem:[#allocation10 + $0x310] sm:$0xff]  ;;  %v4742_v43 = vld [vmem:[#allocation10 + $0x318] sm:$0xff] }
 0x528   : > { %8541 = vmatprep.subr.bf16.mxu0 %v8540_v38  ;;  %8573 = vmatprep.subr.bf16.mxu1 %v8572_v31  ;;  %v8644_v44 = vpack.c.bf16 %v4742_v43, %v4741_v39  ;;  %v4941_v39 = vld [vmem:[#allocation10 + $0x470] sm:$0xff]  ;;  %v4942_v43 = vld [vmem:[#allocation10 + $0x478] sm:$0xff] }
 0x52b   : > { %8543 = vmatpush3.bf16.msra.mxu0 %v8540_v38  ;;  %8575 = vmatpush3.bf16.msra.mxu1 %v8572_v31  ;;  %v4744_v38 = vld [vmem:[#allocation10 + $0x328] sm:$0xff]  ;;  %v8676_v31 = vpack.c.bf16 %v4836_v52, %v4835_v27  ;;  %v8732_v27 = vpack.c.bf16 %v4942_v43, %v4941_v39  ;;  %v9168_v52 = vmov 0.0|0.0   ;;  %v5034_v39 = vld [vmem:[%s10761_s7 + $0x70] sm:$0xff] }
 0x52c   : > { %8577 = vmatprep.subr.bf16.mxu0 %v8576_v3  ;;  %8609 = vmatprep.subr.bf16.mxu1 %v8608_v56  ;;  %v8648_v53 = vpack.c.bf16 %v4744_v38, %v4743_v32  ;;  %v5199_v43 = vld [vmem:[%s10765_s11] sm:$0xff] }
 0x52e   : > { %7705 = vmatmul.mubr.f32.vlgmr.msra.gmra.mrb[126].mxu0 %v10582_v55  ;;  %7740 = vmatmul.mubr.f32.vlgmr.msra.gmra.mrb[104].mxu1 %v10582_v55 }
 0x52f   : > { %8579 = vmatpush3.bf16.msra.mxu0 %v8576_v3  ;;  %7774 = vmatprep.mubr.f32.mxu0 %v10578_v0  ;;  %v4745_v3 = vld [vmem:[#allocation10 + $0x330] sm:$0xff] }
 0x530   : > { %8611 = vmatpush3.bf16.msra.mxu1 %v8608_v56  ;;  %7809 = vmatprep.mubr.f32.mxu1 %v10578_v0  ;;  %v4746_v56 = vld [vmem:[#allocation10 + $0x338] sm:$0xff] }
 0x531   : > { %8581 = vmatprep.subr.bf16.mxu0 %v8580_v4  ;;  %8613 = vmatprep.subr.bf16.mxu1 %v8612_v6  ;;  %v8652_v41 = vpack.c.bf16 %v4746_v56, %v4745_v3 }
 0x533   : > { %8583 = vmatpush3.bf16.msra.mxu0 %v8580_v4  ;;  %v4747_v4 = vld [vmem:[#allocation10 + $0x340] sm:$0xff] }
 0x534   : > { %8615 = vmatpush3.bf16.msra.mxu1 %v8612_v6  ;;  %8585 = vmatprep.subr.bf16.mxu0 %v8584_v51  ;;  %v4748_v6 = vld [vmem:[#allocation10 + $0x348] sm:$0xff] }
 0x535   : > { %8617 = vmatprep.subr.bf16.mxu1 %v8616_v14  ;;  %v8656_v11 = vpack.c.bf16 %v4748_v6, %v4747_v4 }
 0x537   : > { %8587 = vmatpush3.bf16.msra.mxu0 %v8584_v51  ;;  %v4749_v51 = vld [vmem:[#allocation10 + $0x350] sm:$0xff] }
 0x538   : > { %8619 = vmatpush3.bf16.msra.mxu1 %v8616_v14  ;;  %8589 = vmatprep.subr.bf16.mxu0 %v8588_v48  ;;  %v4750_v14 = vld [vmem:[#allocation10 + $0x358] sm:$0xff] }
 0x539   : > { %8621 = vmatprep.subr.bf16.mxu1 %v8620_v37  ;;  %v8660_v40 = vpack.c.bf16 %v4750_v14, %v4749_v51 }
 0x53b   : > { %8591 = vmatpush3.bf16.msra.mxu0 %v8588_v48  ;;  %v4751_v48 = vld [vmem:[#allocation10 + $0x360] sm:$0xff] }
 0x53c   : > { %8623 = vmatpush3.bf16.msra.mxu1 %v8620_v37  ;;  %8593 = vmatprep.subr.bf16.mxu0 %v8592_v59  ;;  %v4752_v37 = vld [vmem:[#allocation10 + $0x368] sm:$0xff] }
 0x53d   : > { %8625 = vmatprep.subr.bf16.mxu1 %v8624_v50  ;;  %v8664_v13 = vpack.c.bf16 %v4752_v37, %v4751_v48 }
 0x53f   : > { %8595 = vmatpush3.bf16.msra.mxu0 %v8592_v59  ;;  %v4753_v59 = vld [vmem:[#allocation10 + $0x370] sm:$0xff] }
 0x540   : > { %8627 = vmatpush3.bf16.msra.mxu1 %v8624_v50  ;;  %8597 = vmatprep.subr.bf16.mxu0 %v8596_v25  ;;  %v4754_v50 = vld [vmem:[#allocation10 + $0x378] sm:$0xff] }
 0x541   : > { %8629 = vmatprep.subr.bf16.mxu1 %v8628_v26  ;;  %v8668_v21 = vpack.c.bf16 %v4754_v50, %v4753_v59 }
 0x543   : > { %8599 = vmatpush3.bf16.msra.mxu0 %v8596_v25  ;;  %v4927_v25 = vld [vmem:[#allocation10 + $0x400] sm:$0xff] }
 0x544   : > { %8631 = vmatpush3.bf16.msra.mxu1 %v8628_v26  ;;  %8601 = vmatprep.subr.bf16.mxu0 %v8600_v16  ;;  %v4928_v26 = vld [vmem:[#allocation10 + $0x408] sm:$0xff] }
 0x545   : > { %8633 = vmatprep.subr.bf16.mxu1 %v8632_v24  ;;  %v8704_v7 = vpack.c.bf16 %v4928_v26, %v4927_v25 }
 0x547   : > { %8603 = vmatpush3.bf16.msra.mxu0 %v8600_v16  ;;  %v4931_v16 = vld [vmem:[#allocation10 + $0x420] sm:$0xff] }
 0x548   : > { %8635 = vmatpush3.bf16.msra.mxu1 %v8632_v24  ;;  %8605 = vmatprep.subr.bf16.mxu0 %v8604_v46  ;;  %v4932_v24 = vld [vmem:[#allocation10 + $0x428] sm:$0xff] }
 0x549   : > { %8637 = vmatprep.subr.bf16.mxu1 %v8636_v47  ;;  %v8712_v34 = vpack.c.bf16 %v4932_v24, %v4931_v16  ;;  %v5020_v24 = vld [vmem:[%s10761_s7] sm:$0xff] }
 0x54b   : > { %8607 = vmatpush3.bf16.msra.mxu0 %v8604_v46  ;;  %v4935_v46 = vld [vmem:[#allocation10 + $0x440] sm:$0xff] }
 0x54c   : > { %8639 = vmatpush3.bf16.msra.mxu1 %v8636_v47  ;;  %8641 = vmatprep.subr.bf16.mxu0 %v8640_v22  ;;  %v4936_v47 = vld [vmem:[#allocation10 + $0x448] sm:$0xff] }
 0x54d   : > { %8673 = vmatprep.subr.bf16.mxu1 %v8672_v42  ;;  %v8720_v19 = vpack.c.bf16 %v4936_v47, %v4935_v46  ;;  %v5027_v46 = vld [vmem:[%s10761_s7 + $0x38] sm:$0xff]  ;;  %v5026_v47 = vld [vmem:[%s10761_s7 + $0x30] sm:$0xff] }
 0x54e   : > { %7775 = vmatmul.mubr.f32.vlgmr.msra.gmra.mrb[128].mxu0 %v10582_v55 }
 0x54f   : > { %7810 = vmatmul.mubr.f32.vlgmr.msra.gmra.mrb[106].mxu1 %v10582_v55  ;;  %8643 = vmatpush3.bf16.msra.mxu0 %v8640_v22  ;;  %v4939_v22 = vld [vmem:[#allocation10 + $0x460] sm:$0xff] }
 0x550   : > { %7844 = vmatprep.mubr.f32.mxu0 %v10578_v0  ;;  %8675 = vmatpush3.bf16.msra.mxu1 %v8672_v42  ;;  %v4940_v42 = vld [vmem:[#allocation10 + $0x468] sm:$0xff] }
 0x551   : > { %7879 = vmatprep.mubr.f32.mxu1 %v10578_v0  ;;  %8645 = vmatprep.subr.bf16.mxu0 %v8644_v44 }
 0x552   : > { %8677 = vmatprep.subr.bf16.mxu1 %v8676_v31 }
 0x553   : > { %8647 = vmatpush3.bf16.msra.mxu0 %v8644_v44 }
 0x554   : > { %8679 = vmatpush3.bf16.msra.mxu1 %v8676_v31  ;;  %8649 = vmatprep.subr.bf16.mxu0 %v8648_v53 }
 0x555   : > { %8681 = vmatprep.subr.bf16.mxu1 %v8680_v62 }
 0x557   : > { %8651 = vmatpush3.bf16.msra.mxu0 %v8648_v53 }
 0x558   : > { %8683 = vmatpush3.bf16.msra.mxu1 %v8680_v62  ;;  %8653 = vmatprep.subr.bf16.mxu0 %v8652_v41 }
 0x559   : > { %8685 = vmatprep.subr.bf16.mxu1 %v8684_v63 }
 0x55b   : > { %8655 = vmatpush3.bf16.msra.mxu0 %v8652_v41 }
 0x55c   : > { %8687 = vmatpush3.bf16.msra.mxu1 %v8684_v63  ;;  %8657 = vmatprep.subr.bf16.mxu0 %v8656_v11 }
 0x55d   : > { %8689 = vmatprep.subr.bf16.mxu1 %v8688_v5 }
 0x55f   : > { %8659 = vmatpush3.bf16.msra.mxu0 %v8656_v11 }
 0x560   : > { %8691 = vmatpush3.bf16.msra.mxu1 %v8688_v5  ;;  %8661 = vmatprep.subr.bf16.mxu0 %v8660_v40 }
 0x561   : > { %8693 = vmatprep.subr.bf16.mxu1 %v8692_v60 }
 0x563   : > { %8663 = vmatpush3.bf16.msra.mxu0 %v8660_v40 }
 0x564   : > { %8695 = vmatpush3.bf16.msra.mxu1 %v8692_v60  ;;  %8665 = vmatprep.subr.bf16.mxu0 %v8664_v13 }
 0x565   : > { %8697 = vmatprep.subr.bf16.mxu1 %v8696_v61 }
 0x567   : > { %8667 = vmatpush3.bf16.msra.mxu0 %v8664_v13 }
 0x568   : > { %8699 = vmatpush3.bf16.msra.mxu1 %v8696_v61  ;;  %8669 = vmatprep.subr.bf16.mxu0 %v8668_v21 }
 0x569   : > { %8701 = vmatprep.subr.bf16.mxu1 %v8700_v8 }
 0x56b   : > { %8671 = vmatpush3.bf16.msra.mxu0 %v8668_v21 }
 0x56c   : > { %8703 = vmatpush3.bf16.msra.mxu1 %v8700_v8  ;;  %8705 = vmatprep.subr.bf16.mxu0 %v8704_v7 }
 0x56e   : > { %7845 = vmatmul.mubr.f32.vlgmr.msra.gmra.mrb[130].mxu0 %v10582_v55 }
 0x56f   : > { %7880 = vmatmul.mubr.f32.vlgmr.msra.gmra.mrb[108].mxu1 %v10582_v55  ;;  %8707 = vmatpush3.bf16.msra.mxu0 %v8704_v7 }
 0x570   : > { %7914 = vmatprep.mubr.f32.mxu0 %v10578_v0  ;;  %8709 = vmatprep.subr.bf16.mxu0 %v8708_v29  ;;  %v8728_v0 = vpack.c.bf16 %v4940_v42, %v4939_v22  ;;  %v5033_v22 = vld [vmem:[%s10761_s7 + $0x68] sm:$0xff]  ;;  %v5032_v42 = vld [vmem:[%s10761_s7 + $0x60] sm:$0xff] }
 0x573   : > { %8711 = vmatpush3.bf16.msra.mxu0 %v8708_v29 }
 0x574   : > { %8713 = vmatprep.subr.bf16.mxu0 %v8712_v34 }
 0x577   : > { %8715 = vmatpush3.bf16.msra.mxu0 %v8712_v34  ;;  %v5023_v34 = vld [vmem:[%s10761_s7 + $0x18] sm:$0xff] }
 0x578   : > { %8717 = vmatprep.subr.bf16.mxu0 %v8716_v10 }
 0x57b   : > { %8719 = vmatpush3.bf16.msra.mxu0 %v8716_v10  ;;  %v5024_v10 = vld [vmem:[%s10761_s7 + $0x20] sm:$0xff] }
 0x57c   : > { %8721 = vmatprep.subr.bf16.mxu0 %v8720_v19 }
 0x57f   : > { %8723 = vmatpush3.bf16.msra.mxu0 %v8720_v19  ;;  %v5029_v19 = vld [vmem:[%s10761_s7 + $0x48] sm:$0xff] }
 0x580   : > { %8725 = vmatprep.subr.bf16.mxu0 %v8724_v23 }
 0x583   : > { %8727 = vmatpush3.bf16.msra.mxu0 %v8724_v23  ;;  %v5030_v23 = vld [vmem:[%s10761_s7 + $0x50] sm:$0xff] }
 0x584   : > { %8729 = vmatprep.subr.bf16.mxu0 %v8728_v0 }
 0x587   : > { %8731 = vmatpush3.bf16.msra.mxu0 %v8728_v0  ;;  %v5035_v0 = vld [vmem:[%s10761_s7 + $0x78] sm:$0xff] }
 0x588   : > { %8733 = vmatprep.subr.bf16.mxu0 %v8732_v27 }
 0x58b   : > { %8735 = vmatpush3.bf16.msra.mxu0 %v8732_v27  ;;  %v5324_v27 = vld [vmem:[#allocation11 + $0x88] sm:$0xff] }
 0x58c   : > { %8736 = vmatprep.subr.bf16.mxu0 %v9168_v52 }
 0x58e   : > { %7915 = vmatmul.mubr.f32.vlgmr.msra.gmra.mrb[132].mxu0 %v10582_v55  ;;  %v5021_v55 = vld [vmem:[%s10761_s7 + $0x8] sm:$0xff] }
 0x58f   : > { %6395 = vmatprep.mubr.msk.f32.mxu0 %vm5061_vm1, %v5021_v55  ;;  %v5332_v55 = vld [vmem:[#allocation11 + $0xc8] sm:$0xff] }
 0x5e1   : > { %v7636_v44 = vpop.f32.mrb[124].mxu0  ;;  %v7671_v32 = vpop.f32.mrb[102].mxu1 }
 0x5e2   : > { %4267 = vst.msk [vmem:[#allocation4 + $0x8] sm:$0xff] %vm731_vm0, %v7636_v44  ;;  %4361 = vst.msk [vmem:[#allocation4 + $0x18] sm:$0xff] %vm731_vm0, %v7671_v32  ;;  %v4257_v38 = vpop.f32.mrb[125].mxu0  ;;  %v4351_v31 = vpop.f32.mrb[103].mxu1  ;;  %v5323_v44 = vld [vmem:[#allocation11 + $0x80] sm:$0xff] }
 0x5e3   : > { %4266 = vst.msk [vmem:[#allocation4] sm:$0xff] %vm731_vm0, %v4257_v38  ;;  %4360 = vst.msk [vmem:[#allocation4 + $0x10] sm:$0xff] %vm731_vm0, %v4351_v31  ;;  %v5325_v38 = vld [vmem:[#allocation11 + $0x90] sm:$0xff]  ;;  %v5328_v31 = vld [vmem:[#allocation11 + $0xa8] sm:$0xff] }
 0x5e9   : > { %v5037_v45 = vld [vmem:[#allocation4 + $0x8] sm:$0xff]  ;;  %v5039_v3 = vld [vmem:[#allocation4 + $0x18] sm:$0xff] }
 0x5ea   : > { %v5036_v36 = vld [vmem:[#allocation4] sm:$0xff]  ;;  %v5038_v62 = vld [vmem:[#allocation4 + $0x10] sm:$0xff] }
 0x5eb   : > { %v8737_v53 = vpack.c.bf16 %v5037_v45, %v5036_v36  ;;  %v8740_v56 = vpack.c.bf16 %v5039_v3, %v5038_v62  ;;  %v5330_v45 = vld [vmem:[#allocation11 + $0xb8] sm:$0xff]  ;;  %v8789_v36 = vpack.c.bf16 %v5325_v38, %v5323_v44  ;;  %v5327_v62 = vld [vmem:[#allocation11 + $0xa0] sm:$0xff]  ;;  %v5329_v3 = vld [vmem:[#allocation11 + $0xb0] sm:$0xff] }
 0x5ec   : > { %v5308_v38 = vld [vmem:[#allocation11 + $0x10] sm:$0xff] }
 0x5ed   : > { %8738 = vmatpush1.bf16.msra.mxu0 %v8737_v53  ;;  %v8791_v53 = vpack.c.bf16 %v5330_v45, %v5328_v31  ;;  %v5311_v31 = vld [vmem:[#allocation11 + $0x28] sm:$0xff]  ;;  %v5313_v45 = vld [vmem:[#allocation11 + $0x38] sm:$0xff] }
 0x5ee   : > { %8739 = vmatprep.subr.bf16.mxu0 %v9168_v52 }
 0x5f1   : > { %8741 = vmatpush1.bf16.msra.mxu0 %v8740_v56  ;;  %v5334_v56 = vld [vmem:[#allocation11 + $0xd8] sm:$0xff] }
 0x5f2   : > { %8742 = vmatprep.subr.bf16.mxu0 %v9168_v52 }
 0x601   : > { %v7706_v30 = vpop.f32.mrb[126].mxu0  ;;  %v7741_v58 = vpop.f32.mrb[104].mxu1 }
 0x602   : > { %4455 = vst.msk [vmem:[#allocation4 + $0x28] sm:$0xff] %vm731_vm0, %v7706_v30  ;;  %4549 = vst.msk [vmem:[#allocation4 + $0x38] sm:$0xff] %vm731_vm0, %v7741_v58  ;;  %v4445_v41 = vpop.f32.mrb[127].mxu0  ;;  %v4539_v63 = vpop.f32.mrb[105].mxu1  ;;  %v8793_v30 = vpack.c.bf16 %v5329_v3, %v5327_v62  ;;  %v8795_v58 = vpack.c.bf16 %v5334_v56, %v5332_v55  ;;  %v8807_v55 = vpack.c.bf16 %v5313_v45, %v5311_v31  ;;  %v5310_v56 = vld [vmem:[#allocation11 + $0x20] sm:$0xff]  ;;  %v5591_v31 = vld [vmem:[#allocation11 + $0x1d0] sm:$0xff] }
 0x603   : > { %4454 = vst.msk [vmem:[#allocation4 + $0x20] sm:$0xff] %vm731_vm0, %v4445_v41  ;;  %4548 = vst.msk [vmem:[#allocation4 + $0x30] sm:$0xff] %vm731_vm0, %v4539_v63  ;;  %v5331_v41 = vld [vmem:[#allocation11 + $0xc0] sm:$0xff]  ;;  %v5333_v63 = vld [vmem:[#allocation11 + $0xd0] sm:$0xff] }
 0x604   : > { %v5594_v45 = vld [vmem:[#allocation11 + $0x1e8] sm:$0xff] }
 0x609   : > { %v5041_v4 = vld [vmem:[#allocation4 + $0x28] sm:$0xff]  ;;  %v5043_v11 = vld [vmem:[#allocation4 + $0x38] sm:$0xff] }
 0x60a   : > { %v5040_v6 = vld [vmem:[#allocation4 + $0x20] sm:$0xff]  ;;  %v5042_v54 = vld [vmem:[#allocation4 + $0x30] sm:$0xff] }
 0x60b   : > { %v8743_v1 = vpack.c.bf16 %v5041_v4, %v5040_v6  ;;  %v8746_v5 = vpack.c.bf16 %v5043_v11, %v5042_v54  ;;  %v5336_v4 = vld [vmem:[#allocation11 + $0xe8] sm:$0xff]  ;;  %v5338_v6 = vld [vmem:[#allocation11 + $0xf8] sm:$0xff] }
 0x60c   : > { %v8799_v54 = vpack.c.bf16 %v5338_v6, %v5336_v4  ;;  %v6394_v11 = vld [vmem:[%s10763_s9] ss:$0 sm:$0xff]  ;;  %v5314_v6 = vld [vmem:[#allocation11 + $0x40] sm:$0xff] }
 0x60d   : > { %8744 = vmatpush1.bf16.msra.mxu0 %v8743_v1  ;;  %v8797_v1 = vpack.c.bf16 %v5333_v63, %v5331_v41  ;;  %v5317_v41 = vld [vmem:[#allocation11 + $0x58] sm:$0xff] }
 0x60e   : > { %8745 = vmatprep.subr.bf16.mxu0 %v9168_v52 }
 0x611   : > { %8747 = vmatpush1.bf16.msra.mxu0 %v8746_v5 }
 0x612   : > { %8748 = vmatprep.subr.bf16.mxu0 %v9168_v52 }
 0x621   : > { %v7776_v51 = vpop.f32.mrb[128].mxu0 }
 0x622   : > { %4643 = vst.msk [vmem:[#allocation4 + $0x48] sm:$0xff] %vm731_vm0, %v7776_v51  ;;  %v7811_v14 = vpop.f32.mrb[106].mxu1  ;;  %v4633_v2 = vpop.f32.mrb[129].mxu0 }
 0x623   : > { %4737 = vst.msk [vmem:[#allocation4 + $0x58] sm:$0xff] %vm731_vm0, %v7811_v14  ;;  %4642 = vst.msk [vmem:[#allocation4 + $0x40] sm:$0xff] %vm731_vm0, %v4633_v2  ;;  %v4727_v12 = vpop.f32.mrb[107].mxu1 }
 0x624   : > { %4736 = vst.msk [vmem:[#allocation4 + $0x50] sm:$0xff] %vm731_vm0, %v4727_v12 }
 0x629   : > { %v5045_v40 = vld [vmem:[#allocation4 + $0x48] sm:$0xff] }
 0x62a   : > { %v5044_v60 = vld [vmem:[#allocation4 + $0x40] sm:$0xff]  ;;  %v5047_v9 = vld [vmem:[#allocation4 + $0x58] sm:$0xff] }
 0x62b   : > { %v8749_v48 = vpack.c.bf16 %v5045_v40, %v5044_v60  ;;  %v5046_v37 = vld [vmem:[#allocation4 + $0x50] sm:$0xff] }
 0x62c   : > { %v8752_v17 = vpack.c.bf16 %v5047_v9, %v5046_v37  ;;  %v5490_v9 = vld [vmem:[#allocation11 + $0x110] sm:$0xff] }
 0x62d   : > { %8750 = vmatpush1.bf16.msra.mxu0 %v8749_v48 }
 0x62e   : > { %8751 = vmatprep.subr.bf16.mxu0 %v9168_v52 }
 0x631   : > { %8753 = vmatpush1.bf16.msra.mxu0 %v8752_v17 }
 0x632   : > { %8754 = vmatprep.subr.bf16.mxu0 %v9168_v52 }
 0x641   : > { %v7846_v13 = vpop.f32.mrb[130].mxu0 }
 0x642   : > { %4831 = vst.msk [vmem:[#allocation4 + $0x68] sm:$0xff] %vm731_vm0, %v7846_v13  ;;  %v7881_v61 = vpop.f32.mrb[108].mxu1  ;;  %v4821_v59 = vpop.f32.mrb[131].mxu0 }
 0x643   : > { %4925 = vst.msk [vmem:[#allocation4 + $0x78] sm:$0xff] %vm731_vm0, %v7881_v61  ;;  %4830 = vst.msk [vmem:[#allocation4 + $0x60] sm:$0xff] %vm731_vm0, %v4821_v59  ;;  %v4915_v50 = vpop.f32.mrb[109].mxu1 }
 0x644   : > { %4924 = vst.msk [vmem:[#allocation4 + $0x70] sm:$0xff] %vm731_vm0, %v4915_v50 }
 0x649   : > { %v5049_v20 = vld [vmem:[#allocation4 + $0x68] sm:$0xff] }
 0x64a   : > { %v5048_v18 = vld [vmem:[#allocation4 + $0x60] sm:$0xff]  ;;  %v5051_v25 = vld [vmem:[#allocation4 + $0x78] sm:$0xff] }
 0x64b   : > { %v8755_v21 = vpack.c.bf16 %v5049_v20, %v5048_v18  ;;  %v5050_v8 = vld [vmem:[#allocation4 + $0x70] sm:$0xff] }
 0x64c   : > { %v8758_v26 = vpack.c.bf16 %v5051_v25, %v5050_v8 }
 0x64d   : > { %8756 = vmatpush1.bf16.msra.mxu0 %v8755_v21 }
 0x64e   : > { %8757 = vmatprep.subr.bf16.mxu0 %v9168_v52 }
 0x651   : > { %8759 = vmatpush1.bf16.msra.mxu0 %v8758_v26 }
 0x652   : > { %8760 = vmatprep.subr.bf16.mxu0 %v9168_v52  ;;  %v5326_v52 = vld [vmem:[#allocation11 + $0x98] sm:$0xff] }
 0x653   : > { %v8787_v32 = vpack.c.bf16 %v5326_v52, %v5324_v27  ;;  %v5309_v27 = vld [vmem:[#allocation11 + $0x18] sm:$0xff]  ;;  %v9169_v52 = vmov 0.0  }
 0x654   : > { %5407 = vmatprep.mubr.f32.mxu1 %v9169_v52 }
 0x655   : > { %8788 = vmatprep.subr.bf16.mxu1 %v8787_v32  ;;  %v5306_v32 = vld [vmem:[#allocation11] sm:$0xff] }
 0x656   : > { %8790 = vmatpush1.bf16.msra.mxu1 %v8789_v36  ;;  %v8805_v62 = vpack.c.bf16 %v5308_v38, %v5306_v32  ;;  %v5589_v38 = vld [vmem:[#allocation11 + $0x1c0] sm:$0xff] }
 0x657   : > { %8792 = vmatprep.subr.bf16.mxu1 %v8791_v53 }
 0x65a   : > { %8794 = vmatpush1.bf16.msra.mxu1 %v8793_v30  ;;  %v5312_v30 = vld [vmem:[#allocation11 + $0x30] sm:$0xff] }
 0x65b   : > { %8796 = vmatprep.subr.bf16.mxu1 %v8795_v58  ;;  %v5315_v58 = vld [vmem:[#allocation11 + $0x48] sm:$0xff]  ;;  %v8809_v63 = vpack.c.bf16 %v5312_v30, %v5310_v56  ;;  %v5593_v56 = vld [vmem:[#allocation11 + $0x1e0] sm:$0xff]  ;;  %v5595_v30 = vld [vmem:[#allocation11 + $0x1f0] sm:$0xff] }
 0x65c   : > { %v8811_v4 = vpack.c.bf16 %v5317_v41, %v5315_v58  ;;  %v5675_v58 = vld [vmem:[#allocation11 + $0x208] sm:$0xff]  ;;  %v5677_v41 = vld [vmem:[#allocation11 + $0x218] sm:$0xff] }
 0x65e   : > { %8798 = vmatpush1.bf16.msra.mxu1 %v8797_v1  ;;  %v5316_v1 = vld [vmem:[#allocation11 + $0x50] sm:$0xff] }
 0x65f   : > { %8800 = vmatprep.subr.bf16.mxu1 %v8799_v54  ;;  %v5319_v54 = vld [vmem:[#allocation11 + $0x68] sm:$0xff] }
 0x661   : > { %v7916_v7 = vpop.f32.mrb[132].mxu0 }
 0x662   : > { %5019 = vst.msk [vmem:[#allocation4 + $0x88] sm:$0xff] %vm731_vm0, %v7916_v7  ;;  %v5009_v57 = vpop.f32.mrb[133].mxu0 }
 0x663   : > { %5018 = vst.msk [vmem:[#allocation4 + $0x80] sm:$0xff] %vm731_vm0, %v5009_v57 }
 0x669   : > { %v5053_v28 = vld [vmem:[#allocation4 + $0x88] sm:$0xff] }
 0x66a   : > { %v5052_v29 = vld [vmem:[#allocation4 + $0x80] sm:$0xff] }
 0x66b   : > { %v8761_v16 = vpack.c.bf16 %v5053_v28, %v5052_v29 }
 0x66d   : > { %8762 = vmatpush1.bf16.msra.mxu0 %v8761_v16 }
 0x670   : > { %5151 = vmatmul.mubr.f32.vlgmr.msra.gmra.mrb[134].mxu0 %v5020_v24 }
 0x671   : > { %6396 = vmatprep.mubr.msk.f32.mxu0 %vm5061_vm1, %v5023_v34 }
 0x674   : > { %5156 = vmatmul.mubr.f32.gmra.mrb[136].mxu0 %v5022_v35 }
 0x675   : > { %6397 = vmatprep.mubr.msk.f32.mxu0 %vm5061_vm1, %v5025_v15 }
 0x678   : > { %5161 = vmatmul.mubr.f32.gmra.mrb[138].mxu0 %v5024_v10 }
 0x679   : > { %6398 = vmatprep.mubr.msk.f32.mxu0 %vm5061_vm1, %v5027_v46 }
 0x67c   : > { %5166 = vmatmul.mubr.f32.gmra.mrb[140].mxu0 %v5026_v47 }
 0x67d   : > { %6399 = vmatprep.mubr.msk.f32.mxu0 %vm5061_vm1, %v5029_v19 }
 0x680   : > { %5171 = vmatmul.mubr.f32.gmra.mrb[142].mxu0 %v5028_v49 }
 0x681   : > { %6400 = vmatprep.mubr.msk.f32.mxu0 %vm5061_vm1, %v5031_v33 }
 0x684   : > { %5176 = vmatmul.mubr.f32.gmra.mrb[144].mxu0 %v5030_v23 }
 0x685   : > { %6401 = vmatprep.mubr.msk.f32.mxu0 %vm5061_vm1, %v5033_v22  ;;  %v5200_v22 = vld [vmem:[%s10765_s11 + $0x8] sm:$0x1] }
 0x688   : > { %5181 = vmatmul.mubr.f32.gmra.mrb[146].mxu0 %v5032_v42  ;;  %v5335_v42 = vld [vmem:[#allocation11 + $0xe0] sm:$0xff] }
 0x689   : > { %6402 = vmatprep.mubr.msk.f32.mxu0 %vm5061_vm1, %v5035_v0  ;;  %v5337_v0 = vld [vmem:[#allocation11 + $0xf0] sm:$0xff] }
 0x68c   : > { %5186 = vmatmul.mubr.f32.gmra.mrb[148].mxu0 %v5034_v39  ;;  %v8801_v39 = vpack.c.bf16 %v5337_v0, %v5335_v42  ;;  %v5585_v0 = vld [vmem:[#allocation11 + $0x1a0] sm:$0xff] }
 0x68d   : > { %7933 = vmatprep.mubr.msk.f32.mxu0 %vm731_vm0, %v5199_v43  ;;  %v5307_v43 = vld [vmem:[#allocation11 + $0x8] sm:$0xff] }
 0x68e   : > { %v8803_v44 = vpack.c.bf16 %v5309_v27, %v5307_v43  ;;  %8802 = vmatpush1.bf16.msra.mxu1 %v8801_v39  ;;  %v5587_v39 = vld [vmem:[#allocation11 + $0x1b0] sm:$0xff]  ;;  %v5590_v43 = vld [vmem:[#allocation11 + $0x1c8] sm:$0xff]  ;;  %v5592_v27 = vld [vmem:[#allocation11 + $0x1d8] sm:$0xff] }
 0x68f   : > { %v8843_v32 = vpack.c.bf16 %v5592_v27, %v5590_v43  ;;  %v5781_v43 = vld [vmem:[#allocation11 + $0x2f0] sm:$0xff]  ;;  %v5861_v27 = vld [vmem:[#allocation11 + $0x308] sm:$0xff] }
 0x690   : > { %8804 = vmatprep.subr.bf16.mxu1 %v8803_v44  ;;  %v8841_v44 = vpack.c.bf16 %v5587_v39, %v5585_v0  ;;  %v5779_v39 = vld [vmem:[#allocation11 + $0x2e0] sm:$0xff] }
 0x743   : > { %v5152_v5 = vpop.f32.mrb[134].mxu0 }
 0x744   : > { %v5154_v51 = vpop.f32.mrb[135].mxu0  ;;  %v5153_v14 = vadd.f32 %v6394_v11, %v5152_v5  ;;  %v8813_v5 = vpack.c.bf16 %v5316_v1, %v5314_v6  ;;  %v5674_v6 = vld [vmem:[#allocation11 + $0x200] sm:$0xff]  ;;  %v5676_v1 = vld [vmem:[#allocation11 + $0x210] sm:$0xff] }
 0x746   : > { %v5191_v60 = vmax.f32 %v5153_v14, 0.0  ;;  %v5318_v14 = vld [vmem:[#allocation11 + $0x60] sm:$0xff] }
 0x747   : > { %v5157_v2 = vpop.f32.mrb[136].mxu0 }
 0x748   : > { %v5158_v12 = vadd.f32 %v6394_v11, %v5157_v2  ;;  %v5159_v40 = vpop.f32.mrb[137].mxu0  ;;  %v5320_v2 = vld [vmem:[#allocation11 + $0x70] sm:$0xff] }
 0x749   : > { %v5491_v40 = vld [vmem:[#allocation11 + $0x118] sm:$0xff] }
 0x74a   : > { %v5192_v48 = vmax.f32 %v5158_v12, 0.0  ;;  %v5489_v12 = vld [vmem:[#allocation11 + $0x108] sm:$0xff] }
 0x74b   : > { %v5162_v37 = vpop.f32.mrb[138].mxu0 }
 0x74c   : > { %v8763_v17 = vpack.c.bf16 %v5192_v48, %v5191_v60  ;;  %v5164_v13 = vpop.f32.mrb[139].mxu0  ;;  %v5163_v61 = vadd.f32 %v6394_v11, %v5162_v37  ;;  %v8817_v60 = vpack.c.bf16 %v5320_v2, %v5318_v14  ;;  %v8819_v48 = vpack.c.bf16 %v5491_v40, %v5489_v12  ;;  %v5488_v37 = vld [vmem:[#allocation11 + $0x100] sm:$0xff]  ;;  %v5680_v12 = vld [vmem:[#allocation11 + $0x230] sm:$0xff]  ;;  %v5683_v40 = vld [vmem:[#allocation11 + $0x248] sm:$0xff] }
 0x74d   : > { %v5495_v13 = vld [vmem:[#allocation11 + $0x138] sm:$0xff]  ;;  %v5678_v2 = vld [vmem:[#allocation11 + $0x220] sm:$0xff] }
 0x74e   : > { %8765 = vmatprep.subr.msk.bf16.mxu0 %vm10692_vm2, %v8763_v17  ;;  %v5193_v18 = vmax.f32 %v5163_v61, 0.0  ;;  %v8821_v61 = vpack.c.bf16 %v5490_v9, %v5488_v37  ;;  %v5682_v9 = vld [vmem:[#allocation11 + $0x240] sm:$0xff] }
 0x74f   : > { %v5167_v59 = vpop.f32.mrb[140].mxu0  ;;  %8768 = vmatpush3.bf16.xpose.msk.msra.mxu0 %vm10692_vm2, %v8763_v17  ;;  %v5493_v17 = vld [vmem:[#allocation11 + $0x128] sm:$0xff] }
 0x750   : > { %v5168_v50 = vadd.f32 %v6394_v11, %v5167_v59  ;;  %v5169_v20 = vpop.f32.mrb[141].mxu0  ;;  %v8823_v59 = vpack.c.bf16 %v5495_v13, %v5493_v17  ;;  %v5684_v17 = vld [vmem:[#allocation11 + $0x250] sm:$0xff]  ;;  %v5687_v13 = vld [vmem:[#allocation11 + $0x268] sm:$0xff] }
 0x751   : > { %v5494_v20 = vld [vmem:[#allocation11 + $0x130] sm:$0xff] }
 0x752   : > { %v5194_v21 = vmax.f32 %v5168_v50, 0.0  ;;  %v5492_v50 = vld [vmem:[#allocation11 + $0x120] sm:$0xff] }
 0x753   : > { %v5172_v8 = vpop.f32.mrb[142].mxu0 }
 0x754   : > { %v8769_v25 = vpack.c.bf16 %v5194_v21, %v5193_v18  ;;  %v5174_v26 = vpop.f32.mrb[143].mxu0  ;;  %v5173_v7 = vadd.f32 %v6394_v11, %v5172_v8  ;;  %v5497_v18 = vld [vmem:[#allocation11 + $0x148] sm:$0xff]  ;;  %v5499_v21 = vld [vmem:[#allocation11 + $0x158] sm:$0xff]  ;;  %v8825_v8 = vpack.c.bf16 %v5494_v20, %v5492_v50  ;;  %v5686_v20 = vld [vmem:[#allocation11 + $0x260] sm:$0xff] }
 0x755   : > { %v5496_v26 = vld [vmem:[#allocation11 + $0x140] sm:$0xff] }
 0x756   : > { %8771 = vmatprep.subr.msk.bf16.mxu0 %vm10692_vm2, %v8769_v25  ;;  %v5195_v16 = vmax.f32 %v5173_v7, 0.0  ;;  %v5498_v7 = vld [vmem:[#allocation11 + $0x150] sm:$0xff] }
 0x757   : > { %v5177_v57 = vpop.f32.mrb[144].mxu0  ;;  %8774 = vmatpush3.bf16.xpose.msk.msra.mxu0 %vm10692_vm2, %v8769_v25  ;;  %v8827_v25 = vpack.c.bf16 %v5499_v21, %v5497_v18  ;;  %v5688_v18 = vld [vmem:[#allocation11 + $0x270] sm:$0xff]  ;;  %v5768_v21 = vld [vmem:[#allocation11 + $0x288] sm:$0xff] }
 0x758   : > { %v5178_v28 = vadd.f32 %v6394_v11, %v5177_v57  ;;  %v5179_v29 = vpop.f32.mrb[145].mxu0  ;;  %v5501_v57 = vld [vmem:[#allocation11 + $0x168] sm:$0xff] }
 0x759   : > { %v8829_v29 = vpack.c.bf16 %v5498_v7, %v5496_v26  ;;  %v5767_v7 = vld [vmem:[#allocation11 + $0x280] sm:$0xff] }
 0x75a   : > { %v5196_v24 = vmax.f32 %v5178_v28, 0.0  ;;  %v5503_v28 = vld [vmem:[#allocation11 + $0x178] sm:$0xff] }
 0x75b   : > { %v5182_v34 = vpop.f32.mrb[146].mxu0 }
 0x75c   : > { %v8775_v35 = vpack.c.bf16 %v5196_v24, %v5195_v16  ;;  %v5184_v15 = vpop.f32.mrb[147].mxu0  ;;  %v5183_v10 = vadd.f32 %v6394_v11, %v5182_v34  ;;  %v8831_v16 = vpack.c.bf16 %v5503_v28, %v5501_v57  ;;  %v5500_v24 = vld [vmem:[#allocation11 + $0x160] sm:$0xff]  ;;  %v5502_v34 = vld [vmem:[#allocation11 + $0x170] sm:$0xff]  ;;  %v5772_v28 = vld [vmem:[#allocation11 + $0x2a8] sm:$0xff] }
 0x75d   : > { %v5584_v15 = vld [vmem:[#allocation11 + $0x198] sm:$0xff]  ;;  %v5769_v57 = vld [vmem:[#allocation11 + $0x290] sm:$0xff] }
 0x75e   : > { %8777 = vmatprep.subr.msk.bf16.mxu0 %vm10692_vm2, %v8775_v35  ;;  %v5197_v49 = vmax.f32 %v5183_v10, 0.0  ;;  %v8833_v10 = vpack.c.bf16 %v5502_v34, %v5500_v24 }
 0x75f   : > { %v5187_v46 = vpop.f32.mrb[148].mxu0  ;;  %8780 = vmatpush3.bf16.xpose.msk.msra.mxu0 %vm10692_vm2, %v8775_v35  ;;  %v5582_v35 = vld [vmem:[#allocation11 + $0x188] sm:$0xff] }
 0x760   : > { %v5188_v47 = vadd.f32 %v6394_v11, %v5187_v46  ;;  %v5189_v19 = vpop.f32.mrb[149].mxu0  ;;  %v5321_v11 = vld [vmem:[#allocation11 + $0x78] sm:$0xff]  ;;  %v8835_v46 = vpack.c.bf16 %v5584_v15, %v5582_v35  ;;  %v5771_v35 = vld [vmem:[#allocation11 + $0x2a0] sm:$0xff]  ;;  %v5773_v15 = vld [vmem:[#allocation11 + $0x2b0] sm:$0xff] }
 0x761   : > { %v8815_v51 = vpack.c.bf16 %v5321_v11, %v5319_v54  ;;  %v5583_v19 = vld [vmem:[#allocation11 + $0x190] sm:$0xff]  ;;  %v5679_v54 = vld [vmem:[#allocation11 + $0x228] sm:$0xff]  ;;  %v5681_v11 = vld [vmem:[#allocation11 + $0x238] sm:$0xff] }
 0x762   : > { %v5198_v33 = vmax.f32 %v5188_v47, 0.0  ;;  %v5581_v47 = vld [vmem:[#allocation11 + $0x180] sm:$0xff]  ;;  %v8855_v14 = vpack.c.bf16 %v5681_v11, %v5679_v54  ;;  %v5870_v11 = vld [vmem:[#allocation11 + $0x350] sm:$0xff] }
 0x763   : > { %v5868_v54 = vld [vmem:[#allocation11 + $0x340] sm:$0xff] }
 0x764   : > { %v8781_v23 = vpack.c.bf16 %v5198_v33, %v5197_v49  ;;  %v5586_v49 = vld [vmem:[#allocation11 + $0x1a8] sm:$0xff]  ;;  %v5588_v33 = vld [vmem:[#allocation11 + $0x1b8] sm:$0xff] }
 0x765   : > { %v8839_v42 = vpack.c.bf16 %v5588_v33, %v5586_v49  ;;  %v5775_v49 = vld [vmem:[#allocation11 + $0x2c0] sm:$0xff]  ;;  %v5777_v33 = vld [vmem:[#allocation11 + $0x2d0] sm:$0xff] }
 0x766   : > { %8783 = vmatprep.subr.msk.bf16.mxu0 %vm10692_vm2, %v8781_v23 }
 0x767   : > { %8786 = vmatpush3.bf16.xpose.msk.msra.mxu0 %vm10692_vm2, %v8781_v23  ;;  %v8837_v23 = vpack.c.bf16 %v5583_v19, %v5581_v47  ;;  %v8873_v47 = vpack.c.bf16 %v5773_v15, %v5771_v35  ;;  %v5965_v15 = vld [vmem:[#allocation11 + $0x3e0] sm:$0xff] }
 0x76e   : > { %7934 = vmatmul.mubr.msk.f32.vlgmr.msra.gmra.mrb[150].mxu0 %vm731_vm0, %v5200_v22 }
 0x841   : > { %v10717_v36 = vpop.f32.mrb[150].mxu0 }
 0x842   : > { %v10719_v53 = vpop.f32.mrb[151].mxu0 }
 0x843   : > { %v5340_v3 = vrot.slane %v10719_v53, 1  ;;  %v5504_v22 = vrot.slane %v10719_v53, 2  ;;  %v5690_v24 = vrot.slane %v10719_v53, 4 }
 0x845   : > { %6413 = vmatmul.mubr.msk.f32.vlgmr.msra.gmra.mrb[110].mxu1 %vm731_vm0, %v5340_v3  ;;  %v8845_v3 = vpack.c.bf16 %v5591_v31, %v5589_v38  ;;  %v5860_v31 = vld [vmem:[#allocation11 + $0x300] sm:$0xff] }
 0x846   : > { %8806 = vmatpush1.bf16.msra.mxu1 %v8805_v62  ;;  %5480 = vmatprep.mubr.f32.mxu1 %v9169_v52  ;;  %v5596_v62 = vld [vmem:[#allocation11 + $0x1f8] sm:$0xff] }
 0x847   : > { %8808 = vmatprep.subr.bf16.mxu1 %v8807_v55  ;;  %v8847_v55 = vpack.c.bf16 %v5596_v62, %v5594_v45  ;;  %v5862_v45 = vld [vmem:[#allocation11 + $0x310] sm:$0xff]  ;;  %v5865_v62 = vld [vmem:[#allocation11 + $0x328] sm:$0xff] }
 0x84a   : > { %8810 = vmatpush1.bf16.msra.mxu1 %v8809_v63  ;;  %v8849_v63 = vpack.c.bf16 %v5595_v30, %v5593_v56  ;;  %v5783_v56 = vrot.slane %v10719_v53, 5 }
 0x84b   : > { %8812 = vmatprep.subr.bf16.mxu1 %v8811_v4  ;;  %v8851_v4 = vpack.c.bf16 %v5677_v41, %v5675_v58  ;;  %v5864_v58 = vld [vmem:[#allocation11 + $0x320] sm:$0xff]  ;;  %v5866_v41 = vld [vmem:[#allocation11 + $0x330] sm:$0xff] }
 0x84e   : > { %8814 = vmatpush1.bf16.msra.mxu1 %v8813_v5  ;;  %v8853_v5 = vpack.c.bf16 %v5676_v1, %v5674_v6  ;;  %v8889_v6 = vpack.c.bf16 %v5866_v41, %v5864_v58  ;;  %v6058_v58 = vld [vmem:[#allocation11 + $0x460] sm:$0xff]  ;;  %v6060_v41 = vld [vmem:[#allocation11 + $0x470] sm:$0xff] }
 0x84f   : > { %8816 = vmatprep.subr.bf16.mxu1 %v8815_v51  ;;  %v5597_v51 = vrot.slane %v10719_v53, 3 }
 0x852   : > { %8818 = vmatpush1.bf16.msra.mxu1 %v8817_v60  ;;  %v5685_v60 = vld [vmem:[#allocation11 + $0x258] sm:$0xff] }
 0x853   : > { %8820 = vmatprep.subr.bf16.mxu1 %v8819_v48  ;;  %v8857_v48 = vpack.c.bf16 %v5680_v12, %v5678_v2  ;;  %v8859_v37 = vpack.c.bf16 %v5685_v60, %v5683_v40  ;;  %v5872_v12 = vld [vmem:[#allocation11 + $0x360] sm:$0xff]  ;;  %v5874_v40 = vld [vmem:[#allocation11 + $0x370] sm:$0xff]  ;;  %v5954_v60 = vld [vmem:[#allocation11 + $0x388] sm:$0xff] }
 0x855   : > { %6414 = vmatmul.mubr.msk.f32.vlgmr.msra.gmra.mrb[110].mxu1 %vm731_vm0, %v10719_v53 }
 0x856   : > { %8822 = vmatpush1.bf16.msra.mxu1 %v8821_v61  ;;  %5571 = vmatprep.mubr.f32.mxu1 %v9169_v52  ;;  %v5689_v61 = vld [vmem:[#allocation11 + $0x278] sm:$0xff] }
 0x857   : > { %8824 = vmatprep.subr.bf16.mxu1 %v8823_v59  ;;  %v8861_v59 = vpack.c.bf16 %v5684_v17, %v5682_v9  ;;  %v8863_v50 = vpack.c.bf16 %v5689_v61, %v5687_v13  ;;  %v5953_v17 = vld [vmem:[#allocation11 + $0x380] sm:$0xff]  ;;  %v5955_v13 = vld [vmem:[#allocation11 + $0x390] sm:$0xff]  ;;  %v5958_v61 = vld [vmem:[#allocation11 + $0x3a8] sm:$0xff] }
 0x85a   : > { %8826 = vmatpush1.bf16.msra.mxu1 %v8825_v8  ;;  %v5770_v8 = vld [vmem:[#allocation11 + $0x298] sm:$0xff] }
 0x85b   : > { %8828 = vmatprep.subr.bf16.mxu1 %v8827_v25  ;;  %v8865_v25 = vpack.c.bf16 %v5688_v18, %v5686_v20  ;;  %v8867_v26 = vpack.c.bf16 %v5770_v8, %v5768_v21  ;;  %v5876_v20 = vrot.slane %v10719_v53, 6  ;;  %v5957_v21 = vld [vmem:[#allocation11 + $0x3a0] sm:$0xff]  ;;  %v5959_v8 = vld [vmem:[#allocation11 + $0x3b0] sm:$0xff] }
 0x85e   : > { %8830 = vmatpush1.bf16.msra.mxu1 %v8829_v29  ;;  %v5774_v29 = vld [vmem:[#allocation11 + $0x2b8] sm:$0xff] }
 0x85f   : > { %8832 = vmatprep.subr.bf16.mxu1 %v8831_v16  ;;  %v8869_v16 = vpack.c.bf16 %v5769_v57, %v5767_v7  ;;  %v8871_v34 = vpack.c.bf16 %v5774_v29, %v5772_v28  ;;  %v8905_v7 = vpack.c.bf16 %v5959_v8, %v5957_v21  ;;  %v5961_v28 = vld [vmem:[#allocation11 + $0x3c0] sm:$0xff]  ;;  %v5963_v29 = vld [vmem:[#allocation11 + $0x3d0] sm:$0xff] }
 0x862   : > { %8834 = vmatpush1.bf16.msra.mxu1 %v8833_v10  ;;  %v5776_v10 = vld [vmem:[#allocation11 + $0x2c8] sm:$0xff] }
 0x863   : > { %8836 = vmatprep.subr.bf16.mxu1 %v8835_v46  ;;  %v5778_v46 = vld [vmem:[#allocation11 + $0x2d8] sm:$0xff] }
 0x864   : > { %v8875_v19 = vpack.c.bf16 %v5778_v46, %v5776_v10  ;;  %v5967_v10 = vld [vmem:[#allocation11 + $0x3f0] sm:$0xff]  ;;  %v6047_v46 = vld [vmem:[#allocation11 + $0x408] sm:$0xff] }
 0x865   : > { %6415 = vmatmul.mubr.msk.f32.vlgmr.msra.gmra.mrb[110].mxu1 %vm731_vm0, %v5504_v22  ;;  %v5782_v22 = vld [vmem:[#allocation11 + $0x2f8] sm:$0xff] }
 0x866   : > { %8838 = vmatpush1.bf16.msra.mxu1 %v8837_v23  ;;  %5664 = vmatprep.mubr.f32.mxu1 %v9169_v52  ;;  %v5780_v23 = vld [vmem:[#allocation11 + $0x2e8] sm:$0xff] }
 0x867   : > { %8840 = vmatprep.subr.bf16.mxu1 %v8839_v42  ;;  %v8877_v42 = vpack.c.bf16 %v5777_v33, %v5775_v49  ;;  %v8879_v0 = vpack.c.bf16 %v5782_v22, %v5780_v23  ;;  %v6046_v33 = vld [vmem:[#allocation11 + $0x400] sm:$0xff]  ;;  %v6048_v23 = vld [vmem:[#allocation11 + $0x410] sm:$0xff]  ;;  %v6051_v22 = vld [vmem:[#allocation11 + $0x428] sm:$0xff] }
 0x86a   : > { %8842 = vmatpush1.bf16.msra.mxu1 %v8841_v44  ;;  %v5863_v44 = vld [vmem:[#allocation11 + $0x318] sm:$0xff] }
 0x86b   : > { %8844 = vmatprep.subr.bf16.mxu1 %v8843_v32  ;;  %v8881_v32 = vpack.c.bf16 %v5781_v43, %v5779_v39  ;;  %v8883_v38 = vpack.c.bf16 %v5863_v44, %v5861_v27  ;;  %v5969_v39 = vrot.slane %v10719_v53, 7  ;;  %v6050_v27 = vld [vmem:[#allocation11 + $0x420] sm:$0xff]  ;;  %v6052_v44 = vld [vmem:[#allocation11 + $0x430] sm:$0xff] }
 0x86e   : > { %8846 = vmatpush1.bf16.msra.mxu1 %v8845_v3  ;;  %v5867_v3 = vld [vmem:[#allocation11 + $0x338] sm:$0xff] }
 0x86f   : > { %8848 = vmatprep.subr.bf16.mxu1 %v8847_v55  ;;  %v8885_v55 = vpack.c.bf16 %v5862_v45, %v5860_v31  ;;  %v8887_v30 = vpack.c.bf16 %v5867_v3, %v5865_v62  ;;  %v8921_v31 = vpack.c.bf16 %v6052_v44, %v6050_v27  ;;  %v6054_v62 = vld [vmem:[#allocation11 + $0x440] sm:$0xff]  ;;  %v6056_v3 = vld [vmem:[#allocation11 + $0x450] sm:$0xff] }
 0x870   : > { %v8925_v53 = vpack.c.bf16 %v6056_v3, %v6054_v62 }
 0x872   : > { %8850 = vmatpush1.bf16.msra.mxu1 %v8849_v63  ;;  %v5869_v63 = vld [vmem:[#allocation11 + $0x348] sm:$0xff] }
 0x873   : > { %8852 = vmatprep.subr.bf16.mxu1 %v8851_v4  ;;  %v5871_v4 = vld [vmem:[#allocation11 + $0x358] sm:$0xff] }
 0x874   : > { %v8891_v1 = vpack.c.bf16 %v5871_v4, %v5869_v63  ;;  %v8929_v63 = vpack.c.bf16 %v6060_v41, %v6058_v58 }
 0x875   : > { %6416 = vmatmul.mubr.msk.f32.vlgmr.msra.gmra.mrb[110].mxu1 %vm731_vm0, %v5597_v51  ;;  %v5875_v51 = vld [vmem:[#allocation11 + $0x378] sm:$0xff] }
 0x876   : > { %8854 = vmatpush1.bf16.msra.mxu1 %v8853_v5  ;;  %5757 = vmatprep.mubr.f32.mxu1 %v9169_v52  ;;  %v5873_v5 = vld [vmem:[#allocation11 + $0x368] sm:$0xff] }
 0x877   : > { %8856 = vmatprep.subr.bf16.mxu1 %v8855_v14  ;;  %v8893_v14 = vpack.c.bf16 %v5870_v11, %v5868_v54  ;;  %v8895_v2 = vpack.c.bf16 %v5875_v51, %v5873_v5 }
 0x87a   : > { %8858 = vmatpush1.bf16.msra.mxu1 %v8857_v48  ;;  %v5956_v48 = vld [vmem:[#allocation11 + $0x398] sm:$0xff] }
 0x87b   : > { %8860 = vmatprep.subr.bf16.mxu1 %v8859_v37  ;;  %v8897_v37 = vpack.c.bf16 %v5874_v40, %v5872_v12  ;;  %v8899_v9 = vpack.c.bf16 %v5956_v48, %v5954_v60 }
 0x87e   : > { %8862 = vmatpush1.bf16.msra.mxu1 %v8861_v59  ;;  %v5960_v59 = vld [vmem:[#allocation11 + $0x3b8] sm:$0xff] }
 0x87f   : > { %8864 = vmatprep.subr.bf16.mxu1 %v8863_v50  ;;  %v8901_v50 = vpack.c.bf16 %v5955_v13, %v5953_v17  ;;  %v8903_v18 = vpack.c.bf16 %v5960_v59, %v5958_v61  ;;  %v9170_v61 = vmov 1966171168  }
 0x880   : > { %v6172_v59 = vunpack.c.l.s4 %v9170_v61 }
 0x882   : > { %8866 = vmatpush1.bf16.msra.mxu1 %v8865_v25  ;;  %v5962_v25 = vld [vmem:[#allocation11 + $0x3c8] sm:$0xff] }
 0x883   : > { %8868 = vmatprep.subr.bf16.mxu1 %v8867_v26  ;;  %v5964_v26 = vld [vmem:[#allocation11 + $0x3d8] sm:$0xff] }
 0x884   : > { %v8907_v57 = vpack.c.bf16 %v5964_v26, %v5962_v25 }
 0x885   : > { %6417 = vmatmul.mubr.msk.f32.vlgmr.msra.gmra.mrb[110].mxu1 %vm731_vm0, %v5690_v24  ;;  %v5968_v24 = vld [vmem:[#allocation11 + $0x3f8] sm:$0xff] }
 0x886   : > { %8870 = vmatpush1.bf16.msra.mxu1 %v8869_v16  ;;  %5850 = vmatprep.mubr.f32.mxu1 %v9169_v52  ;;  %v5966_v16 = vld [vmem:[#allocation11 + $0x3e8] sm:$0xff] }
 0x887   : > { %8872 = vmatprep.subr.bf16.mxu1 %v8871_v34  ;;  %v8909_v34 = vpack.c.bf16 %v5963_v29, %v5961_v28  ;;  %v8911_v35 = vpack.c.bf16 %v5968_v24, %v5966_v16 }
 0x88a   : > { %8874 = vmatpush1.bf16.msra.mxu1 %v8873_v47  ;;  %v6049_v47 = vld [vmem:[#allocation11 + $0x418] sm:$0xff] }
 0x88b   : > { %8876 = vmatprep.subr.bf16.mxu1 %v8875_v19  ;;  %v8913_v19 = vpack.c.bf16 %v5967_v10, %v5965_v15  ;;  %v8915_v49 = vpack.c.bf16 %v6049_v47, %v6047_v46 }
 0x88e   : > { %8878 = vmatpush1.bf16.msra.mxu1 %v8877_v42  ;;  %v6053_v42 = vld [vmem:[#allocation11 + $0x438] sm:$0xff] }
 0x88f   : > { %8880 = vmatprep.subr.bf16.mxu1 %v8879_v0  ;;  %v8917_v0 = vpack.c.bf16 %v6048_v23, %v6046_v33  ;;  %v8919_v43 = vpack.c.bf16 %v6053_v42, %v6051_v22 }
 0x892   : > { %8882 = vmatpush1.bf16.msra.mxu1 %v8881_v32  ;;  %v6055_v32 = vld [vmem:[#allocation11 + $0x448] sm:$0xff] }
 0x893   : > { %8884 = vmatprep.subr.bf16.mxu1 %v8883_v38  ;;  %v6057_v38 = vld [vmem:[#allocation11 + $0x458] sm:$0xff] }
 0x894   : > { %v8923_v45 = vpack.c.bf16 %v6057_v38, %v6055_v32 }
 0x895   : > { %6418 = vmatmul.mubr.msk.f32.vlgmr.msra.gmra.mrb[110].mxu1 %vm731_vm0, %v5783_v56  ;;  %v6061_v56 = vld [vmem:[#allocation11 + $0x478] sm:$0xff] }
 0x896   : > { %8886 = vmatpush1.bf16.msra.mxu1 %v8885_v55  ;;  %5943 = vmatprep.mubr.f32.mxu1 %v9169_v52  ;;  %v6059_v55 = vld [vmem:[#allocation11 + $0x468] sm:$0xff] }
 0x897   : > { %8888 = vmatprep.subr.bf16.mxu1 %v8887_v30  ;;  %v8927_v30 = vpack.c.bf16 %v6061_v56, %v6059_v55 }
 0x89a   : > { %8890 = vmatpush1.bf16.msra.mxu1 %v8889_v6 }
 0x89b   : > { %8892 = vmatprep.subr.bf16.mxu1 %v8891_v1  ;;  %v6142_v1 = vpop.permute.xlu0 %6141 }
 0x89e   : > { %8894 = vmatpush1.bf16.msra.mxu1 %v8893_v14 }
 0x89f   : > { %8896 = vmatprep.subr.bf16.mxu1 %v8895_v2 }
 0x8a2   : > { %8898 = vmatpush1.bf16.msra.mxu1 %v8897_v37 }
 0x8a3   : > { %8900 = vmatprep.subr.bf16.mxu1 %v8899_v9 }
 0x8a5   : > { %6419 = vmatmul.mubr.msk.f32.vlgmr.msra.gmra.mrb[110].mxu1 %vm731_vm0, %v5876_v20 }
 0x8a6   : > { %8902 = vmatpush1.bf16.msra.mxu1 %v8901_v50  ;;  %6036 = vmatprep.mubr.f32.mxu1 %v9169_v52  ;;  %v6173_v50 = vunpack.c.0.s8 %v6172_v59 }
 0x8a7   : > { %8904 = vmatprep.subr.bf16.mxu1 %v8903_v18 }
 0x8aa   : > { %8906 = vmatpush1.bf16.msra.mxu1 %v8905_v7 }
 0x8ab   : > { %8908 = vmatprep.subr.bf16.mxu1 %v8907_v57 }
 0x8ae   : > { %8910 = vmatpush1.bf16.msra.mxu1 %v8909_v34 }
 0x8af   : > { %8912 = vmatprep.subr.bf16.mxu1 %v8911_v35 }
 0x8b2   : > { %8914 = vmatpush1.bf16.msra.mxu1 %v8913_v19 }
 0x8b3   : > { %8916 = vmatprep.subr.bf16.mxu1 %v8915_v49 }
 0x8b5   : > { %6420 = vmatmul.mubr.msk.f32.vlgmr.msra.gmra.mrb[110].mxu1 %vm731_vm0, %v5969_v39 }
 0x8b6   : > { %8918 = vmatpush1.bf16.msra.mxu1 %v8917_v0  ;;  %6129 = vmatprep.mubr.f32.mxu1 %v9169_v52  ;;  %v6144_v52 = vlaneseq }
 0x8b7   : > { %8920 = vmatprep.subr.bf16.mxu1 %v8919_v43 }
 0x8b8   : > { %v6145_v4 = vshrl.u32 %v6144_v52, 7  ;;  %vm6188_vm5 = vcmp.lt.s32.totalorder %v6144_v52, 256 }
 0x8ba   : > { %8922 = vmatpush1.bf16.msra.mxu1 %v8921_v31  ;;  %v6146_v6 = vsub.s32 0, %v6145_v4  ;;  %v6176_v25 = vsub.s32 %v6173_v50, %v6145_v4 }
 0x8bb   : > { %8924 = vmatprep.subr.bf16.mxu1 %v8923_v45 }
 0x8bc   : > { %v6147_v54 = vrot.slane %v6142_v1, %v6146_v6 }
 0x8be   : > { %8926 = vmatpush1.bf16.msra.mxu1 %v8925_v53 }
 0x8bf   : > { %8928 = vmatprep.subr.bf16.mxu1 %v8927_v30 }
 0x8c2   : > { %8930 = vmatpush1.bf16.msra.mxu1 %v8929_v63 }
 0x8c5   : > { %6421 = vmatmul.mubr.msk.f32.vlgmr.msra.gmra.mrb[110].mxu1 %vm731_vm0, %v10717_v36 }
 0x998   : > { %v6131_v11 = vpop.f32.mrb[110].mxu1 }
 0x999   : > { %v6148_v5 = vadd.f32 %v6147_v54, %v6131_v11  ;;  %v6133_v51 = vpop.f32.mrb[111].mxu1 }
 0x99a   : > { %v6149_v14 = vadd.f32 %v6147_v54, %v6133_v51 }
 0x99b   : > { %v6150_v2 = vand.u32 2147483647, %v6148_v5  ;;  %vm6162_vm3 = vcmp.ge.f32.partialorder %v6148_v5, 0.0 }
 0x99c   : > { %v6151_v12 = vand.u32 2147483647, %v6149_v14  ;;  %vm6163_vm4 = vcmp.ge.f32.partialorder %v6149_v14, 0.0 }
 0x99d   : > { %v6152_v40 = vsub.f32 0.0, %v6150_v2 }
 0x99e   : > { %v6153_v60 = vsub.f32 0.0, %v6151_v12 }
 0x99f   : > { %v6154_v48 = vmul.f32 1.442695, %v6152_v40 }
 0x9a0   : > { %v6156_v37 = vmul.f32 1.442695, %v6153_v60 }
 0x9a1   : > { %9008 = vpow2.f32 %v6154_v48 }
 0x9a2   : > { %9010 = vpow2.f32 %v6156_v37 }
 0x9ab   : > { %v9009_v9 = vpop.eup %9008 }
 0x9ac   : > { %v9011_v17 = vpop.eup %9010  ;;  %v6158_v36 = vadd.f32 1.0, %v9009_v9 }
 0x9ad   : > { %v6159_v13 = vadd.f32 1.0, %v9011_v17 }
 0x9ae   : > { %9012 = vrcp.f32 %v6158_v36 }
 0x9af   : > { %9014 = vrcp.f32 %v6159_v13 }
 0x9b8   : > { %v9013_v20 = vpop.eup %9012 }
 0x9b9   : > { %v9015_v18 = vpop.eup %9014  ;;  %v6164_v21 = vmul.f32 %v9013_v20, %v9009_v9 }
 0x9ba   : > { %v6165_v8 = vmul.f32 %v9015_v18, %v9011_v17 }
 0x9bb   : > { %v6166_v26 = vsel %vm6162_vm3, %v9013_v20, %v6164_v21 }
 0x9bc   : > { %v6167_v7 = vsel %vm6163_vm4, %v9015_v18, %v6165_v8 }
 0x9bd   : > { %v6170_v57 = vcombine.low %v6166_v26, %v6167_v7 }
 0x9bf   : > { %v6177_v28 = vrot.slane %v6170_v57, %v6176_v25 }
 0x9c1   : > { %v6184_v29 = vrot.slane %v6177_v28, %v6176_v25 }
 0x9c3   : > { %6190 = vst.msk [vmem:[%s499_s15] sm:$0x3] %vm6188_vm5, %v6184_v29 }
 0x9c4 PF: > { %s10790_s14 = sld [smem:[#allocation16_spill]] }
 0x9ca   : > { %s28_s27 = sadd.s32 1, %s10790_s14  }
 0x9cb   : > { %p25_p1 = scmp.ge.s32.totalorder %s28_s27, 4  }
 0x9cd   :  { %27 = sbr.rel (!%p25_p1) target bundleno = 6 (0x6), region = 151 }
 0x9d4   :  { %6210 = vsyncpa [#allocation7], 1 }
 0x9d5   :  { %6212 = vsyncpa [#allocation7 + $0x1], 1 }
 0x9d6   :  { %6213 = vsyncpa [#allocation9], 1 }
 0x9d7   :  { %6214 = vsyncpa [#allocation12], 1 }

</bundles_post_ra>
